<compile_context>
chip_gen: v6e
topology: v6e:2x2x1
jax: 0.10.0
libtpu: 0.0.40
codegen_flags: <defaults>
</compile_context>

<pallas_src>
import functools

import jax
import jax.numpy as jnp
from jax.experimental import pallas as pl
from jax.experimental.pallas import tpu as pltpu


# ---------------------------------------------------------------------------
# Fused forward kernel (one image per grid step).
# ---------------------------------------------------------------------------
def _fused_forward_kernel(x_ref,
                          w1_ref, b1_ref, w2_ref, b2_ref,
                          w3_ref, b3_ref, w4_ref, b4_ref,
                          wf1_ref, bf1_ref, wf2_ref, bf2_ref,
                          o_ref,
                          b1_s, b2_s, m1_s, b3_s, b4_s,
                          *, w0, l1, l2, lm1, l3, l4, feat_rows):
    """Activations are flat (rows = y*w0 + x, lanes = channels) panels.

    A valid 3x3 conv is one MXU matmul against the 9-tap-folded weight: tap
    (kh, kw) contributes the contiguous row slice at offset kh*w0 + kw
    (stride-2 rows when the input is the 2x-dilated pooled panel).
    """
    tap_offs = tuple(kh * w0 + kw for kh in range(3) for kw in range(3))

    def conv(load_tap, w_ref, b_ref):
        # (L, 9*Cin) panel  @  (9*Cin, Cout)  ->  (L, Cout)  (single MXU dot)
        panel = jnp.concatenate([load_tap(off) for off in tap_offs], axis=-1)
        return (jnp.dot(panel, w_ref[...], preferred_element_type=jnp.float32)
                + b_ref[...])

    # conv1: input image -> b1_s                                   (l1, 32)
    b1_s[...] = conv(lambda off: x_ref[0, pl.ds(off, l1), :], w1_ref, b1_ref)
    # conv2: b1 -> b2                                              (l2, 32)
    b2_s[...] = conv(lambda off: b1_s[pl.ds(off, l2), :], w2_ref, b2_ref)
    # maxpool1 in stride-1 form; factor-2 decimation is deferred to conv3's
    # stride-2 tap reads                                           (lm1, 32)
    m1_s[...] = jnp.maximum(
        jnp.maximum(b2_s[pl.ds(0, lm1), :], b2_s[pl.ds(1, lm1), :]),
        jnp.maximum(b2_s[pl.ds(w0, lm1), :], b2_s[pl.ds(w0 + 1, lm1), :]))
    # conv3: pooled (2x-dilated) panel -> b3                       (l3, 64)
    b3_s[...] = conv(lambda off: m1_s[pl.ds(2 * off, l3, stride=2), :],
                     w3_ref, b3_ref)
    # conv4: b3 -> b4                                              (l4, 64)
    b4_s[...] = conv(lambda off: b3_s[pl.ds(off, l4), :], w4_ref, b4_ref)

    # maxpool2 evaluated only at the valid pooled positions, concatenated in
    # position-major order (fc1 weight rows were pre-permuted to match).
    def pooled_row(i):
        return jnp.maximum(
            jnp.maximum(b4_s[pl.ds(i, 1), :], b4_s[pl.ds(i + 1, 1), :]),
            jnp.maximum(b4_s[pl.ds(i + w0, 1), :],
                        b4_s[pl.ds(i + w0 + 1, 1), :]))

    feats = jnp.concatenate([pooled_row(i) for i in feat_rows], axis=-1)

    # head: Linear -> Dropout2d (identity at inference) -> ReLU -> Linear
    h = jnp.dot(feats, wf1_ref[...], preferred_element_type=jnp.float32)
    h = jnp.maximum(h + bf1_ref[...], 0.0)
    o_ref[0] = (jnp.dot(h, wf2_ref[...], preferred_element_type=jnp.float32)
                + bf2_ref[...])


# ---------------------------------------------------------------------------
# Wrapper: layout plumbing (tiny, one-off) + the single pallas_call.
# ---------------------------------------------------------------------------
def _resident(arr):
    # Full-array block, constant index_map -> stays resident in VMEM.
    return pl.BlockSpec(arr.shape, lambda i: (0, 0))


@jax.jit
def font_identification_forward(x_nchw, params):
    B, cin, H, W = x_nchw.shape
    w0 = W

    # Spatial trace of the backbone (valid 3x3 convs, 2x2/2 maxpools; pools
    # floor odd sizes exactly like nn.MaxPool2d without ceil_mode).
    h1, w1 = H - 2, W - 2
    h2, w2 = h1 - 2, w1 - 2
    hp, wp = h2 // 2, w2 // 2
    h3, w3 = hp - 2, wp - 2
    h4, w4 = h3 - 2, w3 - 2
    hf, wf = h4 // 2, w4 // 2
    assert min(h1, w1, h2, w2, h3, w3, h4, w4, hf, wf) >= 1, "input too small"

    # Flat-panel row counts needed by each stage (last valid index + 1).
    l1 = (h1 - 1) * w0 + w1
    l2 = (h2 - 1) * w0 + w2
    lm1 = 2 * ((hp - 1) * w0 + (wp - 1)) + 1
    l3 = (h3 - 1) * w0 + w3
    l4 = (h4 - 1) * w0 + w4
    feat_rows = tuple(2 * (yp * w0 + xp)
                      for yp in range(hf) for xp in range(wf))

    # ---- host-side layout plumbing (tiny, one-off) --------------------------
    # NCHW -> flat (rows = y*W + x, lanes = channels)
    x_flat = jnp.transpose(x_nchw, (0, 2, 3, 1)).reshape(B, H * W, cin)
    x_flat = x_flat.astype(jnp.float32)

    def fold(w):  # (3,3,Cin,Cout) -> (9*Cin, Cout), row = (kh*3+kw)*Cin + ci
        return w.reshape(-1, w.shape[-1])

    w1f, w2f = fold(params["w_c1"]), fold(params["w_c2"])
    w3f, w4f = fold(params["w_c3"]), fold(params["w_c4"])

    n_hidden = params["w_fc1"].shape[1]
    n_pos, c_last = hf * wf, 64
    assert params["w_fc1"].shape[0] == c_last * n_pos, "feature_dim mismatch"
    # PyTorch X.view(B,-1) is channel-major (c*HW + p); the kernel emits
    # position-major (p*C + c) features, so permute fc1 rows to match.
    wf1r = jnp.transpose(
        params["w_fc1"].reshape(c_last, n_pos, n_hidden), (1, 0, 2)
    ).reshape(c_last * n_pos, n_hidden)

    kernel = functools.partial(
        _fused_forward_kernel,
        w0=w0, l1=l1, l2=l2, lm1=lm1, l3=l3, l4=l4, feat_rows=feat_rows)

    operands = (x_flat,
                w1f, params["b_c1"], w2f, params["b_c2"],
                w3f, params["b_c3"], w4f, params["b_c4"],
                wf1r, params["b_fc1"], params["w_fc2"], params["b_fc2"])

    in_specs = [pl.BlockSpec((1, H * W, cin), lambda i: (i, 0, 0))]
    in_specs += [_resident(a) for a in operands[1:]]

    out = pl.pallas_call(
        kernel,
        out_shape=jax.ShapeDtypeStruct((B, 1, 2), jnp.float32),
        grid=(B,),
        in_specs=in_specs,
        out_specs=pl.BlockSpec((1, 1, 2), lambda i: (i, 0, 0)),
        scratch_shapes=[
            pltpu.VMEM((l1, 32), jnp.float32),    # conv1 out
            pltpu.VMEM((l2, 32), jnp.float32),    # conv2 out
            pltpu.VMEM((lm1, 32), jnp.float32),   # maxpool1 (stride-1 form)
            pltpu.VMEM((l3, 64), jnp.float32),    # conv3 out
            pltpu.VMEM((l4, 64), jnp.float32),    # conv4 out
        ],
        compiler_params=pltpu.CompilerParams(
            dimension_semantics=("parallel",)),   # batch is independent
    )(*operands)
    return out.reshape(B, 2)


# ---------------------------------------------------------------------------
# Parameter init (deterministic, synthetic).
# ---------------------------------------------------------------------------
def init_params(key, in_dim, feature_dim, n_hidden):
    ks = jax.random.split(key, 12)

    def conv(kw, kb, cin, cout):
        return (0.1 * jax.random.normal(kw, (3, 3, cin, cout), jnp.float32),
                0.01 * jax.random.normal(kb, (1, cout), jnp.float32))

    w1, b1 = conv(ks[0], ks[1], in_dim, 32)
    w2, b2 = conv(ks[2], ks[3], 32, 32)
    w3, b3 = conv(ks[4], ks[5], 32, 64)
    w4, b4 = conv(ks[6], ks[7], 64, 64)
    wf1 = 0.05 * jax.random.normal(ks[8], (feature_dim, n_hidden), jnp.float32)
    bf1 = 0.01 * jax.random.normal(ks[9], (1, n_hidden), jnp.float32)
    wf2 = 0.05 * jax.random.normal(ks[10], (n_hidden, 2), jnp.float32)
    bf2 = 0.01 * jax.random.normal(ks[11], (1, 2), jnp.float32)
    return dict(w_c1=w1, b_c1=b1, w_c2=w2, b_c2=b2,
                w_c3=w3, b_c3=b3, w_c4=w4, b_c4=b4,
                w_fc1=wf1, b_fc1=bf1, w_fc2=wf2, b_fc2=bf2)


if __name__ == "__main__":
    B, in_dim, H, W = 2, 4, 20, 20
    n_hidden = 32
    # spatial trace: 20 ->18 ->16 ->pool 8 ->6 ->4 ->pool 2 ; feature_dim = 64*2*2
    feature_dim = 64 * 2 * 2

    key = jax.random.PRNGKey(0)
    kx, kp = jax.random.split(key)
    x = jax.random.normal(kx, (B, in_dim, H, W), jnp.float32)
    params = init_params(kp, in_dim, feature_dim, n_hidden)

    logits = font_identification_forward(x, params)
    logits = jax.block_until_ready(logits)
    assert logits.shape == (B, 2) and logits.dtype == jnp.float32
    print("KERNEL_OK")
</pallas_src>

<mosaic_0001>
module attributes {stable_mosaic.version = 11 : i64} {
  func.func @_fused_forward_kernel(%arg0: i32, %arg1: memref<1x400x4xf32, #tpu.memory_space<vmem>>, %arg2: memref<36x32xf32, #tpu.memory_space<vmem>>, %arg3: memref<1x32xf32, #tpu.memory_space<vmem>>, %arg4: memref<288x32xf32, #tpu.memory_space<vmem>>, %arg5: memref<1x32xf32, #tpu.memory_space<vmem>>, %arg6: memref<288x64xf32, #tpu.memory_space<vmem>>, %arg7: memref<1x64xf32, #tpu.memory_space<vmem>>, %arg8: memref<576x64xf32, #tpu.memory_space<vmem>>, %arg9: memref<1x64xf32, #tpu.memory_space<vmem>>, %arg10: memref<256x32xf32, #tpu.memory_space<vmem>>, %arg11: memref<1x32xf32, #tpu.memory_space<vmem>>, %arg12: memref<32x2xf32, #tpu.memory_space<vmem>>, %arg13: memref<1x2xf32, #tpu.memory_space<vmem>>, %arg14: memref<1x1x2xf32, #tpu.memory_space<vmem>>, %arg15: memref<358x32xf32, #tpu.memory_space<vmem>>, %arg16: memref<316x32xf32, #tpu.memory_space<vmem>>, %arg17: memref<295x32xf32, #tpu.memory_space<vmem>>, %arg18: memref<106x64xf32, #tpu.memory_space<vmem>>, %arg19: memref<64x64xf32, #tpu.memory_space<vmem>>) attributes {dimension_semantics = [#tpu.dimension_semantics<parallel>], iteration_bounds = array<i64: 2>, scalar_prefetch = 0 : i64, scratch_operands = 5 : i64, tpu.core_type = #tpu.core_type<tc>, window_params = [{transform_indices = @transform_0, window_bounds = array<i64: 1, 400, 4>}, {pipeline_mode = #tpu.pipeline_mode<synchronous>, transform_indices = @transform_1, window_bounds = array<i64: 36, 32>}, {pipeline_mode = #tpu.pipeline_mode<synchronous>, transform_indices = @transform_2, window_bounds = array<i64: 1, 32>}, {pipeline_mode = #tpu.pipeline_mode<synchronous>, transform_indices = @transform_3, window_bounds = array<i64: 288, 32>}, {pipeline_mode = #tpu.pipeline_mode<synchronous>, transform_indices = @transform_4, window_bounds = array<i64: 1, 32>}, {pipeline_mode = #tpu.pipeline_mode<synchronous>, transform_indices = @transform_5, window_bounds = array<i64: 288, 64>}, {pipeline_mode = #tpu.pipeline_mode<synchronous>, transform_indices = @transform_6, window_bounds = array<i64: 1, 64>}, {pipeline_mode = #tpu.pipeline_mode<synchronous>, transform_indices = @transform_7, window_bounds = array<i64: 576, 64>}, {pipeline_mode = #tpu.pipeline_mode<synchronous>, transform_indices = @transform_8, window_bounds = array<i64: 1, 64>}, {pipeline_mode = #tpu.pipeline_mode<synchronous>, transform_indices = @transform_9, window_bounds = array<i64: 256, 32>}, {pipeline_mode = #tpu.pipeline_mode<synchronous>, transform_indices = @transform_10, window_bounds = array<i64: 1, 32>}, {pipeline_mode = #tpu.pipeline_mode<synchronous>, transform_indices = @transform_11, window_bounds = array<i64: 32, 2>}, {pipeline_mode = #tpu.pipeline_mode<synchronous>, transform_indices = @transform_12, window_bounds = array<i64: 1, 2>}, {transform_indices = @transform_13, window_bounds = array<i64: 1, 1, 2>}]} {
    %c0 = arith.constant 0 : index
    %c0_0 = arith.constant 0 : index
    %c0_1 = arith.constant 0 : index
    %0 = vector.load %arg1[%c0, %c0_0, %c0_1] : memref<1x400x4xf32, #tpu.memory_space<vmem>>, vector<1x358x4xf32>
    %1 = vector.shape_cast %0 : vector<1x358x4xf32> to vector<358x4xf32>
    %c0_2 = arith.constant 0 : index
    %c1 = arith.constant 1 : index
    %c0_3 = arith.constant 0 : index
    %2 = vector.load %arg1[%c0_2, %c1, %c0_3] : memref<1x400x4xf32, #tpu.memory_space<vmem>>, vector<1x358x4xf32>
    %3 = vector.shape_cast %2 : vector<1x358x4xf32> to vector<358x4xf32>
    %c0_4 = arith.constant 0 : index
    %c2 = arith.constant 2 : index
    %c0_5 = arith.constant 0 : index
    %4 = vector.load %arg1[%c0_4, %c2, %c0_5] : memref<1x400x4xf32, #tpu.memory_space<vmem>>, vector<1x358x4xf32>
    %5 = vector.shape_cast %4 : vector<1x358x4xf32> to vector<358x4xf32>
    %c0_6 = arith.constant 0 : index
    %c20 = arith.constant 20 : index
    %c0_7 = arith.constant 0 : index
    %6 = vector.load %arg1[%c0_6, %c20, %c0_7] : memref<1x400x4xf32, #tpu.memory_space<vmem>>, vector<1x358x4xf32>
    %7 = vector.shape_cast %6 : vector<1x358x4xf32> to vector<358x4xf32>
    %c0_8 = arith.constant 0 : index
    %c21 = arith.constant 21 : index
    %c0_9 = arith.constant 0 : index
    %8 = vector.load %arg1[%c0_8, %c21, %c0_9] : memref<1x400x4xf32, #tpu.memory_space<vmem>>, vector<1x358x4xf32>
    %9 = vector.shape_cast %8 : vector<1x358x4xf32> to vector<358x4xf32>
    %c0_10 = arith.constant 0 : index
    %c22 = arith.constant 22 : index
    %c0_11 = arith.constant 0 : index
    %10 = vector.load %arg1[%c0_10, %c22, %c0_11] : memref<1x400x4xf32, #tpu.memory_space<vmem>>, vector<1x358x4xf32>
    %11 = vector.shape_cast %10 : vector<1x358x4xf32> to vector<358x4xf32>
    %c0_12 = arith.constant 0 : index
    %c40 = arith.constant 40 : index
    %c0_13 = arith.constant 0 : index
    %12 = vector.load %arg1[%c0_12, %c40, %c0_13] : memref<1x400x4xf32, #tpu.memory_space<vmem>>, vector<1x358x4xf32>
    %13 = vector.shape_cast %12 : vector<1x358x4xf32> to vector<358x4xf32>
    %c0_14 = arith.constant 0 : index
    %c41 = arith.constant 41 : index
    %c0_15 = arith.constant 0 : index
    %14 = vector.load %arg1[%c0_14, %c41, %c0_15] : memref<1x400x4xf32, #tpu.memory_space<vmem>>, vector<1x358x4xf32>
    %15 = vector.shape_cast %14 : vector<1x358x4xf32> to vector<358x4xf32>
    %c0_16 = arith.constant 0 : index
    %c42 = arith.constant 42 : index
    %c0_17 = arith.constant 0 : index
    %16 = vector.load %arg1[%c0_16, %c42, %c0_17] : memref<1x400x4xf32, #tpu.memory_space<vmem>>, vector<1x358x4xf32>
    %17 = vector.shape_cast %16 : vector<1x358x4xf32> to vector<358x4xf32>
    %18 = tpu.concatenate %1, %3, %5, %7, %9, %11, %13, %15, %17 in 1 : vector<358x4xf32>, vector<358x4xf32>, vector<358x4xf32>, vector<358x4xf32>, vector<358x4xf32>, vector<358x4xf32>, vector<358x4xf32>, vector<358x4xf32>, vector<358x4xf32> -> vector<358x36xf32>
    %c0_18 = arith.constant 0 : index
    %c0_19 = arith.constant 0 : index
    %19 = vector.load %arg2[%c0_18, %c0_19] : memref<36x32xf32, #tpu.memory_space<vmem>>, vector<36x32xf32>
    %cst = arith.constant dense<0.000000e+00> : vector<358x32xf32>
    %20 = tpu.matmul %18, %19, %cst {dimension_numbers = #tpu.dot_dimension_numbers<[1], [0], [0], [1], [0, 0, 1, 1], [], []>} : vector<358x36xf32>, vector<36x32xf32>, vector<358x32xf32> -> vector<358x32xf32>
    %c0_20 = arith.constant 0 : index
    %c0_21 = arith.constant 0 : index
    %21 = vector.load %arg3[%c0_20, %c0_21] : memref<1x32xf32, #tpu.memory_space<vmem>>, vector<1x32xf32>
    %22 = vector.broadcast %21 : vector<1x32xf32> to vector<358x32xf32>
    %23 = arith.addf %20, %22 : vector<358x32xf32>
    %c0_22 = arith.constant 0 : index
    %c0_23 = arith.constant 0 : index
    %24 = vector.load %arg15[%c0_22, %c0_23] : memref<358x32xf32, #tpu.memory_space<vmem>>, vector<358x32xf32>
    tpu.vector_store %arg15[%c0_22, %c0_23], %23 {strides = array<i32>} : memref<358x32xf32, #tpu.memory_space<vmem>>, vector<358x32xf32>,
    %c0_24 = arith.constant 0 : index
    %c0_25 = arith.constant 0 : index
    %25 = vector.load %arg15[%c0_24, %c0_25] : memref<358x32xf32, #tpu.memory_space<vmem>>, vector<316x32xf32>
    %c1_26 = arith.constant 1 : index
    %c0_27 = arith.constant 0 : index
    %26 = vector.load %arg15[%c1_26, %c0_27] : memref<358x32xf32, #tpu.memory_space<vmem>>, vector<316x32xf32>
    %c2_28 = arith.constant 2 : index
    %c0_29 = arith.constant 0 : index
    %27 = vector.load %arg15[%c2_28, %c0_29] : memref<358x32xf32, #tpu.memory_space<vmem>>, vector<316x32xf32>
    %c20_30 = arith.constant 20 : index
    %c0_31 = arith.constant 0 : index
    %28 = vector.load %arg15[%c20_30, %c0_31] : memref<358x32xf32, #tpu.memory_space<vmem>>, vector<316x32xf32>
    %c21_32 = arith.constant 21 : index
    %c0_33 = arith.constant 0 : index
    %29 = vector.load %arg15[%c21_32, %c0_33] : memref<358x32xf32, #tpu.memory_space<vmem>>, vector<316x32xf32>
    %c22_34 = arith.constant 22 : index
    %c0_35 = arith.constant 0 : index
    %30 = vector.load %arg15[%c22_34, %c0_35] : memref<358x32xf32, #tpu.memory_space<vmem>>, vector<316x32xf32>
    %c40_36 = arith.constant 40 : index
    %c0_37 = arith.constant 0 : index
    %31 = vector.load %arg15[%c40_36, %c0_37] : memref<358x32xf32, #tpu.memory_space<vmem>>, vector<316x32xf32>
    %c41_38 = arith.constant 41 : index
    %c0_39 = arith.constant 0 : index
    %32 = vector.load %arg15[%c41_38, %c0_39] : memref<358x32xf32, #tpu.memory_space<vmem>>, vector<316x32xf32>
    %c42_40 = arith.constant 42 : index
    %c0_41 = arith.constant 0 : index
    %33 = vector.load %arg15[%c42_40, %c0_41] : memref<358x32xf32, #tpu.memory_space<vmem>>, vector<316x32xf32>
    %34 = tpu.concatenate %25, %26, %27, %28, %29, %30, %31, %32, %33 in 1 : vector<316x32xf32>, vector<316x32xf32>, vector<316x32xf32>, vector<316x32xf32>, vector<316x32xf32>, vector<316x32xf32>, vector<316x32xf32>, vector<316x32xf32>, vector<316x32xf32> -> vector<316x288xf32>
    %c0_42 = arith.constant 0 : index
    %c0_43 = arith.constant 0 : index
    %35 = vector.load %arg4[%c0_42, %c0_43] : memref<288x32xf32, #tpu.memory_space<vmem>>, vector<288x32xf32>
    %cst_44 = arith.constant dense<0.000000e+00> : vector<316x32xf32>
    %36 = tpu.matmul %34, %35, %cst_44 {dimension_numbers = #tpu.dot_dimension_numbers<[1], [0], [0], [1], [0, 0, 1, 1], [], []>} : vector<316x288xf32>, vector<288x32xf32>, vector<316x32xf32> -> vector<316x32xf32>
    %c0_45 = arith.constant 0 : index
    %c0_46 = arith.constant 0 : index
    %37 = vector.load %arg5[%c0_45, %c0_46] : memref<1x32xf32, #tpu.memory_space<vmem>>, vector<1x32xf32>
    %38 = vector.broadcast %37 : vector<1x32xf32> to vector<316x32xf32>
    %39 = arith.addf %36, %38 : vector<316x32xf32>
    %c0_47 = arith.constant 0 : index
    %c0_48 = arith.constant 0 : index
    %40 = vector.load %arg16[%c0_47, %c0_48] : memref<316x32xf32, #tpu.memory_space<vmem>>, vector<316x32xf32>
    tpu.vector_store %arg16[%c0_47, %c0_48], %39 {strides = array<i32>} : memref<316x32xf32, #tpu.memory_space<vmem>>, vector<316x32xf32>,
    %c0_49 = arith.constant 0 : index
    %c0_50 = arith.constant 0 : index
    %41 = vector.load %arg16[%c0_49, %c0_50] : memref<316x32xf32, #tpu.memory_space<vmem>>, vector<295x32xf32>
    %c1_51 = arith.constant 1 : index
    %c0_52 = arith.constant 0 : index
    %42 = vector.load %arg16[%c1_51, %c0_52] : memref<316x32xf32, #tpu.memory_space<vmem>>, vector<295x32xf32>
    %43 = arith.maximumf %41, %42 : vector<295x32xf32>
    %c20_53 = arith.constant 20 : index
    %c0_54 = arith.constant 0 : index
    %44 = vector.load %arg16[%c20_53, %c0_54] : memref<316x32xf32, #tpu.memory_space<vmem>>, vector<295x32xf32>
    %c21_55 = arith.constant 21 : index
    %c0_56 = arith.constant 0 : index
    %45 = vector.load %arg16[%c21_55, %c0_56] : memref<316x32xf32, #tpu.memory_space<vmem>>, vector<295x32xf32>
    %46 = arith.maximumf %44, %45 : vector<295x32xf32>
    %47 = arith.maximumf %43, %46 : vector<295x32xf32>
    %c0_57 = arith.constant 0 : index
    %c0_58 = arith.constant 0 : index
    %48 = vector.load %arg17[%c0_57, %c0_58] : memref<295x32xf32, #tpu.memory_space<vmem>>, vector<295x32xf32>
    tpu.vector_store %arg17[%c0_57, %c0_58], %47 {strides = array<i32>} : memref<295x32xf32, #tpu.memory_space<vmem>>, vector<295x32xf32>,
    %c0_59 = arith.constant 0 : index
    %c0_60 = arith.constant 0 : index
    %49 = tpu.strided_load %arg17[%c0_59, %c0_60] {strides = array<i32: 2, 1>} : memref<295x32xf32, #tpu.memory_space<vmem>>, vector<106x32xf32>
    %c2_61 = arith.constant 2 : index
    %c0_62 = arith.constant 0 : index
    %50 = tpu.strided_load %arg17[%c2_61, %c0_62] {strides = array<i32: 2, 1>} : memref<295x32xf32, #tpu.memory_space<vmem>>, vector<106x32xf32>
    %c4 = arith.constant 4 : index
    %c0_63 = arith.constant 0 : index
    %51 = tpu.strided_load %arg17[%c4, %c0_63] {strides = array<i32: 2, 1>} : memref<295x32xf32, #tpu.memory_space<vmem>>, vector<106x32xf32>
    %c40_64 = arith.constant 40 : index
    %c0_65 = arith.constant 0 : index
    %52 = tpu.strided_load %arg17[%c40_64, %c0_65] {strides = array<i32: 2, 1>} : memref<295x32xf32, #tpu.memory_space<vmem>>, vector<106x32xf32>
    %c42_66 = arith.constant 42 : index
    %c0_67 = arith.constant 0 : index
    %53 = tpu.strided_load %arg17[%c42_66, %c0_67] {strides = array<i32: 2, 1>} : memref<295x32xf32, #tpu.memory_space<vmem>>, vector<106x32xf32>
    %c44 = arith.constant 44 : index
    %c0_68 = arith.constant 0 : index
    %54 = tpu.strided_load %arg17[%c44, %c0_68] {strides = array<i32: 2, 1>} : memref<295x32xf32, #tpu.memory_space<vmem>>, vector<106x32xf32>
    %c80 = arith.constant 80 : index
    %c0_69 = arith.constant 0 : index
    %55 = tpu.strided_load %arg17[%c80, %c0_69] {strides = array<i32: 2, 1>} : memref<295x32xf32, #tpu.memory_space<vmem>>, vector<106x32xf32>
    %c82 = arith.constant 82 : index
    %c0_70 = arith.constant 0 : index
    %56 = tpu.strided_load %arg17[%c82, %c0_70] {strides = array<i32: 2, 1>} : memref<295x32xf32, #tpu.memory_space<vmem>>, vector<106x32xf32>
    %c84 = arith.constant 84 : index
    %c0_71 = arith.constant 0 : index
    %57 = tpu.strided_load %arg17[%c84, %c0_71] {strides = array<i32: 2, 1>} : memref<295x32xf32, #tpu.memory_space<vmem>>, vector<106x32xf32>
    %58 = tpu.concatenate %49, %50, %51, %52, %53, %54, %55, %56, %57 in 1 : vector<106x32xf32>, vector<106x32xf32>, vector<106x32xf32>, vector<106x32xf32>, vector<106x32xf32>, vector<106x32xf32>, vector<106x32xf32>, vector<106x32xf32>, vector<106x32xf32> -> vector<106x288xf32>
    %c0_72 = arith.constant 0 : index
    %c0_73 = arith.constant 0 : index
    %59 = vector.load %arg6[%c0_72, %c0_73] : memref<288x64xf32, #tpu.memory_space<vmem>>, vector<288x64xf32>
    %cst_74 = arith.constant dense<0.000000e+00> : vector<106x64xf32>
    %60 = tpu.matmul %58, %59, %cst_74 {dimension_numbers = #tpu.dot_dimension_numbers<[1], [0], [0], [1], [0, 0, 1, 1], [], []>} : vector<106x288xf32>, vector<288x64xf32>, vector<106x64xf32> -> vector<106x64xf32>
    %c0_75 = arith.constant 0 : index
    %c0_76 = arith.constant 0 : index
    %61 = vector.load %arg7[%c0_75, %c0_76] : memref<1x64xf32, #tpu.memory_space<vmem>>, vector<1x64xf32>
    %62 = vector.broadcast %61 : vector<1x64xf32> to vector<106x64xf32>
    %63 = arith.addf %60, %62 : vector<106x64xf32>
    %c0_77 = arith.constant 0 : index
    %c0_78 = arith.constant 0 : index
    %64 = vector.load %arg18[%c0_77, %c0_78] : memref<106x64xf32, #tpu.memory_space<vmem>>, vector<106x64xf32>
    tpu.vector_store %arg18[%c0_77, %c0_78], %63 {strides = array<i32>} : memref<106x64xf32, #tpu.memory_space<vmem>>, vector<106x64xf32>,
    %c0_79 = arith.constant 0 : index
    %c0_80 = arith.constant 0 : index
    %65 = vector.load %arg18[%c0_79, %c0_80] : memref<106x64xf32, #tpu.memory_space<vmem>>, vector<64x64xf32>
    %c1_81 = arith.constant 1 : index
    %c0_82 = arith.constant 0 : index
    %66 = vector.load %arg18[%c1_81, %c0_82] : memref<106x64xf32, #tpu.memory_space<vmem>>, vector<64x64xf32>
    %c2_83 = arith.constant 2 : index
    %c0_84 = arith.constant 0 : index
    %67 = vector.load %arg18[%c2_83, %c0_84] : memref<106x64xf32, #tpu.memory_space<vmem>>, vector<64x64xf32>
    %c20_85 = arith.constant 20 : index
    %c0_86 = arith.constant 0 : index
    %68 = vector.load %arg18[%c20_85, %c0_86] : memref<106x64xf32, #tpu.memory_space<vmem>>, vector<64x64xf32>
    %c21_87 = arith.constant 21 : index
    %c0_88 = arith.constant 0 : index
    %69 = vector.load %arg18[%c21_87, %c0_88] : memref<106x64xf32, #tpu.memory_space<vmem>>, vector<64x64xf32>
    %c22_89 = arith.constant 22 : index
    %c0_90 = arith.constant 0 : index
    %70 = vector.load %arg18[%c22_89, %c0_90] : memref<106x64xf32, #tpu.memory_space<vmem>>, vector<64x64xf32>
    %c40_91 = arith.constant 40 : index
    %c0_92 = arith.constant 0 : index
    %71 = vector.load %arg18[%c40_91, %c0_92] : memref<106x64xf32, #tpu.memory_space<vmem>>, vector<64x64xf32>
    %c41_93 = arith.constant 41 : index
    %c0_94 = arith.constant 0 : index
    %72 = vector.load %arg18[%c41_93, %c0_94] : memref<106x64xf32, #tpu.memory_space<vmem>>, vector<64x64xf32>
    %c42_95 = arith.constant 42 : index
    %c0_96 = arith.constant 0 : index
    %73 = vector.load %arg18[%c42_95, %c0_96] : memref<106x64xf32, #tpu.memory_space<vmem>>, vector<64x64xf32>
    %74 = tpu.concatenate %65, %66, %67, %68, %69, %70, %71, %72, %73 in 1 : vector<64x64xf32>, vector<64x64xf32>, vector<64x64xf32>, vector<64x64xf32>, vector<64x64xf32>, vector<64x64xf32>, vector<64x64xf32>, vector<64x64xf32>, vector<64x64xf32> -> vector<64x576xf32>
    %c0_97 = arith.constant 0 : index
    %c0_98 = arith.constant 0 : index
    %75 = vector.load %arg8[%c0_97, %c0_98] : memref<576x64xf32, #tpu.memory_space<vmem>>, vector<576x64xf32>
    %cst_99 = arith.constant dense<0.000000e+00> : vector<64x64xf32>
    %76 = tpu.matmul %74, %75, %cst_99 {dimension_numbers = #tpu.dot_dimension_numbers<[1], [0], [0], [1], [0, 0, 1, 1], [], []>} : vector<64x576xf32>, vector<576x64xf32>, vector<64x64xf32> -> vector<64x64xf32>
    %c0_100 = arith.constant 0 : index
    %c0_101 = arith.constant 0 : index
    %77 = vector.load %arg9[%c0_100, %c0_101] : memref<1x64xf32, #tpu.memory_space<vmem>>, vector<1x64xf32>
    %78 = vector.broadcast %77 : vector<1x64xf32> to vector<64x64xf32>
    %79 = arith.addf %76, %78 : vector<64x64xf32>
    %c0_102 = arith.constant 0 : index
    %c0_103 = arith.constant 0 : index
    %80 = vector.load %arg19[%c0_102, %c0_103] : memref<64x64xf32, #tpu.memory_space<vmem>>, vector<64x64xf32>
    tpu.vector_store %arg19[%c0_102, %c0_103], %79 {strides = array<i32>} : memref<64x64xf32, #tpu.memory_space<vmem>>, vector<64x64xf32>,
    %c0_104 = arith.constant 0 : index
    %c0_105 = arith.constant 0 : index
    %81 = vector.load %arg19[%c0_104, %c0_105] : memref<64x64xf32, #tpu.memory_space<vmem>>, vector<1x64xf32>
    %c1_106 = arith.constant 1 : index
    %c0_107 = arith.constant 0 : index
    %82 = vector.load %arg19[%c1_106, %c0_107] : memref<64x64xf32, #tpu.memory_space<vmem>>, vector<1x64xf32>
    %83 = arith.maximumf %81, %82 : vector<1x64xf32>
    %c20_108 = arith.constant 20 : index
    %c0_109 = arith.constant 0 : index
    %84 = vector.load %arg19[%c20_108, %c0_109] : memref<64x64xf32, #tpu.memory_space<vmem>>, vector<1x64xf32>
    %c21_110 = arith.constant 21 : index
    %c0_111 = arith.constant 0 : index
    %85 = vector.load %arg19[%c21_110, %c0_111] : memref<64x64xf32, #tpu.memory_space<vmem>>, vector<1x64xf32>
    %86 = arith.maximumf %84, %85 : vector<1x64xf32>
    %87 = arith.maximumf %83, %86 : vector<1x64xf32>
    %c2_112 = arith.constant 2 : index
    %c0_113 = arith.constant 0 : index
    %88 = vector.load %arg19[%c2_112, %c0_113] : memref<64x64xf32, #tpu.memory_space<vmem>>, vector<1x64xf32>
    %c3 = arith.constant 3 : index
    %c0_114 = arith.constant 0 : index
    %89 = vector.load %arg19[%c3, %c0_114] : memref<64x64xf32, #tpu.memory_space<vmem>>, vector<1x64xf32>
    %90 = arith.maximumf %88, %89 : vector<1x64xf32>
    %c22_115 = arith.constant 22 : index
    %c0_116 = arith.constant 0 : index
    %91 = vector.load %arg19[%c22_115, %c0_116] : memref<64x64xf32, #tpu.memory_space<vmem>>, vector<1x64xf32>
    %c23 = arith.constant 23 : index
    %c0_117 = arith.constant 0 : index
    %92 = vector.load %arg19[%c23, %c0_117] : memref<64x64xf32, #tpu.memory_space<vmem>>, vector<1x64xf32>
    %93 = arith.maximumf %91, %92 : vector<1x64xf32>
    %94 = arith.maximumf %90, %93 : vector<1x64xf32>
    %c40_118 = arith.constant 40 : index
    %c0_119 = arith.constant 0 : index
    %95 = vector.load %arg19[%c40_118, %c0_119] : memref<64x64xf32, #tpu.memory_space<vmem>>, vector<1x64xf32>
    %c41_120 = arith.constant 41 : index
    %c0_121 = arith.constant 0 : index
    %96 = vector.load %arg19[%c41_120, %c0_121] : memref<64x64xf32, #tpu.memory_space<vmem>>, vector<1x64xf32>
    %97 = arith.maximumf %95, %96 : vector<1x64xf32>
    %c60 = arith.constant 60 : index
    %c0_122 = arith.constant 0 : index
    %98 = vector.load %arg19[%c60, %c0_122] : memref<64x64xf32, #tpu.memory_space<vmem>>, vector<1x64xf32>
    %c61 = arith.constant 61 : index
    %c0_123 = arith.constant 0 : index
    %99 = vector.load %arg19[%c61, %c0_123] : memref<64x64xf32, #tpu.memory_space<vmem>>, vector<1x64xf32>
    %100 = arith.maximumf %98, %99 : vector<1x64xf32>
    %101 = arith.maximumf %97, %100 : vector<1x64xf32>
    %c42_124 = arith.constant 42 : index
    %c0_125 = arith.constant 0 : index
    %102 = vector.load %arg19[%c42_124, %c0_125] : memref<64x64xf32, #tpu.memory_space<vmem>>, vector<1x64xf32>
    %c43 = arith.constant 43 : index
    %c0_126 = arith.constant 0 : index
    %103 = vector.load %arg19[%c43, %c0_126] : memref<64x64xf32, #tpu.memory_space<vmem>>, vector<1x64xf32>
    %104 = arith.maximumf %102, %103 : vector<1x64xf32>
    %c62 = arith.constant 62 : index
    %c0_127 = arith.constant 0 : index
    %105 = vector.load %arg19[%c62, %c0_127] : memref<64x64xf32, #tpu.memory_space<vmem>>, vector<1x64xf32>
    %c63 = arith.constant 63 : index
    %c0_128 = arith.constant 0 : index
    %106 = vector.load %arg19[%c63, %c0_128] : memref<64x64xf32, #tpu.memory_space<vmem>>, vector<1x64xf32>
    %107 = arith.maximumf %105, %106 : vector<1x64xf32>
    %108 = arith.maximumf %104, %107 : vector<1x64xf32>
    %109 = tpu.concatenate %87, %94, %101, %108 in 1 : vector<1x64xf32>, vector<1x64xf32>, vector<1x64xf32>, vector<1x64xf32> -> vector<1x256xf32>
    %c0_129 = arith.constant 0 : index
    %c0_130 = arith.constant 0 : index
    %110 = vector.load %arg10[%c0_129, %c0_130] : memref<256x32xf32, #tpu.memory_space<vmem>>, vector<256x32xf32>
    %cst_131 = arith.constant dense<0.000000e+00> : vector<1x32xf32>
    %111 = tpu.matmul %109, %110, %cst_131 {dimension_numbers = #tpu.dot_dimension_numbers<[1], [0], [0], [1], [0, 0, 1, 1], [], []>} : vector<1x256xf32>, vector<256x32xf32>, vector<1x32xf32> -> vector<1x32xf32>
    %c0_132 = arith.constant 0 : index
    %c0_133 = arith.constant 0 : index
    %112 = vector.load %arg11[%c0_132, %c0_133] : memref<1x32xf32, #tpu.memory_space<vmem>>, vector<1x32xf32>
    %113 = arith.addf %111, %112 : vector<1x32xf32>
    %cst_134 = arith.constant 0.000000e+00 : f32
    %114 = vector.broadcast %cst_134 : f32 to vector<1x32xf32>
    %115 = arith.maximumf %113, %114 : vector<1x32xf32>
    %c0_135 = arith.constant 0 : index
    %c0_136 = arith.constant 0 : index
    %116 = vector.load %arg12[%c0_135, %c0_136] : memref<32x2xf32, #tpu.memory_space<vmem>>, vector<32x2xf32>
    %cst_137 = arith.constant dense<0.000000e+00> : vector<1x2xf32>
    %117 = tpu.matmul %115, %116, %cst_137 {dimension_numbers = #tpu.dot_dimension_numbers<[1], [0], [0], [1], [0, 0, 1, 1], [], []>} : vector<1x32xf32>, vector<32x2xf32>, vector<1x2xf32> -> vector<1x2xf32>
    %c0_138 = arith.constant 0 : index
    %c0_139 = arith.constant 0 : index
    %118 = vector.load %arg13[%c0_138, %c0_139] : memref<1x2xf32, #tpu.memory_space<vmem>>, vector<1x2xf32>
    %119 = arith.addf %117, %118 : vector<1x2xf32>
    %c0_140 = arith.constant 0 : index
    %c0_141 = arith.constant 0 : index
    %c0_142 = arith.constant 0 : index
    %120 = vector.load %arg14[%c0_140, %c0_141, %c0_142] : memref<1x1x2xf32, #tpu.memory_space<vmem>>, vector<1x1x2xf32>
    %121 = vector.shape_cast %120 : vector<1x1x2xf32> to vector<1x2xf32>
    %122 = vector.shape_cast %119 : vector<1x2xf32> to vector<1x1x2xf32>
    tpu.vector_store %arg14[%c0_140, %c0_141, %c0_142], %122 {strides = array<i32>} : memref<1x1x2xf32, #tpu.memory_space<vmem>>, vector<1x1x2xf32>,
    return
  }
  func.func @transform_0(%arg0: i32) -> (i32, i32, i32) {
    %c0_i32 = arith.constant 0 : i32
    %c0_i32_0 = arith.constant 0 : i32
    %c0_i32_1 = arith.constant 0 : i32
    return %arg0, %c0_i32, %c0_i32_0 : i32, i32, i32
  }
  func.func @transform_1(%arg0: i32) -> (i32, i32) {
    %c0_i32 = arith.constant 0 : i32
    %c0_i32_0 = arith.constant 0 : i32
    %c0_i32_1 = arith.constant 0 : i32
    return %c0_i32, %c0_i32_0 : i32, i32
  }
  func.func @transform_2(%arg0: i32) -> (i32, i32) {
    %c0_i32 = arith.constant 0 : i32
    %c0_i32_0 = arith.constant 0 : i32
    %c0_i32_1 = arith.constant 0 : i32
    return %c0_i32, %c0_i32_0 : i32, i32
  }
  func.func @transform_3(%arg0: i32) -> (i32, i32) {
    %c0_i32 = arith.constant 0 : i32
    %c0_i32_0 = arith.constant 0 : i32
    %c0_i32_1 = arith.constant 0 : i32
    return %c0_i32, %c0_i32_0 : i32, i32
  }
  func.func @transform_4(%arg0: i32) -> (i32, i32) {
    %c0_i32 = arith.constant 0 : i32
    %c0_i32_0 = arith.constant 0 : i32
    %c0_i32_1 = arith.constant 0 : i32
    return %c0_i32, %c0_i32_0 : i32, i32
  }
  func.func @transform_5(%arg0: i32) -> (i32, i32) {
    %c0_i32 = arith.constant 0 : i32
    %c0_i32_0 = arith.constant 0 : i32
    %c0_i32_1 = arith.constant 0 : i32
    return %c0_i32, %c0_i32_0 : i32, i32
  }
  func.func @transform_6(%arg0: i32) -> (i32, i32) {
    %c0_i32 = arith.constant 0 : i32
    %c0_i32_0 = arith.constant 0 : i32
    %c0_i32_1 = arith.constant 0 : i32
    return %c0_i32, %c0_i32_0 : i32, i32
  }
  func.func @transform_7(%arg0: i32) -> (i32, i32) {
    %c0_i32 = arith.constant 0 : i32
    %c0_i32_0 = arith.constant 0 : i32
    %c0_i32_1 = arith.constant 0 : i32
    return %c0_i32, %c0_i32_0 : i32, i32
  }
  func.func @transform_8(%arg0: i32) -> (i32, i32) {
    %c0_i32 = arith.constant 0 : i32
    %c0_i32_0 = arith.constant 0 : i32
    %c0_i32_1 = arith.constant 0 : i32
    return %c0_i32, %c0_i32_0 : i32, i32
  }
  func.func @transform_9(%arg0: i32) -> (i32, i32) {
    %c0_i32 = arith.constant 0 : i32
    %c0_i32_0 = arith.constant 0 : i32
    %c0_i32_1 = arith.constant 0 : i32
    return %c0_i32, %c0_i32_0 : i32, i32
  }
  func.func @transform_10(%arg0: i32) -> (i32, i32) {
    %c0_i32 = arith.constant 0 : i32
    %c0_i32_0 = arith.constant 0 : i32
    %c0_i32_1 = arith.constant 0 : i32
    return %c0_i32, %c0_i32_0 : i32, i32
  }
  func.func @transform_11(%arg0: i32) -> (i32, i32) {
    %c0_i32 = arith.constant 0 : i32
    %c0_i32_0 = arith.constant 0 : i32
    %c0_i32_1 = arith.constant 0 : i32
    return %c0_i32, %c0_i32_0 : i32, i32
  }
  func.func @transform_12(%arg0: i32) -> (i32, i32) {
    %c0_i32 = arith.constant 0 : i32
    %c0_i32_0 = arith.constant 0 : i32
    %c0_i32_1 = arith.constant 0 : i32
    return %c0_i32, %c0_i32_0 : i32, i32
  }
  func.func @transform_13(%arg0: i32) -> (i32, i32, i32) {
    %c0_i32 = arith.constant 0 : i32
    %c0_i32_0 = arith.constant 0 : i32
    %c0_i32_1 = arith.constant 0 : i32
    return %arg0, %c0_i32, %c0_i32_0 : i32, i32, i32
  }
}

</mosaic_0001>

<bundles_post_ra>
// kernel: font_identification_forward.1
= control target key start
LH: loop header
LB: loop body
LE: loop exit
PB: predicated region body
PF: predicated region fallthrough
CT: control target
= control target key end

     0   :  { %s12719_s0 = inlined_call_operand.vmem [shape: f32[2,400,4], index: 0, kind: input, shape index: {}]   ;;  %s12720_s1 = inlined_call_operand.vmem [shape: f32[36,32], index: 1, kind: input, shape index: {}]   ;;  %s12721_s2 = inlined_call_operand.vmem [shape: f32[1,32], index: 2, kind: input, shape index: {}]   ;;  %s12722_s3 = inlined_call_operand.vmem [shape: f32[288,32], index: 3, kind: input, shape index: {}]   ;;  %s12723_s4 = inlined_call_operand.vmem [shape: f32[1,32], index: 4, kind: input, shape index: {}]   ;;  %s12724_s5 = inlined_call_operand.vmem [shape: f32[288,64], index: 5, kind: input, shape index: {}]   ;;  %s12725_s6 = inlined_call_operand.vmem [shape: f32[1,64], index: 6, kind: input, shape index: {}]   ;;  %s12726_s7 = inlined_call_operand.vmem [shape: f32[576,64], index: 7, kind: input, shape index: {}]   ;;  %s12727_s8 = inlined_call_operand.vmem [shape: f32[1,64], index: 8, kind: input, shape index: {}]   ;;  %s12728_s9 = inlined_call_operand.vmem [shape: f32[256,32], index: 9, kind: input, shape index: {}]   ;;  %s12729_s10 = inlined_call_operand.vmem [shape: f32[1,32], index: 10, kind: input, shape index: {}]   ;;  %s12730_s11 = inlined_call_operand.vmem [shape: f32[32,2], index: 11, kind: input, shape index: {}]   ;;  %s12731_s12 = inlined_call_operand.vmem [shape: f32[1,2], index: 12, kind: input, shape index: {}]   ;;  %s12732_s13 = inlined_call_operand.hbm [shape: f32[2,1,2], index: 13, kind: output, shape index: {}]  }
   0x1   :  { %12754 = sst [smem:[#allocation15_spill]] %s12719_s0 }
   0x2   :  { %12755 = sst [smem:[#allocation16_spill]] %s12720_s1 }
   0x3   :  { %18 = vsyncpa [#allocation8], 0 }
   0x4   :  { %20 = vsyncpa [#allocation8 + $0x1], 0  ;;  %s9153_s25 = smov 0   ;;  %s9155_s26 = smov 0  }
   0x5   :  { %s9157_s27 = smov 0   ;;  %s9159_s28 = smov 0  }
   0x6 LB: > { %12756 = sst [smem:[#allocation10_spill]] %s9056_s25  ;;  %s9174_s29 = sadd.s32 4294967295, %s9068_s28   ;;  %s9068_s28 = sphi %s9159_s28, %s12775_s28   ;;  %s9064_s27 = sphi %s9157_s27, %s12777_s27   ;;  %s9060_s26 = sphi %s9155_s26, %s12779_s26   ;;  %s9056_s25 = sphi %s9153_s25, %s12778_s25  }
   0x7   : > { %12757 = sst [smem:[#allocation11_spill]] %s9064_s27  ;;  %s7265_s30 = sadd.s32 4294967294, %s9068_s28  }
   0x8   : > { %s9178_s14 = sadd.s32 1, %s9068_s28   ;;  %s311_s15 = sadd.s32 1, %s9064_s27 }
   0x9   : > { %12758 = sst [smem:[#allocation12_spill]] %s9178_s14  ;;  %s308_s16 = ssub.s32 %s9068_s28, %s9178_s14 }
   0xa   : > { %p321_p0 = scmp.ne.s32.totalorder %s9064_s27, %s9060_s26  ;;  %p309_p1 = scmp.eq.s32.totalorder %s308_s16, 0 }
   0xb   : > { %p322_p2 = scmp.eq.s32.totalorder %s9174_s29, 1  ;;  %p327_p3 = scmp.ne.s32.totalorder %s9060_s26, %s9056_s25 }
   0xc   : > { %p328_p4 = scmp.eq.s32.totalorder %s7265_s30, 1  ;;  %p7268_p7 = scmp.ge.s32.totalorder %s9068_s28, 1 }
   0xd   : > { %s9189_s17 = scalar_select %p309_p1, %s9064_s27, %s311_s15  }
   0xe   : > { %p9191_p5 = por %p322_p2, %p321_p0  ;;  %p9195_p6 = por %p328_p4, %p327_p3 }
   0xf   : > { %12759 = sst [smem:[#allocation13_spill]] %s9189_s17  ;;  %p390_p8 = scmp.lt.s32.totalorder %s9068_s28, 3 }
  0x10   : > { %s12761_s19 = scalar_select %p9195_p6, 1, 0 }
  0x11   : > { %p391_p9 = pnand %p7268_p7, %p390_p8 }
  0x12   : > { %12762 = sst [smem:[#allocation14_spill]] %s12761_s19  ;;  %p433_p10 = scmp.lt.s32.totalorder (!%p391_p9), %s9174_s29, 1 }
  0x13   : > { %394 = sbr.rel (%p391_p9) target bundleno = 2611 (0xa33), region = 72  ;;  %s12763_s0 = sld [smem:[#allocation15_spill]] (!%p391_p9) }
  0x14   : > { %s12764_s1 = sld [smem:[#allocation16_spill]] (!%p391_p9)  ;;  %s12741_s16 = smov (!%p391_p9), 12  }
  0x15   : > { %s12733_s22 = smov (!%p391_p9), 8   ;;  %s12737_s23 = smov (!%p391_p9), 20  }
  0x16   : > { %s12735_s30 = smov (!%p391_p9), 24   ;;  %s12739_s15 = smov (!%p391_p9), 28  }
  0x17   : > { %s12772_s17 = smov (!%p391_p9), 4   ;;  %s9080_s19 = smov (!%p391_p9), 64  }
  0x18   : > { %s434_s20 = scalar_select %p433_p10, %s9174_s29, 1  ;;  %v9070_v0 = vmov 0.0   ;;  %vm2604_vm0 = vcmask 1043456   ;;  %vm9075_vm1 = vmmov 0   ;;  %vm2088_vm2 = vcmask 31744  }
  0x19   : > { %7740 = vmatprep.subr.mxu0 %v9070_v0  ;;  %4499 = vmatprep.subr.mxu1 %v9070_v0  ;;  %vm2134_vm3 = vcmask 64512   ;;  %vm2180_vm4 = vcmask 97280   ;;  %vm2226_vm5 = vcmask 130048   ;;  %vm2272_vm6 = vcmask 162816  }
  0x1a   : > { %s8021_s21 = smul.u32 400, %s434_s20  ;;  %v2460_v1 = vld [vmem:[%s12764_s1 + $0x20] sm:$0xf]  ;;  %s12747_s20 = smov 4   ;;  %7750 = vmatprep.mubr.msk.f32.mxu0 %vm9075_vm1, %v9070_v0  ;;  %v2459_v16 = vld [vmem:[%s12764_s1 + $0x18] sm:$0xff]  ;;  %v2458_v17 = vld [vmem:[%s12764_s1 + $0x10] sm:$0xff] }
  0x1b   : > { %7741 = vmatpush3.msk.msra.mxu0 %vm2604_vm0, %v2460_v1  ;;  %v2457_v18 = vld [vmem:[%s12764_s1 + $0x8] sm:$0xff]  ;;  %v2456_v21 = vld [vmem:[%s12764_s1] sm:$0xff]  ;;  %vm2318_vm7 = vcmask 195584   ;;  %vm2364_vm8 = vcmask 228352   ;;  %vm2410_vm9 = vcmask 261120   ;;  %vm2468_vm10 = vcmask 293888  }
  0x1c   : > { %s9208_s24 = scalar_lea.vmem %s12763_s0, %s8021_s21  ;;  %7742 = vmatprep.subr.mxu0 %v9070_v0  ;;  %s12743_s21 = smov 16   ;;  %vm4168_vm11 = vcmask 523264   ;;  %vm4209_vm12 = vcmask 785408   ;;  %vm2942_vm13 = vcmask 259072   ;;  %vm5068_vm14 = vcmask 257024  }
  0x1d   : > { %v573_v2 = vld [vmem:[%s9208_s24 + $0x14] sm:$0xff]  ;;  %v483_v3 = vld [vmem:[%s9208_s24 + $0x1] sm:$0xff]  ;;  %v484_v7 = vld [vmem:[%s9208_s24 + $0x9] sm:$0xff]  ;;  %7743 = vmatpush3.msra.mxu0 %v2459_v16  ;;  %s12768_s0 = smov 12   ;;  %vm5365_vm15 = vcmask 260096   ;;  %vm6339_vm0 = vcmask 517120  }
  0x1e   : > { %1131 = vrot.lane.b32.xlu1 %v573_v2, %s12741_s16  ;;  %771 = vrot.lane.b32.xlu0 %v483_v3, %s12747_s20  ;;  %v618_v4 = vld [vmem:[%s9208_s24 + $0x15] sm:$0xff]  ;;  %v528_v5 = vld [vmem:[%s9208_s24 + $0x2] sm:$0xff] }
  0x1f   : > { %v663_v6 = vld [vmem:[%s9208_s24 + $0x16] sm:$0xff]  ;;  %v529_v8 = vld [vmem:[%s9208_s24 + $0xa] sm:$0xff]  ;;  %v664_v15 = vld [vmem:[%s9208_s24 + $0x1e] sm:$0xff]  ;;  %7744 = vmatprep.subr.mxu0 %v9070_v0 }
  0x20   : > { %v9230_v9 = vld [vmem:[%s9208_s24 + $0x28] sm:$0xff]  ;;  %v574_v10 = vld [vmem:[%s9208_s24 + $0x1c] sm:$0xff]  ;;  %v485_v14 = vld [vmem:[%s9208_s24 + $0x11] sm:$0xff]  ;;  %7745 = vmatpush3.msra.mxu0 %v2458_v17 }
  0x21   : > { %v9237_v11 = vld [vmem:[%s9208_s24 + $0x29] sm:$0xff]  ;;  %v619_v12 = vld [vmem:[%s9208_s24 + $0x1d] sm:$0xff]  ;;  %v530_v19 = vld [vmem:[%s9208_s24 + $0x12] sm:$0xff]  ;;  %7746 = vmatprep.subr.mxu0 %v9070_v0 }
  0x22   : > { %1311 = vrot.lane.b32.xlu1 %v618_v4, %s12743_s21  ;;  %951 = vrot.lane.b32.xlu0 %v528_v5, %s12733_s22  ;;  %v9244_v13 = vld [vmem:[%s9208_s24 + $0x2a] sm:$0xff]  ;;  %v534_v25 = vld [vmem:[%s9208_s24 + $0x32] sm:$0xff] }
  0x23   : > { %v9265_v20 = vld [vmem:[%s9208_s24 + $0x30] sm:$0xff]  ;;  %7747 = vmatpush3.msra.mxu0 %v2457_v18  ;;  %v575_v22 = vld [vmem:[%s9208_s24 + $0x24] sm:$0xff]  ;;  %v486_v26 = vld [vmem:[%s9208_s24 + $0x19] sm:$0xff] }
  0x24   : > { %v489_v23 = vld [vmem:[%s9208_s24 + $0x31] sm:$0xff]  ;;  %7748 = vmatprep.subr.mxu0 %v9070_v0  ;;  %v620_v24 = vld [vmem:[%s9208_s24 + $0x25] sm:$0xff]  ;;  %v531_v28 = vld [vmem:[%s9208_s24 + $0x1a] sm:$0xff] }
  0x25   : > { %7749 = vmatpush3.msra.mxu0 %v2456_v21  ;;  %v665_v27 = vld [vmem:[%s9208_s24 + $0x26] sm:$0xff]  ;;  %v9289_v29 = vld [vmem:[%s9208_s24 + $0x38] sm:$0xff]  ;;  %v666_v35 = vld [vmem:[%s9208_s24 + $0x2e] sm:$0xff] }
  0x26   : > { %1491 = vrot.lane.b32.xlu1 %v663_v6, %s12737_s23  ;;  %773 = vrot.lane.b32.xlu0 %v484_v7, %s12747_s20  ;;  %s12771_s23 = smov 32   ;;  %v576_v30 = vld [vmem:[%s9208_s24 + $0x2c] sm:$0xff]  ;;  %v490_v31 = vld [vmem:[%s9208_s24 + $0x39] sm:$0xff] }
  0x27   : > { %v621_v32 = vld [vmem:[%s9208_s24 + $0x2d] sm:$0xff]  ;;  %v535_v33 = vld [vmem:[%s9208_s24 + $0x3a] sm:$0xff]  ;;  %v532_v36 = vld [vmem:[%s9208_s24 + $0x22] sm:$0xff] }
  0x28   : > { %v487_v34 = vld [vmem:[%s9208_s24 + $0x21] sm:$0xff]  ;;  %v577_v38 = vld [vmem:[%s9208_s24 + $0x34] sm:$0xff]  ;;  %v9334_v45 = vld [vmem:[%s9208_s24 + $0x49] sm:$0xff] }
  0x29   : > { %v9308_v37 = vld [vmem:[%s9208_s24 + $0x40] sm:$0xff]  ;;  %v622_v40 = vld [vmem:[%s9208_s24 + $0x35] sm:$0xff]  ;;  %v9326_v43 = vld [vmem:[%s9208_s24 + $0x48] sm:$0xff] }
  0x2a   : > { %953 = vrot.lane.b32.xlu0 %v529_v8, %s12733_s22  ;;  %1671 = vrot.lane.b32.xlu1 %v9230_v9, %s12735_s30  ;;  %s12745_s22 = smov 32   ;;  %s12766_s30 = smov 8   ;;  %v491_v39 = vld [vmem:[%s9208_s24 + $0x41] sm:$0xff]  ;;  %v667_v42 = vld [vmem:[%s9208_s24 + $0x36] sm:$0xff] }
  0x2b   : > { %v536_v41 = vld [vmem:[%s9208_s24 + $0x42] sm:$0xff]  ;;  %v9341_v47 = vld [vmem:[%s9208_s24 + $0x4a] sm:$0xff]  ;;  %v9364_v53 = vld [vmem:[%s9208_s24 + $0x52] sm:$0xff] }
  0x2c   : > { %v578_v44 = vld [vmem:[%s9208_s24 + $0x3c] sm:$0xff]  ;;  %v9350_v49 = vld [vmem:[%s9208_s24 + $0x50] sm:$0xff]  ;;  %v579_v50 = vld [vmem:[%s9208_s24 + $0x44] sm:$0xff] }
  0x2d   : > { %v623_v46 = vld [vmem:[%s9208_s24 + $0x3d] sm:$0xff]  ;;  %v9357_v51 = vld [vmem:[%s9208_s24 + $0x51] sm:$0xff]  ;;  %v624_v52 = vld [vmem:[%s9208_s24 + $0x45] sm:$0xff] }
  0x2e   : > { %1133 = vrot.lane.b32.xlu0 %v574_v10, %s12741_s16  ;;  %1812 = vrot.lane.b32.xlu1 %v9237_v11, %s12739_s15  ;;  %s12767_s15 = smov 24   ;;  %s12770_s16 = smov 16   ;;  %v668_v48 = vld [vmem:[%s9208_s24 + $0x3e] sm:$0xff]  ;;  %v669_v54 = vld [vmem:[%s9208_s24 + $0x46] sm:$0xff] }
  0x2f   : > { %v9373_v55 = vld [vmem:[%s9208_s24 + $0x58] sm:$0xff]  ;;  %v580_v56 = vld [vmem:[%s9208_s24 + $0x4c] sm:$0xff]  ;;  %v438_v2 = vld [vmem:[%s9208_s24] sm:$0xff] }
  0x30   : > { %v9380_v57 = vld [vmem:[%s9208_s24 + $0x59] sm:$0xff]  ;;  %v625_v58 = vld [vmem:[%s9208_s24 + $0x4d] sm:$0xff]  ;;  %v9406_v10 = vld [vmem:[%s9208_s24 + $0x61] sm:$0xff] }
  0x31   : > { %v9387_v59 = vld [vmem:[%s9208_s24 + $0x5a] sm:$0xff]  ;;  %v670_v62 = vld [vmem:[%s9208_s24 + $0x4e] sm:$0xff]  ;;  %v9415_v16 = vld [vmem:[%s9208_s24 + $0x62] sm:$0xff] }
  0x32   : > { %1313 = vrot.lane.b32.xlu0 %v619_v12, %s12743_s21  ;;  %1953 = vrot.lane.b32.xlu1 %v9244_v13, %s12745_s22  ;;  %s12765_s21 = smov 20   ;;  %s12769_s22 = smov 28   ;;  %v9397_v3 = vld [vmem:[%s9208_s24 + $0x60] sm:$0xff]  ;;  %v581_v8 = vld [vmem:[%s9208_s24 + $0x54] sm:$0xff] }
  0x36   : > { %775 = vrot.lane.b32.xlu0 %v485_v14, %s12747_s20  ;;  %1493 = vrot.lane.b32.xlu1 %v664_v15, %s12765_s21  ;;  %v626_v15 = vld [vmem:[%s9208_s24 + $0x55] sm:$0xff] }
  0x3a   : > { %955 = vrot.lane.b32.xlu0 %v530_v19, %s12766_s30  ;;  %1673 = vrot.lane.b32.xlu1 %v9265_v20, %s12767_s15 }
  0x3e   : > { %1135 = vrot.lane.b32.xlu0 %v575_v22, %s12768_s0  ;;  %1814 = vrot.lane.b32.xlu1 %v489_v23, %s12769_s22  ;;  %v671_v22 = vld [vmem:[%s9208_s24 + $0x56] sm:$0xff] }
  0x42   : > { %1315 = vrot.lane.b32.xlu0 %v620_v24, %s12770_s16  ;;  %1955 = vrot.lane.b32.xlu1 %v534_v25, %s12771_s23 }
  0x46   : > { %777 = vrot.lane.b32.xlu0 %v486_v26, %s12747_s20  ;;  %1495 = vrot.lane.b32.xlu1 %v665_v27, %s12765_s21  ;;  %v9430_v27 = vld [vmem:[%s9208_s24 + $0x68] sm:$0xff] }
  0x4a   : > { %957 = vrot.lane.b32.xlu0 %v531_v28, %s12766_s30  ;;  %1675 = vrot.lane.b32.xlu1 %v9289_v29, %s12767_s15 }
  0x4e   : > { %1137 = vrot.lane.b32.xlu0 %v576_v30, %s12768_s0  ;;  %1816 = vrot.lane.b32.xlu1 %v490_v31, %s12769_s22 }
  0x52   : > { %1317 = vrot.lane.b32.xlu0 %v621_v32, %s12770_s16  ;;  %1957 = vrot.lane.b32.xlu1 %v535_v33, %s12771_s23  ;;  %v582_v32 = vld [vmem:[%s9208_s24 + $0x5c] sm:$0xff] }
  0x56   : > { %779 = vrot.lane.b32.xlu0 %v487_v34, %s12747_s20  ;;  %1497 = vrot.lane.b32.xlu1 %v666_v35, %s12765_s21 }
  0x5a   : > { %959 = vrot.lane.b32.xlu0 %v532_v36, %s12766_s30  ;;  %1677 = vrot.lane.b32.xlu1 %v9308_v37, %s12767_s15 }
  0x5e   : > { %1139 = vrot.lane.b32.xlu0 %v577_v38, %s12768_s0  ;;  %1818 = vrot.lane.b32.xlu1 %v491_v39, %s12769_s22 }
  0x62   : > { %1319 = vrot.lane.b32.xlu0 %v622_v40, %s12770_s16  ;;  %1959 = vrot.lane.b32.xlu1 %v536_v41, %s12771_s23  ;;  %v9450_v40 = vld [vmem:[%s9208_s24 + $0x6a] sm:$0xff] }
  0x66   : > { %781 = vrot.lane.b32.xlu0 %v9237_v11, %s12747_s20  ;;  %1499 = vrot.lane.b32.xlu1 %v667_v42, %s12765_s21 }
  0x6a   : > { %961 = vrot.lane.b32.xlu0 %v9244_v13, %s12766_s30  ;;  %1679 = vrot.lane.b32.xlu1 %v9326_v43, %s12767_s15 }
  0x6e   : > { %1141 = vrot.lane.b32.xlu0 %v578_v44, %s12768_s0  ;;  %1820 = vrot.lane.b32.xlu1 %v9334_v45, %s12769_s22 }
  0x72   : > { %1321 = vrot.lane.b32.xlu0 %v623_v46, %s12770_s16  ;;  %1961 = vrot.lane.b32.xlu1 %v9341_v47, %s12771_s23 }
  0x76   : > { %783 = vrot.lane.b32.xlu0 %v489_v23, %s12747_s20  ;;  %1501 = vrot.lane.b32.xlu1 %v668_v48, %s12765_s21  ;;  %v672_v48 = vld [vmem:[%s9208_s24 + $0x5e] sm:$0xff] }
  0x7a   : > { %963 = vrot.lane.b32.xlu0 %v534_v25, %s12766_s30  ;;  %1681 = vrot.lane.b32.xlu1 %v9350_v49, %s12767_s15 }
  0x7e   : > { %1143 = vrot.lane.b32.xlu0 %v579_v50, %s12768_s0  ;;  %1822 = vrot.lane.b32.xlu1 %v9357_v51, %s12769_s22 }
  0x82   : > { %1323 = vrot.lane.b32.xlu0 %v624_v52, %s12770_s16  ;;  %1963 = vrot.lane.b32.xlu1 %v9364_v53, %s12771_s23 }
  0x86   : > { %785 = vrot.lane.b32.xlu0 %v490_v31, %s12747_s20  ;;  %1503 = vrot.lane.b32.xlu1 %v669_v54, %s12765_s21  ;;  %v439_v31 = vld [vmem:[%s9208_s24 + $0x8] sm:$0xff] }
  0x8a   : > { %965 = vrot.lane.b32.xlu0 %v535_v33, %s12766_s30  ;;  %1683 = vrot.lane.b32.xlu1 %v9373_v55, %s12767_s15  ;;  %v9441_v33 = vld [vmem:[%s9208_s24 + $0x69] sm:$0xff] }
  0x8e   : > { %1145 = vrot.lane.b32.xlu0 %v580_v56, %s12768_s0  ;;  %1824 = vrot.lane.b32.xlu1 %v9380_v57, %s12769_s22 }
  0x90   : > { %v1132_v60 = vpop.permute.xlu1 %1131  ;;  %v772_v61 = vpop.permute.xlu0 %771 }
  0x91   : > { %v2089_v4 = vsel %vm2088_vm2, %v438_v2, %v772_v61 }
  0x92   : > { %1325 = vrot.lane.b32.xlu0 %v625_v58, %s12770_s16  ;;  %1965 = vrot.lane.b32.xlu1 %v9387_v59, %s12771_s23  ;;  %v9467_v58 = vld [vmem:[%s9208_s24 + $0x70] sm:$0xff] }
  0x94   : > { %v1312_v63 = vpop.permute.xlu1 %1311  ;;  %v952_v1 = vpop.permute.xlu0 %951 }
  0x95   : > { %v2135_v7 = vsel %vm2134_vm3, %v2089_v4, %v952_v1 }
  0x96   : > { %787 = vrot.lane.b32.xlu0 %v491_v39, %s12747_s20  ;;  %1505 = vrot.lane.b32.xlu1 %v670_v62, %s12765_s21  ;;  %v2181_v11 = vsel %vm2180_vm4, %v2135_v7, %v1132_v60  ;;  %v627_v39 = vld [vmem:[%s9208_s24 + $0x5d] sm:$0xff] }
  0x97   : > { %v2227_v14 = vsel %vm2226_vm5, %v2181_v11, %v1312_v63  ;;  %v583_v62 = vld [vmem:[%s9208_s24 + $0x64] sm:$0xff]  ;;  %v9478_v63 = vld [vmem:[%s9208_s24 + $0x71] sm:$0xff] }
  0x98   : > { %v1492_v5 = vpop.permute.xlu1 %1491  ;;  %v774_v6 = vpop.permute.xlu0 %773 }
  0x99   : > { %v2273_v19 = vsel %vm2272_vm6, %v2227_v14, %v1492_v5  ;;  %v2090_v36 = vsel %vm2088_vm2, %v439_v31, %v774_v6  ;;  %v9487_v6 = vld [vmem:[%s9208_s24 + $0x72] sm:$0xff] }
  0x9a   : > { %967 = vrot.lane.b32.xlu0 %v536_v41, %s12766_s30  ;;  %1685 = vrot.lane.b32.xlu1 %v9397_v3, %s12767_s15 }
  0x9c   : > { %v954_v12 = vpop.permute.xlu0 %953  ;;  %v1672_v13 = vpop.permute.xlu1 %1671 }
  0x9d   : > { %v2319_v21 = vsel %vm2318_vm7, %v2273_v19, %v1672_v13  ;;  %v2136_v38 = vsel %vm2134_vm3, %v2090_v36, %v954_v12 }
  0x9e   : > { %1147 = vrot.lane.b32.xlu0 %v581_v8, %s12768_s0  ;;  %1826 = vrot.lane.b32.xlu1 %v9406_v10, %s12769_s22 }
  0xa0   : > { %v1134_v17 = vpop.permute.xlu0 %1133  ;;  %v1813_v18 = vpop.permute.xlu1 %1812 }
  0xa1   : > { %v2365_v23 = vsel %vm2364_vm8, %v2319_v21, %v1813_v18  ;;  %v2182_v41 = vsel %vm2180_vm4, %v2136_v38, %v1134_v17 }
  0xa2   : > { %1327 = vrot.lane.b32.xlu0 %v626_v15, %s12770_s16  ;;  %1967 = vrot.lane.b32.xlu1 %v9415_v16, %s12771_s23  ;;  %v673_v15 = vld [vmem:[%s9208_s24 + $0x66] sm:$0xff] }
  0xa4   : > { %v1314_v24 = vpop.permute.xlu0 %1313  ;;  %v1954_v25 = vpop.permute.xlu1 %1953 }
  0xa5   : > { %v2411_v26 = vsel %vm2410_vm9, %v2365_v23, %v1954_v25  ;;  %v584_v25 = vld [vmem:[%s9208_s24 + $0x6c] sm:$0xff] }
  0xa6   : > { %789 = vrot.lane.b32.xlu0 %v9334_v45, %s12747_s20  ;;  %1507 = vrot.lane.b32.xlu1 %v671_v22, %s12765_s21  ;;  %v2228_v45 = vsel %vm2226_vm5, %v2182_v41, %v1314_v24  ;;  %v9504_v22 = vld [vmem:[%s9208_s24 + $0x78] sm:$0xff] }
  0xa7   : > { %7751 = vmatmul.mubr.msk.f32.vlgmr.msra.gmra.mxu0 %vm2468_vm10, %v2411_v26  ;;  %v9515_v26 = vld [vmem:[%s9208_s24 + $0x79] sm:$0xff] }
  0xa8   : > { %v776_v28 = vpop.permute.xlu0 %775  ;;  %v1494_v30 = vpop.permute.xlu1 %1493  ;;  %7753 = vmatprep.mubr.msk.f32.mxu0 %vm9075_vm1, %v9070_v0 }
  0xa9   : > { %v2274_v46 = vsel %vm2272_vm6, %v2228_v45, %v1494_v30 }
  0xaa   : > { %969 = vrot.lane.b32.xlu0 %v9341_v47, %s12766_s30  ;;  %1687 = vrot.lane.b32.xlu1 %v9430_v27, %s12767_s15 }
  0xac   : > { %v956_v34 = vpop.permute.xlu0 %955  ;;  %v1674_v35 = vpop.permute.xlu1 %1673 }
  0xad   : > { %v2320_v47 = vsel %vm2318_vm7, %v2274_v46, %v1674_v35 }
  0xae   : > { %1149 = vrot.lane.b32.xlu0 %v582_v32, %s12768_s0  ;;  %1828 = vrot.lane.b32.xlu1 %v9441_v33, %s12769_s22 }
  0xb0   : > { %v1136_v42 = vpop.permute.xlu0 %1135  ;;  %v1815_v44 = vpop.permute.xlu1 %1814 }
  0xb1   : > { %v2366_v50 = vsel %vm2364_vm8, %v2320_v47, %v1815_v44  ;;  %v674_v44 = vld [vmem:[%s9208_s24 + $0x6e] sm:$0xff] }
  0xb2   : > { %1329 = vrot.lane.b32.xlu0 %v627_v39, %s12770_s16  ;;  %1969 = vrot.lane.b32.xlu1 %v9450_v40, %s12771_s23 }
  0xb4   : > { %v1316_v52 = vpop.permute.xlu0 %1315  ;;  %v1956_v54 = vpop.permute.xlu1 %1955 }
  0xb5   : > { %v2412_v56 = vsel %vm2410_vm9, %v2366_v50, %v1956_v54  ;;  %v9541_v50 = vld [vmem:[%s9208_s24 + $0x80] sm:$0xff] }
  0xb6   : > { %791 = vrot.lane.b32.xlu0 %v9357_v51, %s12747_s20  ;;  %1509 = vrot.lane.b32.xlu1 %v672_v48, %s12765_s21  ;;  %v440_v51 = vld [vmem:[%s9208_s24 + $0x10] sm:$0xff] }
  0xb7   : > { %7754 = vmatmul.mubr.msk.f32.gmra.mxu0 %vm2468_vm10, %v2412_v56  ;;  %v2091_v4 = vsel %vm2088_vm2, %v440_v51, %v776_v28  ;;  %v585_v56 = vld [vmem:[%s9208_s24 + $0x74] sm:$0xff] }
  0xb8   : > { %v778_v60 = vpop.permute.xlu0 %777  ;;  %v1496_v61 = vpop.permute.xlu1 %1495  ;;  %7756 = vmatprep.mubr.msk.f32.mxu0 %vm9075_vm1, %v9070_v0  ;;  %v2137_v5 = vsel %vm2134_vm3, %v2091_v4, %v956_v34  ;;  %v9524_v34 = vld [vmem:[%s9208_s24 + $0x7a] sm:$0xff] }
  0xb9   : > { %v2183_v7 = vsel %vm2180_vm4, %v2137_v5, %v1136_v42 }
  0xba   : > { %971 = vrot.lane.b32.xlu0 %v9364_v53, %s12766_s30  ;;  %1689 = vrot.lane.b32.xlu1 %v9467_v58, %s12767_s15  ;;  %v628_v53 = vld [vmem:[%s9208_s24 + $0x65] sm:$0xff]  ;;  %v2229_v12 = vsel %vm2226_vm5, %v2183_v7, %v1316_v52 }
  0xbb   : > { %v2275_v13 = vsel %vm2272_vm6, %v2229_v12, %v1496_v61  ;;  %v675_v12 = vld [vmem:[%s9208_s24 + $0x76] sm:$0xff] }
  0xbc   : > { %v958_v1 = vpop.permute.xlu0 %957  ;;  %v1676_v2 = vpop.permute.xlu1 %1675 }
  0xbd   : > { %v2321_v14 = vsel %vm2318_vm7, %v2275_v13, %v1676_v2  ;;  %v9561_v2 = vld [vmem:[%s9208_s24 + $0x82] sm:$0xff] }
  0xbe   : > { %1151 = vrot.lane.b32.xlu0 %v583_v62, %s12768_s0  ;;  %1830 = vrot.lane.b32.xlu1 %v9478_v63, %s12769_s22 }
  0xc0   : > { %v1138_v8 = vpop.permute.xlu0 %1137  ;;  %v1817_v11 = vpop.permute.xlu1 %1816 }
  0xc1   : > { %v2367_v17 = vsel %vm2364_vm8, %v2321_v14, %v1817_v11 }
  0xc2   : > { %1331 = vrot.lane.b32.xlu0 %v628_v53, %s12770_s16  ;;  %1971 = vrot.lane.b32.xlu1 %v9487_v6, %s12771_s23 }
  0xc4   : > { %v1318_v18 = vpop.permute.xlu0 %1317  ;;  %v1958_v19 = vpop.permute.xlu1 %1957 }
  0xc5   : > { %v2413_v21 = vsel %vm2410_vm9, %v2367_v17, %v1958_v19 }
  0xc6   : > { %793 = vrot.lane.b32.xlu0 %v9380_v57, %s12747_s20  ;;  %1511 = vrot.lane.b32.xlu1 %v673_v15, %s12765_s21  ;;  %v441_v57 = vld [vmem:[%s9208_s24 + $0x18] sm:$0xff] }
  0xc7   : > { %7757 = vmatmul.mubr.msk.f32.gmra.mxu0 %vm2468_vm10, %v2413_v21  ;;  %v2092_v31 = vsel %vm2088_vm2, %v441_v57, %v778_v60  ;;  %v9552_v60 = vld [vmem:[%s9208_s24 + $0x81] sm:$0xff] }
  0xc8   : > { %v780_v23 = vpop.permute.xlu0 %779  ;;  %v1498_v24 = vpop.permute.xlu1 %1497  ;;  %7759 = vmatprep.mubr.msk.f32.mxu0 %vm9075_vm1, %v9070_v0  ;;  %v2138_v32 = vsel %vm2134_vm3, %v2092_v31, %v958_v1 }
  0xc9   : > { %v2184_v35 = vsel %vm2180_vm4, %v2138_v32, %v1138_v8 }
  0xca   : > { %973 = vrot.lane.b32.xlu0 %v9387_v59, %s12766_s30  ;;  %1691 = vrot.lane.b32.xlu1 %v9504_v22, %s12767_s15  ;;  %v629_v59 = vld [vmem:[%s9208_s24 + $0x6d] sm:$0xff]  ;;  %v2230_v39 = vsel %vm2226_vm5, %v2184_v35, %v1318_v18 }
  0xcb   : > { %v2276_v41 = vsel %vm2272_vm6, %v2230_v39, %v1498_v24  ;;  %v9578_v18 = vld [vmem:[%s9208_s24 + $0x88] sm:$0xff] }
  0xcc   : > { %v960_v28 = vpop.permute.xlu0 %959  ;;  %v1678_v30 = vpop.permute.xlu1 %1677 }
  0xcd   : > { %v2322_v42 = vsel %vm2318_vm7, %v2276_v41, %v1678_v30  ;;  %v9598_v30 = vld [vmem:[%s9208_s24 + $0x8a] sm:$0xff] }
  0xce   : > { %1153 = vrot.lane.b32.xlu0 %v584_v25, %s12768_s0  ;;  %1832 = vrot.lane.b32.xlu1 %v9515_v26, %s12769_s22 }
  0xd0   : > { %v1140_v36 = vpop.permute.xlu0 %1139  ;;  %v1819_v38 = vpop.permute.xlu1 %1818 }
  0xd1   : > { %v2368_v45 = vsel %vm2364_vm8, %v2322_v42, %v1819_v38  ;;  %v676_v38 = vld [vmem:[%s9208_s24 + $0x7e] sm:$0xff] }
  0xd2   : > { %1333 = vrot.lane.b32.xlu0 %v629_v59, %s12770_s16  ;;  %1973 = vrot.lane.b32.xlu1 %v9524_v34, %s12771_s23 }
  0xd4   : > { %v1320_v46 = vpop.permute.xlu0 %1319  ;;  %v1960_v47 = vpop.permute.xlu1 %1959 }
  0xd5   : > { %v2414_v48 = vsel %vm2410_vm9, %v2368_v45, %v1960_v47  ;;  %v9615_v45 = vld [vmem:[%s9208_s24 + $0x90] sm:$0xff] }
  0xd6   : > { %795 = vrot.lane.b32.xlu0 %v9406_v10, %s12747_s20  ;;  %1513 = vrot.lane.b32.xlu1 %v674_v44, %s12765_s21  ;;  %v442_v10 = vld [vmem:[%s9208_s24 + $0x20] sm:$0xff] }
  0xd7   : > { %7760 = vmatmul.mubr.msk.f32.gmra.mxu0 %vm2468_vm10, %v2414_v48  ;;  %v2093_v62 = vsel %vm2088_vm2, %v442_v10, %v780_v23  ;;  %v9588_v23 = vld [vmem:[%s9208_s24 + $0x89] sm:$0xff]  ;;  %v9625_v48 = vld [vmem:[%s9208_s24 + $0x91] sm:$0xff] }
  0xd8   : > { %v782_v52 = vpop.permute.xlu0 %781  ;;  %v1500_v54 = vpop.permute.xlu1 %1499  ;;  %7762 = vmatprep.mubr.msk.f32.mxu0 %vm9075_vm1, %v9070_v0  ;;  %v2139_v1 = vsel %vm2134_vm3, %v2093_v62, %v960_v28 }
  0xd9   : > { %v2185_v4 = vsel %vm2180_vm4, %v2139_v1, %v1140_v36  ;;  %v2094_v25 = vsel %vm2088_vm2, %v9230_v9, %v782_v52 }
  0xda   : > { %975 = vrot.lane.b32.xlu0 %v9415_v16, %s12766_s30  ;;  %1693 = vrot.lane.b32.xlu1 %v9541_v50, %s12767_s15  ;;  %v630_v16 = vld [vmem:[%s9208_s24 + $0x75] sm:$0xff]  ;;  %v2231_v7 = vsel %vm2226_vm5, %v2185_v4, %v1320_v46 }
  0xdb   : > { %v2277_v8 = vsel %vm2272_vm6, %v2231_v7, %v1500_v54 }
  0xdc   : > { %v962_v61 = vpop.permute.xlu0 %961  ;;  %v1680_v51 = vpop.permute.xlu1 %1679 }
  0xdd   : > { %v2323_v11 = vsel %vm2318_vm7, %v2277_v8, %v1680_v51  ;;  %v2140_v28 = vsel %vm2134_vm3, %v2094_v25, %v962_v61  ;;  %v9635_v61 = vld [vmem:[%s9208_s24 + $0x92] sm:$0xff] }
  0xde   : > { %1155 = vrot.lane.b32.xlu0 %v585_v56, %s12768_s0  ;;  %1834 = vrot.lane.b32.xlu1 %v9552_v60, %s12769_s22 }
  0xe0   : > { %v1142_v5 = vpop.permute.xlu0 %1141  ;;  %v1821_v53 = vpop.permute.xlu1 %1820 }
  0xe1   : > { %v2369_v13 = vsel %vm2364_vm8, %v2323_v11, %v1821_v53  ;;  %v2186_v31 = vsel %vm2180_vm4, %v2140_v28, %v1142_v5  ;;  %v677_v5 = vld [vmem:[%s9208_s24 + $0x86] sm:$0xff] }
  0xe2   : > { %1335 = vrot.lane.b32.xlu0 %v630_v16, %s12770_s16  ;;  %1975 = vrot.lane.b32.xlu1 %v9561_v2, %s12771_s23 }
  0xe4   : > { %v1322_v14 = vpop.permute.xlu0 %1321  ;;  %v1962_v15 = vpop.permute.xlu1 %1961 }
  0xe5   : > { %v2415_v17 = vsel %vm2410_vm9, %v2369_v13, %v1962_v15  ;;  %v2232_v35 = vsel %vm2226_vm5, %v2186_v31, %v1322_v14  ;;  %v9662_v15 = vld [vmem:[%s9208_s24 + $0x99] sm:$0xff] }
  0xe6   : > { %797 = vrot.lane.b32.xlu0 %v9441_v33, %s12747_s20  ;;  %1515 = vrot.lane.b32.xlu1 %v675_v12, %s12765_s21  ;;  %v586_v33 = vld [vmem:[%s9208_s24 + $0x7c] sm:$0xff] }
  0xe7   : > { %7763 = vmatmul.mubr.msk.f32.gmra.mxu0 %vm2468_vm10, %v2415_v17  ;;  %v9652_v12 = vld [vmem:[%s9208_s24 + $0x98] sm:$0xff] }
  0xe8   : > { %v784_v19 = vpop.permute.xlu0 %783  ;;  %v1502_v21 = vpop.permute.xlu1 %1501  ;;  %7765 = vmatprep.mubr.msk.f32.mxu0 %vm9075_vm1, %v9070_v0 }
  0xe9   : > { %v2278_v36 = vsel %vm2272_vm6, %v2232_v35, %v1502_v21  ;;  %v2095_v10 = vsel %vm2088_vm2, %v9265_v20, %v784_v19 }
  0xea   : > { %977 = vrot.lane.b32.xlu0 %v9450_v40, %s12766_s30  ;;  %1695 = vrot.lane.b32.xlu1 %v9578_v18, %s12767_s15  ;;  %v631_v40 = vld [vmem:[%s9208_s24 + $0x7d] sm:$0xff] }
  0xec   : > { %v964_v24 = vpop.permute.xlu0 %963  ;;  %v1682_v57 = vpop.permute.xlu1 %1681 }
  0xed   : > { %v2324_v9 = vsel %vm2318_vm7, %v2278_v36, %v1682_v57  ;;  %v2141_v56 = vsel %vm2134_vm3, %v2095_v10, %v964_v24  ;;  %v9672_v24 = vld [vmem:[%s9208_s24 + $0x9a] sm:$0xff] }
  0xee   : > { %1157 = vrot.lane.b32.xlu0 %v586_v33, %s12768_s0  ;;  %1836 = vrot.lane.b32.xlu1 %v9588_v23, %s12769_s22 }
  0xf0   : > { %v1144_v32 = vpop.permute.xlu0 %1143  ;;  %v1823_v59 = vpop.permute.xlu1 %1822 }
  0xf1   : > { %v2370_v39 = vsel %vm2364_vm8, %v2324_v9, %v1823_v59  ;;  %v2187_v51 = vsel %vm2180_vm4, %v2141_v56, %v1144_v32  ;;  %v678_v32 = vld [vmem:[%s9208_s24 + $0x8e] sm:$0xff] }
  0xf2   : > { %1337 = vrot.lane.b32.xlu0 %v631_v40, %s12770_s16  ;;  %1977 = vrot.lane.b32.xlu1 %v9598_v30, %s12771_s23 }
  0xf4   : > { %v1324_v41 = vpop.permute.xlu0 %1323  ;;  %v1964_v42 = vpop.permute.xlu1 %1963 }
  0xf5   : > { %v2416_v44 = vsel %vm2410_vm9, %v2370_v39, %v1964_v42  ;;  %v2233_v16 = vsel %vm2226_vm5, %v2187_v51, %v1324_v41  ;;  %v9699_v42 = vld [vmem:[%s9208_s24 + $0xa1] sm:$0xff] }
  0xf6   : > { %799 = vrot.lane.b32.xlu0 %v9478_v63, %s12747_s20  ;;  %1517 = vrot.lane.b32.xlu1 %v676_v38, %s12765_s21  ;;  %v587_v63 = vld [vmem:[%s9208_s24 + $0x84] sm:$0xff] }
  0xf7   : > { %7766 = vmatmul.mubr.msk.f32.gmra.mxu0 %vm2468_vm10, %v2416_v44  ;;  %v9689_v38 = vld [vmem:[%s9208_s24 + $0xa0] sm:$0xff] }
  0xf8   : > { %v786_v46 = vpop.permute.xlu0 %785  ;;  %v1504_v47 = vpop.permute.xlu1 %1503  ;;  %7768 = vmatprep.mubr.msk.f32.mxu0 %vm9075_vm1, %v9070_v0 }
  0xf9   : > { %v2279_v4 = vsel %vm2272_vm6, %v2233_v16, %v1504_v47  ;;  %v2096_v21 = vsel %vm2088_vm2, %v9289_v29, %v786_v46 }
  0xfa   : > { %979 = vrot.lane.b32.xlu0 %v9487_v6, %s12766_s30  ;;  %1697 = vrot.lane.b32.xlu1 %v9615_v45, %s12767_s15  ;;  %v632_v6 = vld [vmem:[%s9208_s24 + $0x85] sm:$0xff] }
  0xfc   : > { %v966_v52 = vpop.permute.xlu0 %965  ;;  %v1684_v54 = vpop.permute.xlu1 %1683 }
  0xfd   : > { %v2325_v20 = vsel %vm2318_vm7, %v2279_v4, %v1684_v54  ;;  %v2142_v33 = vsel %vm2134_vm3, %v2096_v21, %v966_v52  ;;  %v9709_v52 = vld [vmem:[%s9208_s24 + $0xa2] sm:$0xff] }
  0xfe   : > { %1159 = vrot.lane.b32.xlu0 %v587_v63, %s12768_s0  ;;  %1838 = vrot.lane.b32.xlu1 %v9625_v48, %s12769_s22 }
 0x100   : > { %v1146_v62 = vpop.permute.xlu0 %1145  ;;  %v1825_v1 = vpop.permute.xlu1 %1824 }
 0x101   : > { %v2371_v53 = vsel %vm2364_vm8, %v2325_v20, %v1825_v1  ;;  %v2188_v57 = vsel %vm2180_vm4, %v2142_v33, %v1146_v62  ;;  %v679_v62 = vld [vmem:[%s9208_s24 + $0x96] sm:$0xff] }
 0x102   : > { %1339 = vrot.lane.b32.xlu0 %v632_v6, %s12770_s16  ;;  %1979 = vrot.lane.b32.xlu1 %v9635_v61, %s12771_s23 }
 0x104   : > { %v1326_v7 = vpop.permute.xlu0 %1325  ;;  %v1966_v8 = vpop.permute.xlu1 %1965 }
 0x105   : > { %v2417_v11 = vsel %vm2410_vm9, %v2371_v53, %v1966_v8  ;;  %v2234_v40 = vsel %vm2226_vm5, %v2188_v57, %v1326_v7  ;;  %v9736_v8 = vld [vmem:[%s9208_s24 + $0xa9] sm:$0xff] }
 0x106   : > { %801 = vrot.lane.b32.xlu0 %v9515_v26, %s12747_s20  ;;  %1519 = vrot.lane.b32.xlu1 %v677_v5, %s12765_s21  ;;  %v588_v26 = vld [vmem:[%s9208_s24 + $0x8c] sm:$0xff] }
 0x107   : > { %7769 = vmatmul.mubr.msk.f32.gmra.mxu0 %vm2468_vm10, %v2417_v11  ;;  %v9726_v5 = vld [vmem:[%s9208_s24 + $0xa8] sm:$0xff] }
 0x108   : > { %v788_v13 = vpop.permute.xlu0 %787  ;;  %v1506_v14 = vpop.permute.xlu1 %1505  ;;  %7771 = vmatprep.mubr.msk.f32.mxu0 %vm9075_vm1, %v9070_v0 }
 0x109   : > { %v2280_v31 = vsel %vm2272_vm6, %v2234_v40, %v1506_v14  ;;  %v2097_v47 = vsel %vm2088_vm2, %v9308_v37, %v788_v13 }
 0x10a   : > { %981 = vrot.lane.b32.xlu0 %v9524_v34, %s12766_s30  ;;  %1699 = vrot.lane.b32.xlu1 %v9652_v12, %s12767_s15  ;;  %v633_v34 = vld [vmem:[%s9208_s24 + $0x8d] sm:$0xff] }
 0x10c   : > { %v968_v17 = vpop.permute.xlu0 %967  ;;  %v1686_v19 = vpop.permute.xlu1 %1685 }
 0x10d   : > { %v2326_v29 = vsel %vm2318_vm7, %v2280_v31, %v1686_v19  ;;  %v2143_v63 = vsel %vm2134_vm3, %v2097_v47, %v968_v17  ;;  %v9746_v17 = vld [vmem:[%s9208_s24 + $0xaa] sm:$0xff] }
 0x10e   : > { %1161 = vrot.lane.b32.xlu0 %v588_v26, %s12768_s0  ;;  %1840 = vrot.lane.b32.xlu1 %v9662_v15, %s12769_s22 }
 0x110   : > { %v1148_v25 = vpop.permute.xlu0 %1147  ;;  %v1827_v28 = vpop.permute.xlu1 %1826 }
 0x111   : > { %v2372_v59 = vsel %vm2364_vm8, %v2326_v29, %v1827_v28  ;;  %v2189_v54 = vsel %vm2180_vm4, %v2143_v63, %v1148_v25  ;;  %v680_v25 = vld [vmem:[%s9208_s24 + $0x9e] sm:$0xff] }
 0x112   : > { %1341 = vrot.lane.b32.xlu0 %v633_v34, %s12770_s16  ;;  %1981 = vrot.lane.b32.xlu1 %v9672_v24, %s12771_s23 }
 0x114   : > { %v1328_v35 = vpop.permute.xlu0 %1327  ;;  %v1968_v36 = vpop.permute.xlu1 %1967 }
 0x115   : > { %v2418_v9 = vsel %vm2410_vm9, %v2372_v59, %v1968_v36  ;;  %v2235_v6 = vsel %vm2226_vm5, %v2189_v54, %v1328_v35  ;;  %v9773_v36 = vld [vmem:[%s9208_s24 + $0xb1] sm:$0xff] }
 0x116   : > { %803 = vrot.lane.b32.xlu0 %v9552_v60, %s12747_s20  ;;  %1521 = vrot.lane.b32.xlu1 %v678_v32, %s12765_s21  ;;  %v589_v60 = vld [vmem:[%s9208_s24 + $0x94] sm:$0xff] }
 0x117   : > { %7772 = vmatmul.mubr.msk.f32.gmra.mxu0 %vm2468_vm10, %v2418_v9  ;;  %v9763_v32 = vld [vmem:[%s9208_s24 + $0xb0] sm:$0xff] }
 0x118   : > { %v790_v39 = vpop.permute.xlu0 %789  ;;  %v1508_v41 = vpop.permute.xlu1 %1507  ;;  %7774 = vmatprep.mubr.msk.f32.mxu0 %vm9075_vm1, %v9070_v0 }
 0x119   : > { %v2281_v51 = vsel %vm2272_vm6, %v2235_v6, %v1508_v41  ;;  %v2098_v14 = vsel %vm2088_vm2, %v9326_v43, %v790_v39 }
 0x11a   : > { %983 = vrot.lane.b32.xlu0 %v9561_v2, %s12766_s30  ;;  %1701 = vrot.lane.b32.xlu1 %v9689_v38, %s12767_s15  ;;  %v634_v2 = vld [vmem:[%s9208_s24 + $0x95] sm:$0xff] }
 0x11c   : > { %v970_v44 = vpop.permute.xlu0 %969  ;;  %v1688_v46 = vpop.permute.xlu1 %1687 }
 0x11d   : > { %v2327_v37 = vsel %vm2318_vm7, %v2281_v51, %v1688_v46  ;;  %v2144_v26 = vsel %vm2134_vm3, %v2098_v14, %v970_v44  ;;  %v9783_v44 = vld [vmem:[%s9208_s24 + $0xb2] sm:$0xff] }
 0x11e   : > { %1163 = vrot.lane.b32.xlu0 %v589_v60, %s12768_s0  ;;  %1842 = vrot.lane.b32.xlu1 %v9699_v42, %s12769_s22 }
 0x120   : > { %v1150_v10 = vpop.permute.xlu0 %1149  ;;  %v1829_v56 = vpop.permute.xlu1 %1828 }
 0x121   : > { %v2373_v1 = vsel %vm2364_vm8, %v2327_v37, %v1829_v56  ;;  %v2190_v19 = vsel %vm2180_vm4, %v2144_v26, %v1150_v10  ;;  %v681_v10 = vld [vmem:[%s9208_s24 + $0xa6] sm:$0xff] }
 0x122   : > { %1343 = vrot.lane.b32.xlu0 %v634_v2, %s12770_s16  ;;  %1983 = vrot.lane.b32.xlu1 %v9709_v52, %s12771_s23 }
 0x124   : > { %v1330_v16 = vpop.permute.xlu0 %1329  ;;  %v1970_v4 = vpop.permute.xlu1 %1969 }
 0x125   : > { %v2419_v20 = vsel %vm2410_vm9, %v2373_v1, %v1970_v4  ;;  %v2236_v34 = vsel %vm2226_vm5, %v2190_v19, %v1330_v16  ;;  %v9810_v4 = vld [vmem:[%s9208_s24 + $0xb9] sm:$0xff] }
 0x126   : > { %805 = vrot.lane.b32.xlu0 %v9588_v23, %s12747_s20  ;;  %1523 = vrot.lane.b32.xlu1 %v679_v62, %s12765_s21  ;;  %v590_v23 = vld [vmem:[%s9208_s24 + $0x9c] sm:$0xff] }
 0x127   : > { %7775 = vmatmul.mubr.msk.f32.gmra.mxu0 %vm2468_vm10, %v2419_v20  ;;  %v9800_v62 = vld [vmem:[%s9208_s24 + $0xb8] sm:$0xff] }
 0x128   : > { %v792_v53 = vpop.permute.xlu0 %791  ;;  %v1510_v7 = vpop.permute.xlu1 %1509  ;;  %7777 = vmatprep.mubr.msk.f32.mxu0 %vm9075_vm1, %v9070_v0 }
 0x129   : > { %v2282_v57 = vsel %vm2272_vm6, %v2236_v34, %v1510_v7  ;;  %v2099_v41 = vsel %vm2088_vm2, %v9350_v49, %v792_v53 }
 0x12a   : > { %985 = vrot.lane.b32.xlu0 %v9598_v30, %s12766_s30  ;;  %1703 = vrot.lane.b32.xlu1 %v9726_v5, %s12767_s15  ;;  %v635_v30 = vld [vmem:[%s9208_s24 + $0x9d] sm:$0xff] }
 0x12c   : > { %v972_v11 = vpop.permute.xlu0 %971  ;;  %v1690_v13 = vpop.permute.xlu1 %1689 }
 0x12d   : > { %v2328_v43 = vsel %vm2318_vm7, %v2282_v57, %v1690_v13  ;;  %v2145_v60 = vsel %vm2134_vm3, %v2099_v41, %v972_v11  ;;  %v9820_v11 = vld [vmem:[%s9208_s24 + $0xba] sm:$0xff] }
 0x12e   : > { %1165 = vrot.lane.b32.xlu0 %v590_v23, %s12768_s0  ;;  %1844 = vrot.lane.b32.xlu1 %v9736_v8, %s12769_s22 }
 0x130   : > { %v1152_v21 = vpop.permute.xlu0 %1151  ;;  %v1831_v33 = vpop.permute.xlu1 %1830 }
 0x131   : > { %v2374_v28 = vsel %vm2364_vm8, %v2328_v43, %v1831_v33  ;;  %v2191_v46 = vsel %vm2180_vm4, %v2145_v60, %v1152_v21  ;;  %v682_v21 = vld [vmem:[%s9208_s24 + $0xae] sm:$0xff] }
 0x132   : > { %1345 = vrot.lane.b32.xlu0 %v635_v30, %s12770_s16  ;;  %1985 = vrot.lane.b32.xlu1 %v9746_v17, %s12771_s23 }
 0x134   : > { %v1332_v40 = vpop.permute.xlu0 %1331  ;;  %v1972_v31 = vpop.permute.xlu1 %1971 }
 0x135   : > { %v2420_v29 = vsel %vm2410_vm9, %v2374_v28, %v1972_v31  ;;  %v2237_v2 = vsel %vm2226_vm5, %v2191_v46, %v1332_v40  ;;  %v9847_v31 = vld [vmem:[%s9208_s24 + $0xc1] sm:$0xff] }
 0x136   : > { %807 = vrot.lane.b32.xlu0 %v9625_v48, %s12747_s20  ;;  %1525 = vrot.lane.b32.xlu1 %v680_v25, %s12765_s21  ;;  %v591_v48 = vld [vmem:[%s9208_s24 + $0xa4] sm:$0xff] }
 0x137   : > { %7778 = vmatmul.mubr.msk.f32.gmra.mxu0 %vm2468_vm10, %v2420_v29  ;;  %v9837_v25 = vld [vmem:[%s9208_s24 + $0xc0] sm:$0xff] }
 0x138   : > { %v794_v59 = vpop.permute.xlu0 %793  ;;  %v1512_v35 = vpop.permute.xlu1 %1511  ;;  %7780 = vmatprep.mubr.msk.f32.mxu0 %vm9075_vm1, %v9070_v0 }
 0x139   : > { %v2283_v54 = vsel %vm2272_vm6, %v2237_v2, %v1512_v35  ;;  %v2100_v7 = vsel %vm2088_vm2, %v9373_v55, %v794_v59 }
 0x13a   : > { %987 = vrot.lane.b32.xlu0 %v9635_v61, %s12766_s30  ;;  %1705 = vrot.lane.b32.xlu1 %v9763_v32, %s12767_s15  ;;  %v636_v61 = vld [vmem:[%s9208_s24 + $0xa5] sm:$0xff] }
 0x13c   : > { %v974_v9 = vpop.permute.xlu0 %973  ;;  %v1692_v39 = vpop.permute.xlu1 %1691 }
 0x13d   : > { %v2329_v49 = vsel %vm2318_vm7, %v2283_v54, %v1692_v39  ;;  %v2146_v23 = vsel %vm2134_vm3, %v2100_v7, %v974_v9  ;;  %v9857_v9 = vld [vmem:[%s9208_s24 + $0xc2] sm:$0xff] }
 0x13e   : > { %1167 = vrot.lane.b32.xlu0 %v591_v48, %s12768_s0  ;;  %1846 = vrot.lane.b32.xlu1 %v9773_v36, %s12769_s22 }
 0x140   : > { %v1154_v47 = vpop.permute.xlu0 %1153  ;;  %v1833_v63 = vpop.permute.xlu1 %1832 }
 0x141   : > { %v2375_v56 = vsel %vm2364_vm8, %v2329_v49, %v1833_v63  ;;  %v2192_v13 = vsel %vm2180_vm4, %v2146_v23, %v1154_v47  ;;  %v683_v47 = vld [vmem:[%s9208_s24 + $0xb6] sm:$0xff] }
 0x142   : > { %1347 = vrot.lane.b32.xlu0 %v636_v61, %s12770_s16  ;;  %1987 = vrot.lane.b32.xlu1 %v9783_v44, %s12771_s23 }
 0x144   : > { %v1334_v6 = vpop.permute.xlu0 %1333  ;;  %v1974_v51 = vpop.permute.xlu1 %1973 }
 0x145   : > { %v2421_v37 = vsel %vm2410_vm9, %v2375_v56, %v1974_v51  ;;  %v2238_v30 = vsel %vm2226_vm5, %v2192_v13, %v1334_v6  ;;  %v9879_v6 = vld [vmem:[%s9208_s24 + $0xc8] sm:$0xff] }
 0x146   : > { %809 = vrot.lane.b32.xlu0 %v9662_v15, %s12747_s20  ;;  %1527 = vrot.lane.b32.xlu1 %v681_v10, %s12765_s21  ;;  %v592_v15 = vld [vmem:[%s9208_s24 + $0xac] sm:$0xff]  ;;  %v9872_v10 = vld [vmem:[%s12721_s2] ss:$0 sm:$0xff] }
 0x147   : > { %7781 = vmatmul.mubr.msk.f32.gmra.mxu0 %vm2468_vm10, %v2421_v37 }
 0x148   : > { %v796_v1 = vpop.permute.xlu0 %795  ;;  %v1514_v16 = vpop.permute.xlu1 %1513  ;;  %7783 = vmatprep.mubr.msk.f32.mxu0 %vm9075_vm1, %v9070_v0 }
 0x149   : > { %v2284_v19 = vsel %vm2272_vm6, %v2238_v30, %v1514_v16  ;;  %v2101_v35 = vsel %vm2088_vm2, %v9397_v3, %v796_v1 }
 0x14a   : > { %989 = vrot.lane.b32.xlu0 %v9672_v24, %s12766_s30  ;;  %1707 = vrot.lane.b32.xlu1 %v9800_v62, %s12767_s15  ;;  %v637_v24 = vld [vmem:[%s9208_s24 + $0xad] sm:$0xff] }
 0x14c   : > { %v976_v20 = vpop.permute.xlu0 %975  ;;  %v1694_v53 = vpop.permute.xlu1 %1693 }
 0x14d   : > { %v2330_v55 = vsel %vm2318_vm7, %v2284_v19, %v1694_v53  ;;  %v2147_v48 = vsel %vm2134_vm3, %v2101_v35, %v976_v20  ;;  %v9930_v35 = vld [vmem:[%s9208_s24 + $0xd1] sm:$0xff] }
 0x14e   : > { %1169 = vrot.lane.b32.xlu0 %v592_v15, %s12768_s0  ;;  %1848 = vrot.lane.b32.xlu1 %v9810_v4, %s12769_s22  ;;  %v9891_v15 = vld [vmem:[%s9208_s24 + $0xc9] sm:$0xff] }
 0x150   : > { %v1156_v14 = vpop.permute.xlu0 %1155  ;;  %v1835_v26 = vpop.permute.xlu1 %1834 }
 0x151   : > { %v2376_v33 = vsel %vm2364_vm8, %v2330_v55, %v1835_v26  ;;  %v2193_v39 = vsel %vm2180_vm4, %v2147_v48, %v1156_v14  ;;  %v684_v55 = vld [vmem:[%s9208_s24 + $0xbe] sm:$0xff] }
 0x152   : > { %1349 = vrot.lane.b32.xlu0 %v637_v24, %s12770_s16  ;;  %1989 = vrot.lane.b32.xlu1 %v9820_v11, %s12771_s23  ;;  %v9901_v24 = vld [vmem:[%s9208_s24 + $0xca] sm:$0xff] }
 0x154   : > { %v1336_v34 = vpop.permute.xlu0 %1335  ;;  %v1976_v57 = vpop.permute.xlu1 %1975 }
 0x155   : > { %v2422_v43 = vsel %vm2410_vm9, %v2376_v33, %v1976_v57  ;;  %v2239_v61 = vsel %vm2226_vm5, %v2193_v39, %v1336_v34 }
 0x156   : > { %811 = vrot.lane.b32.xlu0 %v9699_v42, %s12747_s20  ;;  %1529 = vrot.lane.b32.xlu1 %v682_v21, %s12765_s21  ;;  %v593_v42 = vld [vmem:[%s9208_s24 + $0xb4] sm:$0xff]  ;;  %s9081_s20 = smov 96  }
 0x157   : > { %7784 = vmatmul.mubr.msk.f32.gmra.mxu0 %vm2468_vm10, %v2422_v43 }
 0x158   : > { %v798_v28 = vpop.permute.xlu0 %797  ;;  %v1516_v40 = vpop.permute.xlu1 %1515  ;;  %7786 = vmatprep.mubr.msk.f32.mxu0 %vm9075_vm1, %v9070_v0 }
 0x159   : > { %v2285_v46 = vsel %vm2272_vm6, %v2239_v61, %v1516_v40  ;;  %v2102_v7 = vsel %vm2088_vm2, %v9430_v27, %v798_v28  ;;  %v9918_v28 = vld [vmem:[%s9208_s24 + $0xd0] sm:$0xff] }
 0x15a   : > { %991 = vrot.lane.b32.xlu0 %v9709_v52, %s12766_s30  ;;  %1709 = vrot.lane.b32.xlu1 %v9837_v25, %s12767_s15  ;;  %v638_v52 = vld [vmem:[%s9208_s24 + $0xb5] sm:$0xff] }
 0x15c   : > { %v978_v29 = vpop.permute.xlu0 %977  ;;  %v1696_v59 = vpop.permute.xlu1 %1695 }
 0x15d   : > { %v2331_v3 = vsel %vm2318_vm7, %v2285_v46, %v1696_v59  ;;  %v2148_v23 = vsel %vm2134_vm3, %v2102_v7, %v978_v29  ;;  %v9969_v7 = vld [vmem:[%s9208_s24 + $0xd9] sm:$0xff] }
 0x15e   : > { %1171 = vrot.lane.b32.xlu0 %v593_v42, %s12768_s0  ;;  %1850 = vrot.lane.b32.xlu1 %v9847_v31, %s12769_s22 }
 0x160   : > { %v1158_v41 = vpop.permute.xlu0 %1157  ;;  %v1837_v60 = vpop.permute.xlu1 %1836 }
 0x161   : > { %v2377_v63 = vsel %vm2364_vm8, %v2331_v3, %v1837_v60  ;;  %v2194_v13 = vsel %vm2180_vm4, %v2148_v23, %v1158_v41  ;;  %v9940_v60 = vld [vmem:[%s9208_s24 + $0xd2] sm:$0xff] }
 0x162   : > { %1351 = vrot.lane.b32.xlu0 %v638_v52, %s12770_s16  ;;  %1991 = vrot.lane.b32.xlu1 %v9857_v9, %s12771_s23 }
 0x164   : > { %v1338_v2 = vpop.permute.xlu0 %1337  ;;  %v1978_v54 = vpop.permute.xlu1 %1977 }
 0x165   : > { %v2423_v49 = vsel %vm2410_vm9, %v2377_v63, %v1978_v54  ;;  %v2240_v30 = vsel %vm2226_vm5, %v2194_v13, %v1338_v2  ;;  %v685_v2 = vld [vmem:[%s9208_s24 + $0xc6] sm:$0xff] }
 0x166   : > { %813 = vrot.lane.b32.xlu0 %v9736_v8, %s12772_s17  ;;  %1531 = vrot.lane.b32.xlu1 %v683_v47, %s12765_s21  ;;  %v594_v8 = vld [vmem:[%s9208_s24 + $0xbc] sm:$0xff] }
 0x167   : > { %v2674_v56 = vpop.f32.mrf.mxu0  ;;  %7787 = vmatmul.mubr.msk.f32.gmra.mxu0 %vm2468_vm10, %v2423_v49 }
 0x168   : > { %v2675_v51 = vadd.f32 %v9872_v10, %v2674_v56  ;;  %v800_v37 = vpop.permute.xlu0 %799  ;;  %v1518_v1 = vpop.permute.xlu1 %1517  ;;  %7789 = vmatprep.mubr.msk.f32.mxu0 %vm9075_vm1, %v9070_v0 }
 0x169   : > { %v7752_v16 = vpop.f32.mrf.mxu0  ;;  %v2286_v19 = vsel %vm2272_vm6, %v2240_v30, %v1518_v1  ;;  %v2103_v39 = vsel %vm2088_vm2, %v9467_v58, %v800_v37  ;;  %v9957_v1 = vld [vmem:[%s9208_s24 + $0xd8] sm:$0xff] }
 0x16a   : > { %2898 = vst.msk [vmem:[#allocation2] sm:$0xff] %vm2410_vm9, %v2675_v51  ;;  %993 = vrot.lane.b32.xlu0 %v9746_v17, %s12766_s30  ;;  %1711 = vrot.lane.b32.xlu1 %v9879_v6, %s12767_s15  ;;  %v639_v17 = vld [vmem:[%s9208_s24 + $0xbd] sm:$0xff] }
 0x16c   : > { %v980_v20 = vpop.permute.xlu0 %979  ;;  %v1698_v53 = vpop.permute.xlu1 %1697 }
 0x16d   : > { %v2332_v27 = vsel %vm2318_vm7, %v2286_v19, %v1698_v53  ;;  %v2149_v41 = vsel %vm2134_vm3, %v2103_v39, %v980_v20  ;;  %v10008_v39 = vld [vmem:[%s9208_s24 + $0xe1] sm:$0xff] }
 0x16e   : > { %1173 = vrot.lane.b32.xlu0 %v594_v8, %s12768_s0  ;;  %1852 = vrot.lane.b32.xlu1 %v9891_v15, %s12769_s22 }
 0x170   : > { %v1160_v14 = vpop.permute.xlu0 %1159  ;;  %v1839_v26 = vpop.permute.xlu1 %1838 }
 0x171   : > { %v2378_v21 = vsel %vm2364_vm8, %v2332_v27, %v1839_v26  ;;  %v2195_v61 = vsel %vm2180_vm4, %v2149_v41, %v1160_v14  ;;  %v9979_v26 = vld [vmem:[%s9208_s24 + $0xda] sm:$0xff] }
 0x172   : > { %1353 = vrot.lane.b32.xlu0 %v639_v17, %s12770_s16  ;;  %1993 = vrot.lane.b32.xlu1 %v9901_v24, %s12771_s23 }
 0x174   : > { %v1340_v33 = vpop.permute.xlu0 %1339  ;;  %v1980_v34 = vpop.permute.xlu1 %1979 }
 0x175   : > { %v2424_v57 = vsel %vm2410_vm9, %v2378_v21, %v1980_v34  ;;  %v2241_v47 = vsel %vm2226_vm5, %v2195_v61, %v1340_v33  ;;  %v686_v33 = vld [vmem:[%s9208_s24 + $0xce] sm:$0xff] }
 0x176   : > { %815 = vrot.lane.b32.xlu0 %v9773_v36, %s12772_s17  ;;  %1533 = vrot.lane.b32.xlu1 %v684_v55, %s12765_s21  ;;  %v595_v36 = vld [vmem:[%s9208_s24 + $0xc4] sm:$0xff] }
 0x177   : > { %v2679_v43 = vpop.f32.mrf.mxu0  ;;  %7790 = vmatmul.mubr.msk.f32.gmra.mxu0 %vm2468_vm10, %v2424_v57 }
 0x178   : > { %v2680_v40 = vadd.f32 %v9872_v10, %v2679_v43  ;;  %v802_v42 = vpop.permute.xlu0 %801  ;;  %v1520_v29 = vpop.permute.xlu1 %1519  ;;  %7792 = vmatprep.mubr.msk.f32.mxu0 %vm9075_vm1, %v9070_v0 }
 0x179   : > { %v7755_v59 = vpop.f32.mrf.mxu0  ;;  %v2287_v63 = vsel %vm2272_vm6, %v2241_v47, %v1520_v29  ;;  %v2104_v13 = vsel %vm2088_vm2, %v9504_v22, %v802_v42  ;;  %v9996_v29 = vld [vmem:[%s9208_s24 + $0xe0] sm:$0xff] }
 0x17a   : > { %2899 = vst.msk [vmem:[#allocation2 + $0x8] sm:$0xff] %vm2410_vm9, %v2680_v40  ;;  %995 = vrot.lane.b32.xlu0 %v9783_v44, %s12766_s30  ;;  %1713 = vrot.lane.b32.xlu1 %v9918_v28, %s12767_s15  ;;  %v640_v44 = vld [vmem:[%s9208_s24 + $0xc5] sm:$0xff] }
 0x17c   : > { %v982_v48 = vpop.permute.xlu0 %981  ;;  %v1700_v52 = vpop.permute.xlu1 %1699 }
 0x17d   : > { %v2333_v58 = vsel %vm2318_vm7, %v2287_v63, %v1700_v52  ;;  %v2150_v14 = vsel %vm2134_vm3, %v2104_v13, %v982_v48  ;;  %v10047_v13 = vld [vmem:[%s9208_s24 + $0xe9] sm:$0xff] }
 0x17e   : > { %1175 = vrot.lane.b32.xlu0 %v595_v36, %s12768_s0  ;;  %1854 = vrot.lane.b32.xlu1 %v9930_v35, %s12769_s22 }
 0x180   : > { %v1162_v46 = vpop.permute.xlu0 %1161  ;;  %v1841_v3 = vpop.permute.xlu1 %1840 }
 0x181   : > { %v2379_v54 = vsel %vm2364_vm8, %v2333_v58, %v1841_v3  ;;  %v2196_v30 = vsel %vm2180_vm4, %v2150_v14, %v1162_v46  ;;  %v10018_v3 = vld [vmem:[%s9208_s24 + $0xe2] sm:$0xff] }
 0x182   : > { %1355 = vrot.lane.b32.xlu0 %v640_v44, %s12770_s16  ;;  %1995 = vrot.lane.b32.xlu1 %v9940_v60, %s12771_s23 }
 0x184   : > { %v1342_v49 = vpop.permute.xlu0 %1341  ;;  %v1982_v56 = vpop.permute.xlu1 %1981 }
 0x185   : > { %v2425_v51 = vsel %vm2410_vm9, %v2379_v54, %v1982_v56  ;;  %v2242_v55 = vsel %vm2226_vm5, %v2196_v30, %v1342_v49  ;;  %v687_v49 = vld [vmem:[%s9208_s24 + $0xd6] sm:$0xff] }
 0x186   : > { %817 = vrot.lane.b32.xlu0 %v9810_v4, %s12772_s17  ;;  %1535 = vrot.lane.b32.xlu1 %v685_v2, %s12765_s21  ;;  %v596_v4 = vld [vmem:[%s9208_s24 + $0xcc] sm:$0xff] }
 0x187   : > { %v2684_v37 = vpop.f32.mrf.mxu0  ;;  %7793 = vmatmul.mubr.msk.f32.gmra.mxu0 %vm2468_vm10, %v2425_v51 }
 0x188   : > { %v2685_v16 = vadd.f32 %v9872_v10, %v2684_v37  ;;  %v804_v8 = vpop.permute.xlu0 %803  ;;  %v1522_v20 = vpop.permute.xlu1 %1521  ;;  %7795 = vmatprep.mubr.msk.f32.mxu0 %vm9075_vm1, %v9070_v0 }
 0x189   : > { %v7758_v53 = vpop.f32.mrf.mxu0  ;;  %v2288_v21 = vsel %vm2272_vm6, %v2242_v55, %v1522_v20  ;;  %v2105_v61 = vsel %vm2088_vm2, %v9541_v50, %v804_v8  ;;  %v10035_v20 = vld [vmem:[%s9208_s24 + $0xe8] sm:$0xff] }
 0x18a   : > { %2900 = vst.msk [vmem:[#allocation2 + $0x10] sm:$0xff] %vm2410_vm9, %v2685_v16  ;;  %997 = vrot.lane.b32.xlu0 %v9820_v11, %s12766_s30  ;;  %1715 = vrot.lane.b32.xlu1 %v9957_v1, %s12767_s15  ;;  %v641_v11 = vld [vmem:[%s9208_s24 + $0xcd] sm:$0xff] }
 0x18c   : > { %v984_v23 = vpop.permute.xlu0 %983  ;;  %v1702_v17 = vpop.permute.xlu1 %1701 }
 0x18d   : > { %v2334_v22 = vsel %vm2318_vm7, %v2288_v21, %v1702_v17  ;;  %v2151_v46 = vsel %vm2134_vm3, %v2105_v61, %v984_v23  ;;  %v10086_v61 = vld [vmem:[%s9208_s24 + $0xf1] sm:$0xff] }
 0x18e   : > { %1177 = vrot.lane.b32.xlu0 %v596_v4, %s12768_s0  ;;  %1856 = vrot.lane.b32.xlu1 %v9969_v7, %s12769_s22 }
 0x190   : > { %v1164_v19 = vpop.permute.xlu0 %1163  ;;  %v1843_v27 = vpop.permute.xlu1 %1842 }
 0x191   : > { %v2380_v34 = vsel %vm2364_vm8, %v2334_v22, %v1843_v27  ;;  %v2197_v47 = vsel %vm2180_vm4, %v2151_v46, %v1164_v19  ;;  %v10057_v27 = vld [vmem:[%s9208_s24 + $0xea] sm:$0xff] }
 0x192   : > { %1357 = vrot.lane.b32.xlu0 %v641_v11, %s12770_s16  ;;  %1997 = vrot.lane.b32.xlu1 %v9979_v26, %s12771_s23 }
 0x194   : > { %v1344_v57 = vpop.permute.xlu0 %1343  ;;  %v1984_v43 = vpop.permute.xlu1 %1983 }
 0x195   : > { %v2426_v40 = vsel %vm2410_vm9, %v2380_v34, %v1984_v43  ;;  %v2243_v2 = vsel %vm2226_vm5, %v2197_v47, %v1344_v57  ;;  %v688_v57 = vld [vmem:[%s9208_s24 + $0xde] sm:$0xff] }
 0x196   : > { %819 = vrot.lane.b32.xlu0 %v9847_v31, %s12772_s17  ;;  %1537 = vrot.lane.b32.xlu1 %v686_v33, %s12765_s21  ;;  %v597_v31 = vld [vmem:[%s9208_s24 + $0xd4] sm:$0xff] }
 0x197   : > { %v2689_v42 = vpop.f32.mrf.mxu0  ;;  %7796 = vmatmul.mubr.msk.f32.gmra.mxu0 %vm2468_vm10, %v2426_v40 }
 0x198   : > { %v2690_v59 = vadd.f32 %v9872_v10, %v2689_v42  ;;  %v806_v36 = vpop.permute.xlu0 %805  ;;  %v1524_v48 = vpop.permute.xlu1 %1523  ;;  %7798 = vmatprep.mubr.msk.f32.mxu0 %vm9075_vm1, %v9070_v0 }
 0x199   : > { %v7761_v52 = vpop.f32.mrf.mxu0  ;;  %v2289_v54 = vsel %vm2272_vm6, %v2243_v2, %v1524_v48  ;;  %v2106_v30 = vsel %vm2088_vm2, %v9578_v18, %v806_v36  ;;  %v10074_v48 = vld [vmem:[%s9208_s24 + $0xf0] sm:$0xff] }
 0x19a   : > { %2901 = vst.msk [vmem:[#allocation2 + $0x18] sm:$0xff] %vm2410_vm9, %v2690_v59  ;;  %999 = vrot.lane.b32.xlu0 %v9857_v9, %s12766_s30  ;;  %1717 = vrot.lane.b32.xlu1 %v9996_v29, %s12767_s15  ;;  %v642_v9 = vld [vmem:[%s9208_s24 + $0xd5] sm:$0xff] }
 0x19c   : > { %v986_v41 = vpop.permute.xlu0 %985  ;;  %v1704_v44 = vpop.permute.xlu1 %1703 }
 0x19d   : > { %v2335_v50 = vsel %vm2318_vm7, %v2289_v54, %v1704_v44  ;;  %v2152_v19 = vsel %vm2134_vm3, %v2106_v30, %v986_v41  ;;  %v10125_v30 = vld [vmem:[%s9208_s24 + $0xf9] sm:$0xff] }
 0x19e   : > { %1179 = vrot.lane.b32.xlu0 %v597_v31, %s12768_s0  ;;  %1858 = vrot.lane.b32.xlu1 %v10008_v39, %s12769_s22 }
 0x1a0   : > { %v1166_v63 = vpop.permute.xlu0 %1165  ;;  %v1845_v58 = vpop.permute.xlu1 %1844 }
 0x1a1   : > { %v2381_v56 = vsel %vm2364_vm8, %v2335_v50, %v1845_v58  ;;  %v2198_v55 = vsel %vm2180_vm4, %v2152_v19, %v1166_v63  ;;  %v10096_v58 = vld [vmem:[%s9208_s24 + $0xf2] sm:$0xff] }
 0x1a2   : > { %1359 = vrot.lane.b32.xlu0 %v642_v9, %s12770_s16  ;;  %1999 = vrot.lane.b32.xlu1 %v10018_v3, %s12771_s23 }
 0x1a4   : > { %v1346_v51 = vpop.permute.xlu0 %1345  ;;  %v1986_v37 = vpop.permute.xlu1 %1985 }
 0x1a5   : > { %v2427_v16 = vsel %vm2410_vm9, %v2381_v56, %v1986_v37  ;;  %v2244_v33 = vsel %vm2226_vm5, %v2198_v55, %v1346_v51  ;;  %v689_v51 = vld [vmem:[%s9208_s24 + $0xe6] sm:$0xff] }
 0x1a6   : > { %821 = vrot.lane.b32.xlu0 %v9891_v15, %s12772_s17  ;;  %1539 = vrot.lane.b32.xlu1 %v687_v49, %s12765_s21  ;;  %v598_v15 = vld [vmem:[%s9208_s24 + $0xdc] sm:$0xff] }
 0x1a7   : > { %v2694_v8 = vpop.f32.mrf.mxu0  ;;  %7799 = vmatmul.mubr.msk.f32.gmra.mxu0 %vm2468_vm10, %v2427_v16 }
 0x1a8   : > { %v2695_v53 = vadd.f32 %v9872_v10, %v2694_v8  ;;  %v808_v4 = vpop.permute.xlu0 %807  ;;  %v1526_v23 = vpop.permute.xlu1 %1525  ;;  %7801 = vmatprep.mubr.msk.f32.mxu0 %vm9075_vm1, %v9070_v0 }
 0x1a9   : > { %v7764_v17 = vpop.f32.mrf.mxu0  ;;  %v2290_v34 = vsel %vm2272_vm6, %v2244_v33, %v1526_v23  ;;  %v2107_v47 = vsel %vm2088_vm2, %v9615_v45, %v808_v4  ;;  %v10113_v23 = vld [vmem:[%s9208_s24 + $0xf8] sm:$0xff] }
 0x1aa   : > { %2902 = vst.msk [vmem:[#allocation2 + $0x20] sm:$0xff] %vm2410_vm9, %v2695_v53  ;;  %1001 = vrot.lane.b32.xlu0 %v9901_v24, %s12766_s30  ;;  %1719 = vrot.lane.b32.xlu1 %v10035_v20, %s12767_s15  ;;  %v643_v24 = vld [vmem:[%s9208_s24 + $0xdd] sm:$0xff] }
 0x1ac   : > { %v988_v14 = vpop.permute.xlu0 %987  ;;  %v1706_v11 = vpop.permute.xlu1 %1705 }
 0x1ad   : > { %v2336_v18 = vsel %vm2318_vm7, %v2290_v34, %v1706_v11  ;;  %v2153_v63 = vsel %vm2134_vm3, %v2107_v47, %v988_v14  ;;  %v10164_v47 = vld [vmem:[%s9208_s24 + $0x101] sm:$0xff] }
 0x1ae   : > { %1181 = vrot.lane.b32.xlu0 %v598_v15, %s12768_s0  ;;  %1860 = vrot.lane.b32.xlu1 %v10047_v13, %s12769_s22 }
 0x1b0   : > { %v1168_v21 = vpop.permute.xlu0 %1167  ;;  %v1847_v22 = vpop.permute.xlu1 %1846 }
 0x1b1   : > { %v2382_v43 = vsel %vm2364_vm8, %v2336_v18, %v1847_v22  ;;  %v2199_v2 = vsel %vm2180_vm4, %v2153_v63, %v1168_v21  ;;  %v10135_v22 = vld [vmem:[%s9208_s24 + $0xfa] sm:$0xff] }
 0x1b2   : > { %1361 = vrot.lane.b32.xlu0 %v643_v24, %s12770_s16  ;;  %2001 = vrot.lane.b32.xlu1 %v10057_v27, %s12771_s23 }
 0x1b4   : > { %v1348_v40 = vpop.permute.xlu0 %1347  ;;  %v1988_v42 = vpop.permute.xlu1 %1987 }
 0x1b5   : > { %v2428_v59 = vsel %vm2410_vm9, %v2382_v43, %v1988_v42  ;;  %v2245_v49 = vsel %vm2226_vm5, %v2199_v2, %v1348_v40  ;;  %v690_v40 = vld [vmem:[%s9208_s24 + $0xee] sm:$0xff] }
 0x1b6   : > { %823 = vrot.lane.b32.xlu0 %v9930_v35, %s12772_s17  ;;  %1541 = vrot.lane.b32.xlu1 %v688_v57, %s12765_s21  ;;  %v599_v35 = vld [vmem:[%s9208_s24 + $0xe4] sm:$0xff] }
 0x1b7   : > { %v2699_v36 = vpop.f32.mrf.mxu0  ;;  %7802 = vmatmul.mubr.msk.f32.gmra.mxu0 %vm2468_vm10, %v2428_v59 }
 0x1b8   : > { %v2700_v52 = vadd.f32 %v9872_v10, %v2699_v36  ;;  %v810_v31 = vpop.permute.xlu0 %809  ;;  %v1528_v41 = vpop.permute.xlu1 %1527  ;;  %7804 = vmatprep.mubr.msk.f32.mxu0 %vm9075_vm1, %v9070_v0 }
 0x1b9   : > { %v7767_v44 = vpop.f32.mrf.mxu0  ;;  %v2291_v56 = vsel %vm2272_vm6, %v2245_v49, %v1528_v41  ;;  %v2108_v55 = vsel %vm2088_vm2, %v9652_v12, %v810_v31  ;;  %v10152_v41 = vld [vmem:[%s9208_s24 + $0x100] sm:$0xff] }
 0x1ba   : > { %2903 = vst.msk [vmem:[#allocation2 + $0x28] sm:$0xff] %vm2410_vm9, %v2700_v52  ;;  %1003 = vrot.lane.b32.xlu0 %v9940_v60, %s12766_s30  ;;  %1721 = vrot.lane.b32.xlu1 %v10074_v48, %s12767_s15  ;;  %v644_v60 = vld [vmem:[%s9208_s24 + $0xe5] sm:$0xff] }
 0x1bc   : > { %v990_v46 = vpop.permute.xlu0 %989  ;;  %v1708_v9 = vpop.permute.xlu1 %1707 }
 0x1bd   : > { %v2337_v45 = vsel %vm2318_vm7, %v2291_v56, %v1708_v9  ;;  %v2154_v21 = vsel %vm2134_vm3, %v2108_v55, %v990_v46  ;;  %v10203_v55 = vld [vmem:[%s9208_s24 + $0x109] sm:$0xff] }
 0x1be   : > { %1183 = vrot.lane.b32.xlu0 %v599_v35, %s12768_s0  ;;  %1862 = vrot.lane.b32.xlu1 %v10086_v61, %s12769_s22 }
 0x1c0   : > { %v1170_v54 = vpop.permute.xlu0 %1169  ;;  %v1849_v50 = vpop.permute.xlu1 %1848 }
 0x1c1   : > { %v2383_v37 = vsel %vm2364_vm8, %v2337_v45, %v1849_v50  ;;  %v2200_v33 = vsel %vm2180_vm4, %v2154_v21, %v1170_v54  ;;  %v10174_v50 = vld [vmem:[%s9208_s24 + $0x102] sm:$0xff] }
 0x1c2   : > { %1363 = vrot.lane.b32.xlu0 %v644_v60, %s12770_s16  ;;  %2003 = vrot.lane.b32.xlu1 %v10096_v58, %s12771_s23 }
 0x1c4   : > { %v1350_v16 = vpop.permute.xlu0 %1349  ;;  %v1990_v8 = vpop.permute.xlu1 %1989 }
 0x1c5   : > { %v2429_v53 = vsel %vm2410_vm9, %v2383_v37, %v1990_v8  ;;  %v2246_v57 = vsel %vm2226_vm5, %v2200_v33, %v1350_v16  ;;  %v691_v16 = vld [vmem:[%s9208_s24 + $0xf6] sm:$0xff] }
 0x1c6   : > { %825 = vrot.lane.b32.xlu0 %v9969_v7, %s12772_s17  ;;  %1543 = vrot.lane.b32.xlu1 %v689_v51, %s12765_s21  ;;  %v600_v7 = vld [vmem:[%s9208_s24 + $0xec] sm:$0xff] }
 0x1c7   : > { %v2704_v4 = vpop.f32.mrf.mxu0  ;;  %7805 = vmatmul.mubr.msk.f32.gmra.mxu0 %vm2468_vm10, %v2429_v53 }
 0x1c8   : > { %v2705_v17 = vadd.f32 %v9872_v10, %v2704_v4  ;;  %v812_v15 = vpop.permute.xlu0 %811  ;;  %v1530_v14 = vpop.permute.xlu1 %1529  ;;  %7807 = vmatprep.mubr.msk.f32.mxu0 %vm9075_vm1, %v9070_v0 }
 0x1c9   : > { %v7770_v11 = vpop.f32.mrf.mxu0  ;;  %v2292_v43 = vsel %vm2272_vm6, %v2246_v57, %v1530_v14  ;;  %v2109_v2 = vsel %vm2088_vm2, %v9689_v38, %v812_v15  ;;  %v10191_v14 = vld [vmem:[%s9208_s24 + $0x108] sm:$0xff] }
 0x1ca   : > { %2904 = vst.msk [vmem:[#allocation2 + $0x30] sm:$0xff] %vm2410_vm9, %v2705_v17  ;;  %1005 = vrot.lane.b32.xlu0 %v9979_v26, %s12766_s30  ;;  %1723 = vrot.lane.b32.xlu1 %v10113_v23, %s12767_s15  ;;  %v645_v26 = vld [vmem:[%s9208_s24 + $0xed] sm:$0xff] }
 0x1cc   : > { %v992_v19 = vpop.permute.xlu0 %991  ;;  %v1710_v24 = vpop.permute.xlu1 %1709 }
 0x1cd   : > { %v2338_v12 = vsel %vm2318_vm7, %v2292_v43, %v1710_v24  ;;  %v2155_v54 = vsel %vm2134_vm3, %v2109_v2, %v992_v19  ;;  %v10242_v2 = vld [vmem:[%s9208_s24 + $0x111] sm:$0xff] }
 0x1ce   : > { %1185 = vrot.lane.b32.xlu0 %v600_v7, %s12768_s0  ;;  %1864 = vrot.lane.b32.xlu1 %v10125_v30, %s12769_s22 }
 0x1d0   : > { %v1172_v34 = vpop.permute.xlu0 %1171  ;;  %v1851_v18 = vpop.permute.xlu1 %1850 }
 0x1d1   : > { %v2384_v42 = vsel %vm2364_vm8, %v2338_v12, %v1851_v18  ;;  %v2201_v49 = vsel %vm2180_vm4, %v2155_v54, %v1172_v34  ;;  %v10213_v18 = vld [vmem:[%s9208_s24 + $0x10a] sm:$0xff] }
 0x1d2   : > { %1365 = vrot.lane.b32.xlu0 %v645_v26, %s12770_s16  ;;  %2005 = vrot.lane.b32.xlu1 %v10135_v22, %s12771_s23 }
 0x1d4   : > { %v1352_v59 = vpop.permute.xlu0 %1351  ;;  %v1992_v36 = vpop.permute.xlu1 %1991 }
 0x1d5   : > { %v2430_v52 = vsel %vm2410_vm9, %v2384_v42, %v1992_v36  ;;  %v2247_v51 = vsel %vm2226_vm5, %v2201_v49, %v1352_v59  ;;  %v692_v59 = vld [vmem:[%s9208_s24 + $0xfe] sm:$0xff] }
 0x1d6   : > { %827 = vrot.lane.b32.xlu0 %v10008_v39, %s12772_s17  ;;  %1545 = vrot.lane.b32.xlu1 %v690_v40, %s12765_s21  ;;  %v601_v39 = vld [vmem:[%s9208_s24 + $0xf4] sm:$0xff] }
 0x1d7   : > { %v2709_v31 = vpop.f32.mrf.mxu0  ;;  %7808 = vmatmul.mubr.msk.f32.gmra.mxu0 %vm2468_vm10, %v2430_v52 }
 0x1d8   : > { %v2710_v44 = vadd.f32 %v9872_v10, %v2709_v31  ;;  %v814_v35 = vpop.permute.xlu0 %813  ;;  %v1532_v46 = vpop.permute.xlu1 %1531  ;;  %7810 = vmatprep.mubr.msk.f32.mxu0 %vm9075_vm1, %v9070_v0 }
 0x1d9   : > { %v7773_v9 = vpop.f32.mrf.mxu0  ;;  %v2293_v37 = vsel %vm2272_vm6, %v2247_v51, %v1532_v46  ;;  %v2110_v33 = vsel %vm2088_vm2, %v9726_v5, %v814_v35  ;;  %v10230_v46 = vld [vmem:[%s9208_s24 + $0x110] sm:$0xff] }
 0x1da   : > { %2905 = vst.msk [vmem:[#allocation2 + $0x38] sm:$0xff] %vm2410_vm9, %v2710_v44  ;;  %1007 = vrot.lane.b32.xlu0 %v10018_v3, %s12766_s30  ;;  %1725 = vrot.lane.b32.xlu1 %v10152_v41, %s12767_s15  ;;  %v646_v3 = vld [vmem:[%s9208_s24 + $0xf5] sm:$0xff] }
 0x1dc   : > { %v994_v63 = vpop.permute.xlu0 %993  ;;  %v1712_v60 = vpop.permute.xlu1 %1711 }
 0x1dd   : > { %v2339_v38 = vsel %vm2318_vm7, %v2293_v37, %v1712_v60  ;;  %v2156_v34 = vsel %vm2134_vm3, %v2110_v33, %v994_v63  ;;  %v10281_v33 = vld [vmem:[%s9208_s24 + $0x119] sm:$0xff] }
 0x1de   : > { %1187 = vrot.lane.b32.xlu0 %v601_v39, %s12768_s0  ;;  %1866 = vrot.lane.b32.xlu1 %v10164_v47, %s12769_s22 }
 0x1e0   : > { %v1174_v56 = vpop.permute.xlu0 %1173  ;;  %v1853_v45 = vpop.permute.xlu1 %1852 }
 0x1e1   : > { %v2385_v8 = vsel %vm2364_vm8, %v2339_v38, %v1853_v45  ;;  %v2202_v57 = vsel %vm2180_vm4, %v2156_v34, %v1174_v56  ;;  %v10252_v45 = vld [vmem:[%s9208_s24 + $0x112] sm:$0xff] }
 0x1e2   : > { %1367 = vrot.lane.b32.xlu0 %v646_v3, %s12770_s16  ;;  %2007 = vrot.lane.b32.xlu1 %v10174_v50, %s12771_s23 }
 0x1e4   : > { %v1354_v53 = vpop.permute.xlu0 %1353  ;;  %v1994_v4 = vpop.permute.xlu1 %1993 }
 0x1e5   : > { %v2431_v17 = vsel %vm2410_vm9, %v2385_v8, %v1994_v4  ;;  %v2248_v40 = vsel %vm2226_vm5, %v2202_v57, %v1354_v53  ;;  %v693_v53 = vld [vmem:[%s9208_s24 + $0x106] sm:$0xff] }
 0x1e6   : > { %829 = vrot.lane.b32.xlu0 %v10047_v13, %s12772_s17  ;;  %1547 = vrot.lane.b32.xlu1 %v691_v16, %s12765_s21  ;;  %v602_v13 = vld [vmem:[%s9208_s24 + $0xfc] sm:$0xff] }
 0x1e7   : > { %v2714_v15 = vpop.f32.mrf.mxu0  ;;  %7811 = vmatmul.mubr.msk.f32.gmra.mxu0 %vm2468_vm10, %v2431_v17 }
 0x1e8   : > { %v2715_v11 = vadd.f32 %v9872_v10, %v2714_v15  ;;  %v816_v7 = vpop.permute.xlu0 %815  ;;  %v1534_v19 = vpop.permute.xlu1 %1533  ;;  %7813 = vmatprep.mubr.msk.f32.mxu0 %vm9075_vm1, %v9070_v0 }
 0x1e9   : > { %v7776_v24 = vpop.f32.mrf.mxu0  ;;  %v2294_v42 = vsel %vm2272_vm6, %v2248_v40, %v1534_v19  ;;  %v2111_v49 = vsel %vm2088_vm2, %v9763_v32, %v816_v7  ;;  %v10269_v19 = vld [vmem:[%s9208_s24 + $0x118] sm:$0xff] }
 0x1ea   : > { %2906 = vst.msk [vmem:[#allocation2 + $0x40] sm:$0xff] %vm2410_vm9, %v2715_v11  ;;  %1009 = vrot.lane.b32.xlu0 %v10057_v27, %s12766_s30  ;;  %1727 = vrot.lane.b32.xlu1 %v10191_v14, %s12767_s15  ;;  %v647_v27 = vld [vmem:[%s9208_s24 + $0xfd] sm:$0xff] }
 0x1ec   : > { %v996_v21 = vpop.permute.xlu0 %995  ;;  %v1714_v26 = vpop.permute.xlu1 %1713 }
 0x1ed   : > { %v2340_v5 = vsel %vm2318_vm7, %v2294_v42, %v1714_v26  ;;  %v2157_v56 = vsel %vm2134_vm3, %v2111_v49, %v996_v21  ;;  %v10320_v49 = vld [vmem:[%s9208_s24 + $0x121] sm:$0xff] }
 0x1ee   : > { %1189 = vrot.lane.b32.xlu0 %v602_v13, %s12768_s0  ;;  %1868 = vrot.lane.b32.xlu1 %v10203_v55, %s12769_s22 }
 0x1f0   : > { %v1176_v43 = vpop.permute.xlu0 %1175  ;;  %v1855_v12 = vpop.permute.xlu1 %1854 }
 0x1f1   : > { %v2386_v36 = vsel %vm2364_vm8, %v2340_v5, %v1855_v12  ;;  %v2203_v51 = vsel %vm2180_vm4, %v2157_v56, %v1176_v43  ;;  %v10291_v12 = vld [vmem:[%s9208_s24 + $0x11a] sm:$0xff] }
 0x1f2   : > { %1369 = vrot.lane.b32.xlu0 %v647_v27, %s12770_s16  ;;  %2009 = vrot.lane.b32.xlu1 %v10213_v18, %s12771_s23 }
 0x1f4   : > { %v1356_v52 = vpop.permute.xlu0 %1355  ;;  %v1996_v31 = vpop.permute.xlu1 %1995 }
 0x1f5   : > { %v2432_v44 = vsel %vm2410_vm9, %v2386_v36, %v1996_v31  ;;  %v2249_v16 = vsel %vm2226_vm5, %v2203_v51, %v1356_v52  ;;  %v694_v52 = vld [vmem:[%s9208_s24 + $0x10e] sm:$0xff] }
 0x1f6   : > { %831 = vrot.lane.b32.xlu0 %v10086_v61, %s12772_s17  ;;  %1549 = vrot.lane.b32.xlu1 %v692_v59, %s12765_s21  ;;  %v603_v61 = vld [vmem:[%s9208_s24 + $0x104] sm:$0xff] }
 0x1f7   : > { %v2719_v35 = vpop.f32.mrf.mxu0  ;;  %7814 = vmatmul.mubr.msk.f32.gmra.mxu0 %vm2468_vm10, %v2432_v44 }
 0x1f8   : > { %v2720_v9 = vadd.f32 %v9872_v10, %v2719_v35  ;;  %v818_v39 = vpop.permute.xlu0 %817  ;;  %v1536_v63 = vpop.permute.xlu1 %1535  ;;  %7816 = vmatprep.mubr.msk.f32.mxu0 %vm9075_vm1, %v9070_v0 }
 0x1f9   : > { %v7779_v60 = vpop.f32.mrf.mxu0  ;;  %v2295_v8 = vsel %vm2272_vm6, %v2249_v16, %v1536_v63  ;;  %v2112_v57 = vsel %vm2088_vm2, %v9800_v62, %v818_v39  ;;  %v10308_v63 = vld [vmem:[%s9208_s24 + $0x120] sm:$0xff] }
 0x1fa   : > { %2907 = vst.msk [vmem:[#allocation2 + $0x48] sm:$0xff] %vm2410_vm9, %v2720_v9  ;;  %1011 = vrot.lane.b32.xlu0 %v10096_v58, %s12766_s30  ;;  %1729 = vrot.lane.b32.xlu1 %v10230_v46, %s12767_s15  ;;  %v648_v58 = vld [vmem:[%s9208_s24 + $0x105] sm:$0xff] }
 0x1fc   : > { %v998_v54 = vpop.permute.xlu0 %997  ;;  %v1716_v3 = vpop.permute.xlu1 %1715 }
 0x1fd   : > { %v2341_v32 = vsel %vm2318_vm7, %v2295_v8, %v1716_v3  ;;  %v2158_v43 = vsel %vm2134_vm3, %v2112_v57, %v998_v54  ;;  %v10356_v57 = vld [vmem:[%s9208_s24 + $0x129] sm:$0xff] }
 0x1fe   : > { %1191 = vrot.lane.b32.xlu0 %v603_v61, %s12768_s0  ;;  %1870 = vrot.lane.b32.xlu1 %v10242_v2, %s12769_s22 }
 0x200   : > { %v1178_v37 = vpop.permute.xlu0 %1177  ;;  %v1857_v38 = vpop.permute.xlu1 %1856 }
 0x201   : > { %v2387_v4 = vsel %vm2364_vm8, %v2341_v32, %v1857_v38  ;;  %v2204_v40 = vsel %vm2180_vm4, %v2158_v43, %v1178_v37  ;;  %v10330_v38 = vld [vmem:[%s9208_s24 + $0x122] sm:$0xff] }
 0x202   : > { %1371 = vrot.lane.b32.xlu0 %v648_v58, %s12770_s16  ;;  %2011 = vrot.lane.b32.xlu1 %v10252_v45, %s12771_s23 }
 0x204   : > { %v1358_v17 = vpop.permute.xlu0 %1357  ;;  %v1998_v15 = vpop.permute.xlu1 %1997 }
 0x205   : > { %v2433_v11 = vsel %vm2410_vm9, %v2387_v4, %v1998_v15  ;;  %v2250_v59 = vsel %vm2226_vm5, %v2204_v40, %v1358_v17  ;;  %v695_v17 = vld [vmem:[%s9208_s24 + $0x116] sm:$0xff] }
 0x206   : > { %833 = vrot.lane.b32.xlu0 %v10125_v30, %s12772_s17  ;;  %1551 = vrot.lane.b32.xlu1 %v693_v53, %s12765_s21  ;;  %v604_v30 = vld [vmem:[%s9208_s24 + $0x10c] sm:$0xff] }
 0x207   : > { %v2724_v7 = vpop.f32.mrf.mxu0  ;;  %7817 = vmatmul.mubr.msk.f32.gmra.mxu0 %vm2468_vm10, %v2433_v11 }
 0x208   : > { %v2725_v24 = vadd.f32 %v9872_v10, %v2724_v7  ;;  %v820_v13 = vpop.permute.xlu0 %819  ;;  %v1538_v21 = vpop.permute.xlu1 %1537  ;;  %7819 = vmatprep.mubr.msk.f32.mxu0 %vm9075_vm1, %v9070_v0 }
 0x209   : > { %v7782_v26 = vpop.f32.mrf.mxu0  ;;  %v2296_v36 = vsel %vm2272_vm6, %v2250_v59, %v1538_v21  ;;  %v2113_v51 = vsel %vm2088_vm2, %v9837_v25, %v820_v13  ;;  %v475_v21 = vld [vmem:[%s9208_s24 + $0x128] sm:$0xff] }
 0x20a   : > { %2908 = vst.msk [vmem:[#allocation2 + $0x50] sm:$0xff] %vm2410_vm9, %v2725_v24  ;;  %1013 = vrot.lane.b32.xlu0 %v10135_v22, %s12766_s30  ;;  %1731 = vrot.lane.b32.xlu1 %v10269_v19, %s12767_s15  ;;  %v649_v22 = vld [vmem:[%s9208_s24 + $0x10d] sm:$0xff] }
 0x20c   : > { %v1000_v34 = vpop.permute.xlu0 %999  ;;  %v1718_v27 = vpop.permute.xlu1 %1717 }
 0x20d   : > { %v2342_v62 = vsel %vm2318_vm7, %v2296_v36, %v1718_v27  ;;  %v2159_v37 = vsel %vm2134_vm3, %v2113_v51, %v1000_v34  ;;  %v10392_v51 = vld [vmem:[%s9208_s24 + $0x131] sm:$0xff] }
 0x20e   : > { %1193 = vrot.lane.b32.xlu0 %v604_v30, %s12768_s0  ;;  %1872 = vrot.lane.b32.xlu1 %v10281_v33, %s12769_s22 }
 0x210   : > { %v1180_v42 = vpop.permute.xlu0 %1179  ;;  %v1859_v5 = vpop.permute.xlu1 %1858 }
 0x211   : > { %v2388_v31 = vsel %vm2364_vm8, %v2342_v62, %v1859_v5  ;;  %v2205_v16 = vsel %vm2180_vm4, %v2159_v37, %v1180_v42  ;;  %v651_v5 = vld [vmem:[%s9208_s24 + $0x11d] sm:$0xff] }
 0x212   : > { %1373 = vrot.lane.b32.xlu0 %v649_v22, %s12770_s16  ;;  %2013 = vrot.lane.b32.xlu1 %v10291_v12, %s12771_s23 }
 0x214   : > { %v1360_v44 = vpop.permute.xlu0 %1359  ;;  %v2000_v35 = vpop.permute.xlu1 %1999 }
 0x215   : > { %v2434_v9 = vsel %vm2410_vm9, %v2388_v31, %v2000_v35  ;;  %v2251_v53 = vsel %vm2226_vm5, %v2205_v16, %v1360_v44  ;;  %v696_v44 = vld [vmem:[%s9208_s24 + $0x11e] sm:$0xff] }
 0x216   : > { %835 = vrot.lane.b32.xlu0 %v10164_v47, %s12772_s17  ;;  %1553 = vrot.lane.b32.xlu1 %v694_v52, %s12765_s21  ;;  %v605_v47 = vld [vmem:[%s9208_s24 + $0x114] sm:$0xff] }
 0x217   : > { %v2729_v39 = vpop.f32.mrf.mxu0  ;;  %7820 = vmatmul.mubr.msk.f32.gmra.mxu0 %vm2468_vm10, %v2434_v9 }
 0x218   : > { %v2730_v60 = vadd.f32 %v9872_v10, %v2729_v39  ;;  %v822_v61 = vpop.permute.xlu0 %821  ;;  %v1540_v54 = vpop.permute.xlu1 %1539  ;;  %7822 = vmatprep.mubr.msk.f32.mxu0 %vm9075_vm1, %v9070_v0 }
 0x219   : > { %v7785_v3 = vpop.f32.mrf.mxu0  ;;  %v2297_v4 = vsel %vm2272_vm6, %v2251_v53, %v1540_v54  ;;  %v2114_v40 = vsel %vm2088_vm2, %v9879_v6, %v822_v61  ;;  %v476_v54 = vld [vmem:[%s9208_s24 + $0x130] sm:$0xff] }
 0x21a   : > { %2909 = vst.msk [vmem:[#allocation2 + $0x58] sm:$0xff] %vm2410_vm9, %v2730_v60  ;;  %1015 = vrot.lane.b32.xlu0 %v10174_v50, %s12766_s30  ;;  %1733 = vrot.lane.b32.xlu1 %v10308_v63, %s12767_s15  ;;  %v650_v50 = vld [vmem:[%s9208_s24 + $0x115] sm:$0xff] }
 0x21c   : > { %v1002_v56 = vpop.permute.xlu0 %1001  ;;  %v1720_v58 = vpop.permute.xlu1 %1719 }
 0x21d   : > { %v2343_v25 = vsel %vm2318_vm7, %v2297_v4, %v1720_v58  ;;  %v2160_v42 = vsel %vm2134_vm3, %v2114_v40, %v1002_v56 }
 0x21e   : > { %1195 = vrot.lane.b32.xlu0 %v605_v47, %s12768_s0  ;;  %1874 = vrot.lane.b32.xlu1 %v10320_v49, %s12769_s22 }
 0x220   : > { %v1182_v8 = vpop.permute.xlu0 %1181  ;;  %v1861_v32 = vpop.permute.xlu1 %1860 }
 0x221   : > { %v2389_v15 = vsel %vm2364_vm8, %v2343_v25, %v1861_v32  ;;  %v2206_v59 = vsel %vm2180_vm4, %v2160_v42, %v1182_v8  ;;  %v652_v32 = vld [vmem:[%s9208_s24 + $0x125] sm:$0xff] }
 0x222   : > { %1375 = vrot.lane.b32.xlu0 %v650_v50, %s12770_s16  ;;  %2015 = vrot.lane.b32.xlu1 %v10330_v38, %s12771_s23 }
 0x224   : > { %v1362_v11 = vpop.permute.xlu0 %1361  ;;  %v2002_v7 = vpop.permute.xlu1 %2001 }
 0x225   : > { %v2435_v24 = vsel %vm2410_vm9, %v2389_v15, %v2002_v7  ;;  %v2252_v52 = vsel %vm2226_vm5, %v2206_v59, %v1362_v11  ;;  %v697_v11 = vld [vmem:[%s9208_s24 + $0x126] sm:$0xff] }
 0x226   : > { %837 = vrot.lane.b32.xlu0 %v10203_v55, %s12772_s17  ;;  %1555 = vrot.lane.b32.xlu1 %v695_v17, %s12765_s21  ;;  %v606_v55 = vld [vmem:[%s9208_s24 + $0x11c] sm:$0xff]  ;;  %v653_v59 = vld [vmem:[%s9208_s24 + $0x12d] sm:$0xff] }
 0x227   : > { %v2734_v13 = vpop.f32.mrf.mxu0  ;;  %7823 = vmatmul.mubr.msk.f32.gmra.mxu0 %vm2468_vm10, %v2435_v24 }
 0x228   : > { %v2735_v26 = vadd.f32 %v9872_v10, %v2734_v13  ;;  %v824_v30 = vpop.permute.xlu0 %823  ;;  %v1542_v34 = vpop.permute.xlu1 %1541  ;;  %7825 = vmatprep.mubr.msk.f32.mxu0 %vm9075_vm1, %v9070_v0 }
 0x229   : > { %v7788_v27 = vpop.f32.mrf.mxu0  ;;  %v2298_v31 = vsel %vm2272_vm6, %v2252_v52, %v1542_v34  ;;  %v2115_v16 = vsel %vm2088_vm2, %v9918_v28, %v824_v30  ;;  %v477_v30 = vld [vmem:[%s9208_s24 + $0x138] sm:$0xff] }
 0x22a   : > { %2910 = vst.msk [vmem:[#allocation2 + $0x60] sm:$0xff] %vm2410_vm9, %v2735_v26  ;;  %1017 = vrot.lane.b32.xlu0 %v10213_v18, %s12766_s30  ;;  %1735 = vrot.lane.b32.xlu1 %v475_v21, %s12767_s15  ;;  %v10366_v18 = vld [vmem:[%s9208_s24 + $0x12a] sm:$0xff] }
 0x22c   : > { %v1004_v43 = vpop.permute.xlu0 %1003  ;;  %v1722_v22 = vpop.permute.xlu1 %1721 }
 0x22d   : > { %v2344_v6 = vsel %vm2318_vm7, %v2298_v31, %v1722_v22  ;;  %v2161_v8 = vsel %vm2134_vm3, %v2115_v16, %v1004_v43  ;;  %v10428_v22 = vld [vmem:[%s9208_s24 + $0x139] sm:$0xff] }
 0x22e   : > { %1197 = vrot.lane.b32.xlu0 %v606_v55, %s12768_s0  ;;  %1876 = vrot.lane.b32.xlu1 %v10356_v57, %s12769_s22 }
 0x230   : > { %v1184_v36 = vpop.permute.xlu0 %1183  ;;  %v1863_v62 = vpop.permute.xlu1 %1862 }
 0x231   : > { %v2390_v35 = vsel %vm2364_vm8, %v2344_v6, %v1863_v62  ;;  %v2207_v53 = vsel %vm2180_vm4, %v2161_v8, %v1184_v36 }
 0x232   : > { %1377 = vrot.lane.b32.xlu0 %v651_v5, %s12770_s16  ;;  %2017 = vrot.lane.b32.xlu1 %v10366_v18, %s12771_s23 }
 0x234   : > { %v1364_v9 = vpop.permute.xlu0 %1363  ;;  %v2004_v39 = vpop.permute.xlu1 %2003 }
 0x235   : > { %v2436_v60 = vsel %vm2410_vm9, %v2390_v35, %v2004_v39  ;;  %v2253_v17 = vsel %vm2226_vm5, %v2207_v53, %v1364_v9  ;;  %v654_v53 = vld [vmem:[%s9208_s24 + $0x135] sm:$0xff] }
 0x236   : > { %839 = vrot.lane.b32.xlu0 %v10242_v2, %s12772_s17  ;;  %1557 = vrot.lane.b32.xlu1 %v696_v44, %s12765_s21  ;;  %v607_v2 = vld [vmem:[%s9208_s24 + $0x124] sm:$0xff]  ;;  %v698_v44 = vld [vmem:[%s9208_s24 + $0x12e] sm:$0xff] }
 0x237   : > { %v2739_v61 = vpop.f32.mrf.mxu0  ;;  %7826 = vmatmul.mubr.msk.f32.gmra.mxu0 %vm2468_vm10, %v2436_v60 }
 0x238   : > { %v2740_v3 = vadd.f32 %v9872_v10, %v2739_v61  ;;  %v826_v47 = vpop.permute.xlu0 %825  ;;  %v1544_v56 = vpop.permute.xlu1 %1543  ;;  %7828 = vmatprep.mubr.msk.f32.mxu0 %vm9075_vm1, %v9070_v0 }
 0x239   : > { %v7791_v58 = vpop.f32.mrf.mxu0  ;;  %v2299_v15 = vsel %vm2272_vm6, %v2253_v17, %v1544_v56  ;;  %v2116_v42 = vsel %vm2088_vm2, %v9957_v1, %v826_v47 }
 0x23a   : > { %2911 = vst.msk [vmem:[#allocation2 + $0x68] sm:$0xff] %vm2410_vm9, %v2740_v3  ;;  %1019 = vrot.lane.b32.xlu0 %v10252_v45, %s12766_s30  ;;  %1737 = vrot.lane.b32.xlu1 %v476_v54, %s12767_s15  ;;  %v10402_v45 = vld [vmem:[%s9208_s24 + $0x132] sm:$0xff]  ;;  %v478_v54 = vld [vmem:[%s9208_s24 + $0x140] sm:$0xff] }
 0x23b   : > { %v10458_v3 = vld [vmem:[%s12721_s2] ss:$0 sm:$0xff] }
 0x23c   : > { %v1006_v37 = vpop.permute.xlu0 %1005  ;;  %v1724_v50 = vpop.permute.xlu1 %1723 }
 0x23d   : > { %v2345_v28 = vsel %vm2318_vm7, %v2299_v15, %v1724_v50  ;;  %v2162_v5 = vsel %vm2134_vm3, %v2116_v42, %v1006_v37  ;;  %v10469_v37 = vld [vmem:[%s9208_s24 + $0x141] sm:$0xff] }
 0x23e   : > { %1199 = vrot.lane.b32.xlu0 %v607_v2, %s12768_s0  ;;  %1878 = vrot.lane.b32.xlu1 %v10392_v51, %s12769_s22  ;;  %v609_v2 = vld [vmem:[%s9208_s24 + $0x134] sm:$0xff] }
 0x240   : > { %v1186_v4 = vpop.permute.xlu0 %1185  ;;  %v1865_v25 = vpop.permute.xlu1 %1864 }
 0x241   : > { %v2391_v7 = vsel %vm2364_vm8, %v2345_v28, %v1865_v25  ;;  %v2208_v36 = vsel %vm2180_vm4, %v2162_v5, %v1186_v4 }
 0x242   : > { %1379 = vrot.lane.b32.xlu0 %v652_v32, %s12770_s16  ;;  %2019 = vrot.lane.b32.xlu1 %v10402_v45, %s12771_s23 }
 0x244   : > { %v1366_v24 = vpop.permute.xlu0 %1365  ;;  %v2006_v13 = vpop.permute.xlu1 %2005 }
 0x245   : > { %v2437_v21 = vsel %vm2410_vm9, %v2391_v7, %v2006_v13  ;;  %v2254_v31 = vsel %vm2226_vm5, %v2208_v36, %v1366_v24 }
 0x246   : > { %841 = vrot.lane.b32.xlu0 %v10281_v33, %s12772_s17  ;;  %1559 = vrot.lane.b32.xlu1 %v697_v11, %s12765_s21  ;;  %v608_v33 = vld [vmem:[%s9208_s24 + $0x12c] sm:$0xff]  ;;  %v699_v11 = vld [vmem:[%s9208_s24 + $0x136] sm:$0xff] }
 0x247   : > { %v2744_v26 = vpop.f32.mrf.mxu0  ;;  %7829 = vmatmul.mubr.msk.f32.gmra.mxu0 %vm2468_vm10, %v2437_v21 }
 0x248   : > { %v2745_v34 = vadd.f32 %v9872_v10, %v2744_v26  ;;  %v828_v27 = vpop.permute.xlu0 %827  ;;  %v1546_v55 = vpop.permute.xlu1 %1545  ;;  %7831 = vmatprep.mubr.msk.f32.mxu0 %vm9075_vm1, %v9070_v0 }
 0x249   : > { %v7794_v43 = vpop.f32.mrf.mxu0  ;;  %v2300_v6 = vsel %vm2272_vm6, %v2254_v31, %v1546_v55  ;;  %v2117_v8 = vsel %vm2088_vm2, %v9996_v29, %v828_v27 }
 0x24a   : > { %2912 = vst.msk [vmem:[#allocation2 + $0x70] sm:$0xff] %vm2410_vm9, %v2745_v34  ;;  %1021 = vrot.lane.b32.xlu0 %v10291_v12, %s12766_s30  ;;  %1739 = vrot.lane.b32.xlu1 %v477_v30, %s12767_s15  ;;  %v10438_v12 = vld [vmem:[%s9208_s24 + $0x13a] sm:$0xff]  ;;  %v479_v30 = vld [vmem:[%s9208_s24 + $0x148] sm:$0xff] }
 0x24c   : > { %v1008_v40 = vpop.permute.xlu0 %1007  ;;  %v1726_v10 = vpop.permute.xlu1 %1725 }
 0x24d   : > { %v2346_v1 = vsel %vm2318_vm7, %v2300_v6, %v1726_v10  ;;  %v2163_v32 = vsel %vm2134_vm3, %v2117_v8, %v1008_v40 }
 0x24e   : > { %1201 = vrot.lane.b32.xlu0 %v608_v33, %s12768_s0  ;;  %1880 = vrot.lane.b32.xlu1 %v10428_v22, %s12769_s22  ;;  %v10505_v33 = vld [vmem:[%s9208_s24 + $0x149] sm:$0xff] }
 0x250   : > { %v1188_v62 = vpop.permute.xlu0 %1187  ;;  %v1867_v52 = vpop.permute.xlu1 %1866 }
 0x251   : > { %v2392_v35 = vsel %vm2364_vm8, %v2346_v1, %v1867_v52  ;;  %v2209_v4 = vsel %vm2180_vm4, %v2163_v32, %v1188_v62  ;;  %v700_v1 = vld [vmem:[%s9208_s24 + $0x13e] sm:$0xff] }
 0x252   : > { %1381 = vrot.lane.b32.xlu0 %v653_v59, %s12770_s16  ;;  %2021 = vrot.lane.b32.xlu1 %v10438_v12, %s12771_s23  ;;  %v655_v59 = vld [vmem:[%s9208_s24 + $0x13d] sm:$0xff]  ;;  %v656_v32 = vld [vmem:[%s9208_s24 + $0x145] sm:$0xff] }
 0x254   : > { %v1368_v9 = vpop.permute.xlu0 %1367  ;;  %v2008_v39 = vpop.permute.xlu1 %2007 }
 0x255   : > { %v2438_v60 = vsel %vm2410_vm9, %v2392_v35, %v2008_v39  ;;  %v2255_v15 = vsel %vm2226_vm5, %v2209_v4, %v1368_v9 }
 0x256   : > { %843 = vrot.lane.b32.xlu0 %v10320_v49, %s12772_s17  ;;  %1561 = vrot.lane.b32.xlu1 %v698_v44, %s12765_s21 }
 0x257   : > { %v2749_v61 = vpop.f32.mrf.mxu0  ;;  %7832 = vmatmul.mubr.msk.f32.gmra.mxu0 %vm2468_vm10, %v2438_v60 }
 0x258   : > { %v2750_v47 = vadd.f32 %v10458_v3, %v2749_v61  ;;  %v830_v56 = vpop.permute.xlu0 %829  ;;  %v1548_v58 = vpop.permute.xlu1 %1547  ;;  %7834 = vmatprep.mubr.msk.f32.mxu0 %vm9075_vm1, %v9070_v0  ;;  %v480_v61 = vld [vmem:[%s9208_s24 + $0x150] sm:$0xff] }
 0x259   : > { %v7797_v49 = vpop.f32.mrf.mxu0  ;;  %v2301_v28 = vsel %vm2272_vm6, %v2255_v15, %v1548_v58  ;;  %v2118_v42 = vsel %vm2088_vm2, %v10035_v20, %v830_v56 }
 0x25a   : > { %2913 = vst.msk [vmem:[#allocation2 + $0x78] sm:$0xff] %vm2410_vm9, %v2750_v47  ;;  %1023 = vrot.lane.b32.xlu0 %v10330_v38, %s12766_s30  ;;  %1741 = vrot.lane.b32.xlu1 %v478_v54, %s12767_s15  ;;  %v10479_v38 = vld [vmem:[%s9208_s24 + $0x142] sm:$0xff]  ;;  %v10541_v49 = vld [vmem:[%s9208_s24 + $0x151] sm:$0xff] }
 0x25c   : > { %v1010_v50 = vpop.permute.xlu0 %1009  ;;  %v1728_v16 = vpop.permute.xlu1 %1727 }
 0x25d   : > { %v2347_v29 = vsel %vm2318_vm7, %v2301_v28, %v1728_v16  ;;  %v2164_v5 = vsel %vm2134_vm3, %v2118_v42, %v1010_v50  ;;  %v701_v28 = vld [vmem:[%s9208_s24 + $0x146] sm:$0xff] }
 0x25e   : > { %1203 = vrot.lane.b32.xlu0 %v609_v2, %s12768_s0  ;;  %1882 = vrot.lane.b32.xlu1 %v10469_v37, %s12769_s22  ;;  %v657_v42 = vld [vmem:[%s9208_s24 + $0x14d] sm:$0xff] }
 0x260   : > { %v1190_v25 = vpop.permute.xlu0 %1189  ;;  %v1869_v17 = vpop.permute.xlu1 %1868 }
 0x261   : > { %v2393_v7 = vsel %vm2364_vm8, %v2347_v29, %v1869_v17  ;;  %v2210_v36 = vsel %vm2180_vm4, %v2164_v5, %v1190_v25 }
 0x262   : > { %1383 = vrot.lane.b32.xlu0 %v654_v53, %s12770_s16  ;;  %2023 = vrot.lane.b32.xlu1 %v10479_v38, %s12771_s23 }
 0x264   : > { %v1370_v24 = vpop.permute.xlu0 %1369  ;;  %v2010_v13 = vpop.permute.xlu1 %2009 }
 0x265   : > { %v2439_v21 = vsel %vm2410_vm9, %v2393_v7, %v2010_v13  ;;  %v2256_v31 = vsel %vm2226_vm5, %v2210_v36, %v1370_v24 }
 0x266   : > { %845 = vrot.lane.b32.xlu0 %v10356_v57, %s12772_s17  ;;  %1563 = vrot.lane.b32.xlu1 %v699_v11, %s12765_s21  ;;  %v610_v57 = vld [vmem:[%s9208_s24 + $0x13c] sm:$0xff] }
 0x267   : > { %v2754_v26 = vpop.f32.mrf.mxu0  ;;  %7835 = vmatmul.mubr.msk.f32.gmra.mxu0 %vm2468_vm10, %v2439_v21  ;;  %v481_v21 = vld [vmem:[%s9208_s24 + $0x158] sm:$0xff] }
 0x268   : > { %v2755_v34 = vadd.f32 %v10458_v3, %v2754_v26  ;;  %v832_v27 = vpop.permute.xlu0 %831  ;;  %v1550_v55 = vpop.permute.xlu1 %1549  ;;  %7837 = vmatprep.mubr.msk.f32.mxu0 %vm9075_vm1, %v9070_v0 }
 0x269   : > { %v7800_v43 = vpop.f32.mrf.mxu0  ;;  %v2302_v6 = vsel %vm2272_vm6, %v2256_v31, %v1550_v55  ;;  %v2119_v16 = vsel %vm2088_vm2, %v10074_v48, %v832_v27  ;;  %v10577_v55 = vld [vmem:[%s9208_s24 + $0x159] sm:$0xff]  ;;  %v702_v31 = vld [vmem:[%s9208_s24 + $0x14e] sm:$0xff] }
 0x26a   : > { %2914 = vst.msk [vmem:[#allocation2 + $0x80] sm:$0xff] %vm2410_vm9, %v2755_v34  ;;  %1025 = vrot.lane.b32.xlu0 %v10366_v18, %s12766_s30  ;;  %1743 = vrot.lane.b32.xlu1 %v479_v30, %s12767_s15  ;;  %v10515_v18 = vld [vmem:[%s9208_s24 + $0x14a] sm:$0xff] }
 0x26c   : > { %v1012_v40 = vpop.permute.xlu0 %1011  ;;  %v1730_v10 = vpop.permute.xlu1 %1729 }
 0x26d   : > { %v2348_v20 = vsel %vm2318_vm7, %v2302_v6, %v1730_v10  ;;  %v2165_v8 = vsel %vm2134_vm3, %v2119_v16, %v1012_v40  ;;  %v720_v16 = vld [vmem:[%s9208_s24 + $0x162] sm:$0xff] }
 0x26e   : > { %1205 = vrot.lane.b32.xlu0 %v610_v57, %s12768_s0  ;;  %1884 = vrot.lane.b32.xlu1 %v10505_v33, %s12769_s22 }
 0x270   : > { %v1192_v62 = vpop.permute.xlu0 %1191  ;;  %v1871_v52 = vpop.permute.xlu1 %1870 }
 0x271   : > { %v2394_v44 = vsel %vm2364_vm8, %v2348_v20, %v1871_v52  ;;  %v2211_v53 = vsel %vm2180_vm4, %v2165_v8, %v1192_v62 }
 0x272   : > { %1385 = vrot.lane.b32.xlu0 %v655_v59, %s12770_s16  ;;  %2025 = vrot.lane.b32.xlu1 %v10515_v18, %s12771_s23 }
 0x274   : > { %v1372_v35 = vpop.permute.xlu0 %1371  ;;  %v2012_v9 = vpop.permute.xlu1 %2011 }
 0x275   : > { %v2440_v39 = vsel %vm2410_vm9, %v2394_v44, %v2012_v9  ;;  %v2257_v17 = vsel %vm2226_vm5, %v2211_v53, %v1372_v35  ;;  %v708_v9 = vld [vmem:[%s9208_s24 + $0x160] sm:$0xff] }
 0x276   : > { %847 = vrot.lane.b32.xlu0 %v10392_v51, %s12772_s17  ;;  %1565 = vrot.lane.b32.xlu1 %v700_v1, %s12765_s21  ;;  %v611_v51 = vld [vmem:[%s9208_s24 + $0x144] sm:$0xff] }
 0x277   : > { %v2759_v60 = vpop.f32.mrf.mxu0  ;;  %7838 = vmatmul.mubr.msk.f32.gmra.mxu0 %vm2468_vm10, %v2440_v39 }
 0x278   : > { %v2760_v54 = vadd.f32 %v10458_v3, %v2759_v60  ;;  %v834_v47 = vpop.permute.xlu0 %833  ;;  %v1552_v56 = vpop.permute.xlu1 %1551  ;;  %7840 = vmatprep.mubr.msk.f32.mxu0 %vm9075_vm1, %v9070_v0 }
 0x279   : > { %v7803_v58 = vpop.f32.mrf.mxu0  ;;  %v2303_v15 = vsel %vm2272_vm6, %v2257_v17, %v1552_v56  ;;  %v2120_v40 = vsel %vm2088_vm2, %v10113_v23, %v834_v47  ;;  %v714_v47 = vld [vmem:[%s9208_s24 + $0x161] sm:$0xff] }
 0x27a   : > { %2915 = vst.msk [vmem:[#allocation2 + $0x88] sm:$0xff] %vm2410_vm9, %v2760_v54  ;;  %1027 = vrot.lane.b32.xlu0 %v10402_v45, %s12766_s30  ;;  %1745 = vrot.lane.b32.xlu1 %v480_v61, %s12767_s15  ;;  %v10551_v45 = vld [vmem:[%s9208_s24 + $0x152] sm:$0xff] }
 0x27c   : > { %v1014_v2 = vpop.permute.xlu0 %1013  ;;  %v1732_v50 = vpop.permute.xlu1 %1731 }
 0x27d   : > { %v2349_v48 = vsel %vm2318_vm7, %v2303_v15, %v1732_v50  ;;  %v2166_v10 = vsel %vm2134_vm3, %v2120_v40, %v1014_v2  ;;  %v658_v50 = vld [vmem:[%s9208_s24 + $0x155] sm:$0xff]  ;;  %v659_v40 = vld [vmem:[%s9208_s24 + $0x15d] sm:$0xff] }
 0x27e   : > { %1207 = vrot.lane.b32.xlu0 %v611_v51, %s12768_s0  ;;  %1886 = vrot.lane.b32.xlu1 %v10541_v49, %s12769_s22 }
 0x280   : > { %v1194_v4 = vpop.permute.xlu0 %1193  ;;  %v1873_v25 = vpop.permute.xlu1 %1872 }
 0x281   : > { %v2395_v29 = vsel %vm2364_vm8, %v2349_v48, %v1873_v25  ;;  %v2212_v5 = vsel %vm2180_vm4, %v2166_v10, %v1194_v4  ;;  %v703_v25 = vld [vmem:[%s9208_s24 + $0x156] sm:$0xff]  ;;  %v721_v10 = vld [vmem:[%s9208_s24 + $0x16a] sm:$0xff] }
 0x282   : > { %1387 = vrot.lane.b32.xlu0 %v656_v32, %s12770_s16  ;;  %2027 = vrot.lane.b32.xlu1 %v10551_v45, %s12771_s23 }
 0x284   : > { %v1374_v11 = vpop.permute.xlu0 %1373  ;;  %v2014_v7 = vpop.permute.xlu1 %2013 }
 0x285   : > { %v2441_v24 = vsel %vm2410_vm9, %v2395_v29, %v2014_v7  ;;  %v2258_v62 = vsel %vm2226_vm5, %v2212_v5, %v1374_v11  ;;  %v709_v11 = vld [vmem:[%s9208_s24 + $0x168] sm:$0xff] }
 0x286   : > { %849 = vrot.lane.b32.xlu0 %v10428_v22, %s12772_s17  ;;  %1567 = vrot.lane.b32.xlu1 %v701_v28, %s12765_s21  ;;  %v612_v22 = vld [vmem:[%s9208_s24 + $0x14c] sm:$0xff] }
 0x287   : > { %v2764_v13 = vpop.f32.mrf.mxu0  ;;  %7841 = vmatmul.mubr.msk.f32.gmra.mxu0 %vm2468_vm10, %v2441_v24 }
 0x288   : > { %v2765_v26 = vadd.f32 %v10458_v3, %v2764_v13  ;;  %v836_v30 = vpop.permute.xlu0 %835  ;;  %v1554_v34 = vpop.permute.xlu1 %1553  ;;  %7843 = vmatprep.mubr.msk.f32.mxu0 %vm9075_vm1, %v9070_v0 }
 0x289   : > { %v7806_v27 = vpop.f32.mrf.mxu0  ;;  %v2304_v52 = vsel %vm2272_vm6, %v2258_v62, %v1554_v34  ;;  %v2121_v51 = vsel %vm2088_vm2, %v10152_v41, %v836_v30  ;;  %v715_v30 = vld [vmem:[%s9208_s24 + $0x169] sm:$0xff] }
 0x28a   : > { %2916 = vst.msk [vmem:[#allocation2 + $0x90] sm:$0xff] %vm2410_vm9, %v2765_v26  ;;  %1029 = vrot.lane.b32.xlu0 %v10438_v12, %s12766_s30  ;;  %1747 = vrot.lane.b32.xlu1 %v481_v21, %s12767_s15  ;;  %v10587_v12 = vld [vmem:[%s9208_s24 + $0x15a] sm:$0xff]  ;;  %v4384_v34 = vld [vmem:[%s12722_s3 + $0x70] sm:$0xff] }
 0x28b   : > { %v614_v26 = vld [vmem:[%s9208_s24 + $0x15c] sm:$0xff] }
 0x28c   : > { %v1016_v43 = vpop.permute.xlu0 %1015  ;;  %v1734_v57 = vpop.permute.xlu1 %1733 }
 0x28d   : > { %v2350_v23 = vsel %vm2318_vm7, %v2304_v52, %v1734_v57  ;;  %v2167_v2 = vsel %vm2134_vm3, %v2121_v51, %v1016_v43  ;;  %v4381_v52 = vld [vmem:[%s12722_s3 + $0x58] sm:$0xff] }
 0x28e   : > { %1209 = vrot.lane.b32.xlu0 %v612_v22, %s12768_s0  ;;  %1888 = vrot.lane.b32.xlu1 %v10577_v55, %s12769_s22 }
 0x290   : > { %v1196_v59 = vpop.permute.xlu0 %1195  ;;  %v1875_v36 = vpop.permute.xlu1 %1874 }
 0x291   : > { %v2396_v6 = vsel %vm2364_vm8, %v2350_v23, %v1875_v36 }
 0x292   : > { %1389 = vrot.lane.b32.xlu0 %v657_v42, %s12770_s16  ;;  %2029 = vrot.lane.b32.xlu1 %v10587_v12, %s12771_s23 }
 0x294   : > { %v1376_v20 = vpop.permute.xlu0 %1375  ;;  %v2016_v1 = vpop.permute.xlu1 %2015 }
 0x295   : > { %v2442_v44 = vsel %vm2410_vm9, %v2396_v6, %v2016_v1 }
 0x296   : > { %851 = vrot.lane.b32.xlu0 %v10469_v37, %s12772_s17  ;;  %1569 = vrot.lane.b32.xlu1 %v702_v31, %s12765_s21  ;;  %v613_v37 = vld [vmem:[%s9208_s24 + $0x154] sm:$0xff]  ;;  %v704_v31 = vld [vmem:[%s9208_s24 + $0x15e] sm:$0xff] }
 0x297   : > { %v2769_v35 = vpop.f32.mrf.mxu0  ;;  %7844 = vmatmul.mubr.msk.f32.gmra.mxu0 %vm2468_vm10, %v2442_v44 }
 0x298   : > { %v2770_v39 = vadd.f32 %v10458_v3, %v2769_v35  ;;  %v838_v60 = vpop.permute.xlu0 %837  ;;  %v1556_v61 = vpop.permute.xlu1 %1555  ;;  %7846 = vmatprep.mubr.msk.f32.mxu0 %vm9075_vm1, %v9070_v0  ;;  %v4380_v35 = vld [vmem:[%s12722_s3 + $0x50] sm:$0xff] }
 0x299   : > { %v7809_v54 = vpop.f32.mrf.mxu0  ;;  %v2122_v43 = vsel %vm2088_vm2, %v10191_v14, %v838_v60  ;;  %v4382_v14 = vld [vmem:[%s12722_s3 + $0x60] sm:$0xff] }
 0x29a   : > { %2917 = vst.msk [vmem:[#allocation2 + $0x98] sm:$0xff] %vm2410_vm9, %v2770_v39  ;;  %1031 = vrot.lane.b32.xlu0 %v10479_v38, %s12766_s30  ;;  %1749 = vrot.lane.b32.xlu1 %v708_v9, %s12767_s15  ;;  %v2213_v38 = vsel %vm2180_vm4, %v2167_v2, %v1196_v59  ;;  %v710_v39 = vld [vmem:[%s9208_s24 + $0x170] sm:$0xff] }
 0x29b   : > { %v2259_v53 = vsel %vm2226_vm5, %v2213_v38, %v1376_v20  ;;  %v660_v38 = vld [vmem:[%s9208_s24 + $0x165] sm:$0xff] }
 0x29c   : > { %v1018_v56 = vpop.permute.xlu0 %1017  ;;  %v1736_v58 = vpop.permute.xlu1 %1735  ;;  %v2305_v4 = vsel %vm2272_vm6, %v2259_v53, %v1556_v61 }
 0x29d   : > { %v2351_v41 = vsel %vm2318_vm7, %v2305_v4, %v1736_v58  ;;  %v2168_v57 = vsel %vm2134_vm3, %v2122_v43, %v1018_v56  ;;  %v615_v56 = vld [vmem:[%s9208_s24 + $0x164] sm:$0xff]  ;;  %v716_v58 = vld [vmem:[%s9208_s24 + $0x171] sm:$0xff] }
 0x29e   : > { %1211 = vrot.lane.b32.xlu0 %v613_v37, %s12768_s0  ;;  %1890 = vrot.lane.b32.xlu1 %v714_v47, %s12769_s22  ;;  %v4378_v47 = vld [vmem:[%s12722_s3 + $0x40] sm:$0xff] }
 0x2a0   : > { %v1198_v8 = vpop.permute.xlu0 %1197  ;;  %v1877_v32 = vpop.permute.xlu1 %1876 }
 0x2a1   : > { %v2397_v17 = vsel %vm2364_vm8, %v2351_v41, %v1877_v32  ;;  %v2214_v42 = vsel %vm2180_vm4, %v2168_v57, %v1198_v8  ;;  %v722_v8 = vld [vmem:[%s9208_s24 + $0x172] sm:$0xff] }
 0x2a2   : > { %1391 = vrot.lane.b32.xlu0 %v658_v50, %s12770_s16  ;;  %2031 = vrot.lane.b32.xlu1 %v720_v16, %s12771_s23 }
 0x2a4   : > { %v1378_v15 = vpop.permute.xlu0 %1377  ;;  %v2018_v48 = vpop.permute.xlu1 %2017 }
 0x2a5   : > { %v2443_v28 = vsel %vm2410_vm9, %v2397_v17, %v2018_v48  ;;  %v2260_v36 = vsel %vm2226_vm5, %v2214_v42, %v1378_v15  ;;  %v4375_v17 = vld [vmem:[%s12722_s3 + $0x28] sm:$0xff] }
 0x2a6   : > { %853 = vrot.lane.b32.xlu0 %v10505_v33, %s12772_s17  ;;  %1571 = vrot.lane.b32.xlu1 %v703_v25, %s12765_s21  ;;  %v4385_v33 = vld [vmem:[%s12722_s3 + $0x78] sm:$0xff]  ;;  %v705_v48 = vld [vmem:[%s9208_s24 + $0x166] sm:$0xff] }
 0x2a7   : > { %v2774_v29 = vpop.f32.mrf.mxu0  ;;  %7847 = vmatmul.mubr.msk.f32.gmra.mxu0 %vm2468_vm10, %v2443_v28  ;;  %4500 = vmatpush1.msra.mxu1 %v4385_v33  ;;  %v661_v42 = vld [vmem:[%s9208_s24 + $0x16d] sm:$0xff] }
 0x2a8   : > { %v2775_v7 = vadd.f32 %v10458_v3, %v2774_v29  ;;  %v10635_v24 = vpop.permute.xlu0 %839  ;;  %v1558_v13 = vpop.permute.xlu1 %1557  ;;  %7849 = vmatprep.mubr.msk.f32.mxu0 %vm9075_vm1, %v9070_v0  ;;  %4501 = vmatprep.subr.mxu1 %v9070_v0 }
 0x2a9   : > { %v7812_v21 = vpop.f32.mrf.mxu0  ;;  %4502 = vmatpush1.msra.mxu1 %v4384_v34  ;;  %v2306_v62 = vsel %vm2272_vm6, %v2260_v36, %v1558_v13  ;;  %v2123_v50 = vsel %vm2088_vm2, %v10230_v46, %v10635_v24  ;;  %v4376_v46 = vld [vmem:[%s12722_s3 + $0x30] sm:$0xff]  ;;  %v4374_v24 = vld [vmem:[%s12722_s3 + $0x20] sm:$0xff] }
 0x2aa   : > { %2918 = vst.msk [vmem:[#allocation2 + $0xa0] sm:$0xff] %vm2410_vm9, %v2775_v7  ;;  %1033 = vrot.lane.b32.xlu0 %v10515_v18, %s12766_s30  ;;  %1751 = vrot.lane.b32.xlu1 %v709_v11, %s12767_s15  ;;  %v4383_v18 = vld [vmem:[%s12722_s3 + $0x68] sm:$0xff]  ;;  %v711_v21 = vld [vmem:[%s9208_s24 + $0x178] sm:$0xff] }
 0x2ab   : > { %4503 = vmatprep.subr.mxu1 %v9070_v0 }
 0x2ac   : > { %v10651_v27 = vpop.permute.xlu0 %1019  ;;  %v1738_v22 = vpop.permute.xlu1 %1737  ;;  %4504 = vmatpush1.msra.mxu1 %v4383_v18  ;;  %v717_v18 = vld [vmem:[%s9208_s24 + $0x179] sm:$0xff] }
 0x2ad   : > { %4505 = vmatprep.subr.mxu1 %v9070_v0  ;;  %v2352_v23 = vsel %vm2318_vm7, %v2306_v62, %v1738_v22  ;;  %v2169_v16 = vsel %vm2134_vm3, %v2123_v50, %v10651_v27  ;;  %v4372_v27 = vld [vmem:[%s12722_s3 + $0x10] sm:$0xff]  ;;  %v4405_v50 = vld [vmem:[%s12722_s3 + $0x118] sm:$0xff] }
 0x2ae   : > { %1213 = vrot.lane.b32.xlu0 %v614_v26, %s12768_s0  ;;  %1892 = vrot.lane.b32.xlu1 %v715_v30, %s12769_s22  ;;  %v616_v22 = vld [vmem:[%s9208_s24 + $0x16c] sm:$0xff] }
 0x2af   : > { %4506 = vmatpush1.msra.mxu1 %v4382_v14  ;;  %7885 = vmatprep.subr.mxu0 %v4405_v50 }
 0x2b0   : > { %v1200_v5 = vpop.permute.xlu0 %1199  ;;  %v1879_v59 = vpop.permute.xlu1 %1878  ;;  %4507 = vmatprep.subr.mxu1 %v9070_v0  ;;  %7886 = vmatpush3.msra.mxu0 %v4405_v50 }
 0x2b1   : > { %v2398_v6 = vsel %vm2364_vm8, %v2352_v23, %v1879_v59  ;;  %4508 = vmatpush1.msra.mxu1 %v4381_v52  ;;  %v2215_v32 = vsel %vm2180_vm4, %v2169_v16, %v1200_v5  ;;  %v723_v5 = vld [vmem:[%s9208_s24 + $0x17a] sm:$0xff] }
 0x2b2   : > { %1393 = vrot.lane.b32.xlu0 %v659_v40, %s12770_s16  ;;  %2033 = vrot.lane.b32.xlu1 %v721_v10, %s12771_s23  ;;  %v4401_v23 = vld [vmem:[%s12722_s3 + $0xf8] sm:$0xff] }
 0x2b3   : > { %4509 = vmatprep.subr.mxu1 %v9070_v0 }
 0x2b4   : > { %v1380_v20 = vpop.permute.xlu0 %1379  ;;  %v2020_v1 = vpop.permute.xlu1 %2019  ;;  %4510 = vmatpush1.msra.mxu1 %v4380_v35 }
 0x2b5   : > { %v2444_v44 = vsel %vm2410_vm9, %v2398_v6, %v2020_v1  ;;  %4511 = vmatprep.subr.mxu1 %v9070_v0  ;;  %v2261_v41 = vsel %vm2226_vm5, %v2215_v32, %v1380_v20  ;;  %v527_v6 = vld [vmem:[%s9208_s24 + $0x161] sm:$0x3f]  ;;  %v706_v20 = vld [vmem:[%s9208_s24 + $0x16e] sm:$0xff] }
 0x2b6   : > { %855 = vrot.lane.b32.xlu0 %v10541_v49, %s12772_s17  ;;  %1573 = vrot.lane.b32.xlu1 %v704_v31, %s12765_s21  ;;  %v4379_v49 = vld [vmem:[%s12722_s3 + $0x48] sm:$0xff] }
 0x2b7   : > { %v2779_v9 = vpop.f32.mrf.mxu0  ;;  %7850 = vmatmul.mubr.msk.f32.gmra.mxu0 %vm2468_vm10, %v2444_v44  ;;  %4512 = vmatpush1.msra.mxu1 %v4379_v49 }
 0x2b8   : > { %v2780_v60 = vadd.f32 %v10458_v3, %v2779_v9  ;;  %v10692_v61 = vpop.permute.xlu0 %841  ;;  %v1560_v54 = vpop.permute.xlu1 %1559  ;;  %7852 = vmatprep.mubr.msk.f32.mxu0 %vm9075_vm1, %v9070_v0  ;;  %4513 = vmatprep.subr.mxu1 %v9070_v0 }
 0x2b9   : > { %v7815_v37 = vpop.f32.mrf.mxu0  ;;  %4514 = vmatpush1.msra.mxu1 %v4378_v47  ;;  %v2307_v25 = vsel %vm2272_vm6, %v2261_v41, %v1560_v54  ;;  %v2124_v40 = vsel %vm2088_vm2, %v10269_v19, %v10692_v61  ;;  %v4370_v19 = vld [vmem:[%s12722_s3] sm:$0xff] }
 0x2ba   : > { %2919 = vst.msk [vmem:[#allocation2 + $0xa8] sm:$0xff] %vm2410_vm9, %v2780_v60  ;;  %1035 = vrot.lane.b32.xlu0 %v10551_v45, %s12766_s30  ;;  %1753 = vrot.lane.b32.xlu1 %v710_v39, %s12767_s15  ;;  %v4377_v45 = vld [vmem:[%s12722_s3 + $0x38] sm:$0xff]  ;;  %v4400_v39 = vld [vmem:[%s12722_s3 + $0xf0] sm:$0xff] }
 0x2bb   : > { %4515 = vmatprep.subr.mxu1 %v9070_v0  ;;  %v572_v61 = vld [vmem:[%s9208_s24 + $0x162] sm:$0x3f] }
 0x2bc   : > { %v10709_v51 = vpop.permute.xlu0 %1021  ;;  %v1740_v2 = vpop.permute.xlu1 %1739  ;;  %4516 = vmatpush1.msra.mxu1 %v4377_v45  ;;  %v712_v54 = vld [vmem:[%s9208_s24 + $0x180] sm:$0xff] }
 0x2bd   : > { %4517 = vmatprep.subr.mxu1 %v9070_v0  ;;  %v2353_v15 = vsel %vm2318_vm7, %v2307_v25, %v1740_v2  ;;  %v2170_v10 = vsel %vm2134_vm3, %v2124_v40, %v10709_v51  ;;  %v4398_v51 = vld [vmem:[%s12722_s3 + $0xe0] sm:$0xff]  ;;  %v617_v2 = vld [vmem:[%s9208_s24 + $0x174] sm:$0x3f] }
 0x2be   : > { %1215 = vrot.lane.b32.xlu0 %v615_v56, %s12768_s0  ;;  %1894 = vrot.lane.b32.xlu1 %v716_v58, %s12769_s22  ;;  %v4399_v56 = vld [vmem:[%s12722_s3 + $0xe8] sm:$0xff]  ;;  %v4393_v40 = vld [vmem:[%s12722_s3 + $0xb8] sm:$0xff] }
 0x2bf   : > { %4518 = vmatpush1.msra.mxu1 %v4376_v46  ;;  %v718_v45 = vld [vmem:[%s9208_s24 + $0x181] sm:$0xff]  ;;  %v662_v46 = vld [vmem:[%s9208_s24 + $0x175] sm:$0x3f] }
 0x2c0   : > { %v1202_v53 = vpop.permute.xlu0 %1201  ;;  %v1881_v4 = vpop.permute.xlu1 %1880  ;;  %4519 = vmatprep.subr.mxu1 %v9070_v0  ;;  %v724_v41 = vld [vmem:[%s9208_s24 + $0x182] sm:$0xff] }
 0x2c1   : > { %v2399_v28 = vsel %vm2364_vm8, %v2353_v15, %v1881_v4  ;;  %4520 = vmatpush1.msra.mxu1 %v4375_v17  ;;  %v2216_v59 = vsel %vm2180_vm4, %v2170_v10, %v1202_v53  ;;  %v4404_v53 = vld [vmem:[%s12722_s3 + $0x110] sm:$0xff] }
 0x2c2   : > { %1395 = vrot.lane.b32.xlu0 %v660_v38, %s12770_s16  ;;  %2035 = vrot.lane.b32.xlu1 %v722_v8, %s12771_s23  ;;  %v4397_v8 = vld [vmem:[%s12722_s3 + $0xd8] sm:$0xff] }
 0x2c3   : > { %4521 = vmatprep.subr.mxu1 %v9070_v0  ;;  %7887 = vmatprep.subr.mxu0 %v4404_v53 }
 0x2c4   : > { %v1382_v29 = vpop.permute.xlu0 %1381  ;;  %v2022_v11 = vpop.permute.xlu1 %2021  ;;  %4522 = vmatpush1.msra.mxu1 %v4374_v24  ;;  %7888 = vmatpush3.msra.mxu0 %v4404_v53 }
 0x2c5   : > { %v2445_v7 = vsel %vm2410_vm9, %v2399_v28, %v2022_v11  ;;  %4523 = vmatprep.subr.mxu1 %v9070_v0  ;;  %v2262_v62 = vsel %vm2226_vm5, %v2216_v59, %v1382_v29  ;;  %v4402_v29 = vld [vmem:[%s12722_s3 + $0x100] sm:$0xff]  ;;  %v4392_v59 = vld [vmem:[%s12722_s3 + $0xb0] sm:$0xff] }
 0x2c6   : > { %857 = vrot.lane.b32.xlu0 %v10577_v55, %s12772_s17  ;;  %1575 = vrot.lane.b32.xlu1 %v705_v48, %s12765_s21  ;;  %v4373_v55 = vld [vmem:[%s12722_s3 + $0x18] sm:$0xff]  ;;  %v4396_v48 = vld [vmem:[%s12722_s3 + $0xd0] sm:$0xff] }
 0x2c7   : > { %v2784_v13 = vpop.f32.mrf.mxu0  ;;  %7853 = vmatmul.mubr.msk.f32.gmra.mxu0 %vm2468_vm10, %v2445_v7  ;;  %4524 = vmatpush1.msra.mxu1 %v4373_v55  ;;  %v4395_v7 = vld [vmem:[%s12722_s3 + $0xc8] sm:$0xff] }
 0x2c8   : > { %v2785_v33 = vadd.f32 %v10458_v3, %v2784_v13  ;;  %v10752_v26 = vpop.permute.xlu0 %843  ;;  %v1562_v30 = vpop.permute.xlu1 %1561  ;;  %7855 = vmatprep.mubr.msk.f32.mxu0 %vm9075_vm1, %v9070_v0  ;;  %4525 = vmatprep.subr.mxu1 %v9070_v0  ;;  %v707_v13 = vld [vmem:[%s9208_s24 + $0x176] sm:$0x3f] }
 0x2c9   : > { %v7818_v34 = vpop.f32.mrf.mxu0  ;;  %4526 = vmatpush1.msra.mxu1 %v4372_v27  ;;  %v2308_v52 = vsel %vm2272_vm6, %v2262_v62, %v1562_v30  ;;  %v2125_v32 = vsel %vm2088_vm2, %v10308_v63, %v10752_v26  ;;  %v4403_v63 = vld [vmem:[%s12722_s3 + $0x108] sm:$0xff] }
 0x2ca   : > { %2920 = vst.msk [vmem:[#allocation2 + $0xb0] sm:$0xff] %vm2410_vm9, %v2785_v33  ;;  %1037 = vrot.lane.b32.xlu0 %v10587_v12, %s12766_s30  ;;  %1755 = vrot.lane.b32.xlu1 %v711_v21, %s12767_s15  ;;  %v4371_v12 = vld [vmem:[%s12722_s3 + $0x8] sm:$0xff]  ;;  %v4394_v34 = vld [vmem:[%s12722_s3 + $0xc0] sm:$0xff] }
 0x2cb   : > { %4527 = vmatprep.subr.mxu1 %v9070_v0  ;;  %7889 = vmatprep.subr.mxu0 %v4403_v63  ;;  %v713_v21 = vld [vmem:[%s9208_s24 + $0x188] sm:$0x3f] }
 0x2cc   : > { %v10769_v43 = vpop.permute.xlu0 %1023  ;;  %v1742_v57 = vpop.permute.xlu1 %1741  ;;  %4528 = vmatpush1.msra.mxu1 %v4371_v12  ;;  %7890 = vmatpush3.msra.mxu0 %v4403_v63  ;;  %v3146_v63 = vld [vmem:[#allocation2 + $0x26] sm:$0xff] }
 0x2cd   : > { %4529 = vmatprep.subr.mxu1 %v9070_v0  ;;  %v2354_v31 = vsel %vm2318_vm7, %v2308_v52, %v1742_v57  ;;  %v2171_v4 = vsel %vm2134_vm3, %v2125_v32, %v10769_v43  ;;  %7891 = vmatprep.subr.mxu0 %v4402_v29 }
 0x2ce   : > { %1217 = vrot.lane.b32.xlu0 %v616_v22, %s12768_s0  ;;  %1896 = vrot.lane.b32.xlu1 %v717_v18, %s12769_s22  ;;  %v719_v22 = vld [vmem:[%s9208_s24 + $0x189] sm:$0x3f] }
 0x2cf   : > { %4530 = vmatpush1.msra.mxu1 %v4370_v19  ;;  %7892 = vmatpush3.msra.mxu0 %v4402_v29  ;;  %v725_v18 = vld [vmem:[%s9208_s24 + $0x18a] sm:$0x3f] }
 0x2d0   : > { %v1204_v14 = vpop.permute.xlu0 %1203  ;;  %v1883_v36 = vpop.permute.xlu1 %1882  ;;  %4531 = vmatprep.subr.mxu1 %v9070_v0 }
 0x2d1   : > { %v2400_v1 = vsel %vm2364_vm8, %v2354_v31, %v1883_v36  ;;  %4532 = vmatpush2.msra.mxu1 %v4401_v23  ;;  %v2217_v25 = vsel %vm2180_vm4, %v2171_v4, %v1204_v14  ;;  %v2984_v14 = vld [vmem:[#allocation2 + $0x1] sm:$0xff] }
 0x2d2   : > { %1397 = vrot.lane.b32.xlu0 %v661_v42, %s12770_s16  ;;  %2037 = vrot.lane.b32.xlu1 %v723_v5, %s12771_s23  ;;  %v3144_v42 = vld [vmem:[#allocation2 + $0x16] sm:$0xff]  ;;  %v2949_v5 = vld [vmem:[#allocation2 + $0x28] sm:$0xff]  ;;  %v3145_v31 = vld [vmem:[#allocation2 + $0x1e] sm:$0xff] }
 0x2d3   : > { %4533 = vmatprep.subr.mxu1 %v9070_v0  ;;  %v3024_v36 = vld [vmem:[#allocation2 + $0x2] sm:$0xff]  ;;  %v8073_v52 = vpack.i.bf16 %v2984_v14, %v3144_v42 }
 0x2d4   : > { %v1384_v44 = vpop.permute.xlu0 %1383  ;;  %v2024_v35 = vpop.permute.xlu1 %2023  ;;  %4534 = vmatpush2.msra.mxu1 %v4400_v39  ;;  %v8078_v23 = vpack.i.bf16 %v3024_v36, %v2949_v5  ;;  %v3064_v39 = vld [vmem:[#allocation2 + $0x14] sm:$0xff]  ;;  %v3065_v4 = vld [vmem:[#allocation2 + $0x1c] sm:$0xff] }
 0x2d5   : > { %v2446_v9 = vsel %vm2410_vm9, %v2400_v1, %v2024_v35  ;;  %4535 = vmatprep.subr.mxu1 %v9070_v0  ;;  %v2263_v28 = vsel %vm2226_vm5, %v2217_v25, %v1384_v44  ;;  %v8959_v1 = vld [vmem:[%s9208_s24 + $0x128] sm:$0xff]  ;;  %v2951_v25 = vld [vmem:[#allocation2 + $0x38] sm:$0xff] }
 0x2d6   : > { %859 = vrot.lane.b32.xlu0 %v527_v6, %s12772_s17  ;;  %1577 = vrot.lane.b32.xlu1 %v706_v20, %s12765_s21  ;;  %v10904_v6 = vld [vmem:[#allocation2 + $0x29] sm:$0xff]  ;;  %v10972_v42 = vld [vmem:[#allocation2 + $0x41] sm:$0xff] }
 0x2d7   : > { %v2789_v60 = vpop.f32.mrf.mxu0  ;;  %7856 = vmatmul.mubr.msk.f32.gmra.mxu0 %vm2468_vm10, %v2446_v9  ;;  %4536 = vmatpush2.msra.mxu1 %v4399_v56  ;;  %v4391_v20 = vld [vmem:[%s12722_s3 + $0xa8] sm:$0xff] }
 0x2d8   : > { %v2790_v49 = vadd.f32 %v10458_v3, %v2789_v60  ;;  %v10813_v37 = vpop.permute.xlu0 %845  ;;  %v1564_v47 = vpop.permute.xlu1 %1563  ;;  %7858 = vmatprep.mubr.msk.f32.mxu0 %vm9075_vm1, %v9070_v0  ;;  %4537 = vmatprep.subr.mxu1 %v9070_v0  ;;  %v2985_v9 = vld [vmem:[#allocation2 + $0x9] sm:$0xff] }
 0x2d9   : > { %v7821_v58 = vpop.f32.mrf.mxu0  ;;  %4538 = vmatpush2.msra.mxu1 %v4398_v51  ;;  %v2309_v11 = vsel %vm2272_vm6, %v2263_v28, %v1564_v47  ;;  %v2126_v44 = vsel %vm2088_vm2, %v8959_v1, %v10813_v37  ;;  %v8083_v37 = vpack.i.bf16 %v3064_v39, %v10904_v6  ;;  %v4390_v47 = vld [vmem:[%s12722_s3 + $0xa0] sm:$0xff] }
 0x2da   : > { %2921 = vst.msk [vmem:[#allocation2 + $0xb8] sm:$0xff] %vm2410_vm9, %v2790_v49  ;;  %1039 = vrot.lane.b32.xlu0 %v572_v61, %s12766_s30  ;;  %1757 = vrot.lane.b32.xlu1 %v712_v54, %s12767_s15  ;;  %v8088_v49 = vpack.i.bf16 %v2985_v9, %v3145_v31  ;;  %v2950_v58 = vld [vmem:[#allocation2 + $0x30] sm:$0xff] }
 0x2db   : > { %4539 = vmatprep.subr.mxu1 %v9070_v0 }
 0x2dc   : > { %v10832_v16 = vpop.permute.xlu0 %1025  ;;  %v1744_v38 = vpop.permute.xlu1 %1743  ;;  %4540 = vmatpush2.msra.mxu1 %v4397_v8 }
 0x2dd   : > { %4541 = vmatprep.subr.mxu1 %v9070_v0  ;;  %v2355_v24 = vsel %vm2318_vm7, %v2309_v11, %v1744_v38  ;;  %v2172_v35 = vsel %vm2134_vm3, %v2126_v44, %v10832_v16  ;;  %v3025_v16 = vld [vmem:[#allocation2 + $0xa] sm:$0xff] }
 0x2de   : > { %1219 = vrot.lane.b32.xlu0 %v617_v2, %s12768_s0  ;;  %1898 = vrot.lane.b32.xlu1 %v718_v45, %s12769_s22  ;;  %v10930_v2 = vld [vmem:[#allocation2 + $0x31] sm:$0xff]  ;;  %v8093_v53 = vpack.i.bf16 %v3025_v16, %v2950_v58 }
 0x2df   : > { %4542 = vmatpush2.msra.mxu1 %v4396_v48  ;;  %v4389_v45 = vld [vmem:[%s12722_s3 + $0x98] sm:$0xff] }
 0x2e0   : > { %v10855_v17 = vpop.permute.xlu0 %1205  ;;  %v1885_v15 = vpop.permute.xlu1 %1884  ;;  %4543 = vmatprep.subr.mxu1 %v9070_v0  ;;  %v2986_v48 = vld [vmem:[#allocation2 + $0x11] sm:$0xff] }
 0x2e1   : > { %v2401_v33 = vsel %vm2364_vm8, %v2355_v24, %v1885_v15  ;;  %4544 = vmatpush2.msra.mxu1 %v4395_v7  ;;  %v2218_v60 = vsel %vm2180_vm4, %v2172_v35, %v10855_v17  ;;  %v4388_v17 = vld [vmem:[%s12722_s3 + $0x90] sm:$0xff]  ;;  %v8103_v7 = vpack.i.bf16 %v2986_v48, %v3146_v63  ;;  %v2988_v35 = vld [vmem:[#allocation2 + $0x21] sm:$0xff] }
 0x2e2   : > { %1399 = vrot.lane.b32.xlu0 %v662_v46, %s12770_s16  ;;  %2039 = vrot.lane.b32.xlu1 %v724_v41, %s12771_s23  ;;  %v8098_v41 = vpack.i.bf16 %v3065_v4, %v10930_v2  ;;  %v3026_v24 = vld [vmem:[#allocation2 + $0x12] sm:$0xff] }
 0x2e3   : > { %4545 = vmatprep.subr.mxu1 %v9070_v0  ;;  %v2954_v4 = vld [vmem:[#allocation2 + $0x50] sm:$0xff] }
 0x2e4   : > { %v1386_v26 = vpop.permute.xlu0 %1385  ;;  %v2026_v30 = vpop.permute.xlu1 %2025  ;;  %4546 = vmatpush2.msra.mxu1 %v4394_v34 }
 0x2e5   : > { %v2447_v55 = vsel %vm2410_vm9, %v2401_v33, %v2026_v30  ;;  %4547 = vmatprep.subr.mxu1 %v9070_v0  ;;  %v2264_v56 = vsel %vm2226_vm5, %v2218_v60, %v1386_v26  ;;  %v8108_v33 = vpack.i.bf16 %v3026_v24, %v2951_v25  ;;  %v10955_v26 = vld [vmem:[#allocation2 + $0x39] sm:$0xff] }
 0x2e6   : > { %1579 = vrot.lane.b32.xlu0 %v707_v13, %s12765_s21  ;;  %1759 = vrot.lane.b32.xlu1 %v713_v21, %s12767_s15  ;;  %v4387_v13 = vld [vmem:[%s12722_s3 + $0x88] sm:$0xff]  ;;  %v4386_v30 = vld [vmem:[%s12722_s3 + $0x80] sm:$0xff]  ;;  %s431_s15 = sand.u32 1, %s9060_s26  }
 0x2e7   : > { %v2794_v27 = vpop.f32.mrf.mxu0  ;;  %7859 = vmatmul.mubr.msk.f32.gmra.mxu0 %vm2468_vm10, %v2447_v55  ;;  %4548 = vmatpush2.msra.mxu1 %v4393_v40  ;;  %v3066_v55 = vld [vmem:[#allocation2 + $0x24] sm:$0xff]  ;;  %v8960_v40 = vld [vmem:[%s9208_s24 + $0x130] sm:$0xff] }
 0x2e8   : > { %v2795_v43 = vadd.f32 %v10458_v3, %v2794_v27  ;;  %v10887_v57 = vpop.permute.xlu0 %847  ;;  %v1566_v12 = vpop.permute.xlu1 %1565  ;;  %7861 = vmatprep.mubr.msk.f32.mxu0 %vm9075_vm1, %v9070_v0  ;;  %4549 = vmatprep.subr.mxu1 %v9070_v0 }
 0x2e9   : > { %v7824_v10 = vpop.f32.mrf.mxu0  ;;  %4550 = vmatpush2.msra.mxu1 %v4392_v59  ;;  %v2310_v51 = vsel %vm2272_vm6, %v2264_v56, %v1566_v12  ;;  %v2952_v12 = vld [vmem:[#allocation2 + $0x40] sm:$0xff] }
 0x2ea   : > { %2922 = vst.msk [vmem:[#allocation2 + $0xc0] sm:$0xff] %vm2410_vm9, %v2795_v43  ;;  %1900 = vrot.lane.b32.xlu0 %v719_v22, %s12769_s22  ;;  %2041 = vrot.lane.b32.xlu1 %v725_v18, %s12771_s23  ;;  %v2987_v22 = vld [vmem:[#allocation2 + $0x19] sm:$0xff]  ;;  %v8113_v18 = vpack.i.bf16 %v3066_v55, %v10955_v26  ;;  %v2127_v10 = vsel %vm2088_vm2, %v8960_v40, %v10887_v57 }
 0x2eb   : > { %4551 = vmatprep.subr.mxu1 %v9070_v0  ;;  %v3027_v59 = vld [vmem:[#allocation2 + $0x1a] sm:$0xff] }
 0x2ec   : > { %v10901_v19 = vpop.permute.xlu0 %1027  ;;  %v1746_v62 = vpop.permute.xlu1 %1745  ;;  %4552 = vmatpush2.msra.mxu1 %v4391_v20  ;;  %v3148_v20 = vld [vmem:[#allocation2 + $0x36] sm:$0xff]  ;;  %v3149_v56 = vld [vmem:[#allocation2 + $0x3e] sm:$0xff] }
 0x2ed   : > { %4553 = vmatprep.subr.mxu1 %v9070_v0  ;;  %v2356_v50 = vsel %vm2318_vm7, %v2310_v51, %v1746_v62  ;;  %v2173_v5 = vsel %vm2134_vm3, %v2127_v10, %v10901_v19  ;;  %v2953_v19 = vld [vmem:[#allocation2 + $0x48] sm:$0xff]  ;;  %v3068_v51 = vld [vmem:[#allocation2 + $0x34] sm:$0xff] }
 0x2ee   : > { %8074 = vrot.lane.b32.xlu0 %v8073_v52, %s12771_s23  ;;  %8079 = vrot.lane.b32.xlu1 %v8078_v23, %s9080_s19  ;;  %v8123_v52 = vpack.i.bf16 %v3027_v59, %v2952_v12  ;;  %v3067_v23 = vld [vmem:[#allocation2 + $0x2c] sm:$0xff] }
 0x2ef   : > { %4554 = vmatpush2.msra.mxu1 %v4390_v47  ;;  %v8128_v57 = vpack.i.bf16 %v3067_v23, %v10972_v42  ;;  %v10987_v47 = vld [vmem:[#allocation2 + $0x49] sm:$0xff] }
 0x2f0   : > { %v10919_v61 = vpop.permute.xlu0 %1207  ;;  %v1887_v54 = vpop.permute.xlu1 %1886  ;;  %4555 = vmatprep.subr.mxu1 %v9070_v0 }
 0x2f1   : > { %v2402_v38 = vsel %vm2364_vm8, %v2356_v50, %v1887_v54  ;;  %4556 = vmatpush2.msra.mxu1 %v4389_v45  ;;  %v2219_v14 = vsel %vm2180_vm4, %v2173_v5, %v10919_v61  ;;  %v8133_v61 = vpack.i.bf16 %v2988_v35, %v3148_v20  ;;  %v3028_v54 = vld [vmem:[#allocation2 + $0x22] sm:$0xff]  ;;  %v10997_v45 = vld [vmem:[%s12721_s2] ss:$0 sm:$0xff]  ;;  %v3071_v20 = vld [vmem:[#allocation2 + $0x4c] sm:$0xff] }
 0x2f2   : > { %8089 = vrot.lane.b32.xlu1 %v8088_v49, %s12771_s23  ;;  %8084 = vrot.lane.b32.xlu0 %v8083_v37, %s9081_s20  ;;  %v8138_v37 = vpack.i.bf16 %v3028_v54, %v2953_v19  ;;  %v2957_v35 = vld [vmem:[#allocation2 + $0x68] sm:$0xff] }
 0x2f3   : > { %4557 = vmatprep.subr.mxu1 %v9070_v0 }
 0x2f4   : > { %v1388_v8 = vpop.permute.xlu0 %1387  ;;  %v2028_v32 = vpop.permute.xlu1 %2027  ;;  %4558 = vmatpush2.msra.mxu1 %v4388_v17 }
 0x2f5   : > { %v2448_v46 = vsel %vm2410_vm9, %v2402_v38, %v2028_v32  ;;  %4559 = vmatprep.subr.mxu1 %v9070_v0  ;;  %v2265_v31 = vsel %vm2226_vm5, %v2219_v14, %v1388_v8  ;;  %v8143_v8 = vpack.i.bf16 %v3068_v51, %v10987_v47  ;;  %v2956_v14 = vld [vmem:[#allocation2 + $0x60] sm:$0xff] }
 0x2f6   : > { %7862 = vmatmul.mubr.msk.f32.gmra.mxu0 %vm2468_vm10, %v2448_v46  ;;  %8094 = vrot.lane.b32.xlu0 %v8093_v53, %s9080_s19  ;;  %v8148_v53 = vpack.i.bf16 %v10904_v6, %v3149_v56  ;;  %v11006_v46 = vld [vmem:[#allocation2 + $0x51] sm:$0xff]  ;;  %v3150_v6 = vld [vmem:[#allocation2 + $0x46] sm:$0xff] }
 0x2f7   : > { %8099 = vrot.lane.b32.xlu1 %v8098_v41, %s9081_s20  ;;  %v2799_v15 = vpop.f32.mrf.mxu0  ;;  %7864 = vmatprep.mubr.msk.f32.mxu0 %vm9075_vm1, %v9070_v0  ;;  %v11009_v41 = vld [vmem:[#allocation2 + $0x2a] sm:$0xff] }
 0x2f8   : > { %v2800_v28 = vadd.f32 %v10458_v3, %v2799_v15  ;;  %v10949_v29 = vpop.permute.xlu0 %849  ;;  %v1568_v11 = vpop.permute.xlu1 %1567  ;;  %v3147_v3 = vld [vmem:[#allocation2 + $0x2e] sm:$0xff]  ;;  %4560 = vmatpush2.msra.mxu1 %v4387_v13  ;;  %v8153_v17 = vpack.i.bf16 %v11009_v41, %v2954_v4  ;;  %v3069_v15 = vld [vmem:[#allocation2 + $0x3c] sm:$0xff] }
 0x2f9   : > { %v7827_v21 = vpop.f32.mrf.mxu0  ;;  %4561 = vmatprep.subr.mxu1 %v9070_v0  ;;  %v8118_v43 = vpack.i.bf16 %v2987_v22, %v3147_v3  ;;  %v2311_v1 = vsel %vm2272_vm6, %v2265_v31, %v1568_v11  ;;  %v8158_v48 = vpack.i.bf16 %v3069_v15, %v11006_v46  ;;  %v8163_v3 = vpack.i.bf16 %v10930_v2, %v3150_v6  ;;  %v11080_v15 = vld [vmem:[#allocation2 + $0x4a] sm:$0xff] }
 0x2fa   : > { %2923 = vst.msk [vmem:[#allocation2 + $0xc8] sm:$0xff] %vm2410_vm9, %v2800_v28  ;;  %8104 = vrot.lane.b32.xlu0 %v8103_v7, %s12771_s23  ;;  %4562 = vmatpush2.msra.mxu1 %v4386_v30  ;;  %v8962_v28 = vld [vmem:[%s9208_s24 + $0x138] sm:$0xff] }
 0x2fb   : > { %8109 = vrot.lane.b32.xlu1 %v8108_v33, %s9080_s19  ;;  %v2128_v11 = vsel %vm2088_vm2, %v8962_v28, %v10949_v29  ;;  %v2955_v7 = vld [vmem:[#allocation2 + $0x58] sm:$0xff] }
 0x2fc   : > { %v10964_v34 = vpop.permute.xlu0 %1029  ;;  %v1748_v27 = vpop.permute.xlu1 %1747  ;;  %v11024_v30 = vld [vmem:[#allocation2 + $0x32] sm:$0xff] }
 0x2fd   : > { %v2357_v44 = vsel %vm2318_vm7, %v2311_v1, %v1748_v27  ;;  %v2174_v24 = vsel %vm2134_vm3, %v2128_v11, %v10964_v34  ;;  %v8168_v29 = vpack.i.bf16 %v11024_v30, %v2955_v7  ;;  %v11028_v27 = vld [vmem:[#allocation2 + $0x59] sm:$0xff]  ;;  %v3151_v34 = vld [vmem:[#allocation2 + $0x4e] sm:$0xff] }
 0x2fe   : > { %8114 = vrot.lane.b32.xlu0 %v8113_v18, %s9081_s20  ;;  %v8178_v59 = vpack.i.bf16 %v10955_v26, %v3151_v34  ;;  %v11095_v34 = vld [vmem:[#allocation2 + $0x52] sm:$0xff] }
 0x2ff   : > { %8119 = vrot.lane.b32.xlu1 %v8118_v43, %s12771_s23  ;;  %v3070_v43 = vld [vmem:[#allocation2 + $0x44] sm:$0xff] }
 0x300   : > { %v1210_v36 = vpop.permute.xlu0 %1209  ;;  %v1889_v62 = vpop.permute.xlu1 %1888  ;;  %v8173_v10 = vpack.i.bf16 %v3070_v43, %v11028_v27 }
 0x301   : > { %v2403_v9 = vsel %vm2364_vm8, %v2357_v44, %v1889_v62  ;;  %v2220_v13 = vsel %vm2180_vm4, %v2174_v24, %v1210_v36  ;;  %v11040_v36 = vld [vmem:[#allocation2 + $0x61] sm:$0xff]  ;;  %v3152_v44 = vld [vmem:[#allocation2 + $0x56] sm:$0xff] }
 0x302   : > { %8124 = vrot.lane.b32.xlu0 %v8123_v52, %s9080_s19  ;;  %v11043_v52 = vld [vmem:[#allocation2 + $0x3a] sm:$0xff]  ;;  %v8188_v19 = vpack.i.bf16 %v3071_v20, %v11040_v36 }
 0x303   : > { %8129 = vrot.lane.b32.xlu1 %v8128_v57, %s9081_s20  ;;  %v8183_v57 = vpack.i.bf16 %v11043_v52, %v2956_v14  ;;  %v2960_v14 = vld [vmem:[#allocation2 + $0x80] sm:$0xff] }
 0x304   : > { %v1390_v39 = vpop.permute.xlu0 %1389  ;;  %v2030_v60 = vpop.permute.xlu1 %2029  ;;  %v11116_v20 = vld [vmem:[#allocation2 + $0x5a] sm:$0xff] }
 0x305   : > { %v2449_v49 = vsel %vm2410_vm9, %v2403_v9, %v2030_v60  ;;  %v2266_v55 = vsel %vm2226_vm5, %v2220_v13, %v1390_v39  ;;  %v8193_v60 = vpack.i.bf16 %v10972_v42, %v3152_v44  ;;  %v3154_v13 = vld [vmem:[#allocation2 + $0x66] sm:$0xff]  ;;  %v8243_v44 = vpack.i.bf16 %v11116_v20, %v2960_v14 }
 0x306   : > { %7865 = vmatmul.mubr.msk.f32.gmra.mxu0 %vm2468_vm10, %v2449_v49  ;;  %8134 = vrot.lane.b32.xlu0 %v8133_v61, %s12771_s23  ;;  %v11058_v61 = vld [vmem:[#allocation2 + $0x42] sm:$0xff] }
 0x307   : > { %8139 = vrot.lane.b32.xlu1 %v8138_v37, %s9080_s19  ;;  %v2804_v58 = vpop.f32.mrf.mxu0  ;;  %7867 = vmatprep.mubr.msk.f32.mxu0 %vm9075_vm1, %v9070_v0  ;;  %v8198_v54 = vpack.i.bf16 %v11058_v61, %v2957_v35  ;;  %v11061_v49 = vld [vmem:[#allocation2 + $0x69] sm:$0xff]  ;;  %v8963_v37 = vld [vmem:[%s9208_s24 + $0x140] sm:$0xff] }
 0x308   : > { %v2805_v50 = vadd.f32 %v10997_v45, %v2804_v58  ;;  %v11000_v16 = vpop.permute.xlu0 %851  ;;  %v1570_v38 = vpop.permute.xlu1 %1569  ;;  %v3153_v58 = vld [vmem:[#allocation2 + $0x5e] sm:$0xff]  ;;  %v3075_v35 = vld [vmem:[#allocation2 + $0x6c] sm:$0xff] }
 0x309   : > { %v7830_v32 = vpop.f32.mrf.mxu0  ;;  %v2312_v22 = vsel %vm2272_vm6, %v2266_v55, %v1570_v38  ;;  %v2129_v56 = vsel %vm2088_vm2, %v8963_v37, %v11000_v16  ;;  %v8208_v4 = vpack.i.bf16 %v10987_v47, %v3153_v58  ;;  %v2958_v16 = vld [vmem:[#allocation2 + $0x70] sm:$0xff]  ;;  %v3073_v47 = vld [vmem:[#allocation2 + $0x5c] sm:$0xff] }
 0x30a   : > { %2924 = vst.msk [vmem:[#allocation2 + $0xd0] sm:$0xff] %vm2410_vm9, %v2805_v50  ;;  %8144 = vrot.lane.b32.xlu0 %v8143_v8, %s9081_s20  ;;  %v3072_v50 = vld [vmem:[#allocation2 + $0x54] sm:$0xff]  ;;  %v8213_v11 = vpack.i.bf16 %v11080_v15, %v2958_v16 }
 0x30b   : > { %8149 = vrot.lane.b32.xlu1 %v8148_v53, %s12771_s23  ;;  %v8203_v32 = vpack.i.bf16 %v3072_v50, %v11061_v49  ;;  %v3076_v16 = vld [vmem:[#allocation2 + $0x74] sm:$0xff] }
 0x30c   : > { %v11011_v63 = vpop.permute.xlu0 %1031  ;;  %v1750_v25 = vpop.permute.xlu1 %1749 }
 0x30d   : > { %v2358_v18 = vsel %vm2318_vm7, %v2312_v22, %v1750_v25  ;;  %v2175_v51 = vsel %vm2134_vm3, %v2129_v56, %v11011_v63  ;;  %v8223_v22 = vpack.i.bf16 %v11006_v46, %v3154_v13 }
 0x30e   : > { %8154 = vrot.lane.b32.xlu0 %v8153_v17, %s9080_s19  ;;  %v11076_v17 = vld [vmem:[#allocation2 + $0x71] sm:$0xff] }
 0x30f   : > { %8159 = vrot.lane.b32.xlu1 %v8158_v48, %s9081_s20  ;;  %v8218_v24 = vpack.i.bf16 %v3073_v47, %v11076_v17  ;;  %v11146_v47 = vld [vmem:[#allocation2 + $0x91] sm:$0xff] }
 0x310   : > { %v1212_v21 = vpop.permute.xlu0 %1211  ;;  %v1891_v33 = vpop.permute.xlu1 %1890 }
 0x311   : > { %v2404_v2 = vsel %vm2364_vm8, %v2358_v18, %v1891_v33  ;;  %v2221_v42 = vsel %vm2180_vm4, %v2175_v51, %v1212_v21  ;;  %v2959_v21 = vld [vmem:[#allocation2 + $0x78] sm:$0xff] }
 0x312   : > { %8164 = vrot.lane.b32.xlu0 %v8163_v3, %s12771_s23  ;;  %v8228_v43 = vpack.i.bf16 %v11095_v34, %v2959_v21 }
 0x313   : > { %8169 = vrot.lane.b32.xlu1 %v8168_v29, %s9080_s19 }
 0x314   : > { %v1392_v12 = vpop.permute.xlu0 %1391  ;;  %v2032_v40 = vpop.permute.xlu1 %2031 }
 0x315   : > { %v2450_v5 = vsel %vm2410_vm9, %v2404_v2, %v2032_v40  ;;  %v2267_v53 = vsel %vm2226_vm5, %v2221_v42, %v1392_v12  ;;  %v11098_v2 = vld [vmem:[#allocation2 + $0x79] sm:$0xff]  ;;  %v3155_v12 = vld [vmem:[#allocation2 + $0x6e] sm:$0xff]  ;;  %v3074_v40 = vld [vmem:[#allocation2 + $0x64] sm:$0xff] }
 0x316   : > { %7868 = vmatmul.mubr.msk.f32.gmra.mxu0 %vm2468_vm10, %v2450_v5  ;;  %8174 = vrot.lane.b32.xlu0 %v8173_v10, %s9081_s20  ;;  %v8233_v46 = vpack.i.bf16 %v3074_v40, %v11098_v2  ;;  %v11128_v42 = vld [vmem:[#allocation2 + $0x62] sm:$0xff] }
 0x317   : > { %8179 = vrot.lane.b32.xlu1 %v8178_v59, %s12771_s23  ;;  %v2809_v62 = vpop.f32.mrf.mxu0  ;;  %7870 = vmatprep.mubr.msk.f32.mxu0 %vm9075_vm1, %v9070_v0  ;;  %v8238_v59 = vpack.i.bf16 %v11028_v27, %v3155_v12 }
 0x318   : > { %v2810_v23 = vadd.f32 %v10997_v45, %v2809_v62  ;;  %v11048_v31 = vpop.permute.xlu0 %853  ;;  %v1572_v26 = vpop.permute.xlu1 %1571  ;;  %v8964_v62 = vld [vmem:[%s9208_s24 + $0x148] sm:$0xff] }
 0x319   : > { %v7833_v1 = vpop.f32.mrf.mxu0  ;;  %v2313_v25 = vsel %vm2272_vm6, %v2267_v53, %v1572_v26  ;;  %v11111_v26 = vld [vmem:[#allocation2 + $0x81] sm:$0xff] }
 0x31a   : > { %2925 = vst.msk [vmem:[#allocation2 + $0xd8] sm:$0xff] %vm2410_vm9, %v2810_v23  ;;  %8184 = vrot.lane.b32.xlu0 %v8183_v57, %s9080_s19  ;;  %v2130_v23 = vsel %vm2088_vm2, %v8964_v62, %v11048_v31  ;;  %v3157_v53 = vld [vmem:[#allocation2 + $0x7e] sm:$0xff] }
 0x31b   : > { %8189 = vrot.lane.b32.xlu1 %v8188_v19, %s9081_s20  ;;  %v11168_v62 = vld [vmem:[#allocation2 + $0x99] sm:$0xff] }
 0x31c   : > { %v11055_v9 = vpop.permute.xlu0 %1033  ;;  %v1752_v39 = vpop.permute.xlu1 %1751 }
 0x31d   : > { %v2359_v63 = vsel %vm2318_vm7, %v2313_v25, %v1752_v39  ;;  %v2176_v57 = vsel %vm2134_vm3, %v2130_v23, %v11055_v9  ;;  %v8248_v39 = vpack.i.bf16 %v3075_v35, %v11111_v26  ;;  %v2961_v9 = vld [vmem:[#allocation2 + $0x88] sm:$0xff] }
 0x31e   : > { %8194 = vrot.lane.b32.xlu0 %v8193_v60, %s12771_s23  ;;  %v3156_v60 = vld [vmem:[#allocation2 + $0x76] sm:$0xff] }
 0x31f   : > { %8199 = vrot.lane.b32.xlu1 %v8198_v54, %s9080_s19  ;;  %v8253_v50 = vpack.i.bf16 %v11040_v36, %v3156_v60  ;;  %v11180_v60 = vld [vmem:[#allocation2 + $0xa1] sm:$0xff] }
 0x320   : > { %v1214_v38 = vpop.permute.xlu0 %1213  ;;  %v1893_v8 = vpop.permute.xlu1 %1892 }
 0x321   : > { %v2405_v48 = vsel %vm2364_vm8, %v2359_v63, %v1893_v8  ;;  %v2222_v1 = vsel %vm2180_vm4, %v2176_v57, %v1214_v38  ;;  %v8258_v8 = vpack.i.bf16 %v11128_v42, %v2961_v9  ;;  %v11183_v9 = vld [vmem:[#allocation2 + $0x7a] sm:$0xff] }
 0x322   : > { %8204 = vrot.lane.b32.xlu0 %v8203_v32, %s9081_s20  ;;  %v11132_v32 = vld [vmem:[#allocation2 + $0x89] sm:$0xff] }
 0x323   : > { %8209 = vrot.lane.b32.xlu1 %v8208_v4, %s12771_s23 }
 0x324   : > { %v1394_v6 = vpop.permute.xlu0 %1393  ;;  %v2034_v28 = vpop.permute.xlu1 %2033 }
 0x325   : > { %v2451_v7 = vsel %vm2410_vm9, %v2405_v48, %v2034_v28  ;;  %v2268_v31 = vsel %vm2226_vm5, %v2222_v1, %v1394_v6  ;;  %v8263_v48 = vpack.i.bf16 %v3076_v16, %v11132_v32  ;;  %v8268_v28 = vpack.i.bf16 %v11061_v49, %v3157_v53  ;;  %v3158_v49 = vld [vmem:[#allocation2 + $0x86] sm:$0xff] }
 0x326   : > { %7871 = vmatmul.mubr.msk.f32.gmra.mxu0 %vm2468_vm10, %v2451_v7  ;;  %8214 = vrot.lane.b32.xlu0 %v8213_v11, %s9080_s19  ;;  %v2962_v11 = vld [vmem:[#allocation2 + $0x90] sm:$0xff]  ;;  %v3078_v1 = vld [vmem:[#allocation2 + $0x84] sm:$0xff] }
 0x327   : > { %8219 = vrot.lane.b32.xlu1 %v8218_v24, %s9081_s20  ;;  %v2814_v33 = vpop.f32.mrf.mxu0  ;;  %7873 = vmatprep.mubr.msk.f32.mxu0 %vm9075_vm1, %v9070_v0  ;;  %v11149_v7 = vld [vmem:[#allocation2 + $0x6a] sm:$0xff] }
 0x328   : > { %v2815_v3 = vadd.f32 %v10997_v45, %v2814_v33  ;;  %v11092_v55 = vpop.permute.xlu0 %855  ;;  %v1574_v29 = vpop.permute.xlu1 %1573  ;;  %v8273_v21 = vpack.i.bf16 %v11149_v7, %v2962_v11  ;;  %v3077_v33 = vld [vmem:[#allocation2 + $0x7c] sm:$0xff]  ;;  %v2965_v53 = vld [vmem:[#allocation2 + $0xa8] sm:$0xff] }
 0x329   : > { %v7836_v18 = vpop.f32.mrf.mxu0  ;;  %v2314_v54 = vsel %vm2272_vm6, %v2268_v31, %v1574_v29  ;;  %v8965_v29 = vld [vmem:[%s9208_s24 + $0x150] sm:$0xff] }
 0x32a   : > { %2926 = vst.msk [vmem:[#allocation2 + $0xe0] sm:$0xff] %vm2410_vm9, %v2815_v3  ;;  %8224 = vrot.lane.b32.xlu0 %v8223_v22, %s12771_s23  ;;  %v8278_v3 = vpack.i.bf16 %v3077_v33, %v11146_v47  ;;  %v2131_v22 = vsel %vm2088_vm2, %v8965_v29, %v11092_v55  ;;  %v2963_v18 = vld [vmem:[#allocation2 + $0x98] sm:$0xff] }
 0x32b   : > { %8229 = vrot.lane.b32.xlu1 %v8228_v43, %s9080_s19 }
 0x32c   : > { %v11103_v10 = vpop.permute.xlu0 %1035  ;;  %v1754_v5 = vpop.permute.xlu1 %1753 }
 0x32d   : > { %v2360_v37 = vsel %vm2318_vm7, %v2314_v54, %v1754_v5  ;;  %v2177_v43 = vsel %vm2134_vm3, %v2131_v22, %v11103_v10  ;;  %v3159_v10 = vld [vmem:[#allocation2 + $0x8e] sm:$0xff] }
 0x32e   : > { %8234 = vrot.lane.b32.xlu0 %v8233_v46, %s9081_s20  ;;  %v8283_v46 = vpack.i.bf16 %v11076_v17, %v3158_v49  ;;  %v8298_v31 = vpack.i.bf16 %v11098_v2, %v3159_v10 }
 0x32f   : > { %8239 = vrot.lane.b32.xlu1 %v8238_v59, %s12771_s23  ;;  %v11164_v59 = vld [vmem:[#allocation2 + $0x72] sm:$0xff] }
 0x330   : > { %v1216_v19 = vpop.permute.xlu0 %1215  ;;  %v1895_v27 = vpop.permute.xlu1 %1894  ;;  %v8288_v55 = vpack.i.bf16 %v11164_v59, %v2963_v18 }
 0x331   : > { %v2406_v56 = vsel %vm2364_vm8, %v2360_v37, %v1895_v27  ;;  %v2223_v12 = vsel %vm2180_vm4, %v2177_v43, %v1216_v19  ;;  %v482_v43 = vld [vmem:[%s9208_s24 + $0x160] sm:$0x3f] }
 0x332   : > { %8244 = vrot.lane.b32.xlu0 %v8243_v44, %s9080_s19  ;;  %v8293_v44 = vpack.i.bf16 %v3078_v1, %v11168_v62 }
 0x333   : > { %8249 = vrot.lane.b32.xlu1 %v8248_v39, %s9081_s20  ;;  %v2964_v39 = vld [vmem:[#allocation2 + $0xa0] sm:$0xff] }
 0x334   : > { %v1396_v58 = vpop.permute.xlu0 %1395  ;;  %v2036_v51 = vpop.permute.xlu1 %2035  ;;  %v8303_v2 = vpack.i.bf16 %v11183_v9, %v2964_v39 }
 0x335   : > { %v2452_v38 = vsel %vm2410_vm9, %v2406_v56, %v2036_v51  ;;  %v2269_v14 = vsel %vm2226_vm5, %v2223_v12, %v1396_v58  ;;  %v3079_v51 = vld [vmem:[#allocation2 + $0x8c] sm:$0xff] }
 0x336   : > { %7874 = vmatmul.mubr.msk.f32.gmra.mxu0 %vm2468_vm10, %v2452_v38  ;;  %8254 = vrot.lane.b32.xlu0 %v8253_v50, %s12771_s23  ;;  %v8308_v38 = vpack.i.bf16 %v3079_v51, %v11180_v60 }
 0x337   : > { %8259 = vrot.lane.b32.xlu1 %v8258_v8, %s9080_s19  ;;  %v2819_v4 = vpop.f32.mrf.mxu0  ;;  %7876 = vmatprep.mubr.msk.f32.mxu0 %vm9075_vm1, %v9070_v0  ;;  %v3160_v8 = vld [vmem:[#allocation2 + $0x96] sm:$0xff] }
 0x338   : > { %v2820_v36 = vadd.f32 %v10997_v45, %v2819_v4  ;;  %v11140_v25 = vpop.permute.xlu0 %857  ;;  %v1576_v63 = vpop.permute.xlu1 %1575 }
 0x339   : > { %v7839_v6 = vpop.f32.mrf.mxu0  ;;  %v2315_v23 = vsel %vm2272_vm6, %v2269_v14, %v1576_v63  ;;  %v11194_v63 = vld [vmem:[#allocation2 + $0x82] sm:$0xff] }
 0x33a   : > { %2927 = vst.msk [vmem:[#allocation2 + $0xe8] sm:$0xff] %vm2410_vm9, %v2820_v36  ;;  %8264 = vrot.lane.b32.xlu0 %v8263_v48, %s9081_s20  ;;  %v8313_v36 = vpack.i.bf16 %v11111_v26, %v3160_v8  ;;  %v8318_v48 = vpack.i.bf16 %v11194_v63, %v2965_v53  ;;  %v11197_v6 = vld [vmem:[#allocation2 + $0xa9] sm:$0xff]  ;;  %v3080_v26 = vld [vmem:[#allocation2 + $0x94] sm:$0xff] }
 0x33b   : > { %8269 = vrot.lane.b32.xlu1 %v8268_v28, %s12771_s23  ;;  %v8966_v28 = vld [vmem:[%s9208_s24 + $0x158] sm:$0xff]  ;;  %v8323_v29 = vpack.i.bf16 %v3080_v26, %v11197_v6  ;;  %v3163_v8 = vld [vmem:[#allocation2 + $0xae] sm:$0xff]  ;;  %v3082_v53 = vld [vmem:[#allocation2 + $0xa4] sm:$0xff] }
 0x33c   : > { %v11151_v24 = vpop.permute.xlu0 %1037  ;;  %v1756_v13 = vpop.permute.xlu1 %1755  ;;  %v2132_v11 = vsel %vm2088_vm2, %v8966_v28, %v11140_v25  ;;  %v2966_v25 = vld [vmem:[#allocation2 + $0xb0] sm:$0xff]  ;;  %v8358_v28 = vpack.i.bf16 %v11168_v62, %v3163_v8  ;;  %v11253_v26 = vld [vmem:[#allocation2 + $0x9a] sm:$0xff] }
 0x33d   : > { %v2361_v57 = vsel %vm2318_vm7, %v2315_v23, %v1756_v13  ;;  %v3161_v13 = vld [vmem:[#allocation2 + $0x9e] sm:$0xff] }
 0x33e   : > { %8274 = vrot.lane.b32.xlu0 %v8273_v21, %s9080_s19  ;;  %v2178_v21 = vsel %vm2134_vm3, %v2132_v11, %v11151_v24  ;;  %v8328_v18 = vpack.i.bf16 %v11132_v32, %v3161_v13  ;;  %v11213_v24 = vld [vmem:[#allocation2 + $0xb1] sm:$0xff]  ;;  %v3081_v23 = vld [vmem:[#allocation2 + $0x9c] sm:$0xff] }
 0x33f   : > { %8279 = vrot.lane.b32.xlu1 %v8278_v3, %s9081_s20  ;;  %v8338_v1 = vpack.i.bf16 %v3081_v23, %v11213_v24  ;;  %v2968_v11 = vld [vmem:[#allocation2 + $0xc0] sm:$0xff] }
 0x340   : > { %v1218_v40 = vpop.permute.xlu0 %1217  ;;  %v1897_v5 = vpop.permute.xlu1 %1896  ;;  %v8363_v62 = vpack.i.bf16 %v11253_v26, %v2968_v11 }
 0x341   : > { %v2407_v17 = vsel %vm2364_vm8, %v2361_v57, %v1897_v5  ;;  %v2224_v33 = vsel %vm2180_vm4, %v2178_v21, %v1218_v40  ;;  %v11217_v40 = vld [vmem:[#allocation2 + $0x8a] sm:$0xff]  ;;  %v11249_v21 = vld [vmem:[#allocation2 + $0xc1] sm:$0xff] }
 0x342   : > { %8284 = vrot.lane.b32.xlu0 %v8283_v46, %s12771_s23  ;;  %v8333_v32 = vpack.i.bf16 %v11217_v40, %v2966_v25  ;;  %v3164_v25 = vld [vmem:[#allocation2 + $0xb6] sm:$0xff] }
 0x343   : > { %8289 = vrot.lane.b32.xlu1 %v8288_v55, %s9080_s19 }
 0x344   : > { %v1398_v19 = vpop.permute.xlu0 %1397  ;;  %v2038_v27 = vpop.permute.xlu1 %2037 }
 0x345   : > { %v2453_v35 = vsel %vm2410_vm9, %v2407_v17, %v2038_v27  ;;  %v2270_v22 = vsel %vm2226_vm5, %v2224_v33, %v1398_v19  ;;  %v3162_v17 = vld [vmem:[#allocation2 + $0xa6] sm:$0xff]  ;;  %v2967_v27 = vld [vmem:[#allocation2 + $0xb8] sm:$0xff] }
 0x346   : > { %7877 = vmatmul.mubr.msk.f32.gmra.mxu0 %vm2468_vm10, %v2453_v35  ;;  %8294 = vrot.lane.b32.xlu0 %v8293_v44, %s9081_s20 }
 0x347   : > { %8299 = vrot.lane.b32.xlu1 %v8298_v31, %s12771_s23  ;;  %v2824_v54 = vpop.f32.mrf.mxu0  ;;  %7879 = vmatprep.mubr.msk.f32.mxu0 %vm9075_vm1, %v9070_v0 }
 0x348   : > { %v2825_v37 = vadd.f32 %v10997_v45, %v2824_v54  ;;  %v860_v56 = vpop.permute.xlu0 %859  ;;  %v1578_v58 = vpop.permute.xlu1 %1577 }
 0x349   : > { %v7842_v50 = vpop.f32.mrf.mxu0  ;;  %v2316_v12 = vsel %vm2272_vm6, %v2270_v22, %v1578_v58  ;;  %v2133_v10 = vsel %vm2088_vm2, %v482_v43, %v860_v56  ;;  %v8343_v56 = vpack.i.bf16 %v11146_v47, %v3162_v17  ;;  %v11234_v58 = vld [vmem:[#allocation2 + $0x92] sm:$0xff] }
 0x34a   : > { %2928 = vst.msk [vmem:[#allocation2 + $0xf0] sm:$0xff] %vm2410_vm9, %v2825_v37  ;;  %8304 = vrot.lane.b32.xlu0 %v8303_v2, %s9080_s19  ;;  %v8348_v50 = vpack.i.bf16 %v11234_v58, %v2967_v27 }
 0x34b   : > { %8309 = vrot.lane.b32.xlu1 %v8308_v38, %s9081_s20  ;;  %v11238_v38 = vld [vmem:[#allocation2 + $0xb9] sm:$0xff] }
 0x34c   : > { %v1040_v4 = vpop.permute.xlu0 %1039  ;;  %v1758_v16 = vpop.permute.xlu1 %1757 }
 0x34d   : > { %v2362_v5 = vsel %vm2318_vm7, %v2316_v12, %v1758_v16  ;;  %v2179_v19 = vsel %vm2134_vm3, %v2133_v10, %v1040_v4  ;;  %v8373_v10 = vpack.i.bf16 %v11180_v60, %v3164_v25 }
 0x34e   : > { %8314 = vrot.lane.b32.xlu0 %v8313_v36, %s12771_s23  ;;  %v8353_v36 = vpack.i.bf16 %v3082_v53, %v11238_v38 }
 0x34f   : > { %8319 = vrot.lane.b32.xlu1 %v8318_v48, %s9080_s19 }
 0x350   : > { %v1220_v3 = vpop.permute.xlu0 %1219  ;;  %v1899_v49 = vpop.permute.xlu1 %1898 }
 0x351   : > { %v2408_v46 = vsel %vm2364_vm8, %v2362_v5, %v1899_v49  ;;  %v2225_v44 = vsel %vm2180_vm4, %v2179_v19, %v1220_v3  ;;  %v3083_v49 = vld [vmem:[#allocation2 + $0xac] sm:$0xff] }
 0x352   : > { %8324 = vrot.lane.b32.xlu0 %v8323_v29, %s9081_s20  ;;  %v2969_v5 = vld [vmem:[#allocation2 + $0xc8] sm:$0xff] }
 0x353   : > { %8329 = vrot.lane.b32.xlu1 %v8328_v18, %s12771_s23  ;;  %v8368_v18 = vpack.i.bf16 %v3083_v49, %v11249_v21 }
 0x354   : > { %v1400_v14 = vpop.permute.xlu0 %1399  ;;  %v2040_v55 = vpop.permute.xlu1 %2039 }
 0x355   : > { %v2454_v57 = vsel %vm2410_vm9, %v2408_v46, %v2040_v55  ;;  %v2271_v31 = vsel %vm2226_vm5, %v2225_v44, %v1400_v14  ;;  %v3104_v46 = vld [vmem:[#allocation2 + $0x15] sm:$0xff]  ;;  %v2944_v14 = vld [vmem:[#allocation2] sm:$0xff] }
 0x356   : > { %7880 = vmatmul.mubr.msk.f32.gmra.mxu0 %vm2468_vm10, %v2454_v57  ;;  %8334 = vrot.lane.b32.xlu0 %v8333_v32, %s9080_s19  ;;  %v11268_v57 = vld [vmem:[#allocation2 + $0xa2] sm:$0xff] }
 0x357   : > { %8339 = vrot.lane.b32.xlu1 %v8338_v1, %s9081_s20  ;;  %v2829_v35 = vpop.f32.mrf.mxu0  ;;  %7882 = vmatprep.mubr.msk.f32.mxu0 %vm9075_vm1, %v9070_v0  ;;  %v8378_v19 = vpack.i.bf16 %v11268_v57, %v2969_v5  ;;  %v3166_v5 = vld [vmem:[#allocation2 + $0xc6] sm:$0xff] }
 0x358   : > { %v2830_v39 = vadd.f32 %v10997_v45, %v2829_v35  ;;  %v1580_v54 = vpop.permute.xlu0 %1579  ;;  %v1760_v37 = vpop.permute.xlu1 %1759 }
 0x359   : > { %v2317_v2 = vsel %vm2272_vm6, %v2271_v31, %v1580_v54  ;;  %v7845_v51 = vpop.f32.mrf.mxu0 }
 0x35a   : > { %2929 = vst.msk [vmem:[#allocation2 + $0xf8] sm:$0xff] %vm2410_vm9, %v2830_v39  ;;  %8344 = vrot.lane.b32.xlu0 %v8343_v56, %s12771_s23  ;;  %v2363_v4 = vsel %vm2318_vm7, %v2317_v2, %v1760_v37  ;;  %v3084_v37 = vld [vmem:[#allocation2 + $0xb4] sm:$0xff] }
 0x35b   : > { %8349 = vrot.lane.b32.xlu1 %v8348_v50, %s9080_s19 }
 0x35c   : > { %v1901_v47 = vpop.permute.xlu0 %1900  ;;  %v2042_v16 = vpop.permute.xlu1 %2041 }
 0x35d   : > { %v2409_v48 = vsel %vm2364_vm8, %v2363_v4, %v1901_v47  ;;  %v3105_v47 = vld [vmem:[#allocation2 + $0x1d] sm:$0xff] }
 0x35e   : > { %v2455_v13 = vsel %vm2410_vm9, %v2409_v48, %v2042_v16  ;;  %8354 = vrot.lane.b32.xlu0 %v8353_v36, %s9081_s20  ;;  %v2945_v16 = vld [vmem:[#allocation2 + $0x8] sm:$0xff]  ;;  %v2970_v36 = vld [vmem:[#allocation2 + $0xd0] sm:$0xff] }
 0x35f   : > { %8359 = vrot.lane.b32.xlu1 %v8358_v28, %s12771_s23  ;;  %7883 = vmatmul.mubr.msk.f32.gmra.mxu0 %vm2468_vm10, %v2455_v13  ;;  %v11290_v13 = vld [vmem:[#allocation2 + $0xd1] sm:$0xff] }
 0x360   : > { %v8075_v33 = vpop.permute.xlu0 %8074  ;;  %v8080_v3 = vpop.permute.xlu1 %8079  ;;  %7893 = vmatprep.mubr.msk.f32.mxu0 %vm2410_vm9, %v11009_v41 }
 0x361   : > { %v8077_v29 = vunpack.i.h.bf16 %v8075_v33  ;;  %v8076_v22 = vunpack.i.l.bf16 %v8075_v33  ;;  %v8082_v43 = vunpack.i.h.bf16 %v8080_v3  ;;  %v8081_v12 = vunpack.i.l.bf16 %v8080_v3  ;;  %v11297_v3 = vld [vmem:[#allocation2 + $0xaa] sm:$0xff] }
 0x362   : > { %8364 = vrot.lane.b32.xlu0 %v8363_v62, %s9080_s19 }
 0x363   : > { %8369 = vrot.lane.b32.xlu1 %v8368_v18, %s9081_s20  ;;  %7894 = vmatmul.mubr.msk.f32.vlgmr.msra.gmra.mxu0 %vm2410_vm9, %v11024_v30  ;;  %v4250_v41 = vsel %vm2410_vm9, %v3104_v46, %v8076_v22  ;;  %v4128_v55 = vsel %vm2410_vm9, %v2944_v14, %v8077_v29  ;;  %v11271_v30 = vld [vmem:[#allocation2 + $0xc9] sm:$0xff]  ;;  %v8393_v22 = vpack.i.bf16 %v11297_v3, %v2970_v36  ;;  %v3085_v18 = vld [vmem:[#allocation2 + $0xbc] sm:$0xff] }
 0x364   : > { %v8090_v32 = vpop.permute.xlu1 %8089  ;;  %v8085_v23 = vpop.permute.xlu0 %8084  ;;  %7896 = vmatprep.mubr.msk.f32.mxu0 %vm2410_vm9, %v11043_v52  ;;  %v4290_v35 = vsel %vm4168_vm11, %v4250_v41, %v8081_v12  ;;  %v4169_v31 = vsel %vm4168_vm11, %v4128_v55, %v8082_v43  ;;  %v3165_v52 = vld [vmem:[#allocation2 + $0xbe] sm:$0xff]  ;;  %v8383_v51 = vpack.i.bf16 %v3084_v37, %v11271_v30  ;;  %v8398_v12 = vpack.i.bf16 %v3085_v18, %v11290_v13  ;;  %v2946_v55 = vld [vmem:[#allocation2 + $0x10] sm:$0xff] }
 0x365   : > { %v8087_v1 = vunpack.i.h.bf16 %v8085_v23  ;;  %v8086_v17 = vunpack.i.l.bf16 %v8085_v23  ;;  %v8092_v27 = vunpack.i.h.bf16 %v8090_v32  ;;  %v8091_v44 = vunpack.i.l.bf16 %v8090_v32  ;;  %v3106_v41 = vld [vmem:[#allocation2 + $0x25] sm:$0xff] }
 0x366   : > { %8374 = vrot.lane.b32.xlu0 %v8373_v10, %s12771_s23  ;;  %v3086_v37 = vld [vmem:[#allocation2 + $0xc4] sm:$0xff] }
 0x367   : > { %8379 = vrot.lane.b32.xlu1 %v8378_v19, %s9080_s19  ;;  %v2834_v60 = vpop.f32.mrf.mxu0  ;;  %7897 = vmatmul.mubr.msk.f32.gmra.mxu0 %vm2410_vm9, %v11058_v61  ;;  %v4330_v39 = vsel %vm4209_vm12, %v4290_v35, %v8086_v17  ;;  %v4210_v54 = vsel %vm4209_vm12, %v4169_v31, %v8087_v1  ;;  %v8388_v61 = vpack.i.bf16 %v11197_v6, %v3165_v52  ;;  %v11314_v17 = vld [vmem:[#allocation2 + $0xb2] sm:$0xff] }
 0x368   : > { %v2835_v56 = vadd.f32 %v10997_v45, %v2834_v60  ;;  %4563 = vmatprep.mubr.f32.mxu1 %v4330_v39  ;;  %v8095_v2 = vpop.permute.xlu0 %8094  ;;  %7899 = vmatprep.mubr.msk.f32.mxu0 %vm2410_vm9, %v11080_v15  ;;  %v4251_v15 = vsel %vm2410_vm9, %v3105_v47, %v8091_v44  ;;  %v4129_v11 = vsel %vm2410_vm9, %v2945_v16, %v8092_v27  ;;  %v11317_v31 = vld [vmem:[#allocation2 + $0xd9] sm:$0xff] }
 0x369   : > { %v8097_v50 = vunpack.i.h.bf16 %v8095_v2  ;;  %v8096_v8 = vunpack.i.l.bf16 %v8095_v2  ;;  %v8100_v53 = vpop.permute.xlu1 %8099  ;;  %v7848_v4 = vpop.f32.mrf.mxu0  ;;  %4564 = vmatmul.mubr.f32.vlgmr.msra.gmra.mxu1 %v4210_v54  ;;  %v8403_v1 = vpack.i.bf16 %v11213_v24, %v3166_v5  ;;  %v8413_v2 = vpack.i.bf16 %v3086_v37, %v11317_v31 }
 0x36a   : > { %2930 = vst.msk [vmem:[#allocation2 + $0x100] sm:$0xff] %vm2410_vm9, %v2835_v56  ;;  %v8102_v48 = vunpack.i.h.bf16 %v8100_v53  ;;  %v8101_v28 = vunpack.i.l.bf16 %v8100_v53  ;;  %8384 = vrot.lane.b32.xlu0 %v8383_v51, %s9081_s20  ;;  %v3107_v4 = vld [vmem:[#allocation2 + $0x2d] sm:$0xff] }
 0x36b   : > { %8389 = vrot.lane.b32.xlu1 %v8388_v61, %s12771_s23  ;;  %7900 = vmatmul.mubr.msk.f32.gmra.mxu0 %vm2410_vm9, %v11095_v34  ;;  %v4291_v6 = vsel %vm4168_vm11, %v4251_v15, %v8096_v8  ;;  %v4170_v33 = vsel %vm4168_vm11, %v4129_v11, %v8097_v50  ;;  %v2972_v61 = vld [vmem:[#allocation2 + $0xe0] sm:$0xff] }
 0x36c   : > { %v8105_v62 = vpop.permute.xlu0 %8104  ;;  %7902 = vmatprep.mubr.msk.f32.mxu0 %vm2410_vm9, %v11116_v20  ;;  %v4331_v49 = vsel %vm4209_vm12, %v4291_v6, %v8101_v28  ;;  %v4211_v29 = vsel %vm4209_vm12, %v4170_v33, %v8102_v48  ;;  %v2971_v20 = vld [vmem:[#allocation2 + $0xd8] sm:$0xff] }
 0x36d   : > { %v8107_v25 = vunpack.i.h.bf16 %v8105_v62  ;;  %v8106_v43 = vunpack.i.l.bf16 %v8105_v62  ;;  %v8110_v34 = vpop.permute.xlu1 %8109  ;;  %4568 = vmatprep.mubr.f32.mxu1 %v4331_v49  ;;  %v8408_v35 = vpack.i.bf16 %v11314_v17, %v2971_v20  ;;  %v11341_v11 = vld [vmem:[#allocation2 + $0xba] sm:$0xff] }
 0x36e   : > { %v8112_v46 = vunpack.i.h.bf16 %v8110_v34  ;;  %v8111_v14 = vunpack.i.l.bf16 %v8110_v34  ;;  %4569 = vmatmul.mubr.f32.gmra.mxu1 %v4211_v29  ;;  %8394 = vrot.lane.b32.xlu0 %v8393_v22, %s9080_s19  ;;  %v8423_v29 = vpack.i.bf16 %v11341_v11, %v2972_v61  ;;  %v3087_v22 = vld [vmem:[#allocation2 + $0xcc] sm:$0xff] }
 0x36f   : > { %8399 = vrot.lane.b32.xlu1 %v8398_v12, %s9081_s20  ;;  %7903 = vmatmul.mubr.msk.f32.gmra.mxu0 %vm2410_vm9, %v11128_v42  ;;  %v4252_v32 = vsel %vm2410_vm9, %v3106_v41, %v8106_v43  ;;  %v4130_v23 = vsel %vm2410_vm9, %v2946_v55, %v8107_v25  ;;  %v3168_v12 = vld [vmem:[#allocation2 + $0xd6] sm:$0xff] }
 0x370   : > { %v8115_v10 = vpop.permute.xlu0 %8114  ;;  %7905 = vmatprep.mubr.msk.f32.mxu0 %vm2410_vm9, %v11149_v7  ;;  %v4292_v60 = vsel %vm4168_vm11, %v4252_v32, %v8111_v14  ;;  %v4171_v39 = vsel %vm4168_vm11, %v4130_v23, %v8112_v46  ;;  %v3167_v7 = vld [vmem:[#allocation2 + $0xce] sm:$0xff]  ;;  %v2948_v14 = vld [vmem:[#allocation2 + $0x20] sm:$0xff]  ;;  %v8433_v32 = vpack.i.bf16 %v11249_v21, %v3168_v12 }
 0x371   : > { %v8120_v19 = vpop.permute.xlu1 %8119  ;;  %v8117_v27 = vunpack.i.h.bf16 %v8115_v10  ;;  %v8116_v44 = vunpack.i.l.bf16 %v8115_v10  ;;  %v8418_v53 = vpack.i.bf16 %v11238_v38, %v3167_v7  ;;  %v3108_v46 = vld [vmem:[#allocation2 + $0x35] sm:$0xff]  ;;  %v3048_v23 = vld [vmem:[#allocation2 + $0xc2] sm:$0xff] }
 0x372   : > { %v8122_v42 = vunpack.i.h.bf16 %v8120_v19  ;;  %v8121_v52 = vunpack.i.l.bf16 %v8120_v19  ;;  %8404 = vrot.lane.b32.xlu0 %v8403_v1, %s12771_s23 }
 0x373   : > { %8409 = vrot.lane.b32.xlu1 %v8408_v35, %s9080_s19  ;;  %7906 = vmatmul.mubr.msk.f32.gmra.mxu0 %vm2410_vm9, %v11164_v59  ;;  %v4332_v24 = vsel %vm4209_vm12, %v4292_v60, %v8116_v44  ;;  %v4212_v54 = vsel %vm4209_vm12, %v4171_v39, %v8117_v27  ;;  %v2947_v59 = vld [vmem:[#allocation2 + $0x18] sm:$0xff]  ;;  %v11360_v44 = vld [vmem:[#allocation2 + $0xe9] sm:$0xff] }
 0x374   : > { %4573 = vmatprep.mubr.f32.mxu1 %v4332_v24  ;;  %v8125_v56 = vpop.permute.xlu0 %8124  ;;  %7908 = vmatprep.mubr.msk.f32.mxu0 %vm2410_vm9, %v11183_v9  ;;  %v4253_v36 = vsel %vm2410_vm9, %v3107_v4, %v8121_v52  ;;  %v4131_v48 = vsel %vm2410_vm9, %v2947_v59, %v8122_v42  ;;  %v11334_v9 = vld [vmem:[#allocation2 + $0xe1] sm:$0xff]  ;;  %v3088_v39 = vld [vmem:[#allocation2 + $0xd4] sm:$0xff] }
 0x375   : > { %v8127_v51 = vunpack.i.h.bf16 %v8125_v56  ;;  %v8126_v50 = vunpack.i.l.bf16 %v8125_v56  ;;  %v8130_v8 = vpop.permute.xlu1 %8129  ;;  %4574 = vmatmul.mubr.f32.gmra.mxu1 %v4212_v54  ;;  %v8428_v34 = vpack.i.bf16 %v3087_v22, %v11334_v9  ;;  %v3169_v60 = vld [vmem:[#allocation2 + $0xde] sm:$0xff]  ;;  %v8443_v24 = vpack.i.bf16 %v3088_v39, %v11360_v44  ;;  %v8967_v4 = vld [vmem:[#allocation2 + $0x28] sm:$0xff] }
 0x376   : > { %v8132_v47 = vunpack.i.h.bf16 %v8130_v8  ;;  %v8131_v16 = vunpack.i.l.bf16 %v8130_v8  ;;  %8414 = vrot.lane.b32.xlu0 %v8413_v2, %s9081_s20  ;;  %v8448_v2 = vpack.i.bf16 %v11271_v30, %v3169_v60  ;;  %v2975_v22 = vld [vmem:[#allocation2 + $0xf8] sm:$0xff] }
 0x377   : > { %8419 = vrot.lane.b32.xlu1 %v8418_v53, %s12771_s23  ;;  %v2839_v28 = vpop.f32.mrf.mxu0  ;;  %7909 = vmatmul.mubr.msk.f32.gmra.mxu0 %vm2410_vm9, %v11194_v63  ;;  %v4293_v38 = vsel %vm4168_vm11, %v4253_v36, %v8126_v50  ;;  %v4172_v15 = vsel %vm4168_vm11, %v4131_v48, %v8127_v51  ;;  %v3109_v51 = vld [vmem:[#allocation2 + $0x3d] sm:$0xff] }
 0x378   : > { %v2840_v6 = vadd.f32 %v10997_v45, %v2839_v28  ;;  %v8135_v33 = vpop.permute.xlu0 %8134  ;;  %7911 = vmatprep.mubr.msk.f32.mxu0 %vm2410_vm9, %v11217_v40  ;;  %v4333_v62 = vsel %vm4209_vm12, %v4293_v38, %v8131_v16  ;;  %v4213_v49 = vsel %vm4209_vm12, %v4172_v15, %v8132_v47  ;;  %v2973_v40 = vld [vmem:[#allocation2 + $0xe8] sm:$0xff]  ;;  %v3089_v38 = vld [vmem:[#allocation2 + $0xdc] sm:$0xff] }
 0x379   : > { %v8137_v63 = vunpack.i.h.bf16 %v8135_v33  ;;  %v8136_v18 = vunpack.i.l.bf16 %v8135_v33  ;;  %v8140_v25 = vpop.permute.xlu1 %8139  ;;  %v7851_v43 = vpop.f32.mrf.mxu0  ;;  %4578 = vmatprep.mubr.f32.mxu1 %v4333_v62  ;;  %v8438_v27 = vpack.i.bf16 %v3048_v23, %v2973_v40  ;;  %v3049_v47 = vld [vmem:[#allocation2 + $0xca] sm:$0xff]  ;;  %v3050_v40 = vld [vmem:[#allocation2 + $0xd2] sm:$0xff] }
 0x37a   : > { %2931 = vst.msk [vmem:[#allocation2 + $0x108] sm:$0xff] %vm2410_vm9, %v2840_v6  ;;  %v8142_v45 = vunpack.i.h.bf16 %v8140_v25  ;;  %v8141_v5 = vunpack.i.l.bf16 %v8140_v25  ;;  %4579 = vmatmul.mubr.f32.gmra.mxu1 %v4213_v49  ;;  %8424 = vrot.lane.b32.xlu0 %v8423_v29, %s9080_s19  ;;  %v3170_v62 = vld [vmem:[#allocation2 + $0xe6] sm:$0xff]  ;;  %v8968_v25 = vld [vmem:[#allocation2 + $0x30] sm:$0xff] }
 0x37b   : > { %8429 = vrot.lane.b32.xlu1 %v8428_v34, %s9081_s20  ;;  %7912 = vmatmul.mubr.msk.f32.gmra.mxu0 %vm2410_vm9, %v11234_v58  ;;  %v4254_v20 = vsel %vm2410_vm9, %v3108_v46, %v8136_v18  ;;  %v4132_v41 = vsel %vm2410_vm9, %v2948_v14, %v8137_v63  ;;  %v11397_v34 = vld [vmem:[%s12721_s2] ss:$0 sm:$0xff] }
 0x37c   : > { %v8145_v55 = vpop.permute.xlu0 %8144  ;;  %7914 = vmatprep.mubr.msk.f32.mxu0 %vm2410_vm9, %v11253_v26  ;;  %v4294_v58 = vsel %vm4168_vm11, %v4254_v20, %v8141_v5  ;;  %v4173_v52 = vsel %vm4168_vm11, %v4132_v41, %v8142_v45  ;;  %v8463_v5 = vpack.i.bf16 %v11290_v13, %v3170_v62  ;;  %v11432_v62 = vld [vmem:[#allocation2 + $0xf2] sm:$0xff] }
 0x37d   : > { %v8150_v10 = vpop.permute.xlu1 %8149  ;;  %v8147_v1 = vunpack.i.h.bf16 %v8145_v55  ;;  %v8146_v19 = vunpack.i.l.bf16 %v8145_v55  ;;  %v8468_v55 = vpack.i.bf16 %v3050_v40, %v2975_v22 }
 0x37e   : > { %v8152_v35 = vunpack.i.h.bf16 %v8150_v10  ;;  %v8151_v42 = vunpack.i.l.bf16 %v8150_v10  ;;  %8434 = vrot.lane.b32.xlu0 %v8433_v32, %s12771_s23  ;;  %v11402_v32 = vld [vmem:[#allocation2 + $0xf9] sm:$0xff] }
 0x37f   : > { %8439 = vrot.lane.b32.xlu1 %v8438_v27, %s9080_s19  ;;  %7915 = vmatmul.mubr.msk.f32.gmra.mxu0 %vm2410_vm9, %v11268_v57  ;;  %v4334_v21 = vsel %vm4209_vm12, %v4294_v58, %v8146_v19  ;;  %v4214_v26 = vsel %vm4209_vm12, %v4173_v52, %v8147_v1  ;;  %v2974_v57 = vld [vmem:[#allocation2 + $0xf0] sm:$0xff]  ;;  %v3090_v58 = vld [vmem:[#allocation2 + $0xe4] sm:$0xff] }
 0x380   : > { %4583 = vmatprep.mubr.f32.mxu1 %v4334_v21  ;;  %v8155_v7 = vpop.permute.xlu0 %8154  ;;  %7917 = vmatprep.mubr.msk.f32.mxu0 %vm2410_vm9, %v11297_v3  ;;  %v4255_v53 = vsel %vm2410_vm9, %v3109_v51, %v8151_v42  ;;  %v4133_v59 = vsel %vm2410_vm9, %v8967_v4, %v8152_v35  ;;  %v11377_v3 = vld [vmem:[#allocation2 + $0xf1] sm:$0xff]  ;;  %v8453_v28 = vpack.i.bf16 %v3049_v47, %v2974_v57  ;;  %v3051_v35 = vld [vmem:[#allocation2 + $0xda] sm:$0xff] }
 0x381   : > { %v8157_v54 = vunpack.i.h.bf16 %v8155_v7  ;;  %v8156_v37 = vunpack.i.l.bf16 %v8155_v7  ;;  %v8160_v56 = vpop.permute.xlu1 %8159  ;;  %4584 = vmatmul.mubr.f32.gmra.mxu1 %v4214_v26  ;;  %v3171_v27 = vld [vmem:[#allocation2 + $0xee] sm:$0xff]  ;;  %v8473_v60 = vpack.i.bf16 %v3090_v58, %v11402_v32  ;;  %v2976_v7 = vld [vmem:[#allocation2 + $0x100] sm:$0xff]  ;;  %v8970_v57 = vld [vmem:[#allocation2 + $0x38] sm:$0xff] }
 0x382   : > { %v8162_v50 = vunpack.i.h.bf16 %v8160_v56  ;;  %v8161_v8 = vunpack.i.l.bf16 %v8160_v56  ;;  %8444 = vrot.lane.b32.xlu0 %v8443_v24, %s9081_s20  ;;  %v8478_v24 = vpack.i.bf16 %v11317_v31, %v3171_v27  ;;  %v3092_v27 = vld [vmem:[#allocation2 + $0xf4] sm:$0xff] }
 0x383   : > { %8449 = vrot.lane.b32.xlu1 %v8448_v2, %s12771_s23  ;;  %7918 = vmatmul.mubr.msk.f32.gmra.mxu0 %vm2410_vm9, %v11314_v17  ;;  %v4295_v30 = vsel %vm4168_vm11, %v4255_v53, %v8156_v37  ;;  %v4174_v61 = vsel %vm4168_vm11, %v4133_v59, %v8157_v54  ;;  %v8458_v17 = vpack.i.bf16 %v3089_v38, %v11377_v3  ;;  %v3111_v54 = vld [vmem:[#allocation2 + $0x4d] sm:$0xff]  ;;  %v3052_v2 = vld [vmem:[#allocation2 + $0xe2] sm:$0xff] }
 0x384   : > { %v8165_v16 = vpop.permute.xlu0 %8164  ;;  %7920 = vmatprep.mubr.msk.f32.mxu0 %vm2410_vm9, %v11341_v11  ;;  %v4335_v36 = vsel %vm4209_vm12, %v4295_v30, %v8161_v8  ;;  %v4215_v48 = vsel %vm4209_vm12, %v4174_v61, %v8162_v50  ;;  %v3110_v11 = vld [vmem:[#allocation2 + $0x45] sm:$0xff]  ;;  %v8483_v59 = vpack.i.bf16 %v3051_v35, %v2976_v7  ;;  %v3113_v7 = vld [vmem:[#allocation2 + $0x5d] sm:$0xff] }
 0x385   : > { %v8167_v15 = vunpack.i.h.bf16 %v8165_v16  ;;  %v8166_v6 = vunpack.i.l.bf16 %v8165_v16  ;;  %v8170_v33 = vpop.permute.xlu1 %8169  ;;  %4588 = vmatprep.mubr.f32.mxu1 %v4335_v36  ;;  %v11418_v8 = vld [vmem:[#allocation2 + $0x101] sm:$0xff]  ;;  %v11422_v53 = vld [vmem:[#allocation2 + $0xea] sm:$0xff] }
 0x386   : > { %v8172_v49 = vunpack.i.h.bf16 %v8170_v33  ;;  %v8171_v29 = vunpack.i.l.bf16 %v8170_v33  ;;  %4589 = vmatmul.mubr.f32.gmra.mxu1 %v4215_v48  ;;  %8454 = vrot.lane.b32.xlu0 %v8453_v28, %s9080_s19  ;;  %v3091_v16 = vld [vmem:[#allocation2 + $0xec] sm:$0xff] }
 0x387   : > { %8459 = vrot.lane.b32.xlu1 %v8458_v17, %s9081_s20  ;;  %v2844_v63 = vpop.f32.mrf.mxu0  ;;  %7921 = vmatmul.mubr.msk.f32.gmra.mxu0 %vm2410_vm9, %v3048_v23  ;;  %v4256_v18 = vsel %vm2410_vm9, %v3110_v11, %v8166_v6  ;;  %v4134_v43 = vsel %vm2410_vm9, %v8968_v25, %v8167_v15  ;;  %v8488_v38 = vpack.i.bf16 %v3091_v16, %v11418_v8  ;;  %v3172_v15 = vld [vmem:[#allocation2 + $0xf6] sm:$0xff]  ;;  %v2977_v6 = vld [vmem:[#allocation2 + $0x108] sm:$0xff]  ;;  %v8971_v11 = vld [vmem:[#allocation2 + $0x40] sm:$0xff] }
 0x388   : > { %v2845_v12 = vadd.f32 %v11397_v34, %v2844_v63  ;;  %v8175_v45 = vpop.permute.xlu0 %8174  ;;  %7923 = vmatprep.mubr.msk.f32.mxu0 %vm2410_vm9, %v3049_v47  ;;  %v4296_v1 = vsel %vm4168_vm11, %v4256_v18, %v8171_v29  ;;  %v4175_v19 = vsel %vm4168_vm11, %v4134_v43, %v8172_v49  ;;  %v3112_v49 = vld [vmem:[#allocation2 + $0x55] sm:$0xff]  ;;  %v8493_v25 = vpack.i.bf16 %v11334_v9, %v3172_v15 }
 0x389   : > { %v8180_v46 = vpop.permute.xlu1 %8179  ;;  %v8177_v14 = vunpack.i.h.bf16 %v8175_v45  ;;  %v8176_v20 = vunpack.i.l.bf16 %v8175_v45  ;;  %v7854_v41 = vpop.f32.mrf.mxu0  ;;  %v11437_v29 = vld [vmem:[#allocation2 + $0xfa] sm:$0xff]  ;;  %v8498_v43 = vpack.i.bf16 %v3052_v2, %v2977_v6 }
 0x38a   : > { %2932 = vst.msk [vmem:[#allocation2 + $0x110] sm:$0xff] %vm2410_vm9, %v2845_v12  ;;  %v8182_v23 = vunpack.i.h.bf16 %v8180_v46  ;;  %v8181_v10 = vunpack.i.l.bf16 %v8180_v46  ;;  %8464 = vrot.lane.b32.xlu0 %v8463_v5, %s12771_s23 }
 0x38b   : > { %8469 = vrot.lane.b32.xlu1 %v8468_v55, %s9080_s19  ;;  %7924 = vmatmul.mubr.msk.f32.gmra.mxu0 %vm2410_vm9, %v3050_v40  ;;  %v4336_v13 = vsel %vm4209_vm12, %v4296_v1, %v8176_v20  ;;  %v4216_v42 = vsel %vm4209_vm12, %v4175_v19, %v8177_v14  ;;  %v11447_v20 = vld [vmem:[#allocation2 + $0x102] sm:$0xff] }
 0x38c   : > { %4593 = vmatprep.mubr.f32.mxu1 %v4336_v13  ;;  %v8185_v52 = vpop.permute.xlu0 %8184  ;;  %7926 = vmatprep.mubr.msk.f32.mxu0 %vm2410_vm9, %v3051_v35  ;;  %v4257_v51 = vsel %vm2410_vm9, %v3111_v54, %v8181_v10  ;;  %v4135_v50 = vsel %vm2410_vm9, %v8970_v57, %v8182_v23  ;;  %v3173_v23 = vld [vmem:[#allocation2 + $0xfe] sm:$0xff] }
 0x38d   : > { %v8187_v21 = vunpack.i.h.bf16 %v8185_v52  ;;  %v8186_v26 = vunpack.i.l.bf16 %v8185_v52  ;;  %v8190_v39 = vpop.permute.xlu1 %8189  ;;  %4594 = vmatmul.mubr.f32.gmra.mxu1 %v4216_v42 }
 0x38e   : > { %v8192_v37 = vunpack.i.h.bf16 %v8190_v39  ;;  %v8191_v56 = vunpack.i.l.bf16 %v8190_v39  ;;  %8474 = vrot.lane.b32.xlu0 %v8473_v60, %s9081_s20  ;;  %v8508_v39 = vpack.i.bf16 %v11360_v44, %v3173_v23 }
 0x38f   : > { %8479 = vrot.lane.b32.xlu1 %v8478_v24, %s12771_s23  ;;  %7927 = vmatmul.mubr.msk.f32.gmra.mxu0 %vm2410_vm9, %v3052_v2  ;;  %v4297_v31 = vsel %vm4168_vm11, %v4257_v51, %v8186_v26  ;;  %v4176_v4 = vsel %vm4168_vm11, %v4135_v50, %v8187_v21 }
 0x390   : > { %v8195_v30 = vpop.permute.xlu0 %8194  ;;  %7929 = vmatprep.mubr.msk.f32.mxu0 %vm2410_vm9, %v11422_v53  ;;  %v4337_v61 = vsel %vm4209_vm12, %v4297_v31, %v8191_v56  ;;  %v4217_v47 = vsel %vm4209_vm12, %v4176_v4, %v8192_v37  ;;  %v8972_v56 = vld [vmem:[#allocation2 + $0x48] sm:$0xff] }
 0x391   : > { %v8197_v36 = vunpack.i.h.bf16 %v8195_v30  ;;  %v8196_v48 = vunpack.i.l.bf16 %v8195_v30  ;;  %v8200_v28 = vpop.permute.xlu1 %8199  ;;  %4598 = vmatprep.mubr.f32.mxu1 %v4337_v61  ;;  %v11444_v40 = vld [vmem:[#allocation2 + $0x109] sm:$0xff] }
 0x392   : > { %v8202_v33 = vunpack.i.h.bf16 %v8200_v28  ;;  %v8201_v17 = vunpack.i.l.bf16 %v8200_v28  ;;  %4599 = vmatmul.mubr.f32.gmra.mxu1 %v4217_v47  ;;  %8484 = vrot.lane.b32.xlu0 %v8483_v59, %s9080_s19  ;;  %v11455_v1 = vld [vmem:[#allocation2 + $0x10a] sm:$0xff]  ;;  %v8503_v42 = vpack.i.bf16 %v3092_v27, %v11444_v40 }
 0x393   : > { %8489 = vrot.lane.b32.xlu1 %v8488_v38, %s9081_s20  ;;  %7930 = vmatmul.mubr.msk.f32.gmra.mxu0 %vm2410_vm9, %v11432_v62  ;;  %v4258_v22 = vsel %vm2410_vm9, %v3112_v49, %v8196_v48  ;;  %v4136_v63 = vsel %vm2410_vm9, %v8971_v11, %v8197_v36  ;;  %v2978_v58 = vld [vmem:[#allocation2 + $0x110] sm:$0xff]  ;;  %v3174_v47 = vld [vmem:[#allocation2 + $0x106] sm:$0xff] }
 0x394   : > { %v8205_v18 = vpop.permute.xlu0 %8204  ;;  %7932 = vmatprep.mubr.msk.f32.mxu0 %vm2410_vm9, %v11437_v29  ;;  %v4298_v41 = vsel %vm4168_vm11, %v4258_v22, %v8201_v17  ;;  %v4177_v55 = vsel %vm4168_vm11, %v4136_v63, %v8202_v33  ;;  %v8513_v44 = vpack.i.bf16 %v11422_v53, %v2978_v58  ;;  %v3114_v48 = vld [vmem:[#allocation2 + $0x65] sm:$0xff]  ;;  %v8973_v38 = vld [vmem:[#allocation2 + $0x50] sm:$0xff]  ;;  %v8523_v6 = vpack.i.bf16 %v11377_v3, %v3174_v47  ;;  %v3093_v63 = vld [vmem:[#allocation2 + $0xfc] sm:$0xff] }
 0x395   : > { %v8210_v12 = vpop.permute.xlu1 %8209  ;;  %v8207_v45 = vunpack.i.h.bf16 %v8205_v18  ;;  %v8206_v5 = vunpack.i.l.bf16 %v8205_v18 }
 0x396   : > { %v8212_v46 = vunpack.i.h.bf16 %v8210_v12  ;;  %v8211_v14 = vunpack.i.l.bf16 %v8210_v12  ;;  %8494 = vrot.lane.b32.xlu0 %v8493_v25, %s12771_s23 }
 0x397   : > { %8499 = vrot.lane.b32.xlu1 %v8498_v43, %s9080_s19  ;;  %v2849_v9 = vpop.f32.mrf.mxu0  ;;  %7933 = vmatmul.mubr.msk.f32.gmra.mxu0 %vm2410_vm9, %v11447_v20  ;;  %v4338_v10 = vsel %vm4209_vm12, %v4298_v41, %v8206_v5  ;;  %v4218_v19 = vsel %vm4209_vm12, %v4177_v55, %v8207_v45 }
 0x398   : > { %v2850_v13 = vadd.f32 %v11397_v34, %v2849_v9  ;;  %4603 = vmatprep.mubr.f32.mxu1 %v4338_v10  ;;  %v8215_v35 = vpop.permute.xlu0 %8214  ;;  %7935 = vmatprep.mubr.msk.f32.mxu0 %vm2410_vm9, %v11455_v1  ;;  %v4259_v37 = vsel %vm2410_vm9, %v3113_v7, %v8211_v14  ;;  %v4137_v2 = vsel %vm2410_vm9, %v8972_v56, %v8212_v46  ;;  %v3115_v10 = vld [vmem:[#allocation2 + $0x6d] sm:$0xff] }
 0x399   : > { %v8217_v52 = vunpack.i.h.bf16 %v8215_v35  ;;  %v8216_v60 = vunpack.i.l.bf16 %v8215_v35  ;;  %v8220_v21 = vpop.permute.xlu1 %8219  ;;  %v7857_v26 = vpop.f32.mrf.mxu0  ;;  %4604 = vmatmul.mubr.f32.gmra.mxu1 %v4218_v19  ;;  %v8974_v35 = vld [vmem:[#allocation2 + $0x58] sm:$0xff] }
 0x39a   : > { %2933 = vst.msk [vmem:[#allocation2 + $0x118] sm:$0xff] %vm2410_vm9, %v2850_v13  ;;  %v8222_v24 = vunpack.i.h.bf16 %v8220_v21  ;;  %v8221_v54 = vunpack.i.l.bf16 %v8220_v21  ;;  %8504 = vrot.lane.b32.xlu0 %v8503_v42, %s9081_s20  ;;  %v3175_v21 = vld [vmem:[#allocation2 + $0x10e] sm:$0xff] }
 0x39b   : > { %8509 = vrot.lane.b32.xlu1 %v8508_v39, %s12771_s23  ;;  %v4299_v51 = vsel %vm4168_vm11, %v4259_v37, %v8216_v60  ;;  %v4178_v57 = vsel %vm4168_vm11, %v4137_v2, %v8217_v52 }
 0x39c   : > { %v8225_v50 = vpop.permute.xlu0 %8224  ;;  %v4339_v31 = vsel %vm4209_vm12, %v4299_v51, %v8221_v54  ;;  %v4219_v4 = vsel %vm4209_vm12, %v4178_v57, %v8222_v24  ;;  %v8538_v57 = vpack.i.bf16 %v11402_v32, %v3175_v21 }
 0x39d   : > { %v8227_v59 = vunpack.i.h.bf16 %v8225_v50  ;;  %v8226_v30 = vunpack.i.l.bf16 %v8225_v50  ;;  %v8230_v61 = vpop.permute.xlu1 %8229  ;;  %4608 = vmatprep.mubr.f32.mxu1 %v4339_v31  ;;  %v8975_v31 = vld [vmem:[#allocation2 + $0x60] sm:$0xff] }
 0x39e   : > { %v8232_v16 = vunpack.i.h.bf16 %v8230_v61  ;;  %v8231_v36 = vunpack.i.l.bf16 %v8230_v61  ;;  %4609 = vmatmul.mubr.f32.gmra.mxu1 %v4219_v4  ;;  %8514 = vrot.lane.b32.xlu0 %v8513_v44, %s9080_s19  ;;  %v3116_v44 = vld [vmem:[#allocation2 + $0x75] sm:$0xff] }
 0x39f   : > { %v4260_v28 = vsel %vm2410_vm9, %v3114_v48, %v8226_v30  ;;  %v4138_v53 = vsel %vm2410_vm9, %v8973_v38, %v8227_v59 }
 0x3a0   : > { %v8235_v15 = vpop.permute.xlu0 %8234  ;;  %v4300_v18 = vsel %vm4168_vm11, %v4260_v28, %v8231_v36  ;;  %v4179_v3 = vsel %vm4168_vm11, %v4138_v53, %v8232_v16 }
 0x3a1   : > { %v8240_v33 = vpop.permute.xlu1 %8239  ;;  %v8237_v17 = vunpack.i.h.bf16 %v8235_v15  ;;  %v8236_v49 = vunpack.i.l.bf16 %v8235_v15  ;;  %v11477_v22 = vld [vmem:[#allocation2 + $0x112] sm:$0xff]  ;;  %v3117_v15 = vld [vmem:[#allocation2 + $0x7d] sm:$0xff] }
 0x3a2   : > { %v11479_v11 = vld [vmem:[#allocation2 + $0x111] sm:$0xff]  ;;  %v8242_v25 = vunpack.i.h.bf16 %v8240_v33  ;;  %v8241_v43 = vunpack.i.l.bf16 %v8240_v33  ;;  %7936 = vmatmul.mubr.msk.f32.gmra.mxu0 %vm2410_vm9, %v11477_v22  ;;  %8524 = vrot.lane.b32.xlu0 %v8523_v6, %s12771_s23 }
 0x3a3   : > { %v8518_v12 = vpack.i.bf16 %v3093_v63, %v11479_v11  ;;  %v2979_v45 = vld [vmem:[#allocation2 + $0x118] sm:$0xff]  ;;  %v4340_v5 = vsel %vm4209_vm12, %v4300_v18, %v8236_v49  ;;  %v4220_v46 = vsel %vm4209_vm12, %v4179_v3, %v8237_v17  ;;  %v3094_v18 = vld [vmem:[#allocation2 + $0x104] sm:$0xff] }
 0x3a4   : > { %4613 = vmatprep.mubr.f32.mxu1 %v4340_v5  ;;  %v8245_v14 = vpop.permute.xlu0 %8244  ;;  %v8528_v9 = vpack.i.bf16 %v11432_v62, %v2979_v45  ;;  %v4261_v13 = vsel %vm2410_vm9, %v3115_v10, %v8241_v43  ;;  %v4139_v42 = vsel %vm2410_vm9, %v8974_v35, %v8242_v25  ;;  %v8976_v45 = vld [vmem:[#allocation2 + $0x68] sm:$0xff] }
 0x3a5   : > { %8519 = vrot.lane.b32.xlu1 %v8518_v12, %s9081_s20  ;;  %v8247_v41 = vunpack.i.h.bf16 %v8245_v14  ;;  %v8246_v55 = vunpack.i.l.bf16 %v8245_v14  ;;  %v8250_v23 = vpop.permute.xlu1 %8249  ;;  %4614 = vmatmul.mubr.f32.gmra.mxu1 %v4220_v46 }
 0x3a6   : > { %v8252_v19 = vunpack.i.h.bf16 %v8250_v23  ;;  %v8251_v27 = vunpack.i.l.bf16 %v8250_v23 }
 0x3a7   : > { %v2854_v58 = vpop.f32.mrf.mxu0  ;;  %v4301_v52 = vsel %vm4168_vm11, %v4261_v13, %v8246_v55  ;;  %v4180_v60 = vsel %vm4168_vm11, %v4139_v42, %v8247_v41 }
 0x3a8   : > { %v2855_v26 = vadd.f32 %v11397_v34, %v2854_v58  ;;  %v8255_v39 = vpop.permute.xlu0 %8254  ;;  %v4341_v62 = vsel %vm4209_vm12, %v4301_v52, %v8251_v27  ;;  %v4221_v7 = vsel %vm4209_vm12, %v4180_v60, %v8252_v19  ;;  %v3176_v52 = vld [vmem:[#allocation2 + $0x116] sm:$0xff]  ;;  %v3118_v60 = vld [vmem:[#allocation2 + $0x85] sm:$0xff] }
 0x3a9   : > { %8529 = vrot.lane.b32.xlu1 %v8528_v9, %s9080_s19  ;;  %v8257_v24 = vunpack.i.h.bf16 %v8255_v39  ;;  %v8256_v54 = vunpack.i.l.bf16 %v8255_v39  ;;  %v8260_v37 = vpop.permute.xlu1 %8259  ;;  %v7860_v56 = vpop.f32.mrf.mxu0  ;;  %4618 = vmatprep.mubr.f32.mxu1 %v4341_v62  ;;  %v8977_v39 = vld [vmem:[#allocation2 + $0x70] sm:$0xff] }
 0x3aa   : > { %2934 = vst.msk [vmem:[#allocation2 + $0x120] sm:$0xff] %vm2410_vm9, %v2855_v26  ;;  %v8262_v2 = vunpack.i.h.bf16 %v8260_v37  ;;  %v8261_v51 = vunpack.i.l.bf16 %v8260_v37  ;;  %4619 = vmatmul.mubr.f32.gmra.mxu1 %v4221_v7 }
 0x3ab   : > { %v4262_v50 = vsel %vm2410_vm9, %v3116_v44, %v8256_v54  ;;  %v4140_v4 = vsel %vm2410_vm9, %v8975_v31, %v8257_v24 }
 0x3ac   : > { %v8265_v59 = vpop.permute.xlu0 %8264  ;;  %v4302_v48 = vsel %vm4168_vm11, %v4262_v50, %v8261_v51  ;;  %v4181_v28 = vsel %vm4168_vm11, %v4140_v4, %v8262_v2 }
 0x3ad   : > { %8539 = vrot.lane.b32.xlu1 %v8538_v57, %s12771_s23  ;;  %v8270_v30 = vpop.permute.xlu1 %8269  ;;  %v8267_v61 = vunpack.i.h.bf16 %v8265_v59  ;;  %v8266_v47 = vunpack.i.l.bf16 %v8265_v59 }
 0x3ae   : > { %v8272_v16 = vunpack.i.h.bf16 %v8270_v30  ;;  %v8271_v36 = vunpack.i.l.bf16 %v8270_v30 }
 0x3af   : > { %v4342_v32 = vsel %vm4209_vm12, %v4302_v48, %v8266_v47  ;;  %v4222_v38 = vsel %vm4209_vm12, %v4181_v28, %v8267_v61  ;;  %v3119_v47 = vld [vmem:[#allocation2 + $0x8d] sm:$0xff]  ;;  %v8978_v48 = vld [vmem:[#allocation2 + $0x78] sm:$0xff] }
 0x3b0   : > { %4623 = vmatprep.mubr.f32.mxu1 %v4342_v32  ;;  %v8275_v53 = vpop.permute.xlu0 %8274  ;;  %v4263_v25 = vsel %vm2410_vm9, %v3117_v15, %v8271_v36  ;;  %v4141_v5 = vsel %vm2410_vm9, %v8976_v45, %v8272_v16 }
 0x3b1   : > { %v8277_v6 = vunpack.i.h.bf16 %v8275_v53  ;;  %v8276_v33 = vunpack.i.l.bf16 %v8275_v53  ;;  %v8280_v17 = vpop.permute.xlu1 %8279  ;;  %4624 = vmatmul.mubr.f32.gmra.mxu1 %v4222_v38  ;;  %v11508_v49 = vld [vmem:[#allocation2 + $0x11a] sm:$0xff] }
 0x3b2   : > { %v11510_v63 = vld [vmem:[#allocation2 + $0x119] sm:$0xff]  ;;  %v8282_v43 = vunpack.i.h.bf16 %v8280_v17  ;;  %v8281_v12 = vunpack.i.l.bf16 %v8280_v17  ;;  %7938 = vmatprep.mubr.msk.f32.mxu0 %vm2410_vm9, %v11508_v49 }
 0x3b3   : > { %v8533_v3 = vpack.i.bf16 %v3094_v18, %v11510_v63  ;;  %v4303_v46 = vsel %vm4168_vm11, %v4263_v25, %v8276_v33  ;;  %v4182_v14 = vsel %vm4168_vm11, %v4141_v5, %v8277_v6  ;;  %v2980_v41 = vld [vmem:[#allocation2 + $0x120] sm:$0xff]  ;;  %v3095_v18 = vld [vmem:[#allocation2 + $0x10c] sm:$0xff] }
 0x3b4   : > { %v8285_v55 = vpop.permute.xlu0 %8284  ;;  %v4343_v23 = vsel %vm4209_vm12, %v4303_v46, %v8281_v12  ;;  %v4223_v9 = vsel %vm4209_vm12, %v4182_v14, %v8282_v43  ;;  %v8543_v58 = vpack.i.bf16 %v11437_v29, %v2980_v41  ;;  %v8553_v29 = vpack.i.bf16 %v11418_v8, %v3176_v52  ;;  %v3120_v14 = vld [vmem:[#allocation2 + $0x95] sm:$0xff] }
 0x3b5   : > { %8534 = vrot.lane.b32.xlu0 %v8533_v3, %s9081_s20  ;;  %v8287_v10 = vunpack.i.h.bf16 %v8285_v55  ;;  %v8286_v19 = vunpack.i.l.bf16 %v8285_v55  ;;  %v8290_v27 = vpop.permute.xlu1 %8289  ;;  %4628 = vmatprep.mubr.f32.mxu1 %v4343_v23  ;;  %v8979_v55 = vld [vmem:[#allocation2 + $0x80] sm:$0xff] }
 0x3b6   : > { %v8292_v13 = vunpack.i.h.bf16 %v8290_v27  ;;  %v8291_v35 = vunpack.i.l.bf16 %v8290_v27  ;;  %v2859_v42 = vpop.f32.mrf.mxu0  ;;  %4629 = vmatmul.mubr.f32.gmra.mxu1 %v4223_v9 }
 0x3b7   : > { %v2860_v21 = vadd.f32 %v11397_v34, %v2859_v42  ;;  %v4264_v26 = vsel %vm2410_vm9, %v3118_v60, %v8286_v19  ;;  %v4142_v62 = vsel %vm2410_vm9, %v8977_v39, %v8287_v10 }
 0x3b8   : > { %v8295_v7 = vpop.permute.xlu0 %8294  ;;  %v7863_v24 = vpop.f32.mrf.mxu0  ;;  %v4304_v57 = vsel %vm4168_vm11, %v4264_v26, %v8291_v35  ;;  %v4183_v44 = vsel %vm4168_vm11, %v4142_v62, %v8292_v13 }
 0x3b9   : > { %8544 = vrot.lane.b32.xlu0 %v8543_v58, %s9080_s19  ;;  %2935 = vst.msk [vmem:[#allocation2 + $0x128] sm:$0xff] %vm2410_vm9, %v2860_v21  ;;  %v8300_v54 = vpop.permute.xlu1 %8299  ;;  %v8297_v37 = vunpack.i.h.bf16 %v8295_v7  ;;  %v8296_v56 = vunpack.i.l.bf16 %v8295_v7  ;;  %v3177_v21 = vld [vmem:[#allocation2 + $0x11e] sm:$0xff] }
 0x3ba   : > { %v8302_v2 = vunpack.i.h.bf16 %v8300_v54  ;;  %v8301_v51 = vunpack.i.l.bf16 %v8300_v54 }
 0x3bb   : > { %v4344_v50 = vsel %vm4209_vm12, %v4304_v57, %v8296_v56  ;;  %v4224_v31 = vsel %vm4209_vm12, %v4183_v44, %v8297_v37  ;;  %v8568_v56 = vpack.i.bf16 %v11444_v40, %v3177_v21  ;;  %v8980_v44 = vld [vmem:[#allocation2 + $0x88] sm:$0xff]  ;;  %v8982_v21 = vld [vmem:[#allocation2 + $0x98] sm:$0xff] }
 0x3bc   : > { %4633 = vmatprep.mubr.f32.mxu1 %v4344_v50  ;;  %v8305_v4 = vpop.permute.xlu0 %8304  ;;  %v4265_v36 = vsel %vm2410_vm9, %v3119_v47, %v8301_v51  ;;  %v4143_v28 = vsel %vm2410_vm9, %v8978_v48, %v8302_v2  ;;  %v3122_v48 = vld [vmem:[#allocation2 + $0xa5] sm:$0xff] }
 0x3bd   : > { %8554 = vrot.lane.b32.xlu0 %v8553_v29, %s12771_s23  ;;  %v8307_v59 = vunpack.i.h.bf16 %v8305_v4  ;;  %v8306_v30 = vunpack.i.l.bf16 %v8305_v4  ;;  %v8310_v61 = vpop.permute.xlu1 %8309  ;;  %4634 = vmatmul.mubr.f32.gmra.mxu1 %v4224_v31  ;;  %v3121_v29 = vld [vmem:[#allocation2 + $0x9d] sm:$0xff] }
 0x3be   : > { %v8312_v8 = vunpack.i.h.bf16 %v8310_v61  ;;  %v8311_v16 = vunpack.i.l.bf16 %v8310_v61 }
 0x3bf   : > { %v4305_v32 = vsel %vm4168_vm11, %v4265_v36, %v8306_v30  ;;  %v4184_v38 = vsel %vm4168_vm11, %v4143_v28, %v8307_v59 }
 0x3c0   : > { %v8315_v53 = vpop.permute.xlu0 %8314  ;;  %v4345_v15 = vsel %vm4209_vm12, %v4305_v32, %v8311_v16  ;;  %v11539_v6 = vld [vmem:[#allocation2 + $0x122] sm:$0xff]  ;;  %v4225_v33 = vsel %vm4209_vm12, %v4184_v38, %v8312_v8  ;;  %v8981_v32 = vld [vmem:[#allocation2 + $0x90] sm:$0xff] }
 0x3c1   : > { %v11542_v17 = vld [vmem:[#allocation2 + $0x121] sm:$0xff]  ;;  %v8317_v25 = vunpack.i.h.bf16 %v8315_v53  ;;  %v8316_v43 = vunpack.i.l.bf16 %v8315_v53  ;;  %v8320_v12 = vpop.permute.xlu1 %8319  ;;  %4638 = vmatprep.mubr.f32.mxu1 %v4345_v15  ;;  %7939 = vmatmul.mubr.msk.f32.gmra.mxu0 %vm2410_vm9, %v11539_v6 }
 0x3c2   : > { %v8548_v3 = vpack.i.bf16 %v3095_v18, %v11542_v17  ;;  %v8322_v45 = vunpack.i.h.bf16 %v8320_v12  ;;  %v8321_v5 = vunpack.i.l.bf16 %v8320_v12  ;;  %4639 = vmatmul.mubr.f32.gmra.mxu1 %v4225_v33  ;;  %v2981_v46 = vld [vmem:[#allocation2 + $0x128] sm:$0xff]  ;;  %v3096_v18 = vld [vmem:[#allocation2 + $0x114] sm:$0xff] }
 0x3c3   : > { %v4266_v41 = vsel %vm2410_vm9, %v3120_v14, %v8316_v43  ;;  %v4144_v23 = vsel %vm2410_vm9, %v8979_v55, %v8317_v25  ;;  %v8558_v13 = vpack.i.bf16 %v11447_v20, %v2981_v46 }
 0x3c4   : > { %8549 = vrot.lane.b32.xlu1 %v8548_v3, %s9081_s20  ;;  %v8325_v9 = vpop.permute.xlu0 %8324  ;;  %v4306_v52 = vsel %vm4168_vm11, %v4266_v41, %v8321_v5  ;;  %v4185_v60 = vsel %vm4168_vm11, %v4144_v23, %v8322_v45 }
 0x3c5   : > { %v8330_v10 = vpop.permute.xlu1 %8329  ;;  %v8327_v19 = vunpack.i.h.bf16 %v8325_v9  ;;  %v8326_v27 = vunpack.i.l.bf16 %v8325_v9 }
 0x3c6   : > { %v8332_v35 = vunpack.i.h.bf16 %v8330_v10  ;;  %v8331_v42 = vunpack.i.l.bf16 %v8330_v10  ;;  %v2864_v58 = vpop.f32.mrf.mxu0 }
 0x3c7   : > { %v2865_v26 = vadd.f32 %v11397_v34, %v2864_v58  ;;  %v4346_v39 = vsel %vm4209_vm12, %v4306_v52, %v8326_v27  ;;  %v4226_v62 = vsel %vm4209_vm12, %v4185_v60, %v8327_v19 }
 0x3c8   : > { %8559 = vrot.lane.b32.xlu1 %v8558_v13, %s9080_s19  ;;  %4643 = vmatprep.mubr.f32.mxu1 %v4346_v39  ;;  %v8335_v7 = vpop.permute.xlu0 %8334  ;;  %v7866_v24 = vpop.f32.mrf.mxu0  ;;  %v4267_v57 = vsel %vm2410_vm9, %v3121_v29, %v8331_v42  ;;  %v4145_v50 = vsel %vm2410_vm9, %v8980_v44, %v8332_v35  ;;  %v3123_v35 = vld [vmem:[#allocation2 + $0xad] sm:$0xff] }
 0x3c9   : > { %2936 = vst.msk [vmem:[#allocation2 + $0x130] sm:$0xff] %vm2410_vm9, %v2865_v26  ;;  %v8337_v20 = vunpack.i.h.bf16 %v8335_v7  ;;  %v8336_v54 = vunpack.i.l.bf16 %v8335_v7  ;;  %v8340_v37 = vpop.permute.xlu1 %8339  ;;  %4644 = vmatmul.mubr.f32.gmra.mxu1 %v4226_v62  ;;  %v3178_v39 = vld [vmem:[#allocation2 + $0x126] sm:$0xff] }
 0x3ca   : > { %v8342_v2 = vunpack.i.h.bf16 %v8340_v37  ;;  %v8341_v51 = vunpack.i.l.bf16 %v8340_v37 }
 0x3cb   : > { %v4307_v31 = vsel %vm4168_vm11, %v4267_v57, %v8336_v54  ;;  %v4186_v4 = vsel %vm4168_vm11, %v4145_v50, %v8337_v20  ;;  %v3124_v50 = vld [vmem:[#allocation2 + $0xb5] sm:$0xff] }
 0x3cc   : > { %8569 = vrot.lane.b32.xlu1 %v8568_v56, %s12771_s23  ;;  %v8345_v59 = vpop.permute.xlu0 %8344  ;;  %v4347_v30 = vsel %vm4209_vm12, %v4307_v31, %v8341_v51  ;;  %v4227_v61 = vsel %vm4209_vm12, %v4186_v4, %v8342_v2  ;;  %v8583_v51 = vpack.i.bf16 %v11479_v11, %v3178_v39  ;;  %v8983_v4 = vld [vmem:[#allocation2 + $0xa0] sm:$0xff] }
 0x3cd   : > { %v8347_v40 = vunpack.i.h.bf16 %v8345_v59  ;;  %v8346_v47 = vunpack.i.l.bf16 %v8345_v59  ;;  %v8350_v8 = vpop.permute.xlu1 %8349  ;;  %4648 = vmatprep.mubr.f32.mxu1 %v4347_v30 }
 0x3ce   : > { %v8352_v16 = vunpack.i.h.bf16 %v8350_v8  ;;  %v8351_v36 = vunpack.i.l.bf16 %v8350_v8  ;;  %4649 = vmatmul.mubr.f32.gmra.mxu1 %v4227_v61 }
 0x3cf   : > { %v4268_v28 = vsel %vm2410_vm9, %v3122_v48, %v8346_v47  ;;  %v4146_v38 = vsel %vm2410_vm9, %v8981_v32, %v8347_v40 }
 0x3d0   : > { %v8355_v53 = vpop.permute.xlu0 %8354  ;;  %v11568_v15 = vld [vmem:[#allocation2 + $0x12a] sm:$0xff]  ;;  %v4308_v46 = vsel %vm4168_vm11, %v4268_v28, %v8351_v36  ;;  %v4187_v14 = vsel %vm4168_vm11, %v4146_v38, %v8352_v16 }
 0x3d1   : > { %v11570_v33 = vld [vmem:[#allocation2 + $0x129] sm:$0xff]  ;;  %v8360_v25 = vpop.permute.xlu1 %8359  ;;  %v8357_v43 = vunpack.i.h.bf16 %v8355_v53  ;;  %v8356_v12 = vunpack.i.l.bf16 %v8355_v53  ;;  %7941 = vmatprep.mubr.msk.f32.mxu0 %vm2410_vm9, %v11568_v15 }
 0x3d2   : > { %v8563_v3 = vpack.i.bf16 %v3096_v18, %v11570_v33  ;;  %v8362_v45 = vunpack.i.h.bf16 %v8360_v25  ;;  %v8361_v5 = vunpack.i.l.bf16 %v8360_v25  ;;  %v2982_v41 = vld [vmem:[#allocation2 + $0x130] sm:$0xff]  ;;  %v3097_v18 = vld [vmem:[#allocation2 + $0x11c] sm:$0xff] }
 0x3d3   : > { %v4348_v55 = vsel %vm4209_vm12, %v4308_v46, %v8356_v12  ;;  %v4228_v23 = vsel %vm4209_vm12, %v4187_v14, %v8357_v43  ;;  %v8573_v13 = vpack.i.bf16 %v11455_v1, %v2982_v41  ;;  %v8984_v41 = vld [vmem:[#allocation2 + $0xa8] sm:$0xff] }
 0x3d4   : > { %8564 = vrot.lane.b32.xlu0 %v8563_v3, %s9081_s20  ;;  %4653 = vmatprep.mubr.f32.mxu1 %v4348_v55  ;;  %v8365_v9 = vpop.permute.xlu0 %8364  ;;  %v4269_v60 = vsel %vm2410_vm9, %v3123_v35, %v8361_v5  ;;  %v4147_v26 = vsel %vm2410_vm9, %v8982_v21, %v8362_v45  ;;  %v3125_v45 = vld [vmem:[#allocation2 + $0xbd] sm:$0xff]  ;;  %v3179_v39 = vld [vmem:[#allocation2 + $0x12e] sm:$0xff] }
 0x3d5   : > { %v8367_v10 = vunpack.i.h.bf16 %v8365_v9  ;;  %v8366_v19 = vunpack.i.l.bf16 %v8365_v9  ;;  %v8370_v27 = vpop.permute.xlu1 %8369  ;;  %4654 = vmatmul.mubr.f32.gmra.mxu1 %v4228_v23 }
 0x3d6   : > { %v8372_v42 = vunpack.i.h.bf16 %v8370_v27  ;;  %v8371_v58 = vunpack.i.l.bf16 %v8370_v27  ;;  %v2869_v52 = vpop.f32.mrf.mxu0 }
 0x3d7   : > { %v2870_v62 = vadd.f32 %v11397_v34, %v2869_v52  ;;  %v4309_v7 = vsel %vm4168_vm11, %v4269_v60, %v8366_v19  ;;  %v4188_v24 = vsel %vm4168_vm11, %v4147_v26, %v8367_v10 }
 0x3d8   : > { %8574 = vrot.lane.b32.xlu0 %v8573_v13, %s9080_s19  ;;  %v8375_v20 = vpop.permute.xlu0 %8374  ;;  %v7869_v1 = vpop.f32.mrf.mxu0  ;;  %v4349_v54 = vsel %vm4209_vm12, %v4309_v7, %v8371_v58  ;;  %v4229_v37 = vsel %vm4209_vm12, %v4188_v24, %v8372_v42 }
 0x3d9   : > { %2937 = vst.msk [vmem:[#allocation2 + $0x138] sm:$0xff] %vm2410_vm9, %v2870_v62  ;;  %v8377_v56 = vunpack.i.h.bf16 %v8375_v20  ;;  %v8376_v29 = vunpack.i.l.bf16 %v8375_v20  ;;  %v8380_v2 = vpop.permute.xlu1 %8379  ;;  %4658 = vmatprep.mubr.f32.mxu1 %v4349_v54  ;;  %v3126_v62 = vld [vmem:[#allocation2 + $0xc5] sm:$0xff]  ;;  %v8985_v20 = vld [vmem:[#allocation2 + $0xb0] sm:$0xff] }
 0x3da   : > { %v8382_v57 = vunpack.i.h.bf16 %v8380_v2  ;;  %v8381_v44 = vunpack.i.l.bf16 %v8380_v2  ;;  %4659 = vmatmul.mubr.f32.gmra.mxu1 %v4229_v37  ;;  %v8598_v2 = vpack.i.bf16 %v11510_v63, %v3179_v39 }
 0x3db   : > { %v4270_v31 = vsel %vm2410_vm9, %v3124_v50, %v8376_v29  ;;  %v4148_v59 = vsel %vm2410_vm9, %v8983_v4, %v8377_v56 }
 0x3dc   : > { %8584 = vrot.lane.b32.xlu0 %v8583_v51, %s12771_s23  ;;  %v8385_v30 = vpop.permute.xlu0 %8384  ;;  %v4310_v36 = vsel %vm4168_vm11, %v4270_v31, %v8381_v44  ;;  %v4189_v11 = vsel %vm4168_vm11, %v4148_v59, %v8382_v57 }
 0x3dd   : > { %v8390_v61 = vpop.permute.xlu1 %8389  ;;  %v8387_v40 = vunpack.i.h.bf16 %v8385_v30  ;;  %v8386_v47 = vunpack.i.l.bf16 %v8385_v30 }
 0x3de   : > { %v8392_v8 = vunpack.i.h.bf16 %v8390_v61  ;;  %v8391_v16 = vunpack.i.l.bf16 %v8390_v61 }
 0x3df   : > { %v4350_v48 = vsel %vm4209_vm12, %v4310_v36, %v8386_v47  ;;  %v4230_v28 = vsel %vm4209_vm12, %v4189_v11, %v8387_v40  ;;  %v3127_v47 = vld [vmem:[#allocation2 + $0xcd] sm:$0xff]  ;;  %v8986_v36 = vld [vmem:[#allocation2 + $0xb8] sm:$0xff] }
 0x3e0   : > { %4663 = vmatprep.mubr.f32.mxu1 %v4350_v48  ;;  %v8395_v32 = vpop.permute.xlu0 %8394  ;;  %v11598_v38 = vld [vmem:[#allocation2 + $0x132] sm:$0xff]  ;;  %v4271_v14 = vsel %vm2410_vm9, %v3125_v45, %v8391_v16  ;;  %v4149_v55 = vsel %vm2410_vm9, %v8984_v41, %v8392_v8 }
 0x3e1   : > { %v11600_v53 = vld [vmem:[#allocation2 + $0x131] sm:$0xff]  ;;  %v8397_v25 = vunpack.i.h.bf16 %v8395_v32  ;;  %v8396_v43 = vunpack.i.l.bf16 %v8395_v32  ;;  %v8400_v12 = vpop.permute.xlu1 %8399  ;;  %4664 = vmatmul.mubr.f32.gmra.mxu1 %v4230_v28  ;;  %7942 = vmatmul.mubr.msk.f32.gmra.mxu0 %vm2410_vm9, %v11598_v38 }
 0x3e2   : > { %v8578_v3 = vpack.i.bf16 %v3097_v18, %v11600_v53  ;;  %v8402_v5 = vunpack.i.h.bf16 %v8400_v12  ;;  %v8401_v46 = vunpack.i.l.bf16 %v8400_v12  ;;  %v3184_v23 = vld [vmem:[#allocation2 + $0x138] sm:$0xff]  ;;  %v3098_v12 = vld [vmem:[#allocation2 + $0x124] sm:$0xff] }
 0x3e3   : > { %v4311_v9 = vsel %vm4168_vm11, %v4271_v14, %v8396_v43  ;;  %v4190_v10 = vsel %vm4168_vm11, %v4149_v55, %v8397_v25  ;;  %v8588_v52 = vpack.i.bf16 %v11477_v22, %v3184_v23 }
 0x3e4   : > { %8579 = vrot.lane.b32.xlu1 %v8578_v3, %s9081_s20  ;;  %v8405_v19 = vpop.permute.xlu0 %8404  ;;  %v4351_v27 = vsel %vm4209_vm12, %v4311_v9, %v8401_v46  ;;  %v4231_v13 = vsel %vm4209_vm12, %v4190_v10, %v8402_v5  ;;  %v3128_v9 = vld [vmem:[#allocation2 + $0xd5] sm:$0xff] }
 0x3e5   : > { %v8407_v35 = vunpack.i.h.bf16 %v8405_v19  ;;  %v8406_v42 = vunpack.i.l.bf16 %v8405_v19  ;;  %v8410_v58 = vpop.permute.xlu1 %8409  ;;  %4668 = vmatprep.mubr.f32.mxu1 %v4351_v27  ;;  %v8987_v19 = vld [vmem:[#allocation2 + $0xc0] sm:$0xff] }
 0x3e6   : > { %v8412_v60 = vunpack.i.h.bf16 %v8410_v58  ;;  %v8411_v21 = vunpack.i.l.bf16 %v8410_v58  ;;  %v2874_v26 = vpop.f32.mrf.mxu0  ;;  %4669 = vmatmul.mubr.f32.gmra.mxu1 %v4231_v13 }
 0x3e7   : > { %v2875_v7 = vadd.f32 %v11397_v34, %v2874_v26  ;;  %v4272_v24 = vsel %vm2410_vm9, %v3126_v62, %v8406_v42  ;;  %v4150_v1 = vsel %vm2410_vm9, %v8985_v20, %v8407_v35 }
 0x3e8   : > { %8589 = vrot.lane.b32.xlu1 %v8588_v52, %s9080_s19  ;;  %v8415_v54 = vpop.permute.xlu0 %8414  ;;  %v7872_v37 = vpop.f32.mrf.mxu0  ;;  %v4312_v44 = vsel %vm4168_vm11, %v4272_v24, %v8411_v21  ;;  %v4191_v50 = vsel %vm4168_vm11, %v4150_v1, %v8412_v60 }
 0x3e9   : > { %2938 = vst.msk [vmem:[#allocation2 + $0x140] sm:$0xff] %vm2410_vm9, %v2875_v7  ;;  %v8420_v22 = vpop.permute.xlu1 %8419  ;;  %v8417_v56 = vunpack.i.h.bf16 %v8415_v54  ;;  %v8416_v29 = vunpack.i.l.bf16 %v8415_v54  ;;  %v3180_v7 = vld [vmem:[#allocation2 + $0x136] sm:$0xff] }
 0x3ea   : > { %v8422_v51 = vunpack.i.h.bf16 %v8420_v22  ;;  %v8421_v57 = vunpack.i.l.bf16 %v8420_v22 }
 0x3eb   : > { %v4352_v31 = vsel %vm4209_vm12, %v4312_v44, %v8416_v29  ;;  %v4232_v4 = vsel %vm4209_vm12, %v4191_v50, %v8417_v56  ;;  %v8613_v29 = vpack.i.bf16 %v11542_v17, %v3180_v7  ;;  %v8988_v44 = vld [vmem:[#allocation2 + $0xc8] sm:$0xff]  ;;  %v11664_v7 = vld [vmem:[%s12721_s2] ss:$0 sm:$0xff] }
 0x3ec   : > { %8599 = vrot.lane.b32.xlu1 %v8598_v2, %s12771_s23  ;;  %4673 = vmatprep.mubr.f32.mxu1 %v4352_v31  ;;  %v8425_v59 = vpop.permute.xlu0 %8424  ;;  %v4273_v16 = vsel %vm2410_vm9, %v3127_v47, %v8421_v57  ;;  %v4151_v11 = vsel %vm2410_vm9, %v8986_v36, %v8422_v51  ;;  %v3129_v2 = vld [vmem:[#allocation2 + $0xdd] sm:$0xff] }
 0x3ed   : > { %v8427_v30 = vunpack.i.h.bf16 %v8425_v59  ;;  %v8426_v61 = vunpack.i.l.bf16 %v8425_v59  ;;  %v8430_v40 = vpop.permute.xlu1 %8429  ;;  %4674 = vmatmul.mubr.f32.gmra.mxu1 %v4232_v4 }
 0x3ee   : > { %v8432_v63 = vunpack.i.h.bf16 %v8430_v40  ;;  %v8431_v8 = vunpack.i.l.bf16 %v8430_v40 }
 0x3ef   : > { %v4313_v48 = vsel %vm4168_vm11, %v4273_v16, %v8426_v61  ;;  %v4192_v28 = vsel %vm4168_vm11, %v4151_v11, %v8427_v30  ;;  %v3130_v16 = vld [vmem:[#allocation2 + $0xe5] sm:$0xff]  ;;  %v8989_v11 = vld [vmem:[#allocation2 + $0xd0] sm:$0xff] }
 0x3f0   : > { %v8435_v32 = vpop.permute.xlu0 %8434  ;;  %v4353_v18 = vsel %vm4209_vm12, %v4313_v48, %v8431_v8  ;;  %v3196_v25 = vld [vmem:[#allocation2 + $0x13a] sm:$0xff]  ;;  %v4233_v43 = vsel %vm4209_vm12, %v4192_v28, %v8432_v63 }
 0x3f1   : > { %v3190_v3 = vld [vmem:[#allocation2 + $0x139] sm:$0xff]  ;;  %v8437_v45 = vunpack.i.h.bf16 %v8435_v32  ;;  %v8436_v5 = vunpack.i.l.bf16 %v8435_v32  ;;  %v8440_v46 = vpop.permute.xlu1 %8439  ;;  %4678 = vmatprep.mubr.f32.mxu1 %v4353_v18  ;;  %7944 = vmatprep.mubr.msk.f32.mxu0 %vm2410_vm9, %v3196_v25  ;;  %v3099_v18 = vld [vmem:[#allocation2 + $0x12c] sm:$0xff] }
 0x3f2   : > { %v8593_v14 = vpack.i.bf16 %v3098_v12, %v3190_v3  ;;  %v8442_v41 = vunpack.i.h.bf16 %v8440_v46  ;;  %v8441_v55 = vunpack.i.l.bf16 %v8440_v46  ;;  %4679 = vmatmul.mubr.f32.gmra.mxu1 %v4233_v43  ;;  %v3185_v23 = vld [vmem:[#allocation2 + $0x140] sm:$0xff] }
 0x3f3   : > { %v4274_v10 = vsel %vm2410_vm9, %v3128_v9, %v8436_v5  ;;  %v4152_v27 = vsel %vm2410_vm9, %v8987_v19, %v8437_v45  ;;  %v8603_v52 = vpack.i.bf16 %v11508_v49, %v3185_v23 }
 0x3f4   : > { %8594 = vrot.lane.b32.xlu0 %v8593_v14, %s9081_s20  ;;  %v8445_v13 = vpop.permute.xlu0 %8444  ;;  %v4314_v39 = vsel %vm4168_vm11, %v4274_v10, %v8441_v55  ;;  %v4193_v62 = vsel %vm4168_vm11, %v4152_v27, %v8442_v41 }
 0x3f5   : > { %v8450_v35 = vpop.permute.xlu1 %8449  ;;  %v8447_v42 = vunpack.i.h.bf16 %v8445_v13  ;;  %v8446_v58 = vunpack.i.l.bf16 %v8445_v13 }
 0x3f6   : > { %v8452_v60 = vunpack.i.h.bf16 %v8450_v35  ;;  %v8451_v21 = vunpack.i.l.bf16 %v8450_v35  ;;  %v2879_v26 = vpop.f32.mrf.mxu0 }
 0x3f7   : > { %v2880_v24 = vadd.f32 %v11397_v34, %v2879_v26  ;;  %v4354_v20 = vsel %vm4209_vm12, %v4314_v39, %v8446_v58  ;;  %v4234_v1 = vsel %vm4209_vm12, %v4193_v62, %v8447_v42  ;;  %v3131_v42 = vld [vmem:[#allocation2 + $0xed] sm:$0xff]  ;;  %v8990_v26 = vld [vmem:[#allocation2 + $0xd8] sm:$0xff] }
 0x3f8   : > { %8604 = vrot.lane.b32.xlu0 %v8603_v52, %s9080_s19  ;;  %4683 = vmatprep.mubr.f32.mxu1 %v4354_v20  ;;  %v8455_v54 = vpop.permute.xlu0 %8454  ;;  %v7875_v37 = vpop.f32.mrf.mxu0  ;;  %v4275_v57 = vsel %vm2410_vm9, %v3129_v2, %v8451_v21  ;;  %v4153_v50 = vsel %vm2410_vm9, %v8988_v44, %v8452_v60  ;;  %v3181_v62 = vld [vmem:[#allocation2 + $0x13e] sm:$0xff] }
 0x3f9   : > { %2939 = vst.msk [vmem:[#allocation2 + $0x148] sm:$0xff] %vm2410_vm9, %v2880_v24  ;;  %v8457_v49 = vunpack.i.h.bf16 %v8455_v54  ;;  %v8456_v22 = vunpack.i.l.bf16 %v8455_v54  ;;  %v8460_v56 = vpop.permute.xlu1 %8459  ;;  %4684 = vmatmul.mubr.f32.gmra.mxu1 %v4234_v1  ;;  %v8628_v2 = vpack.i.bf16 %v11570_v33, %v3181_v62 }
 0x3fa   : > { %v8462_v51 = vunpack.i.h.bf16 %v8460_v56  ;;  %v8461_v34 = vunpack.i.l.bf16 %v8460_v56 }
 0x3fb   : > { %v4315_v31 = vsel %vm4168_vm11, %v4275_v57, %v8456_v22  ;;  %v4194_v4 = vsel %vm4168_vm11, %v4153_v50, %v8457_v49  ;;  %v3132_v57 = vld [vmem:[#allocation2 + $0xf5] sm:$0xff]  ;;  %v8992_v50 = vld [vmem:[#allocation2 + $0xe0] sm:$0xff] }
 0x3fc   : > { %8614 = vrot.lane.b32.xlu0 %v8613_v29, %s12771_s23  ;;  %v8465_v59 = vpop.permute.xlu0 %8464  ;;  %v4355_v30 = vsel %vm4209_vm12, %v4315_v31, %v8461_v34  ;;  %v4235_v61 = vsel %vm4209_vm12, %v4194_v4, %v8462_v51 }
 0x3fd   : > { %v8467_v17 = vunpack.i.h.bf16 %v8465_v59  ;;  %v8466_v40 = vunpack.i.l.bf16 %v8465_v59  ;;  %v8470_v47 = vpop.permute.xlu1 %8469  ;;  %4688 = vmatprep.mubr.f32.mxu1 %v4355_v30 }
 0x3fe   : > { %v8472_v63 = vunpack.i.h.bf16 %v8470_v47  ;;  %v8471_v8 = vunpack.i.l.bf16 %v8470_v47  ;;  %4689 = vmatmul.mubr.f32.gmra.mxu1 %v4235_v61 }
 0x3ff   : > { %v4276_v36 = vsel %vm2410_vm9, %v3130_v16, %v8466_v40  ;;  %v4154_v48 = vsel %vm2410_vm9, %v8989_v11, %v8467_v17 }
 0x400   : > { %v8475_v28 = vpop.permute.xlu0 %8474  ;;  %v3197_v32 = vld [vmem:[#allocation2 + $0x142] sm:$0xff]  ;;  %v4316_v14 = vsel %vm4168_vm11, %v4276_v36, %v8471_v8  ;;  %v4195_v41 = vsel %vm4168_vm11, %v4154_v48, %v8472_v63  ;;  %v3100_v8 = vld [vmem:[#allocation2 + $0x134] sm:$0xff] }
 0x401   : > { %v3191_v25 = vld [vmem:[#allocation2 + $0x141] sm:$0xff]  ;;  %v8480_v43 = vpop.permute.xlu1 %8479  ;;  %v8477_v12 = vunpack.i.h.bf16 %v8475_v28  ;;  %v8476_v3 = vunpack.i.l.bf16 %v8475_v28  ;;  %7945 = vmatmul.mubr.msk.f32.gmra.mxu0 %vm2410_vm9, %v3197_v32 }
 0x402   : > { %v8608_v45 = vpack.i.bf16 %v3099_v18, %v3191_v25  ;;  %v8482_v5 = vunpack.i.h.bf16 %v8480_v43  ;;  %v8481_v46 = vunpack.i.l.bf16 %v8480_v43  ;;  %v3186_v55 = vld [vmem:[#allocation2 + $0x148] sm:$0xff] }
 0x403   : > { %v4356_v23 = vsel %vm4209_vm12, %v4316_v14, %v8476_v3  ;;  %v4236_v9 = vsel %vm4209_vm12, %v4195_v41, %v8477_v12  ;;  %v8618_v35 = vpack.i.bf16 %v11539_v6, %v3186_v55  ;;  %v3133_v12 = vld [vmem:[#allocation2 + $0xfd] sm:$0xff] }
 0x404   : > { %8609 = vrot.lane.b32.xlu1 %v8608_v45, %s9081_s20  ;;  %4693 = vmatprep.mubr.f32.mxu1 %v4356_v23  ;;  %v8485_v10 = vpop.permute.xlu0 %8484  ;;  %v4277_v21 = vsel %vm2410_vm9, %v3131_v42, %v8481_v46  ;;  %v4155_v39 = vsel %vm2410_vm9, %v8990_v26, %v8482_v5  ;;  %v3182_v46 = vld [vmem:[#allocation2 + $0x146] sm:$0xff] }
 0x405   : > { %v8487_v19 = vunpack.i.h.bf16 %v8485_v10  ;;  %v8486_v27 = vunpack.i.l.bf16 %v8485_v10  ;;  %v8490_v13 = vpop.permute.xlu1 %8489  ;;  %4694 = vmatmul.mubr.f32.gmra.mxu1 %v4236_v9  ;;  %v8993_v23 = vld [vmem:[#allocation2 + $0xe8] sm:$0xff] }
 0x406   : > { %v8492_v58 = vunpack.i.h.bf16 %v8490_v13  ;;  %v8491_v52 = vunpack.i.l.bf16 %v8490_v13  ;;  %v2884_v60 = vpop.f32.mrf.mxu0 }
 0x407   : > { %v2885_v24 = vadd.f32 %v11664_v7, %v2884_v60  ;;  %v4317_v6 = vsel %vm4168_vm11, %v4277_v21, %v8486_v27  ;;  %v4196_v20 = vsel %vm4168_vm11, %v4155_v39, %v8487_v19  ;;  %v3101_v21 = vld [vmem:[#allocation2 + $0x13c] sm:$0xff] }
 0x408   : > { %8619 = vrot.lane.b32.xlu1 %v8618_v35, %s9080_s19  ;;  %v8495_v1 = vpop.permute.xlu0 %8494  ;;  %v7878_v54 = vpop.f32.mrf.mxu0  ;;  %v4357_v37 = vsel %vm4209_vm12, %v4317_v6, %v8491_v52  ;;  %v4237_v49 = vsel %vm4209_vm12, %v4196_v20, %v8492_v58  ;;  %v8643_v35 = vpack.i.bf16 %v11600_v53, %v3182_v46  ;;  %v6014_v53 = vld [vmem:[%s12724_s5 + $0x118] sm:$0xff] }
 0x409   : > { %2940 = vst.msk [vmem:[#allocation2 + $0x150] sm:$0xff] %vm2410_vm9, %v2885_v24  ;;  %v8497_v22 = vunpack.i.h.bf16 %v8495_v1  ;;  %v8496_v56 = vunpack.i.l.bf16 %v8495_v1  ;;  %v8500_v29 = vpop.permute.xlu1 %8499  ;;  %4698 = vmatprep.mubr.f32.mxu1 %v4357_v37  ;;  %7953 = vmatprep.subr.mxu0 %v6014_v53 }
 0x40a   : > { %v8502_v51 = vunpack.i.h.bf16 %v8500_v29  ;;  %v8501_v34 = vunpack.i.l.bf16 %v8500_v29  ;;  %4699 = vmatmul.mubr.f32.gmra.mxu1 %v4237_v49  ;;  %7954 = vmatpush3.msra.mxu0 %v6014_v53  ;;  %v3134_v29 = vld [vmem:[#allocation2 + $0x105] sm:$0xff] }
 0x40b   : > { %v4278_v44 = vsel %vm2410_vm9, %v3132_v57, %v8496_v56  ;;  %v4156_v31 = vsel %vm2410_vm9, %v8992_v50, %v8497_v22  ;;  %v6012_v22 = vld [vmem:[%s12724_s5 + $0x108] sm:$0xff]  ;;  %v8994_v50 = vld [vmem:[#allocation2 + $0xf0] sm:$0xff] }
 0x40c   : > { %8629 = vrot.lane.b32.xlu1 %v8628_v2, %s12771_s23  ;;  %v8505_v4 = vpop.permute.xlu0 %8504  ;;  %v4318_v61 = vsel %vm4168_vm11, %v4278_v44, %v8501_v34  ;;  %v4197_v17 = vsel %vm4168_vm11, %v4156_v31, %v8502_v51  ;;  %v11712_v44 = vld [vmem:[%s12723_s4] ss:$0 sm:$0xff] }
 0x40d   : > { %v8507_v59 = vunpack.i.h.bf16 %v8505_v4  ;;  %v8506_v30 = vunpack.i.l.bf16 %v8505_v4  ;;  %v8510_v40 = vpop.permute.xlu1 %8509  ;;  %v6011_v4 = vld [vmem:[%s12724_s5 + $0x100] sm:$0xff] }
 0x40e   : > { %v8511_v48 = vunpack.i.l.bf16 %v8510_v40  ;;  %v8512_v32 = vunpack.i.h.bf16 %v8510_v40 }
 0x40f   : > { %v4358_v33 = vsel %vm4209_vm12, %v4318_v61, %v8506_v30  ;;  %v4238_v47 = vsel %vm4209_vm12, %v4197_v17, %v8507_v59  ;;  %v3023_v61 = vld [vmem:[#allocation2 + $0x139] sm:$0xf]  ;;  %v3102_v17 = vld [vmem:[#allocation2 + $0x144] sm:$0xff] }
 0x410   : > { %4703 = vmatprep.mubr.f32.mxu1 %v4358_v33  ;;  %v3198_v63 = vld [vmem:[#allocation2 + $0x14a] sm:$0xff]  ;;  %v8515_v36 = vpop.permute.xlu0 %8514  ;;  %v4279_v5 = vsel %vm2410_vm9, %v3133_v12, %v8511_v48  ;;  %v4157_v9 = vsel %vm2410_vm9, %v8993_v23, %v8512_v32 }
 0x411   : > { %v3192_v16 = vld [vmem:[#allocation2 + $0x149] sm:$0xff]  ;;  %4704 = vmatmul.mubr.f32.gmra.mxu1 %v4238_v47  ;;  %7947 = vmatprep.mubr.msk.f32.mxu0 %vm2410_vm9, %v3198_v63  ;;  %v8517_v18 = vunpack.i.h.bf16 %v8515_v36  ;;  %v8516_v25 = vunpack.i.l.bf16 %v8515_v36 }
 0x412   : > { %v8623_v11 = vpack.i.bf16 %v3100_v8, %v3192_v16  ;;  %v3187_v28 = vld [vmem:[#allocation2 + $0x150] sm:$0xff]  ;;  %v3103_v12 = vld [vmem:[#allocation2 + $0x14c] sm:$0xf] }
 0x413   : > { %v8633_v43 = vpack.i.bf16 %v11568_v15, %v3187_v28  ;;  %v4319_v19 = vsel %vm4168_vm11, %v4279_v5, %v8516_v25  ;;  %v4198_v15 = vsel %vm4168_vm11, %v4157_v9, %v8517_v18  ;;  %v3183_v2 = vld [vmem:[#allocation2 + $0x14e] sm:$0xf] }
 0x414   : > { %8624 = vrot.lane.b32.xlu0 %v8623_v11, %s9081_s20  ;;  %v8525_v58 = vpop.permute.xlu0 %8524  ;;  %v8658_v8 = vpack.i.bf16 %v3023_v61, %v3183_v2 }
 0x415   : > { %v8527_v20 = vunpack.i.h.bf16 %v8525_v58  ;;  %v8526_v1 = vunpack.i.l.bf16 %v8525_v58 }
 0x416   : > { %v2889_v45 = vpop.f32.mrf.mxu0 }
 0x417   : > { %v8520_v3 = vpop.permute.xlu1 %8519  ;;  %v2890_v55 = vadd.f32 %v11664_v7, %v2889_v45  ;;  %v4158_v31 = vsel %vm2410_vm9, %v8994_v50, %v8527_v20  ;;  %v3063_v45 = vld [vmem:[#allocation2 + $0x13a] sm:$0xf] }
 0x418   : > { %v8522_v14 = vunpack.i.h.bf16 %v8520_v3  ;;  %v8521_v41 = vunpack.i.l.bf16 %v8520_v3  ;;  %8634 = vrot.lane.b32.xlu0 %v8633_v43, %s9080_s19  ;;  %v7881_v10 = vpop.f32.mrf.mxu0 }
 0x419   : > { %2941 = vst.msk [vmem:[#allocation2 + $0x158] sm:$0xff] %vm2410_vm9, %v2890_v55 }
 0x41a   : > { %v4359_v27 = vsel %vm4209_vm12, %v4319_v19, %v8521_v41  ;;  %v4239_v13 = vsel %vm4209_vm12, %v4198_v15, %v8522_v14 }
 0x41b   : > { %4708 = vmatprep.mubr.f32.mxu1 %v4359_v27  ;;  %v8530_v39 = vpop.permute.xlu1 %8529 }
 0x41c   : > { %4709 = vmatmul.mubr.f32.gmra.mxu1 %v4239_v13  ;;  %8644 = vrot.lane.b32.xlu0 %v8643_v35, %s12771_s23  ;;  %v8532_v54 = vunpack.i.h.bf16 %v8530_v39  ;;  %v8531_v37 = vunpack.i.l.bf16 %v8530_v39  ;;  %v3135_v35 = vld [vmem:[#allocation2 + $0x10d] sm:$0xff]  ;;  %v8995_v39 = vld [vmem:[#allocation2 + $0xf8] sm:$0xff] }
 0x41e   : > { %v4199_v30 = vsel %vm4168_vm11, %v4158_v31, %v8532_v54 }
 0x41f   : > { %v2894_v42 = vpop.f32.mrf.mxu0  ;;  %v8540_v5 = vpop.permute.xlu1 %8539 }
 0x420   : > { %v2895_v52 = vadd.f32 %v11664_v7, %v2894_v42  ;;  %v3199_v60 = vld [vmem:[#allocation2 + $0x152] sm:$0xff]  ;;  %v8541_v9 = vunpack.i.l.bf16 %v8540_v5  ;;  %v8542_v19 = vunpack.i.h.bf16 %v8540_v5 }
 0x421   : > { %v3193_v26 = vld [vmem:[#allocation2 + $0x151] sm:$0xff]  ;;  %v7884_v62 = vpop.f32.mrf.mxu0  ;;  %7948 = vmatmul.mubr.msk.f32.gmra.mxu0 %vm2410_vm9, %v3199_v60 }
 0x422   : > { %v8638_v24 = vpack.i.bf16 %v3101_v21, %v3193_v26  ;;  %2943 = vst.msk [vmem:[#allocation2 + $0x160] sm:$0x3f] %vm2942_vm13, %v2895_v52  ;;  %v3188_v6 = vld [vmem:[#allocation2 + $0x158] sm:$0xff]  ;;  %v6013_v7 = vld [vmem:[%s12724_s5 + $0x110] sm:$0xff]  ;;  %v4281_v52 = vsel %vm2410_vm9, %v3135_v35, %v8541_v9  ;;  %v4159_v62 = vsel %vm2410_vm9, %v8995_v39, %v8542_v19 }
 0x423   : > { %7955 = vmatprep.subr.mxu0 %v6013_v7  ;;  %v8648_v49 = vpack.i.bf16 %v11598_v38, %v3188_v6  ;;  %v7895_v51 = vpop.f32.mrf.mxu0  ;;  %v4280_v38 = vsel %vm2410_vm9, %v3134_v29, %v8526_v1 }
 0x424   : > { %8639 = vrot.lane.b32.xlu1 %v8638_v24, %s9081_s20  ;;  %7956 = vmatpush3.msra.mxu0 %v6013_v7  ;;  %v4320_v59 = vsel %vm4168_vm11, %v4280_v38, %v8531_v37 }
 0x425   : > { %7957 = vmatprep.subr.mxu0 %v6012_v22  ;;  %v4830_v32 = vpop.f32.mrf.mxu0 }
 0x426   : > { %7958 = vmatpush3.msra.mxu0 %v6012_v22 }
 0x427   : > { %v8535_v56 = vpop.permute.xlu0 %8534  ;;  %7959 = vmatprep.subr.mxu0 %v6011_v4  ;;  %v7898_v15 = vpop.f32.mrf.mxu0 }
 0x428   : > { %v8537_v34 = vunpack.i.h.bf16 %v8535_v56  ;;  %v8536_v57 = vunpack.i.l.bf16 %v8535_v56  ;;  %8649 = vrot.lane.b32.xlu1 %v8648_v49, %s9080_s19  ;;  %7960 = vmatpush3.msra.mxu0 %v6011_v4 }
 0x429   : > { %v4565_v40 = vpop.f32.mrf.mxu1  ;;  %v3200_v63 = vld [vmem:[#allocation2 + $0x15a] sm:$0xff]  ;;  %v3201_v16 = vld [vmem:[#allocation2 + $0x162] sm:$0xf]  ;;  %v4840_v24 = vpop.f32.mrf.mxu0 }
 0x42a   : > { %v4360_v33 = vsel %vm4209_vm12, %v4320_v59, %v8536_v57  ;;  %v4240_v47 = vsel %vm4209_vm12, %v4199_v30, %v8537_v34  ;;  %v3194_v36 = vld [vmem:[#allocation2 + $0x159] sm:$0xff]  ;;  %v4566_v11 = vadd.f32 %v11712_v44, %v4565_v40  ;;  %7950 = vmatprep.mubr.msk.f32.mxu0 %vm2410_vm9, %v3200_v63  ;;  %v3195_v28 = vld [vmem:[#allocation2 + $0x161] sm:$0xf] }
 0x42b   : > { %4713 = vmatprep.mubr.f32.mxu1 %v4360_v33  ;;  %v8653_v48 = vpack.i.bf16 %v3102_v17, %v3194_v36  ;;  %v4567_v18 = vpop.f32.mrf.mxu1  ;;  %v3189_v25 = vld [vmem:[#allocation2 + $0x160] sm:$0xf]  ;;  %7951 = vmatmul.mubr.msk.f32.gmra.mxu0 %vm2410_vm9, %v3201_v16  ;;  %v8668_v3 = vpack.i.bf16 %v3103_v12, %v3195_v28  ;;  %v8545_v55 = vpop.permute.xlu0 %8544  ;;  %v3136_v33 = vld [vmem:[#allocation2 + $0x115] sm:$0xff] }
 0x42c   : > { %4714 = vmatmul.mubr.f32.gmra.mxu1 %v4240_v47  ;;  %8659 = vrot.lane.b32.xlu1 %v8658_v8, %s12771_s23  ;;  %v4831_v43 = vadd.f32 %v4830_v32, %v4566_v11  ;;  %v8663_v14 = vpack.i.bf16 %v3063_v45, %v3189_v25  ;;  %v8547_v27 = vunpack.i.h.bf16 %v8545_v55  ;;  %v8546_v13 = vunpack.i.l.bf16 %v8545_v55  ;;  %v7901_v29 = vpop.f32.mrf.mxu0  ;;  %v8996_v11 = vld [vmem:[#allocation2 + $0x100] sm:$0xff] }
 0x42d   : > { %8654 = vrot.lane.b32.xlu0 %v8653_v48, %s9081_s20 }
 0x42e   : > { %5029 = vst.msk [vmem:[#allocation3] sm:$0xff] %vm2410_vm9, %v4831_v43  ;;  %v4570_v46 = vpop.f32.mrf.mxu1  ;;  %v4321_v6 = vsel %vm4168_vm11, %v4281_v52, %v8546_v13  ;;  %v4200_v20 = vsel %vm4168_vm11, %v4159_v62, %v8547_v27  ;;  %v4850_v31 = vpop.f32.mrf.mxu0 }
 0x42f   : > { %v4571_v41 = vadd.f32 %v11712_v44, %v4570_v46  ;;  %v8555_v2 = vpop.permute.xlu0 %8554 }
 0x430   : > { %8669 = vrot.lane.b32.xlu1 %v8668_v3, %s9081_s20  ;;  %v4572_v23 = vpop.f32.mrf.mxu1  ;;  %v8557_v57 = vunpack.i.h.bf16 %v8555_v2  ;;  %v8556_v38 = vunpack.i.l.bf16 %v8555_v2  ;;  %v7904_v55 = vpop.f32.mrf.mxu0 }
 0x431   : > { %8664 = vrot.lane.b32.xlu0 %v8663_v14, %s9080_s19  ;;  %v4836_v10 = vadd.f32 %v7895_v51, %v4571_v41 }
 0x432   : > { %v4282_v36 = vsel %vm2410_vm9, %v3136_v33, %v8556_v38  ;;  %v4160_v48 = vsel %vm2410_vm9, %v8996_v11, %v8557_v57  ;;  %v4860_v35 = vpop.f32.mrf.mxu0 }
 0x433   : > { %5030 = vst.msk [vmem:[#allocation3 + $0x8] sm:$0xff] %vm2410_vm9, %v4836_v10 }
 0x435   : > { %v4575_v42 = vpop.f32.mrf.mxu1  ;;  %v5070_v28 = vld [vmem:[#allocation3] sm:$0xff] }
 0x436   : > { %v8550_v58 = vpop.permute.xlu1 %8549  ;;  %v4576_v60 = vadd.f32 %v11712_v44, %v4575_v42 }
 0x437   : > { %v8552_v21 = vunpack.i.h.bf16 %v8550_v58  ;;  %v8551_v26 = vunpack.i.l.bf16 %v8550_v58  ;;  %v4577_v53 = vpop.f32.mrf.mxu1 }
 0x438   : > { %v4841_v1 = vadd.f32 %v4840_v24, %v4576_v60 }
 0x439   : > { %v4361_v7 = vsel %vm4209_vm12, %v4321_v6, %v8551_v26  ;;  %v4241_v54 = vsel %vm4209_vm12, %v4200_v20, %v8552_v21 }
 0x43a   : > { %4718 = vmatprep.mubr.f32.mxu1 %v4361_v7  ;;  %5031 = vst.msk [vmem:[#allocation3 + $0x10] sm:$0xff] %vm2410_vm9, %v4841_v1  ;;  %v4580_v37 = vpop.f32.mrf.mxu1  ;;  %v8560_v51 = vpop.permute.xlu1 %8559  ;;  %v5107_v17 = vld [vmem:[#allocation3 + $0x1] sm:$0xff] }
 0x43b   : > { %4719 = vmatmul.mubr.f32.gmra.mxu1 %v4241_v54  ;;  %v4581_v49 = vadd.f32 %v11712_v44, %v4580_v37  ;;  %v8562_v4 = vunpack.i.h.bf16 %v8560_v51  ;;  %v8561_v59 = vunpack.i.l.bf16 %v8560_v51  ;;  %v5144_v12 = vmax.f32 %v5070_v28, %v5107_v17  ;;  %v5071_v19 = vld [vmem:[#allocation3 + $0x8] sm:$0xff] }
 0x43c   : > { %v4582_v22 = vpop.f32.mrf.mxu1 }
 0x43d   : > { %v4846_v56 = vadd.f32 %v7898_v15, %v4581_v49  ;;  %v4322_v25 = vsel %vm4168_vm11, %v4282_v36, %v8561_v59  ;;  %v4201_v43 = vsel %vm4168_vm11, %v4160_v48, %v8562_v4  ;;  %v7907_v59 = vpop.f32.mrf.mxu0 }
 0x43e   : > { %v8570_v15 = vpop.permute.xlu1 %8569 }
 0x43f   : > { %5032 = vst.msk [vmem:[#allocation3 + $0x18] sm:$0xff] %vm2410_vm9, %v4846_v56  ;;  %v8571_v39 = vunpack.i.l.bf16 %v8570_v15  ;;  %v8572_v24 = vunpack.i.h.bf16 %v8570_v15  ;;  %v4870_v11 = vpop.f32.mrf.mxu0 }
 0x441   : > { %v4585_v34 = vpop.f32.mrf.mxu1  ;;  %v5108_v23 = vld [vmem:[#allocation3 + $0x9] sm:$0xff] }
 0x442   : > { %v4586_v50 = vadd.f32 %v11712_v44, %v4585_v34  ;;  %v5145_v42 = vmax.f32 %v5071_v19, %v5108_v23  ;;  %v5072_v20 = vld [vmem:[#allocation3 + $0x10] sm:$0xff] }
 0x443   : > { %v4587_v30 = vpop.f32.mrf.mxu1 }
 0x444   : > { %v4851_v61 = vadd.f32 %v4850_v31, %v4586_v50  ;;  %v8997_v31 = vld [vmem:[#allocation2 + $0x108] sm:$0xff] }
 0x445   : > { %v4161_v4 = vsel %vm2410_vm9, %v8997_v31, %v8572_v24 }
 0x446   : > { %v8565_v40 = vpop.permute.xlu0 %8564  ;;  %v5181_v47 = vld [vmem:[#allocation3 + $0x14] sm:$0xff]  ;;  %5033 = vst.msk [vmem:[#allocation3 + $0x20] sm:$0xff] %vm2410_vm9, %v4851_v61  ;;  %v4590_v16 = vpop.f32.mrf.mxu1 }
 0x447   : > { %v8567_v63 = vunpack.i.h.bf16 %v8565_v40  ;;  %v8566_v8 = vunpack.i.l.bf16 %v8565_v40  ;;  %v5218_v32 = vld [vmem:[#allocation3 + $0x15] sm:$0xff]  ;;  %v4591_v18 = vadd.f32 %v11712_v44, %v4590_v16 }
 0x448   : > { %v5255_v3 = vmax.f32 %v5181_v47, %v5218_v32  ;;  %v4592_v45 = vpop.f32.mrf.mxu1  ;;  %v5109_v26 = vld [vmem:[#allocation3 + $0x11] sm:$0xff] }
 0x449   : > { %v4362_v5 = vsel %vm4209_vm12, %v4322_v25, %v8566_v8  ;;  %v4242_v46 = vsel %vm4209_vm12, %v4201_v43, %v8567_v63  ;;  %v4856_v14 = vadd.f32 %v7901_v29, %v4591_v18  ;;  %v5146_v49 = vmax.f32 %v5072_v20, %v5109_v26  ;;  %v3137_v29 = vld [vmem:[#allocation2 + $0x11d] sm:$0xff] }
 0x44a   : > { %4723 = vmatprep.mubr.f32.mxu1 %v4362_v5  ;;  %v5292_v41 = vmax.f32 %v5144_v12, %v5255_v3  ;;  %v8575_v60 = vpop.permute.xlu0 %8574  ;;  %v4283_v34 = vsel %vm2410_vm9, %v3137_v29, %v8571_v39  ;;  %v5073_v8 = vld [vmem:[#allocation3 + $0x18] sm:$0xff] }
 0x44b   : > { %4724 = vmatmul.mubr.f32.gmra.mxu1 %v4242_v46  ;;  %5034 = vst.msk [vmem:[#allocation3 + $0x28] sm:$0xff] %vm2410_vm9, %v4856_v14  ;;  %v8577_v7 = vunpack.i.h.bf16 %v8575_v60  ;;  %v8576_v54 = vunpack.i.l.bf16 %v8575_v60 }
 0x44c   : > { %5329 = vst.msk [vmem:[#allocation4] sm:$0xff] %vm2410_vm9, %v5292_v41 }
 0x44d   : > { %v5182_v9 = vld [vmem:[#allocation3 + $0x1c] sm:$0xff]  ;;  %v4595_v10 = vpop.f32.mrf.mxu1  ;;  %v4323_v30 = vsel %vm4168_vm11, %v4283_v34, %v8576_v54  ;;  %v4202_v61 = vsel %vm4168_vm11, %v4161_v4, %v8577_v7 }
 0x44e   : > { %v5219_v27 = vld [vmem:[#allocation3 + $0x1d] sm:$0xff]  ;;  %v4596_v13 = vadd.f32 %v11712_v44, %v4595_v10  ;;  %v8585_v12 = vpop.permute.xlu0 %8584 }
 0x44f   : > { %v5256_v58 = vmax.f32 %v5182_v9, %v5219_v27  ;;  %v4597_v52 = vpop.f32.mrf.mxu1  ;;  %v5110_v17 = vld [vmem:[#allocation3 + $0x19] sm:$0xff]  ;;  %v8586_v10 = vunpack.i.l.bf16 %v8585_v12  ;;  %v8587_v15 = vunpack.i.h.bf16 %v8585_v12 }
 0x450   : > { %v4861_v21 = vadd.f32 %v4860_v35, %v4596_v13  ;;  %v5147_v48 = vmax.f32 %v5073_v8, %v5110_v17  ;;  %v5074_v5 = vld [vmem:[#allocation3 + $0x20] sm:$0xff]  ;;  %v7910_v13 = vpop.f32.mrf.mxu0 }
 0x451   : > { %v5293_v62 = vmax.f32 %v5145_v42, %v5256_v58  ;;  %v3138_v52 = vld [vmem:[#allocation2 + $0x125] sm:$0xff] }
 0x452   : > { %v5183_v53 = vld [vmem:[#allocation3 + $0x24] sm:$0xff]  ;;  %5035 = vst.msk [vmem:[#allocation3 + $0x30] sm:$0xff] %vm2410_vm9, %v4861_v21  ;;  %v4600_v6 = vpop.f32.mrf.mxu1  ;;  %v4284_v39 = vsel %vm2410_vm9, %v3138_v52, %v8586_v10  ;;  %v4880_v54 = vpop.f32.mrf.mxu0 }
 0x453   : > { %5330 = vst.msk [vmem:[#allocation4 + $0x8] sm:$0xff] %vm2410_vm9, %v5293_v62  ;;  %v5220_v1 = vld [vmem:[#allocation3 + $0x25] sm:$0xff]  ;;  %v4601_v37 = vadd.f32 %v11712_v44, %v4600_v6 }
 0x454   : > { %v5257_v22 = vmax.f32 %v5183_v53, %v5220_v1  ;;  %v4602_v56 = vpop.f32.mrf.mxu1  ;;  %v5111_v25 = vld [vmem:[#allocation3 + $0x21] sm:$0xff] }
 0x455   : > { %v4866_v2 = vadd.f32 %v7904_v55, %v4601_v37  ;;  %v5148_v41 = vmax.f32 %v5074_v5, %v5111_v25  ;;  %v5075_v62 = vld [vmem:[#allocation3 + $0x28] sm:$0xff] }
 0x456   : > { %v8580_v51 = vpop.permute.xlu1 %8579  ;;  %v5294_v57 = vmax.f32 %v5146_v49, %v5257_v22  ;;  %v8998_v1 = vld [vmem:[#allocation2 + $0x110] sm:$0xff] }
 0x457   : > { %v8582_v38 = vunpack.i.h.bf16 %v8580_v51  ;;  %v8581_v50 = vunpack.i.l.bf16 %v8580_v51  ;;  %5036 = vst.msk [vmem:[#allocation3 + $0x38] sm:$0xff] %vm2410_vm9, %v4866_v2  ;;  %v4162_v7 = vsel %vm2410_vm9, %v8998_v1, %v8587_v15  ;;  %v3139_v10 = vld [vmem:[#allocation2 + $0x12d] sm:$0xff]  ;;  %v6010_v1 = vld [vmem:[%s12724_s5 + $0xf8] sm:$0xff] }
 0x458   : > { %5331 = vst.msk [vmem:[#allocation4 + $0x10] sm:$0xff] %vm2410_vm9, %v5294_v57  ;;  %7480 = vmatprep.subr.mxu1 %v6010_v1 }
 0x459   : > { %v4363_v40 = vsel %vm4209_vm12, %v4323_v30, %v8581_v50  ;;  %v4243_v33 = vsel %vm4209_vm12, %v4202_v61, %v8582_v38  ;;  %v5184_v47 = vld [vmem:[#allocation3 + $0x2c] sm:$0xff]  ;;  %v4605_v63 = vpop.f32.mrf.mxu1 }
 0x45a   : > { %4728 = vmatprep.mubr.f32.mxu1 %v4363_v40  ;;  %v5221_v16 = vld [vmem:[#allocation3 + $0x2d] sm:$0xff]  ;;  %v4606_v36 = vadd.f32 %v11712_v44, %v4605_v63  ;;  %v8590_v23 = vpop.permute.xlu1 %8589  ;;  %v7913_v63 = vpop.f32.mrf.mxu0 }
 0x45b   : > { %4729 = vmatmul.mubr.f32.gmra.mxu1 %v4243_v33  ;;  %v5258_v28 = vmax.f32 %v5184_v47, %v5221_v16  ;;  %v4607_v32 = vpop.f32.mrf.mxu1  ;;  %v8592_v35 = vunpack.i.h.bf16 %v8590_v23  ;;  %v8591_v42 = vunpack.i.l.bf16 %v8590_v23  ;;  %v5112_v58 = vld [vmem:[#allocation3 + $0x29] sm:$0xff] }
 0x45c   : > { %v4871_v18 = vadd.f32 %v4870_v11, %v4606_v36  ;;  %v5149_v37 = vmax.f32 %v5075_v62, %v5112_v58  ;;  %v5076_v4 = vld [vmem:[#allocation3 + $0x30] sm:$0xff]  ;;  %v4890_v12 = vpop.f32.mrf.mxu0 }
 0x45d   : > { %v5295_v43 = vmax.f32 %v5147_v48, %v5258_v28  ;;  %v4324_v56 = vsel %vm4168_vm11, %v4284_v39, %v8591_v42  ;;  %v4203_v29 = vsel %vm4168_vm11, %v4162_v7, %v8592_v35  ;;  %v8999_v42 = vld [vmem:[#allocation2 + $0x118] sm:$0xff] }
 0x45e   : > { %v5185_v3 = vld [vmem:[#allocation3 + $0x34] sm:$0xff]  ;;  %5037 = vst.msk [vmem:[#allocation3 + $0x40] sm:$0xff] %vm2410_vm9, %v4871_v18  ;;  %v4610_v45 = vpop.f32.mrf.mxu1  ;;  %v8600_v8 = vpop.permute.xlu1 %8599 }
 0x45f   : > { %5332 = vst.msk [vmem:[#allocation4 + $0x18] sm:$0xff] %vm2410_vm9, %v5295_v43  ;;  %v5222_v46 = vld [vmem:[#allocation3 + $0x35] sm:$0xff]  ;;  %v4611_v14 = vadd.f32 %v11712_v44, %v4610_v45  ;;  %v8602_v32 = vunpack.i.h.bf16 %v8600_v8  ;;  %v8601_v18 = vunpack.i.l.bf16 %v8600_v8 }
 0x460   : > { %v5259_v55 = vmax.f32 %v5185_v3, %v5222_v46  ;;  %v4612_v9 = vpop.f32.mrf.mxu1  ;;  %v5113_v57 = vld [vmem:[#allocation3 + $0x31] sm:$0xff] }
 0x461   : > { %v4876_v19 = vadd.f32 %v7907_v59, %v4611_v14  ;;  %v5150_v61 = vmax.f32 %v5076_v4, %v5113_v57  ;;  %v5077_v28 = vld [vmem:[#allocation3 + $0x38] sm:$0xff]  ;;  %v4285_v35 = vsel %vm2410_vm9, %v3139_v10, %v8601_v18  ;;  %v4163_v58 = vsel %vm2410_vm9, %v8999_v42, %v8602_v32  ;;  %v5994_v7 = vld [vmem:[%s12724_s5 + $0x78] sm:$0xff] }
 0x462   : > { %v5296_v27 = vmax.f32 %v5148_v41, %v5259_v55  ;;  %7481 = vmatpush3.msra.mxu1 %v5994_v7 }
 0x463   : > { %5038 = vst.msk [vmem:[#allocation3 + $0x48] sm:$0xff] %vm2410_vm9, %v4876_v19 }
 0x464   : > { %5333 = vst.msk [vmem:[#allocation4 + $0x20] sm:$0xff] %vm2410_vm9, %v5296_v27 }
 0x465   : > { %v5186_v60 = vld [vmem:[#allocation3 + $0x3c] sm:$0xff]  ;;  %v4615_v21 = vpop.f32.mrf.mxu1 }
 0x466   : > { %v8595_v26 = vpop.permute.xlu0 %8594  ;;  %v5223_v24 = vld [vmem:[#allocation3 + $0x3d] sm:$0xff]  ;;  %v4616_v53 = vadd.f32 %v11712_v44, %v4615_v21 }
 0x467   : > { %v8597_v6 = vunpack.i.h.bf16 %v8595_v26  ;;  %v8596_v20 = vunpack.i.l.bf16 %v8595_v26  ;;  %v5260_v49 = vmax.f32 %v5186_v60, %v5223_v24  ;;  %v4617_v22 = vpop.f32.mrf.mxu1  ;;  %v5114_v16 = vld [vmem:[#allocation3 + $0x39] sm:$0xff] }
 0x468   : > { %v4881_v2 = vadd.f32 %v4880_v54, %v4616_v53  ;;  %v5151_v3 = vmax.f32 %v5077_v28, %v5114_v16  ;;  %v5078_v52 = vld [vmem:[#allocation3 + $0x40] sm:$0xff]  ;;  %v5993_v22 = vld [vmem:[%s12724_s5 + $0x70] sm:$0xff]  ;;  %v6006_v16 = vld [vmem:[%s12724_s5 + $0xd8] sm:$0xff] }
 0x469   : > { %v4364_v51 = vsel %vm4209_vm12, %v4324_v56, %v8596_v20  ;;  %v4244_v34 = vsel %vm4209_vm12, %v4203_v29, %v8597_v6  ;;  %v5297_v38 = vmax.f32 %v5149_v37, %v5260_v49  ;;  %v6009_v37 = vld [vmem:[%s12724_s5 + $0xf0] sm:$0xff]  ;;  %v7916_v56 = vpop.f32.mrf.mxu0  ;;  %v6008_v29 = vld [vmem:[%s12724_s5 + $0xe8] sm:$0xff] }
 0x46a   : > { %4733 = vmatprep.mubr.f32.mxu1 %v4364_v51  ;;  %v5187_v50 = vld [vmem:[#allocation3 + $0x44] sm:$0xff]  ;;  %5039 = vst.msk [vmem:[#allocation3 + $0x50] sm:$0xff] %vm2410_vm9, %v4881_v2  ;;  %v4620_v31 = vpop.f32.mrf.mxu1  ;;  %v8605_v36 = vpop.permute.xlu0 %8604  ;;  %7482 = vmatprep.subr.mxu1 %v6009_v37  ;;  %v5986_v37 = vld [vmem:[%s12724_s5 + $0x38] sm:$0xff] }
 0x46b   : > { %4734 = vmatmul.mubr.f32.gmra.mxu1 %v4244_v34  ;;  %5334 = vst.msk [vmem:[#allocation4 + $0x28] sm:$0xff] %vm2410_vm9, %v5297_v38  ;;  %v5224_v59 = vld [vmem:[#allocation3 + $0x45] sm:$0xff]  ;;  %v4621_v30 = vadd.f32 %v11712_v44, %v4620_v31  ;;  %v8607_v5 = vunpack.i.h.bf16 %v8605_v36  ;;  %v8606_v46 = vunpack.i.l.bf16 %v8605_v36  ;;  %v6007_v31 = vld [vmem:[%s12724_s5 + $0xe0] sm:$0xff] }
 0x46c   : > { %v5261_v17 = vmax.f32 %v5187_v50, %v5224_v59  ;;  %v4622_v40 = vpop.f32.mrf.mxu1  ;;  %v5115_v55 = vld [vmem:[#allocation3 + $0x41] sm:$0xff]  ;;  %7483 = vmatpush3.msra.mxu1 %v5993_v22 }
 0x46d   : > { %v4886_v33 = vadd.f32 %v7910_v13, %v4621_v30  ;;  %v4325_v26 = vsel %vm4168_vm11, %v4285_v35, %v8606_v46  ;;  %v4204_v39 = vsel %vm4168_vm11, %v4163_v58, %v8607_v5  ;;  %v5152_v62 = vmax.f32 %v5078_v52, %v5115_v55  ;;  %v5395_v51 = vld [vmem:[#allocation4 + $0x2] ss:$2 sm:$0xff]  ;;  %7484 = vmatprep.subr.mxu1 %v6008_v29  ;;  %v4900_v40 = vpop.f32.mrf.mxu0  ;;  %v6003_v58 = vld [vmem:[%s12724_s5 + $0xc0] sm:$0xff] }
 0x46e   : > { %v5298_v47 = vmax.f32 %v5150_v61, %v5261_v17  ;;  %v5992_v34 = vld [vmem:[%s12724_s5 + $0x68] sm:$0xff]  ;;  %v5079_v57 = vld [vmem:[#allocation3 + $0x48] sm:$0xff]  ;;  %v8615_v4 = vpop.permute.xlu0 %8614  ;;  %v5991_v17 = vld [vmem:[%s12724_s5 + $0x60] sm:$0xff] }
 0x46f   : > { %5040 = vst.msk [vmem:[#allocation3 + $0x58] sm:$0xff] %vm2410_vm9, %v4886_v33  ;;  %7485 = vmatpush3.msra.mxu1 %v5992_v34  ;;  %v8616_v32 = vunpack.i.l.bf16 %v8615_v4  ;;  %v5985_v34 = vld [vmem:[%s12724_s5 + $0x30] sm:$0xff] }
 0x470   : > { %5335 = vst.msk [vmem:[#allocation4 + $0x30] sm:$0xff] %vm2410_vm9, %v5298_v47  ;;  %7486 = vmatprep.subr.mxu1 %v6007_v31 }
 0x471   : > { %v5188_v11 = vld [vmem:[#allocation3 + $0x4c] sm:$0xff]  ;;  %v4625_v48 = vpop.f32.mrf.mxu1  ;;  %7487 = vmatpush3.msra.mxu1 %v5991_v17 }
 0x472   : > { %v5225_v25 = vld [vmem:[#allocation3 + $0x4d] sm:$0xff]  ;;  %v4626_v43 = vadd.f32 %v11712_v44, %v4625_v48  ;;  %7488 = vmatprep.subr.mxu1 %v6006_v16 }
 0x473   : > { %v5262_v45 = vmax.f32 %v5188_v11, %v5225_v25  ;;  %v4627_v14 = vpop.f32.mrf.mxu1  ;;  %v5116_v2 = vld [vmem:[#allocation3 + $0x49] sm:$0xff] }
 0x474   : > { %v4891_v41 = vadd.f32 %v4890_v12, %v4626_v43  ;;  %v5153_v33 = vmax.f32 %v5079_v57, %v5116_v2  ;;  %v5990_v48 = vld [vmem:[%s12724_s5 + $0x58] sm:$0xff]  ;;  %v6005_v25 = vld [vmem:[%s12724_s5 + $0xd0] sm:$0xff]  ;;  %v8617_v43 = vunpack.i.h.bf16 %v8615_v4  ;;  %v6000_v4 = vld [vmem:[%s12724_s5 + $0xa8] sm:$0xff] }
 0x475   : > { %v5299_v23 = vmax.f32 %v5151_v3, %v5262_v45  ;;  %v5989_v45 = vld [vmem:[%s12724_s5 + $0x50] sm:$0xff]  ;;  %v5080_v5 = vld [vmem:[#allocation3 + $0x50] sm:$0xff]  ;;  %7489 = vmatpush3.msra.mxu1 %v5990_v48 }
 0x476   : > { %v8610_v9 = vpop.permute.xlu1 %8609  ;;  %v5189_v19 = vld [vmem:[#allocation3 + $0x54] sm:$0xff]  ;;  %5041 = vst.msk [vmem:[#allocation3 + $0x60] sm:$0xff] %vm2410_vm9, %v4891_v41  ;;  %v4630_v13 = vpop.f32.mrf.mxu1  ;;  %7490 = vmatprep.subr.mxu1 %v6005_v25 }
 0x477   : > { %v8612_v15 = vunpack.i.h.bf16 %v8610_v9  ;;  %v8611_v27 = vunpack.i.l.bf16 %v8610_v9  ;;  %5336 = vst.msk [vmem:[#allocation4 + $0x38] sm:$0xff] %vm2410_vm9, %v5299_v23  ;;  %v5226_v60 = vld [vmem:[#allocation3 + $0x55] sm:$0xff]  ;;  %v4631_v21 = vadd.f32 %v11712_v44, %v4630_v13  ;;  %7491 = vmatpush3.msra.mxu1 %v5989_v45 }
 0x478   : > { %v5263_v24 = vmax.f32 %v5189_v19, %v5226_v60  ;;  %v4632_v53 = vpop.f32.mrf.mxu1  ;;  %v5117_v28 = vld [vmem:[#allocation3 + $0x51] sm:$0xff] }
 0x479   : > { %v4365_v6 = vsel %vm4209_vm12, %v4325_v26, %v8611_v27  ;;  %v4245_v20 = vsel %vm4209_vm12, %v4204_v39, %v8612_v15  ;;  %v4896_v54 = vadd.f32 %v7913_v63, %v4631_v21  ;;  %v5154_v23 = vmax.f32 %v5080_v5, %v5117_v28  ;;  %v3140_v19 = vld [vmem:[#allocation2 + $0x135] sm:$0xff]  ;;  %v6004_v15 = vld [vmem:[%s12724_s5 + $0xc8] sm:$0xff]  ;;  %v9000_v26 = vld [vmem:[#allocation2 + $0x120] sm:$0xff] }
 0x47a   : > { %4738 = vmatprep.mubr.f32.mxu1 %v4365_v6  ;;  %v5300_v49 = vmax.f32 %v5152_v62, %v5263_v24  ;;  %v8620_v36 = vpop.permute.xlu1 %8619  ;;  %v5988_v27 = vld [vmem:[%s12724_s5 + $0x48] sm:$0xff]  ;;  %v4286_v42 = vsel %vm2410_vm9, %v3140_v19, %v8616_v32  ;;  %v4164_v39 = vsel %vm2410_vm9, %v9000_v26, %v8617_v43  ;;  %7492 = vmatprep.subr.mxu1 %v6004_v15  ;;  %v5987_v62 = vld [vmem:[%s12724_s5 + $0x40] sm:$0xff]  ;;  %v7919_v24 = vpop.f32.mrf.mxu0  ;;  %v5998_v25 = vld [vmem:[%s12724_s5 + $0x98] sm:$0xff] }
 0x47b   : > { %4739 = vmatmul.mubr.f32.gmra.mxu1 %v4245_v20  ;;  %5042 = vst.msk [vmem:[#allocation3 + $0x68] sm:$0xff] %vm2410_vm9, %v4896_v54  ;;  %v8622_v14 = vunpack.i.h.bf16 %v8620_v36  ;;  %v8621_v41 = vunpack.i.l.bf16 %v8620_v36  ;;  %v6002_v20 = vld [vmem:[%s12724_s5 + $0xb8] sm:$0xff]  ;;  %v5081_v29 = vld [vmem:[#allocation3 + $0x58] sm:$0xff]  ;;  %v5997_v5 = vld [vmem:[%s12724_s5 + $0x90] sm:$0xff] }
 0x47c   : > { %5337 = vst.msk [vmem:[#allocation4 + $0x40] sm:$0xff] %vm2410_vm9, %v5300_v49  ;;  %7493 = vmatpush3.msra.mxu1 %v5988_v27  ;;  %v4910_v57 = vpop.f32.mrf.mxu0  ;;  %v5982_v43 = vld [vmem:[%s12724_s5 + $0x18] sm:$0xff]  ;;  %v5980_v15 = vld [vmem:[%s12724_s5 + $0x8] sm:$0xff] }
 0x47d   : > { %v5190_v38 = vld [vmem:[#allocation3 + $0x5c] sm:$0xff]  ;;  %v4635_v50 = vpop.f32.mrf.mxu1  ;;  %v4326_v53 = vsel %vm4168_vm11, %v4286_v42, %v8621_v41  ;;  %v4205_v6 = vsel %vm4168_vm11, %v4164_v39, %v8622_v14  ;;  %7494 = vmatprep.subr.mxu1 %v6003_v58  ;;  %v5981_v14 = vld [vmem:[%s12724_s5 + $0x10] sm:$0xff] }
 0x47e   : > { %v5227_v59 = vld [vmem:[#allocation3 + $0x5d] sm:$0xff]  ;;  %v4636_v30 = vadd.f32 %v11712_v44, %v4635_v50  ;;  %v5507_v61 = vld [vmem:[#allocation4 + $0x2c] ss:$2 sm:$0xff]  ;;  %7495 = vmatpush3.msra.mxu1 %v5987_v62  ;;  %v11897_v41 = vpop.f32.mrf.mxu0 }
 0x47f   : > { %v5264_v47 = vmax.f32 %v5190_v38, %v5227_v59  ;;  %v4637_v63 = vpop.f32.mrf.mxu1  ;;  %v8673_v8 = vpack.i.bf16 %v5395_v51, %v5507_v61  ;;  %v5118_v1 = vld [vmem:[#allocation3 + $0x59] sm:$0xff]  ;;  %7496 = vmatprep.subr.mxu1 %v6002_v20  ;;  %v5423_v20 = vld [vmem:[#allocation4 + $0x4] ss:$2 sm:$0xff] }
 0x480   : > { %v4901_v11 = vadd.f32 %v4900_v40, %v4636_v30  ;;  %v5155_v38 = vmax.f32 %v5081_v29, %v5118_v1  ;;  %7497 = vmatpush3.msra.mxu1 %v5986_v37  ;;  %v5984_v30 = vld [vmem:[%s12724_s5 + $0x28] sm:$0xff]  ;;  %v5999_v40 = vld [vmem:[%s12724_s5 + $0xa0] sm:$0xff]  ;;  %v4920_v1 = vpop.f32.mrf.mxu0 }
 0x481   : > { %v5301_v18 = vmax.f32 %v5153_v33, %v5264_v47  ;;  %8674 = vrot.lane.b32.xlu0 %v8673_v8, %s12771_s23  ;;  %v8630_v33 = vpop.permute.xlu1 %8629  ;;  %v5983_v8 = vld [vmem:[%s12724_s5 + $0x20] sm:$0xff]  ;;  %v5082_v16 = vld [vmem:[#allocation3 + $0x60] sm:$0xff] }
 0x482   : > { %v5191_v12 = vld [vmem:[#allocation3 + $0x64] sm:$0xff]  ;;  %5043 = vst.msk [vmem:[#allocation3 + $0x70] sm:$0xff] %vm2410_vm9, %v4901_v11  ;;  %v4640_v3 = vpop.f32.mrf.mxu1  ;;  %v3141_v19 = vld [vmem:[#allocation2 + $0x13d] sm:$0xff] }
 0x483   : > { %5338 = vst.msk [vmem:[#allocation4 + $0x48] sm:$0xff] %vm2410_vm9, %v5301_v18  ;;  %v5228_v46 = vld [vmem:[#allocation3 + $0x65] sm:$0xff]  ;;  %v4641_v55 = vadd.f32 %v11712_v44, %v4640_v3  ;;  %v8631_v3 = vunpack.i.l.bf16 %v8630_v33 }
 0x484   : > { %v5265_v9 = vmax.f32 %v5191_v12, %v5228_v46  ;;  %v4642_v10 = vpop.f32.mrf.mxu1  ;;  %v5119_v61 = vld [vmem:[#allocation3 + $0x61] sm:$0xff]  ;;  %v8632_v12 = vunpack.i.h.bf16 %v8630_v33 }
 0x485   : > { %v4906_v13 = vadd.f32 %v7916_v56, %v4641_v55  ;;  %v6001_v56 = vld [vmem:[%s12724_s5 + $0xb0] sm:$0xff]  ;;  %v5156_v48 = vmax.f32 %v5082_v16, %v5119_v61  ;;  %v5996_v10 = vld [vmem:[%s12724_s5 + $0x88] sm:$0xff]  ;;  %v4287_v58 = vsel %vm2410_vm9, %v3141_v19, %v8631_v3 }
 0x486   : > { %v8625_v35 = vpop.permute.xlu0 %8624  ;;  %v5302_v52 = vmax.f32 %v5154_v23, %v5265_v9  ;;  %7498 = vmatprep.subr.mxu1 %v6001_v56  ;;  %v5083_v27 = vld [vmem:[#allocation3 + $0x68] sm:$0xff] }
 0x487   : > { %v8627_v60 = vunpack.i.h.bf16 %v8625_v35  ;;  %v8626_v21 = vunpack.i.l.bf16 %v8625_v35  ;;  %5044 = vst.msk [vmem:[#allocation3 + $0x78] sm:$0xff] %vm2410_vm9, %v4906_v13  ;;  %7499 = vmatpush3.msra.mxu1 %v5985_v34  ;;  %v9002_v19 = vld [vmem:[#allocation2 + $0x130] sm:$0xff] }
 0x488   : > { %5339 = vst.msk [vmem:[#allocation4 + $0x50] sm:$0xff] %vm2410_vm9, %v5302_v52  ;;  %7500 = vmatprep.subr.mxu1 %v6000_v4  ;;  %v9001_v52 = vld [vmem:[#allocation2 + $0x128] sm:$0xff] }
 0x489   : > { %v4366_v7 = vsel %vm4209_vm12, %v4326_v53, %v8626_v21  ;;  %v4246_v54 = vsel %vm4209_vm12, %v4205_v6, %v8627_v60  ;;  %v5192_v49 = vld [vmem:[#allocation3 + $0x6c] sm:$0xff]  ;;  %v4645_v22 = vpop.f32.mrf.mxu1  ;;  %7501 = vmatpush3.msra.mxu1 %v5984_v30  ;;  %v4165_v60 = vsel %vm2410_vm9, %v9001_v52, %v8632_v12  ;;  %v5995_v21 = vld [vmem:[%s12724_s5 + $0x80] sm:$0xff] }
 0x48a   : > { %4743 = vmatprep.mubr.f32.mxu1 %v4366_v7  ;;  %v5229_v2 = vld [vmem:[#allocation3 + $0x6d] sm:$0xff]  ;;  %v4646_v51 = vadd.f32 %v11712_v44, %v4645_v22  ;;  %v8635_v32 = vpop.permute.xlu0 %8634  ;;  %7502 = vmatprep.subr.mxu1 %v5999_v40  ;;  %v5509_v56 = vld [vmem:[#allocation4 + $0x3c] ss:$2 sm:$0xff] }
 0x48b   : > { %4744 = vmatmul.mubr.f32.gmra.mxu1 %v4246_v54  ;;  %v5266_v50 = vmax.f32 %v5192_v49, %v5229_v2  ;;  %v4647_v31 = vpop.f32.mrf.mxu1  ;;  %v5120_v55 = vld [vmem:[#allocation3 + $0x69] sm:$0xff]  ;;  %v8637_v23 = vunpack.i.h.bf16 %v8635_v32  ;;  %v8636_v9 = vunpack.i.l.bf16 %v8635_v32  ;;  %v5397_v4 = vld [vmem:[#allocation4 + $0x12] ss:$2 sm:$0xff] }
 0x48c   : > { %v4911_v59 = vadd.f32 %v4910_v57, %v4646_v51  ;;  %7503 = vmatpush3.msra.mxu1 %v5983_v8  ;;  %v5157_v26 = vmax.f32 %v5083_v27, %v5120_v55  ;;  %v5451_v40 = vld [vmem:[#allocation4 + $0x28] ss:$2 sm:$0xff] }
 0x48d   : > { %v5303_v17 = vmax.f32 %v5155_v38, %v5266_v50  ;;  %7504 = vmatprep.subr.mxu1 %v5998_v25  ;;  %v4327_v49 = vsel %vm4168_vm11, %v4287_v58, %v8636_v9  ;;  %v4206_v22 = vsel %vm4168_vm11, %v4165_v60, %v8637_v23  ;;  %v5979_v38 = vld [vmem:[%s12724_s5] sm:$0xff] }
 0x48e   : > { %v5193_v47 = vld [vmem:[#allocation3 + $0x74] sm:$0xff]  ;;  %5045 = vst.msk [vmem:[#allocation3 + $0x80] sm:$0xff] %vm2410_vm9, %v4911_v59  ;;  %v4650_v63 = vpop.f32.mrf.mxu1  ;;  %7505 = vmatpush3.msra.mxu1 %v5982_v43  ;;  %v8645_v2 = vpop.permute.xlu0 %8644 }
 0x48f   : > { %5340 = vst.msk [vmem:[#allocation4 + $0x58] sm:$0xff] %vm2410_vm9, %v5303_v17  ;;  %v5230_v36 = vld [vmem:[#allocation3 + $0x75] sm:$0xff]  ;;  %v4651_v11 = vadd.f32 %v11712_v44, %v4650_v63  ;;  %7506 = vmatprep.subr.mxu1 %v5997_v5  ;;  %v8688_v17 = vpack.i.bf16 %v5397_v4, %v5509_v56  ;;  %v8646_v63 = vunpack.i.l.bf16 %v8645_v2 }
 0x490   : > { %v5267_v28 = vmax.f32 %v5193_v47, %v5230_v36  ;;  %v4652_v18 = vpop.f32.mrf.mxu1  ;;  %7507 = vmatpush3.msra.mxu1 %v5981_v14  ;;  %v5121_v29 = vld [vmem:[#allocation3 + $0x71] sm:$0xff]  ;;  %v8647_v47 = vunpack.i.h.bf16 %v8645_v2  ;;  %v11934_v14 = vpop.f32.mrf.mxu0 }
 0x491   : > { %v4916_v45 = vadd.f32 %v7919_v24, %v4651_v11  ;;  %7508 = vmatprep.subr.mxu1 %v5996_v10  ;;  %v5084_v59 = vld [vmem:[#allocation3 + $0x70] sm:$0xff] }
 0x492   : > { %v5304_v46 = vmax.f32 %v5156_v48, %v5267_v28  ;;  %7509 = vmatpush3.msra.mxu1 %v5980_v15  ;;  %v5158_v33 = vmax.f32 %v5084_v59, %v5121_v29  ;;  %v2983_v29 = vld [vmem:[#allocation2 + $0x138] sm:$0xf] }
 0x493   : > { %5046 = vst.msk [vmem:[#allocation3 + $0x88] sm:$0xff] %vm2410_vm9, %v4916_v45  ;;  %7510 = vmatprep.subr.mxu1 %v5995_v21  ;;  %v5399_v59 = vld [vmem:[#allocation4 + $0x22] ss:$2 sm:$0xff] }
 0x494   : > { %5341 = vst.msk [vmem:[#allocation4 + $0x60] sm:$0xff] %vm2410_vm9, %v5304_v46  ;;  %7511 = vmatpush3.msra.mxu1 %v5979_v38  ;;  %v3142_v46 = vld [vmem:[#allocation2 + $0x145] sm:$0xff] }
 0x495   : > { %v5194_v13 = vld [vmem:[#allocation3 + $0x7c] sm:$0xff]  ;;  %v4655_v35 = vpop.f32.mrf.mxu1  ;;  %v4288_v10 = vsel %vm2410_vm9, %v3142_v46, %v8646_v63 }
 0x496   : > { %v8640_v42 = vpop.permute.xlu1 %8639  ;;  %v5231_v39 = vld [vmem:[#allocation3 + $0x7d] sm:$0xff]  ;;  %v4656_v62 = vadd.f32 %v11712_v44, %v4655_v35 }
 0x497   : > { %v8642_v24 = vunpack.i.h.bf16 %v8640_v42  ;;  %v8641_v53 = vunpack.i.l.bf16 %v8640_v42  ;;  %v5377_v6 = vld [vmem:[#allocation4 + $0x50] ss:$2 sm:$0xff]  ;;  %v5268_v7 = vmax.f32 %v5194_v13, %v5231_v39  ;;  %v4657_v54 = vpop.f32.mrf.mxu1 }
 0x498   : > { %v8678_v37 = vpack.i.bf16 %v5423_v20, %v5377_v6  ;;  %v4921_v51 = vadd.f32 %v4920_v1, %v4656_v62  ;;  %v5122_v55 = vld [vmem:[#allocation3 + $0x79] sm:$0xff] }
 0x499   : > { %v4367_v34 = vsel %vm4209_vm12, %v4327_v49, %v8641_v53  ;;  %v4247_v57 = vsel %vm4209_vm12, %v4206_v22, %v8642_v24  ;;  %v5305_v50 = vmax.f32 %v5157_v26, %v5268_v7  ;;  %v5085_v35 = vld [vmem:[#allocation3 + $0x78] sm:$0xff]  ;;  %v3143_v26 = vld [vmem:[#allocation2 + $0x14d] sm:$0xf]  ;;  %v4930_v7 = vpop.f32.mrf.mxu0 }
 0x49a   : > { %8679 = vrot.lane.b32.xlu1 %v8678_v37, %s9080_s19  ;;  %4748 = vmatprep.mubr.f32.mxu1 %v4367_v34  ;;  %v8650_v31 = vpop.permute.xlu1 %8649  ;;  %v5195_v30 = vld [vmem:[#allocation3 + $0x84] sm:$0xff]  ;;  %5047 = vst.msk [vmem:[#allocation3 + $0x90] sm:$0xff] %vm2410_vm9, %v4921_v51  ;;  %v4660_v61 = vpop.f32.mrf.mxu1  ;;  %v5159_v39 = vmax.f32 %v5085_v35, %v5122_v55  ;;  %v5425_v20 = vld [vmem:[#allocation4 + $0x14] ss:$2 sm:$0xff] }
 0x49b   : > { %4749 = vmatmul.mubr.f32.gmra.mxu1 %v4247_v57  ;;  %5342 = vst.msk [vmem:[#allocation4 + $0x68] sm:$0xff] %vm2410_vm9, %v5305_v50  ;;  %v5232_v8 = vld [vmem:[#allocation3 + $0x85] sm:$0xff]  ;;  %v4661_v16 = vadd.f32 %v11712_v44, %v4660_v61  ;;  %v11924_v36 = vld [vmem:[#allocation4 + $0x54] ss:$2 sm:$0xff]  ;;  %v8652_v28 = vunpack.i.h.bf16 %v8650_v31  ;;  %v8651_v32 = vunpack.i.l.bf16 %v8650_v31 }
 0x49c   : > { %v11926_v11 = vld [vmem:[#allocation4 + $0x52] ss:$2 sm:$0xff]  ;;  %v5269_v48 = vmax.f32 %v5195_v30, %v5232_v8  ;;  %7961 = vmatprep.mubr.msk.f32.mxu0 %vm2410_vm9, %v11924_v36  ;;  %v4662_v18 = vpop.f32.mrf.mxu1  ;;  %v5123_v38 = vld [vmem:[#allocation3 + $0x81] sm:$0xff] }
 0x49d   : > { %v8683_v25 = vpack.i.bf16 %v5451_v40, %v11926_v11  ;;  %v4926_v43 = vadd.f32 %v11897_v41, %v4661_v16  ;;  %v4166_v41 = vsel %vm2410_vm9, %v9002_v19, %v8647_v47  ;;  %v4328_v27 = vsel %vm4168_vm11, %v4288_v10, %v8651_v32  ;;  %v5511_v57 = vld [vmem:[#allocation4 + $0x4c] ss:$2 sm:$0xff]  ;;  %v5086_v30 = vld [vmem:[#allocation3 + $0x80] sm:$0xff] }
 0x49e   : > { %8689 = vrot.lane.b32.xlu1 %v8688_v17, %s12771_s23  ;;  %v8660_v12 = vpop.permute.xlu1 %8659  ;;  %v5306_v3 = vmax.f32 %v5158_v33, %v5269_v48  ;;  %v4207_v13 = vsel %vm4168_vm11, %v4166_v41, %v8652_v28  ;;  %v5453_v47 = vld [vmem:[#allocation4 + $0x38] ss:$2 sm:$0xff]  ;;  %v8703_v28 = vpack.i.bf16 %v5399_v59, %v5511_v57  ;;  %v5160_v18 = vmax.f32 %v5086_v30, %v5123_v38  ;;  %v5087_v10 = vld [vmem:[#allocation3 + $0x88] sm:$0xff] }
 0x49f   : > { %v8661_v45 = vunpack.i.l.bf16 %v8660_v12  ;;  %8684 = vrot.lane.b32.xlu0 %v8683_v25, %s9081_s20  ;;  %v8655_v5 = vpop.permute.xlu0 %8654  ;;  %5048 = vst.msk [vmem:[#allocation3 + $0x98] sm:$0xff] %vm2410_vm9, %v4926_v43  ;;  %v8662_v15 = vunpack.i.h.bf16 %v8660_v12  ;;  %v11960_v8 = vld [vmem:[%s12723_s4] ss:$0 sm:$0xff] }
 0x4a0   : > { %v8657_v23 = vunpack.i.h.bf16 %v8655_v5  ;;  %v8656_v9 = vunpack.i.l.bf16 %v8655_v5  ;;  %5343 = vst.msk [vmem:[#allocation4 + $0x70] sm:$0xff] %vm2410_vm9, %v5306_v3  ;;  %v7928_v5 = vpop.f32.mrf.mxu0 }
 0x4a1   : > { %v5196_v42 = vld [vmem:[#allocation3 + $0x8c] sm:$0xff]  ;;  %v4665_v58 = vpop.f32.mrf.mxu1  ;;  %v4289_v1 = vsel %vm2410_vm9, %v3143_v26, %v8661_v45 }
 0x4a2   : > { %v8670_v52 = vpop.permute.xlu1 %8669  ;;  %v4368_v60 = vsel %vm4209_vm12, %v4328_v27, %v8656_v9  ;;  %v4248_v21 = vsel %vm4209_vm12, %v4207_v13, %v8657_v23  ;;  %v5233_v62 = vld [vmem:[#allocation3 + $0x8d] sm:$0xff]  ;;  %v4666_v24 = vadd.f32 %v11712_v44, %v4665_v58  ;;  %v4167_v44 = vsel %vm2410_vm9, %v2983_v29, %v8662_v15 }
 0x4a3   : > { %4753 = vmatprep.mubr.f32.mxu1 %v4368_v60  ;;  %v8665_v53 = vpop.permute.xlu0 %8664  ;;  %v11945_v6 = vld [vmem:[#allocation4 + $0x60] ss:$2 sm:$0xff]  ;;  %v5270_v54 = vmax.f32 %v5196_v42, %v5233_v62  ;;  %v4667_v22 = vpop.f32.mrf.mxu1  ;;  %v8672_v51 = vunpack.i.h.bf16 %v8670_v52  ;;  %v8671_v34 = vunpack.i.l.bf16 %v8670_v52 }
 0x4a4   : > { %v8667_v37 = vunpack.i.h.bf16 %v8665_v53  ;;  %v8666_v49 = vunpack.i.l.bf16 %v8665_v53  ;;  %4754 = vmatmul.mubr.f32.gmra.mxu1 %v4248_v21  ;;  %v8693_v56 = vpack.i.bf16 %v5425_v20, %v11945_v6  ;;  %v4931_v2 = vadd.f32 %v4930_v7, %v4666_v24  ;;  %v5124_v46 = vld [vmem:[#allocation3 + $0x89] sm:$0xff]  ;;  %v5401_v26 = vld [vmem:[#allocation4 + $0x32] ss:$2 sm:$0xff] }
 0x4a5   : > { %v5307_v50 = vmax.f32 %v5159_v39, %v5270_v54  ;;  %v5427_v9 = vld [vmem:[#allocation4 + $0x24] ss:$2 sm:$0xff]  ;;  %v5161_v27 = vmax.f32 %v5087_v10, %v5124_v46 }
 0x4a6   : > { %8694 = vrot.lane.b32.xlu0 %v8693_v56, %s9080_s19  ;;  %v4329_v31 = vsel %vm4168_vm11, %v4289_v1, %v8666_v49  ;;  %v4208_v4 = vsel %vm4168_vm11, %v4167_v44, %v8667_v37  ;;  %v5197_v61 = vld [vmem:[#allocation3 + $0x94] sm:$0xff]  ;;  %5049 = vst.msk [vmem:[#allocation3 + $0xa0] sm:$0xff] %vm2410_vm9, %v4931_v2  ;;  %v4670_v17 = vpop.f32.mrf.mxu1  ;;  %v5513_v52 = vld [vmem:[#allocation4 + $0x5c] ss:$2 sm:$0xff] }
 0x4a7   : > { %v4369_v40 = vsel %vm4209_vm12, %v4329_v31, %v8671_v34  ;;  %v4249_v33 = vsel %vm4209_vm12, %v4208_v4, %v8672_v51  ;;  %5344 = vst.msk [vmem:[#allocation4 + $0x78] sm:$0xff] %vm2410_vm9, %v5307_v50  ;;  %v5234_v63 = vld [vmem:[#allocation3 + $0x95] sm:$0xff]  ;;  %v4671_v16 = vadd.f32 %v11960_v8, %v4670_v17  ;;  %v11963_v48 = vld [vmem:[#allocation4 + $0x64] ss:$2 sm:$0xff]  ;;  %v8718_v54 = vpack.i.bf16 %v5401_v26, %v5513_v52 }
 0x4a8   : > { %4758 = vmatprep.mubr.f32.mxu1 %v4369_v40  ;;  %v11965_v32 = vld [vmem:[#allocation4 + $0x62] ss:$2 sm:$0xff]  ;;  %v5271_v25 = vmax.f32 %v5197_v61, %v5234_v63  ;;  %7962 = vmatmul.mubr.msk.f32.vlgmr.msra.gmra.mxu0 %vm2410_vm9, %v11963_v48  ;;  %v4672_v43 = vpop.f32.mrf.mxu1  ;;  %v5125_v60 = vld [vmem:[#allocation3 + $0x91] sm:$0xff] }
 0x4a9   : > { %4759 = vmatmul.mubr.f32.gmra.mxu1 %v4249_v33  ;;  %v8698_v12 = vpack.i.bf16 %v5453_v47, %v11965_v32  ;;  %v4936_v3 = vadd.f32 %v11934_v14, %v4671_v16  ;;  %v4940_v14 = vpop.f32.mrf.mxu0  ;;  %v5088_v39 = vld [vmem:[#allocation3 + $0x90] sm:$0xff]  ;;  %v5089_v31 = vld [vmem:[#allocation3 + $0x98] sm:$0xff] }
 0x4aa   : > { %8704 = vrot.lane.b32.xlu0 %v8703_v28, %s12771_s23  ;;  %v5308_v45 = vmax.f32 %v5160_v18, %v5271_v25  ;;  %v5455_v53 = vld [vmem:[#allocation4 + $0x48] ss:$2 sm:$0xff]  ;;  %v5162_v49 = vmax.f32 %v5088_v39, %v5125_v60 }
 0x4ab   : > { %8699 = vrot.lane.b32.xlu1 %v8698_v12, %s9081_s20  ;;  %5050 = vst.msk [vmem:[#allocation3 + $0xa8] sm:$0xff] %vm2410_vm9, %v4936_v3  ;;  %v7931_v34 = vpop.f32.mrf.mxu0  ;;  %v5429_v50 = vld [vmem:[#allocation4 + $0x34] ss:$2 sm:$0xff]  ;;  %v5431_v60 = vld [vmem:[#allocation4 + $0x44] ss:$2 sm:$0xff] }
 0x4ac   : > { %5345 = vst.msk [vmem:[#allocation4 + $0x80] sm:$0xff] %vm2410_vm9, %v5308_v45  ;;  %v5403_v25 = vld [vmem:[#allocation4 + $0x42] ss:$2 sm:$0xff] }
 0x4ad   : > { %v5198_v55 = vld [vmem:[#allocation3 + $0x9c] sm:$0xff]  ;;  %v4675_v23 = vpop.f32.mrf.mxu1  ;;  %v4950_v61 = vpop.f32.mrf.mxu0 }
 0x4ae   : > { %v5235_v19 = vld [vmem:[#allocation3 + $0x9d] sm:$0xff]  ;;  %v4676_v41 = vadd.f32 %v11960_v8, %v4675_v23  ;;  %v5515_v16 = vld [vmem:[#allocation4 + $0x6c] ss:$2 sm:$0xff] }
 0x4af   : > { %v11976_v15 = vld [vmem:[#allocation4 + $0x70] ss:$2 sm:$0xff]  ;;  %v5272_v13 = vmax.f32 %v5198_v55, %v5235_v19  ;;  %v4677_v35 = vpop.f32.mrf.mxu1  ;;  %v5090_v43 = vld [vmem:[#allocation3 + $0xa0] sm:$0xff]  ;;  %v8733_v23 = vpack.i.bf16 %v5403_v25, %v5515_v16 }
 0x4b0   : > { %v8708_v42 = vpack.i.bf16 %v5427_v9, %v11976_v15  ;;  %v4941_v58 = vadd.f32 %v4940_v14, %v4676_v41  ;;  %v5126_v44 = vld [vmem:[#allocation3 + $0x99] sm:$0xff]  ;;  %v7934_v35 = vpop.f32.mrf.mxu0 }
 0x4b1   : > { %v5309_v21 = vmax.f32 %v5161_v27, %v5272_v13  ;;  %v5163_v17 = vmax.f32 %v5089_v31, %v5126_v44  ;;  %v5457_v45 = vld [vmem:[#allocation4 + $0x58] ss:$2 sm:$0xff]  ;;  %v5459_v44 = vld [vmem:[#allocation4 + $0x68] ss:$2 sm:$0xff] }
 0x4b2   : > { %8709 = vrot.lane.b32.xlu1 %v8708_v42, %s9080_s19  ;;  %v5199_v62 = vld [vmem:[#allocation3 + $0xa4] sm:$0xff]  ;;  %5051 = vst.msk [vmem:[#allocation3 + $0xb0] sm:$0xff] %vm2410_vm9, %v4941_v58  ;;  %v4680_v24 = vpop.f32.mrf.mxu1 }
 0x4b3   : > { %5346 = vst.msk [vmem:[#allocation4 + $0x88] sm:$0xff] %vm2410_vm9, %v5309_v21  ;;  %v5236_v20 = vld [vmem:[#allocation3 + $0xa5] sm:$0xff]  ;;  %v4681_v1 = vadd.f32 %v11960_v8, %v4680_v24  ;;  %v11983_v7 = vld [vmem:[#allocation4 + $0x74] ss:$2 sm:$0xff]  ;;  %v4960_v24 = vpop.f32.mrf.mxu0 }
 0x4b4   : > { %v11985_v37 = vld [vmem:[#allocation4 + $0x72] ss:$2 sm:$0xff]  ;;  %v5273_v22 = vmax.f32 %v5199_v62, %v5236_v20  ;;  %7964 = vmatprep.mubr.msk.f32.mxu0 %vm2410_vm9, %v11983_v7  ;;  %v4682_v56 = vpop.f32.mrf.mxu1  ;;  %v5127_v28 = vld [vmem:[#allocation3 + $0xa1] sm:$0xff] }
 0x4b5   : > { %v8713_v29 = vpack.i.bf16 %v5455_v53, %v11985_v37  ;;  %v4946_v2 = vadd.f32 %v7928_v5, %v4681_v1  ;;  %v5164_v10 = vmax.f32 %v5090_v43, %v5127_v28  ;;  %v5091_v21 = vld [vmem:[#allocation3 + $0xa8] sm:$0xff] }
 0x4b6   : > { %8719 = vrot.lane.b32.xlu1 %v8718_v54, %s12771_s23  ;;  %v5310_v51 = vmax.f32 %v5162_v49, %v5273_v22 }
 0x4b7   : > { %8714 = vrot.lane.b32.xlu0 %v8713_v29, %s9081_s20  ;;  %5052 = vst.msk [vmem:[#allocation3 + $0xb8] sm:$0xff] %vm2410_vm9, %v4946_v2 }
 0x4b8   : > { %5347 = vst.msk [vmem:[#allocation4 + $0x90] sm:$0xff] %vm2410_vm9, %v5310_v51 }
 0x4b9   : > { %v5200_v57 = vld [vmem:[#allocation3 + $0xac] sm:$0xff]  ;;  %v4685_v38 = vpop.f32.mrf.mxu1 }
 0x4ba   : > { %v5237_v4 = vld [vmem:[#allocation3 + $0xad] sm:$0xff]  ;;  %v4686_v59 = vadd.f32 %v11960_v8, %v4685_v38  ;;  %v5517_v22 = vld [vmem:[#allocation4 + $0x7c] ss:$2 sm:$0xff] }
 0x4bb   : > { %v5383_v30 = vld [vmem:[#allocation4 + $0x80] ss:$2 sm:$0xff]  ;;  %v5274_v40 = vmax.f32 %v5200_v57, %v5237_v4  ;;  %v4687_v33 = vpop.f32.mrf.mxu1  ;;  %v5092_v2 = vld [vmem:[#allocation3 + $0xb0] sm:$0xff]  ;;  %v8748_v31 = vpack.i.bf16 %v11926_v11, %v5517_v22 }
 0x4bc   : > { %v8723_v47 = vpack.i.bf16 %v5429_v50, %v5383_v30  ;;  %v4951_v63 = vadd.f32 %v4950_v61, %v4686_v59  ;;  %v5128_v42 = vld [vmem:[#allocation3 + $0xa9] sm:$0xff] }
 0x4bd   : > { %v5311_v18 = vmax.f32 %v5163_v17, %v5274_v40  ;;  %v5165_v53 = vmax.f32 %v5091_v21, %v5128_v42 }
 0x4be   : > { %8724 = vrot.lane.b32.xlu0 %v8723_v47, %s9080_s19  ;;  %v5201_v12 = vld [vmem:[#allocation3 + $0xb4] sm:$0xff]  ;;  %5053 = vst.msk [vmem:[#allocation3 + $0xc0] sm:$0xff] %vm2410_vm9, %v4951_v63  ;;  %v4690_v3 = vpop.f32.mrf.mxu1  ;;  %v7937_v47 = vpop.f32.mrf.mxu0 }
 0x4bf   : > { %5348 = vst.msk [vmem:[#allocation4 + $0x98] sm:$0xff] %vm2410_vm9, %v5311_v18  ;;  %v5238_v5 = vld [vmem:[#allocation3 + $0xb5] sm:$0xff]  ;;  %v4691_v46 = vadd.f32 %v11960_v8, %v4690_v3  ;;  %v11999_v55 = vld [vmem:[#allocation4 + $0x84] ss:$2 sm:$0xff] }
 0x4c0   : > { %v12001_v9 = vld [vmem:[#allocation4 + $0x82] ss:$2 sm:$0xff]  ;;  %v5275_v19 = vmax.f32 %v5201_v12, %v5238_v5  ;;  %7965 = vmatmul.mubr.msk.f32.gmra.mxu0 %vm2410_vm9, %v11999_v55  ;;  %v4692_v41 = vpop.f32.mrf.mxu1  ;;  %v5129_v56 = vld [vmem:[#allocation3 + $0xb1] sm:$0xff]  ;;  %v4970_v12 = vpop.f32.mrf.mxu0 }
 0x4c1   : > { %v8728_v14 = vpack.i.bf16 %v5457_v45, %v12001_v9  ;;  %v4956_v27 = vadd.f32 %v7931_v34, %v4691_v46  ;;  %v5166_v59 = vmax.f32 %v5092_v2, %v5129_v56  ;;  %v5093_v28 = vld [vmem:[#allocation3 + $0xb8] sm:$0xff] }
 0x4c2   : > { %8734 = vrot.lane.b32.xlu0 %v8733_v23, %s12771_s23  ;;  %v5312_v13 = vmax.f32 %v5164_v10, %v5275_v19 }
 0x4c3   : > { %8729 = vrot.lane.b32.xlu1 %v8728_v14, %s9081_s20  ;;  %5054 = vst.msk [vmem:[#allocation3 + $0xc8] sm:$0xff] %vm2410_vm9, %v4956_v27 }
 0x4c4   : > { %5349 = vst.msk [vmem:[#allocation4 + $0xa0] sm:$0xff] %vm2410_vm9, %v5312_v13  ;;  %v5461_v13 = vld [vmem:[#allocation4 + $0x78] ss:$2 sm:$0xff] }
 0x4c5   : > { %v5202_v58 = vld [vmem:[#allocation3 + $0xbc] sm:$0xff]  ;;  %v4695_v52 = vpop.f32.mrf.mxu1 }
 0x4c6   : > { %v5239_v26 = vld [vmem:[#allocation3 + $0xbd] sm:$0xff]  ;;  %v4696_v39 = vadd.f32 %v11960_v8, %v4695_v52  ;;  %v5519_v10 = vld [vmem:[#allocation4 + $0x8c] ss:$2 sm:$0xff] }
 0x4c7   : > { %v12011_v62 = vld [vmem:[#allocation4 + $0x90] ss:$2 sm:$0xff]  ;;  %v5276_v20 = vmax.f32 %v5202_v58, %v5239_v26  ;;  %v4697_v1 = vpop.f32.mrf.mxu1  ;;  %v5094_v14 = vld [vmem:[#allocation3 + $0xc0] sm:$0xff]  ;;  %v8763_v58 = vpack.i.bf16 %v11965_v32, %v5519_v10 }
 0x4c8   : > { %v8738_v54 = vpack.i.bf16 %v5431_v60, %v12011_v62  ;;  %v4961_v49 = vadd.f32 %v4960_v24, %v4696_v39  ;;  %v5130_v11 = vld [vmem:[#allocation3 + $0xb9] sm:$0xff] }
 0x4c9   : > { %v5313_v29 = vmax.f32 %v5165_v53, %v5276_v20  ;;  %v5167_v3 = vmax.f32 %v5093_v28, %v5130_v11 }
 0x4ca   : > { %8739 = vrot.lane.b32.xlu1 %v8738_v54, %s9080_s19  ;;  %v5203_v51 = vld [vmem:[#allocation3 + $0xc4] sm:$0xff]  ;;  %5055 = vst.msk [vmem:[#allocation3 + $0xd0] sm:$0xff] %vm2410_vm9, %v4961_v49  ;;  %v4700_v34 = vpop.f32.mrf.mxu1 }
 0x4cb   : > { %5350 = vst.msk [vmem:[#allocation4 + $0xa8] sm:$0xff] %vm2410_vm9, %v5313_v29  ;;  %v5240_v57 = vld [vmem:[#allocation3 + $0xc5] sm:$0xff]  ;;  %v4701_v38 = vadd.f32 %v11960_v8, %v4700_v34  ;;  %v12018_v50 = vld [vmem:[#allocation4 + $0x94] ss:$2 sm:$0xff] }
 0x4cc   : > { %v12021_v4 = vld [vmem:[#allocation4 + $0x92] ss:$2 sm:$0xff]  ;;  %v5277_v30 = vmax.f32 %v5203_v51, %v5240_v57  ;;  %7967 = vmatprep.mubr.msk.f32.mxu0 %vm2410_vm9, %v12018_v50  ;;  %v4702_v61 = vpop.f32.mrf.mxu1  ;;  %v5131_v19 = vld [vmem:[#allocation3 + $0xc1] sm:$0xff] }
 0x4cd   : > { %v8743_v17 = vpack.i.bf16 %v5459_v44, %v12021_v4  ;;  %v4966_v40 = vadd.f32 %v7934_v35, %v4701_v38  ;;  %v5095_v1 = vld [vmem:[#allocation3 + $0xc8] sm:$0xff] }
 0x4ce   : > { %8749 = vrot.lane.b32.xlu1 %v8748_v31, %s12771_s23  ;;  %v5314_v33 = vmax.f32 %v5166_v59, %v5277_v30  ;;  %v5463_v31 = vld [vmem:[#allocation4 + $0x88] ss:$2 sm:$0xff] }
 0x4cf   : > { %8744 = vrot.lane.b32.xlu0 %v8743_v17, %s9081_s20  ;;  %5056 = vst.msk [vmem:[#allocation3 + $0xd8] sm:$0xff] %vm2410_vm9, %v4966_v40  ;;  %v7940_v40 = vpop.f32.mrf.mxu0 }
 0x4d0   : > { %5351 = vst.msk [vmem:[#allocation4 + $0xb0] sm:$0xff] %vm2410_vm9, %v5314_v33 }
 0x4d1   : > { %v5204_v63 = vld [vmem:[#allocation3 + $0xcc] sm:$0xff]  ;;  %v4705_v16 = vpop.f32.mrf.mxu1 }
 0x4d2   : > { %v5241_v18 = vld [vmem:[#allocation3 + $0xcd] sm:$0xff]  ;;  %v4706_v25 = vadd.f32 %v11960_v8, %v4705_v16  ;;  %v5521_v51 = vld [vmem:[#allocation4 + $0x9c] ss:$2 sm:$0xff] }
 0x4d3   : > { %v12031_v43 = vld [vmem:[#allocation4 + $0xa0] ss:$2 sm:$0xff]  ;;  %v5278_v45 = vmax.f32 %v5204_v63, %v5241_v18  ;;  %v4707_v5 = vpop.f32.mrf.mxu1  ;;  %v8778_v57 = vpack.i.bf16 %v11985_v37, %v5521_v51  ;;  %v5096_v61 = vld [vmem:[#allocation3 + $0xd0] sm:$0xff] }
 0x4d4   : > { %v8753_v46 = vpack.i.bf16 %v11924_v36, %v12031_v43  ;;  %v4971_v23 = vadd.f32 %v4970_v12, %v4706_v25  ;;  %v5168_v36 = vmax.f32 %v5094_v14, %v5131_v19  ;;  %v5132_v24 = vld [vmem:[#allocation3 + $0xc9] sm:$0xff]  ;;  %v4980_v25 = vpop.f32.mrf.mxu0 }
 0x4d5   : > { %v5315_v41 = vmax.f32 %v5167_v3, %v5278_v45  ;;  %v5169_v56 = vmax.f32 %v5095_v1, %v5132_v24 }
 0x4d6   : > { %8754 = vrot.lane.b32.xlu0 %v8753_v46, %s9080_s19  ;;  %v5205_v27 = vld [vmem:[#allocation3 + $0xd4] sm:$0xff]  ;;  %5057 = vst.msk [vmem:[#allocation3 + $0xe0] sm:$0xff] %vm2410_vm9, %v4971_v23  ;;  %v7943_v1 = vpop.f32.mrf.mxu0 }
 0x4d7   : > { %5352 = vst.msk [vmem:[#allocation4 + $0xb8] sm:$0xff] %vm2410_vm9, %v5315_v41  ;;  %v5242_v35 = vld [vmem:[#allocation3 + $0xd5] sm:$0xff]  ;;  %v12038_v42 = vld [vmem:[#allocation4 + $0xa4] ss:$2 sm:$0xff] }
 0x4d8   : > { %v12041_v52 = vld [vmem:[#allocation4 + $0xa2] ss:$2 sm:$0xff]  ;;  %v5279_v60 = vmax.f32 %v5205_v27, %v5242_v35  ;;  %7968 = vmatmul.mubr.msk.f32.gmra.mxu0 %vm2410_vm9, %v12038_v42  ;;  %v5133_v59 = vld [vmem:[#allocation3 + $0xd1] sm:$0xff] }
 0x4d9   : > { %v8758_v21 = vpack.i.bf16 %v5461_v13, %v12041_v52  ;;  %v5170_v33 = vmax.f32 %v5096_v61, %v5133_v59  ;;  %v5097_v41 = vld [vmem:[#allocation3 + $0xd8] sm:$0xff] }
 0x4da   : > { %8764 = vrot.lane.b32.xlu0 %v8763_v58, %s12771_s23  ;;  %v5316_v26 = vmax.f32 %v5168_v36, %v5279_v60 }
 0x4db   : > { %8759 = vrot.lane.b32.xlu1 %v8758_v21, %s9081_s20 }
 0x4dc   : > { %v4710_v39 = vpop.f32.mrf.mxu1  ;;  %5353 = vst.msk [vmem:[#allocation4 + $0xc0] sm:$0xff] %vm2410_vm9, %v5316_v26 }
 0x4dd   : > { %v4711_v53 = vadd.f32 %v11960_v8, %v4710_v39  ;;  %v5206_v32 = vld [vmem:[#allocation3 + $0xdc] sm:$0xff] }
 0x4de   : > { %v4712_v20 = vpop.f32.mrf.mxu1  ;;  %v5243_v54 = vld [vmem:[#allocation3 + $0xdd] sm:$0xff]  ;;  %v5523_v18 = vld [vmem:[#allocation4 + $0xac] ss:$2 sm:$0xff] }
 0x4df   : > { %v4976_v49 = vadd.f32 %v7937_v47, %v4711_v53  ;;  %v12050_v22 = vld [vmem:[#allocation4 + $0xb0] ss:$2 sm:$0xff]  ;;  %v5280_v29 = vmax.f32 %v5206_v32, %v5243_v54  ;;  %v8793_v45 = vpack.i.bf16 %v12001_v9, %v5523_v18  ;;  %v5098_v32 = vld [vmem:[#allocation3 + $0xe0] sm:$0xff] }
 0x4e0   : > { %v8768_v2 = vpack.i.bf16 %v11963_v48, %v12050_v22  ;;  %v5134_v10 = vld [vmem:[#allocation3 + $0xd9] sm:$0xff] }
 0x4e1   : > { %5058 = vst.msk [vmem:[#allocation3 + $0xe8] sm:$0xff] %vm2410_vm9, %v4976_v49  ;;  %v5317_v34 = vmax.f32 %v5169_v56, %v5280_v29  ;;  %v5171_v14 = vmax.f32 %v5097_v41, %v5134_v10 }
 0x4e2   : > { %8769 = vrot.lane.b32.xlu1 %v8768_v2, %s9080_s19 }
 0x4e3   : > { %5354 = vst.msk [vmem:[#allocation4 + $0xc8] sm:$0xff] %vm2410_vm9, %v5317_v34  ;;  %v12057_v44 = vld [vmem:[#allocation4 + $0xb4] ss:$2 sm:$0xff] }
 0x4e4   : > { %v12060_v38 = vld [vmem:[#allocation4 + $0xb2] ss:$2 sm:$0xff]  ;;  %7970 = vmatprep.mubr.msk.f32.mxu0 %vm2410_vm9, %v12057_v44 }
 0x4e5   : > { %v8773_v48 = vpack.i.bf16 %v5463_v31, %v12060_v38 }
 0x4e6   : > { %8779 = vrot.lane.b32.xlu1 %v8778_v57, %s12771_s23 }
 0x4e7   : > { %8774 = vrot.lane.b32.xlu0 %v8773_v48, %s9081_s20 }
 0x4e8   : > { %v5207_v30 = vld [vmem:[#allocation3 + $0xe4] sm:$0xff] }
 0x4e9   : > { %v5244_v17 = vld [vmem:[#allocation3 + $0xe5] sm:$0xff] }
 0x4ea   : > { %v5281_v47 = vmax.f32 %v5207_v30, %v5244_v17  ;;  %v5391_v37 = vld [vmem:[#allocation4 + $0xc0] ss:$2 sm:$0xff] }
 0x4eb   : > { %v8783_v16 = vpack.i.bf16 %v11983_v7, %v5391_v37  ;;  %v5465_v7 = vld [vmem:[#allocation4 + $0x98] ss:$2 sm:$0xff]  ;;  %v5099_v41 = vld [vmem:[#allocation3 + $0xe8] sm:$0xff] }
 0x4ec   : > { %v5318_v11 = vmax.f32 %v5170_v33, %v5281_v47  ;;  %v4715_v63 = vpop.f32.mrf.mxu1  ;;  %v5135_v26 = vld [vmem:[#allocation3 + $0xe1] sm:$0xff]  ;;  %v5479_v33 = vld [vmem:[#allocation4 + $0x2a] ss:$2 sm:$0xff] }
 0x4ed   : > { %v4716_v28 = vadd.f32 %v11960_v8, %v4715_v63  ;;  %8784 = vrot.lane.b32.xlu0 %v8783_v16, %s9080_s19  ;;  %v5525_v53 = vld [vmem:[#allocation4 + $0xbc] ss:$2 sm:$0xff]  ;;  %v5172_v54 = vmax.f32 %v5098_v32, %v5135_v26 }
 0x4ee   : > { %5355 = vst.msk [vmem:[#allocation4 + $0xd0] sm:$0xff] %vm2410_vm9, %v5318_v11  ;;  %v4717_v12 = vpop.f32.mrf.mxu1  ;;  %v8808_v56 = vpack.i.bf16 %v12021_v4, %v5525_v53  ;;  %v5367_v4 = vld [vmem:[#allocation4] ss:$2 sm:$0xff] }
 0x4ef   : > { %v4981_v3 = vadd.f32 %v4980_v25, %v4716_v28 }
 0x4f1   : > { %5059 = vst.msk [vmem:[#allocation3 + $0xf0] sm:$0xff] %vm2410_vm9, %v4981_v3  ;;  %8794 = vrot.lane.b32.xlu0 %v8793_v45, %s12771_s23  ;;  %v5467_v3 = vld [vmem:[#allocation4 + $0xa8] ss:$2 sm:$0xff] }
 0x4f3   : > { %v8675_v29 = vpop.permute.xlu0 %8674 }
 0x4f4   : > { %v8677_v48 = vunpack.i.h.bf16 %v8675_v29  ;;  %v8676_v59 = vunpack.i.l.bf16 %v8675_v29 }
 0x4f5   : > { %v12074_v5 = vld [vmem:[#allocation4 + $0xc4] ss:$2 sm:$0xff] }
 0x4f6   : > { %v12076_v46 = vld [vmem:[#allocation4 + $0xc2] ss:$2 sm:$0xff]  ;;  %7971 = vmatmul.mubr.msk.f32.gmra.mxu0 %vm2410_vm9, %v12074_v5  ;;  %v5895_v47 = vsel %vm2410_vm9, %v5367_v4, %v8677_v48  ;;  %v5937_v63 = vsel %vm2410_vm9, %v5479_v33, %v8676_v59 }
 0x4f7   : > { %v8788_v23 = vpack.i.bf16 %v5465_v7, %v12076_v46 }
 0x4f8   : > { %v5208_v19 = vld [vmem:[#allocation3 + $0xec] sm:$0xff] }
 0x4f9   : > { %8789 = vrot.lane.b32.xlu1 %v8788_v23, %s9081_s20  ;;  %v5245_v9 = vld [vmem:[#allocation3 + $0xed] sm:$0xff] }
 0x4fa   : > { %v5282_v27 = vmax.f32 %v5208_v19, %v5245_v9  ;;  %v5136_v23 = vld [vmem:[#allocation3 + $0xe9] sm:$0xff] }
 0x4fb   : > { %v4720_v13 = vpop.f32.mrf.mxu1 }
 0x4fc   : > { %v5319_v35 = vmax.f32 %v5171_v14, %v5282_v27  ;;  %v4721_v58 = vadd.f32 %v11960_v8, %v4720_v13  ;;  %v5173_v27 = vmax.f32 %v5099_v41, %v5136_v23 }
 0x4fd   : > { %v4722_v36 = vpop.f32.mrf.mxu1 }
 0x4fe   : > { %5356 = vst.msk [vmem:[#allocation4 + $0xd8] sm:$0xff] %vm2410_vm9, %v5319_v35  ;;  %v4986_v60 = vadd.f32 %v7940_v40, %v4721_v58 }
 0x500   : > { %5060 = vst.msk [vmem:[#allocation3 + $0xf8] sm:$0xff] %vm2410_vm9, %v4986_v60 }
 0x505   : > { %v5534_v21 = vld [vmem:[#allocation4 + $0xd0] ss:$2 sm:$0xff] }
 0x506   : > { %v8798_v39 = vpack.i.bf16 %v11999_v55, %v5534_v21  ;;  %v4990_v55 = vpop.f32.mrf.mxu0  ;;  %v5527_v4 = vld [vmem:[#allocation4 + $0xcc] ss:$2 sm:$0xff] }
 0x507   : > { %v5209_v24 = vld [vmem:[#allocation3 + $0xf4] sm:$0xff] }
 0x508   : > { %v5246_v20 = vld [vmem:[#allocation3 + $0xf5] sm:$0xff]  ;;  %8799 = vrot.lane.b32.xlu1 %v8798_v39, %s9080_s19 }
 0x509   : > { %v5283_v49 = vmax.f32 %v5209_v24, %v5246_v20  ;;  %v5481_v24 = vld [vmem:[#allocation4 + $0x3a] ss:$2 sm:$0xff] }
 0x50b   : > { %v4725_v2 = vpop.f32.mrf.mxu1  ;;  %v5320_v51 = vmax.f32 %v5172_v54, %v5283_v49  ;;  %v5369_v54 = vld [vmem:[#allocation4 + $0x10] ss:$2 sm:$0xff] }
 0x50c   : > { %8809 = vrot.lane.b32.xlu1 %v8808_v56, %s12771_s23  ;;  %v4726_v34 = vadd.f32 %v11960_v8, %v4725_v2  ;;  %v8680_v57 = vpop.permute.xlu1 %8679 }
 0x50d   : > { %v4727_v31 = vpop.f32.mrf.mxu1  ;;  %5357 = vst.msk [vmem:[#allocation4 + $0xe0] sm:$0xff] %vm2410_vm9, %v5320_v51  ;;  %v8682_v61 = vunpack.i.h.bf16 %v8680_v57  ;;  %v8681_v17 = vunpack.i.l.bf16 %v8680_v57 }
 0x50e   : > { %v4991_v30 = vadd.f32 %v4990_v55, %v4726_v34 }
 0x50f   : > { %v5909_v16 = vsel %vm4168_vm11, %v5895_v47, %v8682_v61  ;;  %v5951_v28 = vsel %vm4168_vm11, %v5937_v63, %v8681_v17  ;;  %v12111_v63 = vpop.f32.mrf.mxu0 }
 0x510   : > { %5061 = vst.msk [vmem:[#allocation3 + $0x100] sm:$0xff] %vm2410_vm9, %v4991_v30  ;;  %v8690_v10 = vpop.permute.xlu1 %8689  ;;  %v5137_v30 = vld [vmem:[#allocation3 + $0xf1] sm:$0xff] }
 0x511   : > { %v8685_v40 = vpop.permute.xlu0 %8684  ;;  %v8691_v35 = vunpack.i.l.bf16 %v8690_v10  ;;  %v8692_v58 = vunpack.i.h.bf16 %v8690_v10 }
 0x512   : > { %v8687_v37 = vunpack.i.h.bf16 %v8685_v40  ;;  %v8686_v11 = vunpack.i.l.bf16 %v8685_v40 }
 0x513   : > { %v5938_v20 = vsel %vm2410_vm9, %v5481_v24, %v8691_v35  ;;  %v5896_v2 = vsel %vm2410_vm9, %v5369_v54, %v8692_v58 }
 0x514   : > { %v5965_v18 = vsel %vm4209_vm12, %v5951_v28, %v8686_v11  ;;  %v5556_v25 = vld [vmem:[#allocation4 + $0xd4] ss:$2 sm:$0xff]  ;;  %v5923_v12 = vsel %vm4209_vm12, %v5909_v16, %v8687_v37 }
 0x515   : > { %v5545_v45 = vld [vmem:[#allocation4 + $0xd2] ss:$2 sm:$0xff]  ;;  %6120 = vmatprep.mubr.f32.mxu1 %v5965_v18  ;;  %7973 = vmatprep.mubr.msk.f32.mxu0 %vm2410_vm9, %v5556_v25  ;;  %v8823_v25 = vpack.i.bf16 %v12041_v52, %v5527_v4 }
 0x516   : > { %v8803_v7 = vpack.i.bf16 %v5467_v3, %v5545_v45  ;;  %6121 = vmatmul.mubr.f32.vlgmr.msra.gmra.mxu1 %v5923_v12  ;;  %v5100_v37 = vld [vmem:[#allocation3 + $0xf0] sm:$0xff] }
 0x517   : > { %v5210_v19 = vld [vmem:[#allocation3 + $0xfc] sm:$0xff]  ;;  %v5174_v16 = vmax.f32 %v5100_v37, %v5137_v30  ;;  %v5483_v12 = vld [vmem:[#allocation4 + $0x4a] ss:$2 sm:$0xff] }
 0x518   : > { %8804 = vrot.lane.b32.xlu0 %v8803_v7, %s9081_s20  ;;  %v5247_v9 = vld [vmem:[#allocation3 + $0xfd] sm:$0xff]  ;;  %v8695_v14 = vpop.permute.xlu0 %8694 }
 0x519   : > { %v5284_v13 = vmax.f32 %v5210_v19, %v5247_v9  ;;  %v8697_v60 = vunpack.i.h.bf16 %v8695_v14  ;;  %v8696_v21 = vunpack.i.l.bf16 %v8695_v14 }
 0x51b   : > { %v5321_v36 = vmax.f32 %v5173_v27, %v5284_v13  ;;  %v4730_v26 = vpop.f32.mrf.mxu1  ;;  %v5952_v51 = vsel %vm4168_vm11, %v5938_v20, %v8696_v21  ;;  %v5910_v34 = vsel %vm4168_vm11, %v5896_v2, %v8697_v60  ;;  %v5000_v13 = vpop.f32.mrf.mxu0  ;;  %v5138_v2 = vld [vmem:[#allocation3 + $0xf9] sm:$0xff] }
 0x51c   : > { %v4731_v39 = vadd.f32 %v11960_v8, %v4730_v26  ;;  %v8705_v31 = vpop.permute.xlu0 %8704 }
 0x51d   : > { %5358 = vst.msk [vmem:[#allocation4 + $0xe8] sm:$0xff] %vm2410_vm9, %v5321_v36  ;;  %v8700_v53 = vpop.permute.xlu1 %8699  ;;  %v4732_v32 = vpop.f32.mrf.mxu1  ;;  %v8707_v61 = vunpack.i.h.bf16 %v8705_v31  ;;  %v8706_v17 = vunpack.i.l.bf16 %v8705_v31 }
 0x51e   : > { %v4996_v49 = vadd.f32 %v7943_v1, %v4731_v39  ;;  %v8702_v56 = vunpack.i.h.bf16 %v8700_v53  ;;  %v8701_v29 = vunpack.i.l.bf16 %v8700_v53  ;;  %v5469_v32 = vld [vmem:[#allocation4 + $0xb8] ss:$2 sm:$0xff] }
 0x51f   : > { %v5939_v7 = vsel %vm2410_vm9, %v5483_v12, %v8706_v17 }
 0x520   : > { %5062 = vst.msk [vmem:[#allocation3 + $0x108] sm:$0xff] %vm2410_vm9, %v4996_v49  ;;  %v5966_v57 = vsel %vm4209_vm12, %v5952_v51, %v8701_v29  ;;  %v5924_v55 = vsel %vm4209_vm12, %v5910_v34, %v8702_v56  ;;  %v5485_v56 = vld [vmem:[#allocation4 + $0x5a] ss:$2 sm:$0xff] }
 0x521   : > { %6125 = vmatprep.mubr.f32.mxu1 %v5966_v57  ;;  %v5373_v29 = vld [vmem:[#allocation4 + $0x30] ss:$2 sm:$0xff] }
 0x522   : > { %6126 = vmatmul.mubr.f32.gmra.mxu1 %v5924_v55 }
 0x524   : > { %v8710_v48 = vpop.permute.xlu1 %8709  ;;  %v5536_v59 = vld [vmem:[#allocation4 + $0xe0] ss:$2 sm:$0xff] }
 0x525   : > { %v8813_v1 = vpack.i.bf16 %v12018_v50, %v5536_v59  ;;  %v8712_v33 = vunpack.i.h.bf16 %v8710_v48  ;;  %v8711_v47 = vunpack.i.l.bf16 %v8710_v48  ;;  %v5371_v50 = vld [vmem:[#allocation4 + $0x20] ss:$2 sm:$0xff] }
 0x526   : > { %v5897_v23 = vsel %vm2410_vm9, %v5371_v50, %v8707_v61 }
 0x527   : > { %v5211_v40 = vld [vmem:[#allocation3 + $0x104] sm:$0xff]  ;;  %8814 = vrot.lane.b32.xlu0 %v8813_v1, %s9080_s19  ;;  %v5953_v41 = vsel %vm4168_vm11, %v5939_v7, %v8711_v47  ;;  %v5911_v9 = vsel %vm4168_vm11, %v5897_v23, %v8712_v33  ;;  %v5101_v1 = vld [vmem:[#allocation3 + $0xf8] sm:$0xff] }
 0x528   : > { %v5248_v11 = vld [vmem:[#allocation3 + $0x105] sm:$0xff]  ;;  %v8720_v36 = vpop.permute.xlu1 %8719  ;;  %v5175_v4 = vmax.f32 %v5101_v1, %v5138_v2 }
 0x529   : > { %v5285_v28 = vmax.f32 %v5211_v40, %v5248_v11  ;;  %v8715_v18 = vpop.permute.xlu0 %8714  ;;  %v8722_v21 = vunpack.i.h.bf16 %v8720_v36  ;;  %v8721_v26 = vunpack.i.l.bf16 %v8720_v36  ;;  %v5487_v7 = vld [vmem:[#allocation4 + $0x6a] ss:$2 sm:$0xff] }
 0x52a   : > { %v8717_v3 = vunpack.i.h.bf16 %v8715_v18  ;;  %v8716_v45 = vunpack.i.l.bf16 %v8715_v18  ;;  %v5375_v23 = vld [vmem:[#allocation4 + $0x40] ss:$2 sm:$0xff] }
 0x52b   : > { %v5322_v10 = vmax.f32 %v5174_v16, %v5285_v28  ;;  %8824 = vrot.lane.b32.xlu0 %v8823_v25, %s12771_s23  ;;  %v4735_v19 = vpop.f32.mrf.mxu1  ;;  %v5940_v57 = vsel %vm2410_vm9, %v5485_v56, %v8721_v26  ;;  %v5898_v55 = vsel %vm2410_vm9, %v5373_v29, %v8722_v21  ;;  %v12144_v26 = vpop.f32.mrf.mxu0 }
 0x52c   : > { %v4736_v14 = vadd.f32 %v11960_v8, %v4735_v19  ;;  %v5967_v52 = vsel %vm4209_vm12, %v5953_v41, %v8716_v45  ;;  %v5925_v27 = vsel %vm4209_vm12, %v5911_v9, %v8717_v3 }
 0x52d   : > { %5359 = vst.msk [vmem:[#allocation4 + $0xf0] sm:$0xff] %vm2410_vm9, %v5322_v10  ;;  %6130 = vmatprep.mubr.f32.mxu1 %v5967_v52  ;;  %v4737_v35 = vpop.f32.mrf.mxu1 }
 0x52e   : > { %v5001_v58 = vadd.f32 %v5000_v13, %v4736_v14  ;;  %6131 = vmatmul.mubr.f32.gmra.mxu1 %v5925_v27 }
 0x530   : > { %5063 = vst.msk [vmem:[#allocation3 + $0x110] sm:$0xff] %vm2410_vm9, %v5001_v58  ;;  %v8725_v60 = vpop.permute.xlu0 %8724  ;;  %v5139_v58 = vld [vmem:[#allocation3 + $0x101] sm:$0xff] }
 0x531   : > { %v8727_v39 = vunpack.i.h.bf16 %v8725_v60  ;;  %v8726_v24 = vunpack.i.l.bf16 %v8725_v60  ;;  %v5529_v60 = vld [vmem:[#allocation4 + $0xdc] ss:$2 sm:$0xff] }
 0x533   : > { %v5954_v48 = vsel %vm4168_vm11, %v5940_v57, %v8726_v24  ;;  %v5912_v59 = vsel %vm4168_vm11, %v5898_v55, %v8727_v39  ;;  %v5102_v39 = vld [vmem:[#allocation3 + $0x100] sm:$0xff] }
 0x534   : > { %v5558_v53 = vld [vmem:[#allocation4 + $0xe4] ss:$2 sm:$0xff]  ;;  %v8735_v47 = vpop.permute.xlu0 %8734 }
 0x535   : > { %v5547_v20 = vld [vmem:[#allocation4 + $0xe2] ss:$2 sm:$0xff]  ;;  %7974 = vmatmul.mubr.msk.f32.gmra.mxu0 %vm2410_vm9, %v5558_v53  ;;  %v8730_v54 = vpop.permute.xlu1 %8729  ;;  %v8737_v18 = vunpack.i.h.bf16 %v8735_v47  ;;  %v8736_v25 = vunpack.i.l.bf16 %v8735_v47 }
 0x536   : > { %v8818_v49 = vpack.i.bf16 %v5469_v32, %v5547_v20  ;;  %v8732_v51 = vunpack.i.h.bf16 %v8730_v54  ;;  %v8731_v34 = vunpack.i.l.bf16 %v8730_v54  ;;  %v5176_v32 = vmax.f32 %v5102_v39, %v5139_v58  ;;  %v5489_v55 = vld [vmem:[#allocation4 + $0x7a] ss:$2 sm:$0xff] }
 0x537   : > { %v5212_v31 = vld [vmem:[#allocation3 + $0x10c] sm:$0xff]  ;;  %v5941_v41 = vsel %vm2410_vm9, %v5487_v7, %v8736_v25  ;;  %v5899_v9 = vsel %vm2410_vm9, %v5375_v23, %v8737_v18 }
 0x538   : > { %8819 = vrot.lane.b32.xlu1 %v8818_v49, %s9081_s20  ;;  %v5249_v30 = vld [vmem:[#allocation3 + $0x10d] sm:$0xff]  ;;  %v5968_v61 = vsel %vm4209_vm12, %v5954_v48, %v8731_v34  ;;  %v5926_v17 = vsel %vm4209_vm12, %v5912_v59, %v8732_v51  ;;  %v8838_v49 = vpack.i.bf16 %v12060_v38, %v5529_v60  ;;  %v5010_v34 = vpop.f32.mrf.mxu0 }
 0x539   : > { %v5286_v40 = vmax.f32 %v5212_v31, %v5249_v30  ;;  %6135 = vmatprep.mubr.f32.mxu1 %v5968_v61  ;;  %v9004_v61 = vld [vmem:[#allocation4 + $0x50] ss:$2 sm:$0xff]  ;;  %v5103_v23 = vld [vmem:[#allocation3 + $0x108] sm:$0xff] }
 0x53a   : > { %6136 = vmatmul.mubr.f32.gmra.mxu1 %v5926_v17 }
 0x53b   : > { %v5323_v33 = vmax.f32 %v5175_v4, %v5286_v40  ;;  %v4740_v37 = vpop.f32.mrf.mxu1 }
 0x53c   : > { %v4741_v11 = vadd.f32 %v11960_v8, %v4740_v37  ;;  %v8740_v16 = vpop.permute.xlu1 %8739 }
 0x53d   : > { %5360 = vst.msk [vmem:[#allocation4 + $0xf8] sm:$0xff] %vm2410_vm9, %v5323_v33  ;;  %v4742_v28 = vpop.f32.mrf.mxu1  ;;  %v8742_v50 = vunpack.i.h.bf16 %v8740_v16  ;;  %v8741_v3 = vunpack.i.l.bf16 %v8740_v16 }
 0x53e   : > { %v5006_v12 = vadd.f32 %v12111_v63, %v4741_v11  ;;  %v5471_v28 = vld [vmem:[#allocation4 + $0xc8] ss:$2 sm:$0xff] }
 0x53f   : > { %v5955_v14 = vsel %vm4168_vm11, %v5941_v41, %v8741_v3  ;;  %v5913_v52 = vsel %vm4168_vm11, %v5899_v9, %v8742_v50 }
 0x540   : > { %5064 = vst.msk [vmem:[#allocation3 + $0x118] sm:$0xff] %vm2410_vm9, %v5006_v12  ;;  %v8750_v36 = vpop.permute.xlu1 %8749  ;;  %v5140_v12 = vld [vmem:[#allocation3 + $0x109] sm:$0xff] }
 0x541   : > { %v8745_v45 = vpop.permute.xlu0 %8744  ;;  %v8751_v54 = vunpack.i.l.bf16 %v8750_v36  ;;  %v8752_v56 = vunpack.i.h.bf16 %v8750_v36  ;;  %v5177_v41 = vmax.f32 %v5103_v23, %v5140_v12 }
 0x542   : > { %v8747_v10 = vunpack.i.h.bf16 %v8745_v45  ;;  %v8746_v19 = vunpack.i.l.bf16 %v8745_v45 }
 0x543   : > { %v5942_v59 = vsel %vm2410_vm9, %v5489_v55, %v8751_v54  ;;  %v5900_v17 = vsel %vm2410_vm9, %v9004_v61, %v8752_v56 }
 0x544   : > { %v5969_v27 = vsel %vm4209_vm12, %v5955_v14, %v8746_v19  ;;  %v5927_v63 = vsel %vm4209_vm12, %v5913_v52, %v8747_v10  ;;  %v5538_v13 = vld [vmem:[#allocation4 + $0xf0] ss:$2 sm:$0xff] }
 0x545   : > { %6140 = vmatprep.mubr.f32.mxu1 %v5969_v27  ;;  %v8828_v35 = vpack.i.bf16 %v12038_v42, %v5538_v13  ;;  %v5491_v52 = vld [vmem:[#allocation4 + $0x8a] ss:$2 sm:$0xff] }
 0x546   : > { %6141 = vmatmul.mubr.f32.gmra.mxu1 %v5927_v63  ;;  %v5531_v55 = vld [vmem:[#allocation4 + $0xec] ss:$2 sm:$0xff] }
 0x547   : > { %v5213_v21 = vld [vmem:[#allocation3 + $0x114] sm:$0xff]  ;;  %8829 = vrot.lane.b32.xlu1 %v8828_v35, %s9080_s19 }
 0x548   : > { %v5250_v24 = vld [vmem:[#allocation3 + $0x115] sm:$0xff]  ;;  %v8755_v53 = vpop.permute.xlu0 %8754 }
 0x549   : > { %v5287_v20 = vmax.f32 %v5213_v21, %v5250_v24  ;;  %v8757_v29 = vunpack.i.h.bf16 %v8755_v53  ;;  %v8756_v42 = vunpack.i.l.bf16 %v8755_v53 }
 0x54b   : > { %8839 = vrot.lane.b32.xlu1 %v8838_v49, %s12771_s23  ;;  %v4745_v2 = vpop.f32.mrf.mxu1  ;;  %v5324_v51 = vmax.f32 %v5176_v32, %v5287_v20  ;;  %v5956_v4 = vsel %vm4168_vm11, %v5942_v59, %v8756_v42  ;;  %v5914_v40 = vsel %vm4168_vm11, %v5900_v17, %v8757_v29  ;;  %v5141_v29 = vld [vmem:[#allocation3 + $0x111] sm:$0xff] }
 0x54c   : > { %v4746_v57 = vadd.f32 %v11960_v8, %v4745_v2  ;;  %v8765_v37 = vpop.permute.xlu0 %8764 }
 0x54d   : > { %v8760_v31 = vpop.permute.xlu1 %8759  ;;  %v4747_v48 = vpop.f32.mrf.mxu1  ;;  %5361 = vst.msk [vmem:[#allocation4 + $0x100] sm:$0xff] %vm2410_vm9, %v5324_v51  ;;  %v8767_v50 = vunpack.i.h.bf16 %v8765_v37  ;;  %v8766_v3 = vunpack.i.l.bf16 %v8765_v37 }
 0x54e   : > { %v5011_v1 = vadd.f32 %v5010_v34, %v4746_v57  ;;  %v8762_v30 = vunpack.i.h.bf16 %v8760_v31  ;;  %v8761_v38 = vunpack.i.l.bf16 %v8760_v31  ;;  %v5104_v31 = vld [vmem:[#allocation3 + $0x110] sm:$0xff] }
 0x54f   : > { %v5943_v13 = vsel %vm2410_vm9, %v5491_v52, %v8766_v3  ;;  %v5901_v35 = vsel %vm2410_vm9, %v11945_v6, %v8767_v50  ;;  %v7952_v6 = vpop.f32.mrf.mxu0  ;;  %v5473_v52 = vld [vmem:[#allocation4 + $0xd8] ss:$2 sm:$0xff] }
 0x550   : > { %5065 = vst.msk [vmem:[#allocation3 + $0x120] sm:$0xff] %vm2410_vm9, %v5011_v1  ;;  %v5970_v33 = vsel %vm4209_vm12, %v5956_v4, %v8761_v38  ;;  %v5928_v47 = vsel %vm4209_vm12, %v5914_v40, %v8762_v30  ;;  %v5178_v38 = vmax.f32 %v5104_v31, %v5141_v29 }
 0x551   : > { %6145 = vmatprep.mubr.f32.mxu1 %v5970_v33  ;;  %v5020_v34 = vpop.f32.mrf.mxu0 }
 0x552   : > { %6146 = vmatmul.mubr.f32.gmra.mxu1 %v5928_v47  ;;  %v9005_v47 = vld [vmem:[%s12723_s4] ss:$0 sm:$0xff] }
 0x554   : > { %v8770_v11 = vpop.permute.xlu1 %8769  ;;  %v5560_v16 = vld [vmem:[#allocation4 + $0xf4] ss:$2 sm:$0xff] }
 0x555   : > { %v5549_v18 = vld [vmem:[#allocation4 + $0xf2] ss:$2 sm:$0xff]  ;;  %7976 = vmatprep.mubr.msk.f32.mxu0 %vm2410_vm9, %v5560_v16  ;;  %v8772_v45 = vunpack.i.h.bf16 %v8770_v11  ;;  %v8771_v7 = vunpack.i.l.bf16 %v8770_v11 }
 0x556   : > { %v8833_v25 = vpack.i.bf16 %v5471_v28, %v5549_v18  ;;  %v5493_v11 = vld [vmem:[#allocation4 + $0x9a] ss:$2 sm:$0xff] }
 0x557   : > { %v5214_v10 = vld [vmem:[#allocation3 + $0x11c] sm:$0xff]  ;;  %v5957_v60 = vsel %vm4168_vm11, %v5943_v13, %v8771_v7  ;;  %v5915_v21 = vsel %vm4168_vm11, %v5901_v35, %v8772_v45 }
 0x558   : > { %8834 = vrot.lane.b32.xlu0 %v8833_v25, %s9081_s20  ;;  %v5251_v19 = vld [vmem:[#allocation3 + $0x11d] sm:$0xff]  ;;  %v8780_v54 = vpop.permute.xlu1 %8779 }
 0x559   : > { %v5288_v9 = vmax.f32 %v5214_v10, %v5251_v19  ;;  %v8775_v14 = vpop.permute.xlu0 %8774  ;;  %v8782_v48 = vunpack.i.h.bf16 %v8780_v54  ;;  %v8781_v59 = vunpack.i.l.bf16 %v8780_v54  ;;  %v5142_v23 = vld [vmem:[#allocation3 + $0x119] sm:$0xff]  ;;  %v5475_v54 = vld [vmem:[#allocation4 + $0xe8] ss:$2 sm:$0xff] }
 0x55a   : > { %v8777_v27 = vunpack.i.h.bf16 %v8775_v14  ;;  %v8776_v63 = vunpack.i.l.bf16 %v8775_v14  ;;  %v5105_v10 = vld [vmem:[#allocation3 + $0x118] sm:$0xff]  ;;  %v5106_v14 = vld [vmem:[#allocation3 + $0x120] sm:$0x7f] }
 0x55b   : > { %v5325_v58 = vmax.f32 %v5177_v41, %v5288_v9  ;;  %v4750_v36 = vpop.f32.mrf.mxu1  ;;  %v5944_v25 = vsel %vm2410_vm9, %v5493_v11, %v8781_v59  ;;  %v5902_v12 = vsel %vm2410_vm9, %v11976_v15, %v8782_v48  ;;  %v5179_v9 = vmax.f32 %v5105_v10, %v5142_v23 }
 0x55c   : > { %v4751_v39 = vadd.f32 %v11960_v8, %v4750_v36  ;;  %v5971_v24 = vsel %vm4209_vm12, %v5957_v60, %v8776_v63  ;;  %v5929_v53 = vsel %vm4209_vm12, %v5915_v21, %v8777_v27  ;;  %v5143_v27 = vld [vmem:[#allocation3 + $0x121] sm:$0x7f] }
 0x55d   : > { %5362 = vst.msk [vmem:[#allocation4 + $0x108] sm:$0xff] %vm2410_vm9, %v5325_v58  ;;  %6150 = vmatprep.mubr.f32.mxu1 %v5971_v24  ;;  %v4752_v32 = vpop.f32.mrf.mxu1  ;;  %v5180_v21 = vmax.f32 %v5106_v14, %v5143_v27 }
 0x55e   : > { %v5016_v20 = vadd.f32 %v12144_v26, %v4751_v39  ;;  %6151 = vmatmul.mubr.f32.gmra.mxu1 %v5929_v53 }
 0x55f   : > { %v8785_v42 = vpop.permute.xlu0 %8784 }
 0x560   : > { %5066 = vst.msk [vmem:[#allocation3 + $0x128] sm:$0xff] %vm2410_vm9, %v5016_v20  ;;  %v8787_v17 = vunpack.i.h.bf16 %v8785_v42  ;;  %v8786_v4 = vunpack.i.l.bf16 %v8785_v42  ;;  %v5533_v20 = vld [vmem:[#allocation4 + $0xfc] ss:$2 sm:$0x3] }
 0x562   : > { %v5958_v50 = vsel %vm4168_vm11, %v5944_v25, %v8786_v4  ;;  %v5916_v3 = vsel %vm4168_vm11, %v5902_v12, %v8787_v17  ;;  %v5495_v17 = vld [vmem:[#allocation4 + $0xaa] ss:$2 sm:$0xff] }
 0x564   : > { %v4755_v49 = vpop.f32.mrf.mxu1  ;;  %v5540_v56 = vld [vmem:[#allocation4 + $0x100] ss:$2 sm:$0xff] }
 0x565   : > { %v4756_v2 = vadd.f32 %v11960_v8, %v4755_v49  ;;  %v8843_v51 = vpack.i.bf16 %v12057_v44, %v5540_v56  ;;  %v8853_v44 = vpack.i.bf16 %v12076_v46, %v5531_v55 }
 0x566   : > { %v4757_v57 = vpop.f32.mrf.mxu1 }
 0x567   : > { %v5215_v26 = vld [vmem:[#allocation3 + $0x124] sm:$0xff]  ;;  %v5021_v30 = vadd.f32 %v5020_v34, %v4756_v2  ;;  %8844 = vrot.lane.b32.xlu0 %v8843_v51, %s9080_s19  ;;  %v8795_v51 = vpop.permute.xlu0 %8794 }
 0x568   : > { %v5252_v1 = vld [vmem:[#allocation3 + $0x125] sm:$0xff]  ;;  %v8797_v48 = vunpack.i.h.bf16 %v8795_v51  ;;  %v8796_v59 = vunpack.i.l.bf16 %v8795_v51 }
 0x569   : > { %v5289_v61 = vmax.f32 %v5215_v26, %v5252_v1  ;;  %5067 = vst.msk [vmem:[#allocation3 + $0x130] sm:$0xff] %vm2410_vm9, %v5021_v30  ;;  %v4760_v8 = vpop.f32.mrf.mxu1  ;;  %v5449_v26 = vld [vmem:[#allocation4 + $0xd4] ss:$2 sm:$0x3] }
 0x56a   : > { %v4761_v37 = vadd.f32 %v9005_v47, %v4760_v8 }
 0x56b   : > { %v5326_v40 = vmax.f32 %v5178_v38, %v5289_v61  ;;  %v8790_v33 = vpop.permute.xlu1 %8789  ;;  %8854 = vrot.lane.b32.xlu0 %v8853_v44, %s12771_s23  ;;  %v4762_v18 = vpop.f32.mrf.mxu1  ;;  %v5945_v44 = vsel %vm2410_vm9, %v5495_v17, %v8796_v59 }
 0x56c   : > { %v8792_v16 = vunpack.i.h.bf16 %v8790_v33  ;;  %v8791_v28 = vunpack.i.l.bf16 %v8790_v33  ;;  %v5026_v46 = vadd.f32 %v7952_v6, %v4761_v37  ;;  %v5421_v6 = vld [vmem:[#allocation4 + $0xd2] ss:$2 sm:$0x3] }
 0x56d   : > { %5363 = vst.msk [vmem:[#allocation4 + $0x110] sm:$0xff] %vm2410_vm9, %v5326_v40  ;;  %v8868_v29 = vpack.i.bf16 %v5421_v6, %v5533_v20  ;;  %v9006_v40 = vld [vmem:[#allocation4 + $0x80] ss:$2 sm:$0xff] }
 0x56e   : > { %v5972_v45 = vsel %vm4209_vm12, %v5958_v50, %v8791_v28  ;;  %v5930_v7 = vsel %vm4209_vm12, %v5916_v3, %v8792_v16  ;;  %5069 = vst.msk [vmem:[#allocation3 + $0x138] sm:$0xf] %vm5068_vm14, %v5026_v46  ;;  %v5903_v33 = vsel %vm2410_vm9, %v9006_v40, %v8797_v48  ;;  %v6563_v48 = vld [vmem:[%s12726_s7 + $0x70] sm:$0xff]  ;;  %v6561_v40 = vld [vmem:[%s12726_s7 + $0x60] sm:$0xff] }
 0x56f   : > { %6155 = vmatprep.mubr.f32.mxu1 %v5972_v45  ;;  %v5497_v45 = vld [vmem:[#allocation4 + $0xba] ss:$2 sm:$0xff] }
 0x570   : > { %6156 = vmatmul.mubr.f32.gmra.mxu1 %v5930_v7  ;;  %v5216_v19 = vld [vmem:[#allocation3 + $0x12c] sm:$0xff] }
 0x571   : > { %v5253_v41 = vld [vmem:[#allocation3 + $0x12d] sm:$0xff] }
 0x572   : > { %v5290_v15 = vmax.f32 %v5216_v19, %v5253_v41 }
 0x574   : > { %v5327_v63 = vmax.f32 %v5179_v9, %v5290_v15  ;;  %v5562_v13 = vld [vmem:[#allocation4 + $0x104] ss:$2 sm:$0xff] }
 0x575   : > { %v5551_v35 = vld [vmem:[#allocation4 + $0x102] ss:$2 sm:$0xff]  ;;  %7977 = vmatmul.mubr.msk.f32.gmra.mxu0 %vm2410_vm9, %v5562_v13  ;;  %v5217_v36 = vld [vmem:[#allocation3 + $0x134] sm:$0x7f] }
 0x576   : > { %v8848_v58 = vpack.i.bf16 %v5473_v52, %v5551_v35  ;;  %5364 = vst.msk [vmem:[#allocation4 + $0x118] sm:$0xff] %vm2410_vm9, %v5327_v63  ;;  %v5254_v60 = vld [vmem:[#allocation3 + $0x135] sm:$0x7f] }
 0x577   : > { %v5291_v39 = vmax.f32 %v5217_v36, %v5254_v60  ;;  %v5499_v60 = vld [vmem:[#allocation4 + $0xca] ss:$2 sm:$0xff] }
 0x578   : > { %8849 = vrot.lane.b32.xlu1 %v8848_v58, %s9081_s20 }
 0x579   : > { %v5328_v24 = vmax.f32 %v5180_v21, %v5291_v39 }
 0x57a   : > { %v8800_v57 = vpop.permute.xlu1 %8799 }
 0x57b   : > { %5366 = vst.msk [vmem:[#allocation4 + $0x120] sm:$0x7f] %vm5365_vm15, %v5328_v24  ;;  %v8802_v1 = vunpack.i.h.bf16 %v8800_v57  ;;  %v8801_v30 = vunpack.i.l.bf16 %v8800_v57  ;;  %v6580_v57 = vld [vmem:[%s12726_s7 + $0xf8] sm:$0xff] }
 0x57c   : > { %7572 = vmatprep.subr.mxu1 %v6580_v57  ;;  %v6570_v57 = vld [vmem:[%s12726_s7 + $0xa8] sm:$0xff] }
 0x57d   : > { %v5542_v53 = vld [vmem:[#allocation4 + $0x110] ss:$2 sm:$0xff]  ;;  %v5959_v47 = vsel %vm4168_vm11, %v5945_v44, %v8801_v30  ;;  %v5917_v37 = vsel %vm4168_vm11, %v5903_v33, %v8802_v1 }
 0x57e   : > { %v8858_v32 = vpack.i.bf16 %v12074_v5, %v5542_v53  ;;  %v5477_v5 = vld [vmem:[#allocation4 + $0xf8] ss:$2 sm:$0x3]  ;;  %v8810_v28 = vpop.permute.xlu1 %8809 }
 0x57f   : > { %v8812_v25 = vunpack.i.h.bf16 %v8810_v28  ;;  %v8811_v12 = vunpack.i.l.bf16 %v8810_v28  ;;  %v6560_v28 = vld [vmem:[%s12726_s7 + $0x58] sm:$0xff] }
 0x580   : > { %8859 = vrot.lane.b32.xlu1 %v8858_v32, %s9080_s19 }
 0x581   : > { %v5946_v10 = vsel %vm2410_vm9, %v5497_v45, %v8811_v12  ;;  %v5904_v19 = vsel %vm2410_vm9, %v12011_v62, %v8812_v25 }
 0x582   : > { %v5564_v49 = vld [vmem:[#allocation4 + $0x114] ss:$2 sm:$0xff]  ;;  %v5566_v56 = vld [vmem:[#allocation4 + $0x124] ss:$2 sm:$0x3] }
 0x583   : > { %7979 = vmatprep.mubr.msk.f32.mxu0 %vm2410_vm9, %v5564_v49  ;;  %v5553_v42 = vld [vmem:[#allocation4 + $0x112] ss:$2 sm:$0xff]  ;;  %v5555_v2 = vld [vmem:[#allocation4 + $0x122] ss:$2 sm:$0x3]  ;;  %v7963_v49 = vpop.f32.mrf.mxu0 }
 0x584   : > { %7980 = vmatmul.mubr.msk.f32.gmra.mxu0 %vm2410_vm9, %v5566_v56  ;;  %8869 = vrot.lane.b32.xlu1 %v8868_v29, %s12771_s23  ;;  %v8863_v34 = vpack.i.bf16 %v5475_v54, %v5553_v42  ;;  %v5544_v55 = vld [vmem:[#allocation4 + $0x120] ss:$2 sm:$0x3]  ;;  %v8878_v31 = vpack.i.bf16 %v5477_v5, %v5555_v2  ;;  %v12221_v56 = vld [vmem:[%s12725_s6] ss:$0 sm:$0xff]  ;;  %v6564_v5 = vld [vmem:[%s12726_s7 + $0x78] sm:$0xff] }
 0x585   : > { %v8873_v38 = vpack.i.bf16 %v5449_v26, %v5544_v55  ;;  %v6257_v2 = vpop.f32.mrf.mxu0  ;;  %v6579_v55 = vld [vmem:[%s12726_s7 + $0xf0] sm:$0xff]  ;;  %7573 = vmatpush3.msra.mxu1 %v6564_v5  ;;  %v6578_v26 = vld [vmem:[%s12726_s7 + $0xe8] sm:$0xff]  ;;  %s7383_s23 = sshll.u32 %s9174_s29, 4  ;;  %s9082_s29 = smov [#allocation7]  }
 0x586   : > { %8864 = vrot.lane.b32.xlu0 %v8863_v34, %s9081_s20  ;;  %7574 = vmatprep.subr.mxu1 %v6579_v55  ;;  %s12684_s30 = scalar_lea.hbm %s12732_s13, %s7383_s23  ;;  %s9012_s16 = sshll.u32 %s9082_s29, 4  ;;  %s9013_s16 = int_to_ptr.vmem [resolvable:$false] %s9012_s16 }
 0x587   : > { %7575 = vmatpush3.msra.mxu1 %v6563_v48  ;;  %s9014_s25 = scalar_lea.vmem %s9013_s16, 32 }
 0x588   : > { %8879 = vrot.lane.b32.xlu1 %v8878_v31, %s9081_s20  ;;  %7576 = vmatprep.subr.mxu1 %v6578_v26  ;;  %s432_s20 = scalar_lea.vmem [#allocation7], %s431_s15 }
 0x589   : > { %s7210_s0 = sshll.u32 %s432_s20, 4  ;;  %s7211_s0 = int_to_ptr.vmem [resolvable:$true] %s7210_s0 }
 0x58a   : > { %8874 = vrot.lane.b32.xlu0 %v8873_v38, %s9080_s19  ;;  %v8805_v61 = vpop.permute.xlu0 %8804  ;;  %v6562_v38 = vld [vmem:[%s12726_s7 + $0x68] sm:$0xff]  ;;  %s9008_s17 = scalar_lea.vmem %s7211_s0, 16  ;;  %p9015_p0 = scmp.lt.s32.totalorder %s7211_s0, %s9013_s16 }
 0x58b   : > { %v8807_v4 = vunpack.i.h.bf16 %v8805_v61  ;;  %v8806_v8 = vunpack.i.l.bf16 %v8805_v61  ;;  %7577 = vmatpush3.msra.mxu1 %v6562_v38  ;;  %p9009_p11 = scmp.ne.s32.totalorder %s7211_s0, %s9008_s17  ;;  %p9016_p1 = scmp.lt.s32.totalorder %s9014_s25, %s9008_s17 }
 0x58d   : > { %v5973_v11 = vsel %vm4209_vm12, %v5959_v47, %v8806_v8  ;;  %v5931_v16 = vsel %vm4209_vm12, %v5917_v37, %v8807_v4  ;;  %v6577_v4 = vld [vmem:[%s12726_s7 + $0xe0] sm:$0xff]  ;;  %v6576_v37 = vld [vmem:[%s12726_s7 + $0xd8] sm:$0xff]  ;;  %p9010_p12 = pnand %p9009_p11, %p9191_p5  ;;  %p9017_p2 = por %p9016_p1, %p9015_p0 }
 0x58e   : > { %6160 = vmatprep.mubr.f32.mxu1 %v5973_v11  ;;  %v5501_v47 = vld [vmem:[#allocation4 + $0xda] ss:$2 sm:$0xff]  ;;  %7578 = vmatprep.subr.mxu1 %v6577_v4 }
 0x58f   : > { %6161 = vmatmul.mubr.f32.gmra.mxu1 %v5931_v16  ;;  %p9011_p13 = pneg %p9010_p12 }
 0x590   : > { %7579 = vmatpush3.msra.mxu1 %v6561_v40 }
 0x591   : > { %7580 = vmatprep.subr.mxu1 %v6576_v37  ;;  %p9018_p3 = pnand %p9017_p2, %p9011_p13 }
 0x592   : > { %7581 = vmatpush3.msra.mxu1 %v6560_v28 }
 0x599   : > { %v8815_v18 = vpop.permute.xlu0 %8814 }
 0x59a   : > { %v8817_v46 = vunpack.i.h.bf16 %v8815_v18  ;;  %v8816_v50 = vunpack.i.l.bf16 %v8815_v18 }
 0x59c   : > { %v5960_v41 = vsel %vm4168_vm11, %v5946_v10, %v8816_v50  ;;  %v5918_v9 = vsel %vm4168_vm11, %v5904_v19, %v8817_v46  ;;  %v6559_v10 = vld [vmem:[%s12726_s7 + $0x50] sm:$0xff]  ;;  %v12270_v19 = vpop.f32.mrf.mxu0 }
 0x59d   : > { %v8825_v52 = vpop.permute.xlu0 %8824 }
 0x59e   : > { %v8827_v63 = vunpack.i.h.bf16 %v8825_v52  ;;  %v8826_v13 = vunpack.i.l.bf16 %v8825_v52  ;;  %v6574_v52 = vld [vmem:[%s12726_s7 + $0xc8] sm:$0xff] }
 0x5a0   : > { %v5947_v39 = vsel %vm2410_vm9, %v5499_v60, %v8826_v13  ;;  %v5905_v24 = vsel %vm2410_vm9, %v12031_v43, %v8827_v63  ;;  %v6558_v13 = vld [vmem:[%s12726_s7 + $0x48] sm:$0xff] }
 0x5aa   : > { %v8820_v3 = vpop.permute.xlu1 %8819 }
 0x5ab   : > { %v8822_v7 = vunpack.i.h.bf16 %v8820_v3  ;;  %v8821_v23 = vunpack.i.l.bf16 %v8820_v3 }
 0x5ad   : > { %v5974_v15 = vsel %vm4209_vm12, %v5960_v41, %v8821_v23  ;;  %v5932_v14 = vsel %vm4209_vm12, %v5918_v9, %v8822_v7 }
 0x5ae   : > { %6165 = vmatprep.mubr.f32.mxu1 %v5974_v15 }
 0x5af   : > { %6166 = vmatmul.mubr.f32.gmra.mxu1 %v5932_v14 }
 0x5b9   : > { %v8830_v27 = vpop.permute.xlu1 %8829 }
 0x5ba   : > { %v8832_v35 = vunpack.i.h.bf16 %v8830_v27  ;;  %v8831_v58 = vunpack.i.l.bf16 %v8830_v27 }
 0x5bc   : > { %v5961_v53 = vsel %vm4168_vm11, %v5947_v39, %v8831_v58  ;;  %v5919_v32 = vsel %vm4168_vm11, %v5905_v24, %v8832_v35  ;;  %v6267_v35 = vpop.f32.mrf.mxu0  ;;  %v6557_v24 = vld [vmem:[%s12726_s7 + $0x40] sm:$0xff] }
 0x5bd   : > { %v8840_v34 = vpop.permute.xlu1 %8839 }
 0x5be   : > { %v8841_v1 = vunpack.i.l.bf16 %v8840_v34  ;;  %v8842_v61 = vunpack.i.h.bf16 %v8840_v34 }
 0x5c0   : > { %v5948_v16 = vsel %vm2410_vm9, %v5501_v47, %v8841_v1  ;;  %v5906_v46 = vsel %vm2410_vm9, %v12050_v22, %v8842_v61  ;;  %v6575_v22 = vld [vmem:[%s12726_s7 + $0xd0] sm:$0xff]  ;;  %v5505_v61 = vld [vmem:[#allocation4 + $0xfa] ss:$2 sm:$0x3] }
 0x5c1   : > { %7582 = vmatprep.subr.mxu1 %v6575_v22  ;;  %v6553_v47 = vld [vmem:[%s12726_s7 + $0x20] sm:$0xff]  ;;  %v6551_v22 = vld [vmem:[%s12726_s7 + $0x10] sm:$0xff] }
 0x5c2   : > { %7583 = vmatpush3.msra.mxu1 %v6559_v10  ;;  %v6566_v10 = vld [vmem:[%s12726_s7 + $0x88] sm:$0xff] }
 0x5c3   : > { %7584 = vmatprep.subr.mxu1 %v6574_v52  ;;  %v6549_v52 = vld [vmem:[%s12726_s7] sm:$0xff] }
 0x5c4   : > { %7585 = vmatpush3.msra.mxu1 %v6558_v13  ;;  %v7969_v13 = vpop.f32.mrf.mxu0 }
 0x5ca   : > { %v8835_v36 = vpop.permute.xlu0 %8834 }
 0x5cb   : > { %v8837_v21 = vunpack.i.h.bf16 %v8835_v36  ;;  %v8836_v62 = vunpack.i.l.bf16 %v8835_v36  ;;  %v6573_v36 = vld [vmem:[%s12726_s7 + $0xc0] sm:$0xff] }
 0x5cc   : > { %7586 = vmatprep.subr.mxu1 %v6573_v36 }
 0x5cd   : > { %v5975_v20 = vsel %vm4209_vm12, %v5961_v53, %v8836_v62  ;;  %v5933_v6 = vsel %vm4209_vm12, %v5919_v32, %v8837_v21  ;;  %v5503_v53 = vld [vmem:[#allocation4 + $0xea] ss:$2 sm:$0xff]  ;;  %7587 = vmatpush3.msra.mxu1 %v6557_v24  ;;  %v6610_v24 = vld [vmem:[%s12726_s7 + $0x1e8] sm:$0xff] }
 0x5ce   : > { %6170 = vmatprep.mubr.f32.mxu1 %v5975_v20  ;;  %v6572_v32 = vld [vmem:[%s12726_s7 + $0xb8] sm:$0xff] }
 0x5cf   : > { %6171 = vmatmul.mubr.f32.gmra.mxu1 %v5933_v6  ;;  %7588 = vmatprep.subr.mxu1 %v6572_v32 }
 0x5d6   : > { %v7512_v54 = vpop.f32.mrf.mxu1 }
 0x5d8   : > { %v7513_v29 = vpop.f32.mrf.mxu1 }
 0x5d9   : > { %v7514_v42 = vadd.f32 %v7513_v29, %v7512_v54  ;;  %v8845_v59 = vpop.permute.xlu0 %8844  ;;  %v6556_v54 = vld [vmem:[%s12726_s7 + $0x38] sm:$0xff]  ;;  %v6555_v29 = vld [vmem:[%s12726_s7 + $0x30] sm:$0xff] }
 0x5da   : > { %v8847_v8 = vunpack.i.h.bf16 %v8845_v59  ;;  %v8846_v44 = vunpack.i.l.bf16 %v8845_v59  ;;  %7589 = vmatpush3.msra.mxu1 %v6556_v54 }
 0x5db   : > { %v6123_v43 = vadd.f32 %v7514_v42, %v12221_v56 }
 0x5dc   : > { %v5962_v50 = vsel %vm4168_vm11, %v5948_v16, %v8846_v44  ;;  %v5920_v3 = vsel %vm4168_vm11, %v5906_v46, %v8847_v8 }
 0x5dd   : > { %v6258_v51 = vadd.f32 %v6257_v2, %v6123_v43  ;;  %v8855_v41 = vpop.permute.xlu0 %8854 }
 0x5de   : > { %v8856_v27 = vunpack.i.l.bf16 %v8855_v41  ;;  %v8857_v58 = vunpack.i.h.bf16 %v8855_v41  ;;  %v6550_v41 = vld [vmem:[%s12726_s7 + $0x8] sm:$0xff] }
 0x5df   : > { %6326 = vst.msk [vmem:[#allocation5] sm:$0xff] %vm4168_vm11, %v6258_v51  ;;  %v9007_v51 = vld [vmem:[#allocation4 + $0xc0] ss:$2 sm:$0xff] }
 0x5e0   : > { %v5949_v6 = vsel %vm2410_vm9, %v5503_v53, %v8856_v27  ;;  %v5907_v34 = vsel %vm2410_vm9, %v9007_v51, %v8857_v58  ;;  %v6595_v27 = vld [vmem:[%s12726_s7 + $0x170] sm:$0xff]  ;;  %v6594_v53 = vld [vmem:[%s12726_s7 + $0x168] sm:$0xff] }
 0x5e1   : > { %v6591_v51 = vld [vmem:[%s12726_s7 + $0x150] sm:$0xff] }
 0x5e2   : > { %v7515_v31 = vpop.f32.mrf.mxu1 }
 0x5e4   : > { %v7516_v30 = vpop.f32.mrf.mxu1 }
 0x5e5   : > { %v7517_v17 = vadd.f32 %v7516_v30, %v7515_v31  ;;  %v6554_v30 = vld [vmem:[%s12726_s7 + $0x28] sm:$0xff] }
 0x5e7   : > { %v6128_v33 = vadd.f32 %v7517_v17, %v12221_v56  ;;  %v6569_v17 = vld [vmem:[%s12726_s7 + $0xa0] sm:$0xff] }
 0x5e9   : > { %v6263_v18 = vadd.f32 %v7963_v49, %v6128_v33  ;;  %v6571_v49 = vld [vmem:[%s12726_s7 + $0xb0] sm:$0xff]  ;;  %v5393_v33 = vld [vmem:[#allocation4 + $0xd0] ss:$2 sm:$0x3] }
 0x5ea   : > { %v8850_v11 = vpop.permute.xlu1 %8849  ;;  %7590 = vmatprep.subr.mxu1 %v6571_v49  ;;  %v6608_v49 = vld [vmem:[%s12726_s7 + $0x1d8] sm:$0xff] }
 0x5eb   : > { %v8852_v25 = vunpack.i.h.bf16 %v8850_v11  ;;  %v8851_v12 = vunpack.i.l.bf16 %v8850_v11  ;;  %6327 = vst.msk [vmem:[#allocation5 + $0x8] sm:$0xff] %vm4168_vm11, %v6263_v18  ;;  %7591 = vmatpush3.msra.mxu1 %v6555_v29  ;;  %v6568_v18 = vld [vmem:[%s12726_s7 + $0x98] sm:$0xff] }
 0x5ec   : > { %7592 = vmatprep.subr.mxu1 %v6570_v57  ;;  %v6592_v29 = vld [vmem:[%s12726_s7 + $0x158] sm:$0xff] }
 0x5ed   : > { %v5976_v45 = vsel %vm4209_vm12, %v5962_v50, %v8851_v12  ;;  %v5934_v7 = vsel %vm4209_vm12, %v5920_v3, %v8852_v25  ;;  %7593 = vmatpush3.msra.mxu1 %v6554_v30  ;;  %v6604_v30 = vld [vmem:[%s12726_s7 + $0x1b8] sm:$0xff] }
 0x5ee   : > { %6175 = vmatprep.mubr.f32.mxu1 %v5976_v45  ;;  %v7518_v23 = vpop.f32.mrf.mxu1  ;;  %7594 = vmatprep.subr.mxu1 %v6569_v17  ;;  %v6552_v45 = vld [vmem:[%s12726_s7 + $0x18] sm:$0xff]  ;;  %v6587_v17 = vld [vmem:[%s12726_s7 + $0x130] sm:$0xff] }
 0x5ef   : > { %6176 = vmatmul.mubr.f32.gmra.mxu1 %v5934_v7  ;;  %v6567_v7 = vld [vmem:[%s12726_s7 + $0x90] sm:$0xff] }
 0x5f0   : > { %v7519_v9 = vpop.f32.mrf.mxu1  ;;  %7595 = vmatpush3.msra.mxu1 %v6553_v47 }
 0x5f1   : > { %v7520_v15 = vadd.f32 %v7519_v9, %v7518_v23  ;;  %7596 = vmatprep.subr.mxu1 %v6568_v18  ;;  %v6612_v9 = vld [vmem:[%s12726_s7 + $0x1f8] sm:$0xff] }
 0x5f2   : > { %v8860_v14 = vpop.permute.xlu1 %8859  ;;  %7597 = vmatpush3.msra.mxu1 %v6552_v45  ;;  %7628 = vmatprep.subr.mxu0 %v6612_v9  ;;  %v6349_v36 = vld [vmem:[#allocation5 + $0x1] sm:$0xff] }
 0x5f3   : > { %v6133_v63 = vadd.f32 %v7520_v15, %v12221_v56  ;;  %v8862_v21 = vunpack.i.h.bf16 %v8860_v14  ;;  %v8861_v62 = vunpack.i.l.bf16 %v8860_v14  ;;  %7598 = vmatprep.subr.mxu1 %v6567_v7  ;;  %v6596_v15 = vld [vmem:[%s12726_s7 + $0x178] sm:$0xff]  ;;  %v6611_v14 = vld [vmem:[%s12726_s7 + $0x1f0] sm:$0xff] }
 0x5f4   : > { %7599 = vmatpush3.msra.mxu1 %v6551_v22  ;;  %7629 = vmatpush3.msra.mxu0 %v6596_v15  ;;  %v6583_v45 = vld [vmem:[%s12726_s7 + $0x110] sm:$0xff]  ;;  %v6582_v22 = vld [vmem:[%s12726_s7 + $0x108] sm:$0xff] }
 0x5f5   : > { %v6268_v60 = vadd.f32 %v6267_v35, %v6133_v63  ;;  %v5963_v55 = vsel %vm4168_vm11, %v5949_v6, %v8861_v62  ;;  %v5921_v31 = vsel %vm4168_vm11, %v5907_v34, %v8862_v21  ;;  %7600 = vmatprep.subr.mxu1 %v6566_v10  ;;  %7630 = vmatprep.subr.mxu0 %v6611_v14  ;;  %v6593_v6 = vld [vmem:[%s12726_s7 + $0x160] sm:$0xff] }
 0x5f6   : > { %v8870_v39 = vpop.permute.xlu1 %8869  ;;  %7601 = vmatpush3.msra.mxu1 %v6550_v41  ;;  %7631 = vmatpush3.msra.mxu0 %v6595_v27  ;;  %v6597_v10 = vld [vmem:[%s12726_s7 + $0x180] sm:$0xff] }
 0x5f7   : > { %6328 = vst.msk [vmem:[#allocation5 + $0x10] sm:$0xff] %vm4168_vm11, %v6268_v60  ;;  %v8871_v42 = vunpack.i.l.bf16 %v8870_v39  ;;  %v8872_v5 = vunpack.i.h.bf16 %v8870_v39  ;;  %v6277_v39 = vpop.f32.mrf.mxu0  ;;  %7632 = vmatprep.subr.mxu0 %v6610_v24  ;;  %v6581_v41 = vld [vmem:[%s12726_s7 + $0x100] sm:$0xff] }
 0x5f8   : > { %v8865_v20 = vpop.permute.xlu0 %8864  ;;  %7633 = vmatpush3.msra.mxu0 %v6594_v53 }
 0x5f9   : > { %v8867_v43 = vunpack.i.h.bf16 %v8865_v20  ;;  %v8866_v2 = vunpack.i.l.bf16 %v8865_v20  ;;  %v5950_v40 = vsel %vm2410_vm9, %v5505_v61, %v8871_v42  ;;  %v5908_v28 = vsel %vm2410_vm9, %v5393_v33, %v8872_v5  ;;  %v6609_v20 = vld [vmem:[%s12726_s7 + $0x1e0] sm:$0xff]  ;;  %v6603_v61 = vld [vmem:[%s12726_s7 + $0x1b0] sm:$0xff]  ;;  %v7972_v33 = vpop.f32.mrf.mxu0 }
 0x5fa   : > { %v8880_v48 = vpop.permute.xlu1 %8879  ;;  %v7521_v59 = vpop.f32.mrf.mxu1  ;;  %7634 = vmatprep.subr.mxu0 %v6609_v20 }
 0x5fb   : > { %v5977_v26 = vsel %vm4209_vm12, %v5963_v55, %v8866_v2  ;;  %v5935_v1 = vsel %vm4209_vm12, %v5921_v31, %v8867_v43  ;;  %v8882_v37 = vunpack.i.h.bf16 %v8880_v48  ;;  %v8881_v11 = vunpack.i.l.bf16 %v8880_v48  ;;  %7635 = vmatpush3.msra.mxu0 %v6593_v6  ;;  %v6607_v43 = vld [vmem:[%s12726_s7 + $0x1d0] sm:$0xff]  ;;  %v6606_v31 = vld [vmem:[%s12726_s7 + $0x1c8] sm:$0xff] }
 0x5fc   : > { %v8875_v38 = vpop.permute.xlu0 %8874  ;;  %6180 = vmatprep.mubr.f32.mxu1 %v5977_v26  ;;  %v7522_v44 = vpop.f32.mrf.mxu1  ;;  %7636 = vmatprep.subr.mxu0 %v6608_v49  ;;  %v6590_v48 = vld [vmem:[%s12726_s7 + $0x148] sm:$0xff]  ;;  %v6589_v26 = vld [vmem:[%s12726_s7 + $0x140] sm:$0xff] }
 0x5fd   : > { %v8877_v4 = vunpack.i.h.bf16 %v8875_v38  ;;  %v8876_v8 = vunpack.i.l.bf16 %v8875_v38  ;;  %6181 = vmatmul.mubr.f32.gmra.mxu1 %v5935_v1  ;;  %v7523_v16 = vadd.f32 %v7522_v44, %v7521_v59  ;;  %7637 = vmatpush3.msra.mxu0 %v6592_v29  ;;  %v6605_v59 = vld [vmem:[%s12726_s7 + $0x1c0] sm:$0xff]  ;;  %v6588_v38 = vld [vmem:[%s12726_s7 + $0x138] sm:$0xff]  ;;  %v6586_v44 = vld [vmem:[%s12726_s7 + $0x128] sm:$0xff] }
 0x5fe   : > { %7638 = vmatprep.subr.mxu0 %v6607_v43  ;;  %v6350_v34 = vld [vmem:[#allocation5 + $0x9] sm:$0xff] }
 0x5ff   : > { %v5964_v25 = vsel %vm4168_vm11, %v5950_v40, %v8876_v8  ;;  %v5922_v12 = vsel %vm4168_vm11, %v5908_v28, %v8877_v4  ;;  %v6138_v46 = vadd.f32 %v7523_v16, %v12221_v56  ;;  %7639 = vmatpush3.msra.mxu0 %v6591_v51  ;;  %v6602_v4 = vld [vmem:[%s12726_s7 + $0x1a8] sm:$0xff]  ;;  %v6601_v40 = vld [vmem:[%s12726_s7 + $0x1a0] sm:$0xff]  ;;  %v6600_v16 = vld [vmem:[%s12726_s7 + $0x198] sm:$0xff] }
 0x600   : > { %v5978_v50 = vsel %vm4209_vm12, %v5964_v25, %v8881_v11  ;;  %v5936_v3 = vsel %vm4209_vm12, %v5922_v12, %v8882_v37  ;;  %7640 = vmatprep.subr.mxu0 %v6606_v31  ;;  %v6585_v37 = vld [vmem:[%s12726_s7 + $0x120] sm:$0xff]  ;;  %v6584_v25 = vld [vmem:[%s12726_s7 + $0x118] sm:$0xff] }
 0x601   : > { %6185 = vmatprep.mubr.f32.mxu1 %v5978_v50  ;;  %v6273_v23 = vadd.f32 %v12270_v19, %v6138_v46  ;;  %v6565_v19 = vld [vmem:[%s12726_s7 + $0x80] sm:$0xff]  ;;  %7641 = vmatpush3.msra.mxu0 %v6590_v48  ;;  %v6599_v50 = vld [vmem:[%s12726_s7 + $0x190] sm:$0xff] }
 0x602   : > { %6186 = vmatmul.mubr.f32.gmra.mxu1 %v5936_v3  ;;  %7602 = vmatprep.subr.mxu1 %v6565_v19  ;;  %v6287_v3 = vpop.f32.mrf.mxu0 }
 0x603   : > { %6329 = vst.msk [vmem:[#allocation5 + $0x18] sm:$0xff] %vm4168_vm11, %v6273_v23  ;;  %7603 = vmatpush3.msra.mxu1 %v6549_v52  ;;  %7642 = vmatprep.subr.mxu0 %v6605_v59  ;;  %v6598_v23 = vld [vmem:[%s12726_s7 + $0x188] sm:$0xff] }
 0x604   : > { %7643 = vmatpush3.msra.mxu0 %v6589_v26  ;;  %v7975_v20 = vpop.f32.mrf.mxu0 }
 0x605   : > { %7644 = vmatprep.subr.mxu0 %v6604_v30 }
 0x606   : > { %v7524_v63 = vpop.f32.mrf.mxu1  ;;  %7645 = vmatpush3.msra.mxu0 %v6588_v38  ;;  %v6297_v29 = vpop.f32.mrf.mxu0 }
 0x607   : > { %7646 = vmatprep.subr.mxu0 %v6603_v61 }
 0x608   : > { %v7525_v35 = vpop.f32.mrf.mxu1  ;;  %7647 = vmatpush3.msra.mxu0 %v6587_v17 }
 0x609   : > { %v7526_v58 = vadd.f32 %v7525_v35, %v7524_v63  ;;  %7648 = vmatprep.subr.mxu0 %v6602_v4 }
 0x60a   : > { %v6365_v60 = vld [vmem:[#allocation5 + $0x14] sm:$0xff]  ;;  %7649 = vmatpush3.msra.mxu0 %v6586_v44  ;;  %v6341_v44 = vld [vmem:[#allocation5] sm:$0xff] }
 0x60b   : > { %v6143_v21 = vadd.f32 %v7526_v58, %v12221_v56  ;;  %v8883_v62 = vpack.i.bf16 %v6349_v36, %v6365_v60  ;;  %v6351_v28 = vld [vmem:[#allocation5 + $0x11] sm:$0xff]  ;;  %7650 = vmatprep.subr.mxu0 %v6601_v40 }
 0x60c   : > { %7651 = vmatpush3.msra.mxu0 %v6585_v37  ;;  %v6381_v19 = vld [vmem:[#allocation5 + $0x16] sm:$0xff] }
 0x60d   : > { %v6278_v32 = vadd.f32 %v6277_v39, %v6143_v21  ;;  %8884 = vrot.lane.b32.xlu0 %v8883_v62, %s9080_s19  ;;  %7652 = vmatprep.subr.mxu0 %v6600_v16  ;;  %v6358_v16 = vld [vmem:[#allocation5 + $0xa] sm:$0xff] }
 0x60e   : > { %7653 = vmatpush3.msra.mxu0 %v6584_v25 }
 0x60f   : > { %6330 = vst.msk [vmem:[#allocation5 + $0x20] sm:$0xff] %vm4168_vm11, %v6278_v32  ;;  %7654 = vmatprep.subr.mxu0 %v6599_v50 }
 0x610   : > { %7655 = vmatpush3.msra.mxu0 %v6583_v45 }
 0x611   : > { %7656 = vmatprep.subr.mxu0 %v6598_v23 }
 0x612   : > { %v7527_v54 = vpop.f32.mrf.mxu1  ;;  %7657 = vmatpush3.msra.mxu0 %v6582_v22 }
 0x613   : > { %7658 = vmatprep.subr.mxu0 %v6597_v10 }
 0x614   : > { %v7528_v42 = vpop.f32.mrf.mxu1  ;;  %7659 = vmatpush3.msra.mxu0 %v6581_v41 }
 0x615   : > { %v7529_v2 = vadd.f32 %v7528_v42, %v7527_v54 }
 0x616   : > { %v6366_v57 = vld [vmem:[#allocation5 + $0x1c] sm:$0xff] }
 0x617   : > { %v6148_v5 = vadd.f32 %v7529_v2, %v12221_v56  ;;  %v8888_v55 = vpack.i.bf16 %v6350_v34, %v6366_v57  ;;  %v6352_v15 = vld [vmem:[#allocation5 + $0x19] sm:$0xff] }
 0x618   : > { %v6382_v60 = vld [vmem:[#allocation5 + $0x1e] sm:$0xff] }
 0x619   : > { %v6283_v1 = vadd.f32 %v7969_v13, %v6148_v5  ;;  %8889 = vrot.lane.b32.xlu1 %v8888_v55, %s9080_s19 }
 0x61b   : > { %6331 = vst.msk [vmem:[#allocation5 + $0x28] sm:$0xff] %vm4168_vm11, %v6283_v1 }
 0x61e   : > { %v7530_v8 = vpop.f32.mrf.mxu1 }
 0x620   : > { %v7531_v47 = vpop.f32.mrf.mxu1 }
 0x621   : > { %v7532_v11 = vadd.f32 %v7531_v47, %v7530_v8  ;;  %v6357_v8 = vld [vmem:[#allocation5 + $0x2] sm:$0xff] }
 0x622   : > { %v6367_v18 = vld [vmem:[#allocation5 + $0x24] sm:$0xff] }
 0x623   : > { %v6153_v12 = vadd.f32 %v7532_v11, %v12221_v56  ;;  %v8893_v46 = vpack.i.bf16 %v6351_v28, %v6367_v18  ;;  %v6353_v62 = vld [vmem:[#allocation5 + $0x21] sm:$0xff] }
 0x624   : > { %v6383_v2 = vld [vmem:[#allocation5 + $0x26] sm:$0xff] }
 0x625   : > { %v6288_v7 = vadd.f32 %v6287_v3, %v6153_v12  ;;  %8894 = vrot.lane.b32.xlu0 %v8893_v46, %s9080_s19  ;;  %v6342_v28 = vld [vmem:[#allocation5 + $0x8] sm:$0xff] }
 0x627   : > { %6332 = vst.msk [vmem:[#allocation5 + $0x30] sm:$0xff] %vm4168_vm11, %v6288_v7 }
 0x62e   : > { %v6354_v9 = vld [vmem:[#allocation5 + $0x29] sm:$0xff] }
 0x62f   : > { %v6368_v14 = vld [vmem:[#allocation5 + $0x2c] sm:$0xff]  ;;  %v8898_v27 = vpack.i.bf16 %v6381_v19, %v6354_v9  ;;  %v6619_v9 = vld [vmem:[%s12726_s7 + $0x230] sm:$0xff] }
 0x630   : > { %v7533_v52 = vpop.f32.mrf.mxu1  ;;  %v8903_v63 = vpack.i.bf16 %v6352_v15, %v6368_v14  ;;  %v6384_v48 = vld [vmem:[#allocation5 + $0x2e] sm:$0xff] }
 0x631   : > { %8899 = vrot.lane.b32.xlu1 %v8898_v27, %s9080_s19  ;;  %v6620_v19 = vld [vmem:[%s12726_s7 + $0x238] sm:$0xff]  ;;  %v6359_v15 = vld [vmem:[#allocation5 + $0x12] sm:$0xff] }
 0x632   : > { %v7534_v13 = vpop.f32.mrf.mxu1  ;;  %8904 = vrot.lane.b32.xlu0 %v8903_v63, %s9080_s19  ;;  %v6343_v14 = vld [vmem:[#allocation5 + $0x10] sm:$0xff]  ;;  %7982 = vmatprep.subr.mxu1 %v6620_v19  ;;  %v6618_v63 = vld [vmem:[%s12726_s7 + $0x228] sm:$0xff] }
 0x633   : > { %v7535_v35 = vadd.f32 %v7534_v13, %v7533_v52  ;;  %v6617_v13 = vld [vmem:[%s12726_s7 + $0x220] sm:$0xff] }
 0x635   : > { %v6158_v58 = vadd.f32 %v7535_v35, %v12221_v56  ;;  %v7978_v46 = vpop.f32.mrf.mxu0 }
 0x637   : > { %v6293_v36 = vadd.f32 %v7972_v33, %v6158_v58  ;;  %v6307_v7 = vpop.f32.mrf.mxu0 }
 0x639   : > { %6333 = vst.msk [vmem:[#allocation5 + $0x38] sm:$0xff] %vm4168_vm11, %v6293_v36 }
 0x640   : > { %v6355_v21 = vld [vmem:[#allocation5 + $0x31] sm:$0xff] }
 0x641   : > { %v6369_v39 = vld [vmem:[#allocation5 + $0x34] sm:$0xff]  ;;  %v8908_v24 = vpack.i.bf16 %v6382_v60, %v6355_v21 }
 0x642   : > { %v8913_v53 = vpack.i.bf16 %v6353_v62, %v6369_v39  ;;  %v6385_v35 = vld [vmem:[#allocation5 + $0x36] sm:$0xff] }
 0x643   : > { %8909 = vrot.lane.b32.xlu1 %v8908_v24, %s9080_s19  ;;  %v6373_v62 = vld [vmem:[#allocation5 + $0x15] sm:$0xff] }
 0x644   : > { %8914 = vrot.lane.b32.xlu0 %v8913_v53, %s9080_s19 }
 0x64f   : > { %v7536_v32 = vpop.f32.mrf.mxu1 }
 0x651   : > { %v7537_v6 = vpop.f32.mrf.mxu1 }
 0x652   : > { %v7538_v54 = vadd.f32 %v7537_v6, %v7536_v32  ;;  %v6360_v6 = vld [vmem:[#allocation5 + $0x1a] sm:$0xff] }
 0x654   : > { %v6163_v49 = vadd.f32 %v7538_v54, %v12221_v56  ;;  %v6346_v54 = vld [vmem:[#allocation5 + $0x28] sm:$0xff] }
 0x656   : > { %v6298_v42 = vadd.f32 %v6297_v29, %v6163_v49  ;;  %v6344_v49 = vld [vmem:[#allocation5 + $0x18] sm:$0xff] }
 0x658   : > { %6334 = vst.msk [vmem:[#allocation5 + $0x40] sm:$0xff] %vm4168_vm11, %v6298_v42 }
 0x65f   : > { %v6356_v43 = vld [vmem:[#allocation5 + $0x39] sm:$0xff] }
 0x660   : > { %v8918_v51 = vpack.i.bf16 %v6383_v2, %v6356_v43  ;;  %v6370_v26 = vld [vmem:[#allocation5 + $0x3c] sm:$0xff] }
 0x662   : > { %8919 = vrot.lane.b32.xlu1 %v8918_v51, %s9080_s19 }
 0x66f   : > { %v7539_v34 = vpop.f32.mrf.mxu1 }
 0x671   : > { %v7540_v57 = vpop.f32.mrf.mxu1 }
 0x672   : > { %v7541_v5 = vadd.f32 %v7540_v57, %v7539_v34 }
 0x674   : > { %v6168_v55 = vadd.f32 %v7541_v5, %v12221_v56 }
 0x676   : > { %v6303_v31 = vadd.f32 %v7975_v20, %v6168_v55  ;;  %v6386_v20 = vld [vmem:[#allocation5 + $0x3e] sm:$0xff]  ;;  %v6616_v55 = vld [vmem:[%s12726_s7 + $0x218] sm:$0xff] }
 0x678   : > { %6335 = vst.msk [vmem:[#allocation5 + $0x48] sm:$0xff] %vm4168_vm11, %v6303_v31  ;;  %v6615_v31 = vld [vmem:[%s12726_s7 + $0x210] sm:$0xff] }
 0x67f   : > { %v6371_v59 = vld [vmem:[#allocation5 + $0x44] sm:$0xff]  ;;  %v8885_v30 = vpop.permute.xlu0 %8884 }
 0x680   : > { %v6394_v1 = vld [vmem:[#allocation5 + $0x41] sm:$0xff]  ;;  %v8928_v38 = vpack.i.bf16 %v6371_v59, %v6384_v48  ;;  %v8887_v17 = vunpack.i.h.bf16 %v8885_v30  ;;  %v8886_v4 = vunpack.i.l.bf16 %v8885_v30 }
 0x681   : > { %v8923_v61 = vpack.i.bf16 %v6394_v1, %v6370_v26 }
 0x682   : > { %8929 = vrot.lane.b32.xlu1 %v8928_v38, %s9080_s19  ;;  %v6528_v40 = vsel %vm4168_vm11, %v6357_v8, %v8886_v4  ;;  %v6520_v33 = vsel %vm4168_vm11, %v6341_v44, %v8887_v17  ;;  %v6345_v17 = vld [vmem:[#allocation5 + $0x20] sm:$0xff]  ;;  %v6347_v8 = vld [vmem:[#allocation5 + $0x30] sm:$0xff] }
 0x683   : > { %8924 = vrot.lane.b32.xlu0 %v8923_v61, %s9080_s19  ;;  %6716 = vmatprep.mubr.f32.mxu1 %v6528_v40  ;;  %v6361_v4 = vld [vmem:[#allocation5 + $0x22] sm:$0xff] }
 0x684   : > { %6717 = vmatmul.mubr.f32.vlgmr.msra.gmra.mxu1 %v6520_v33  ;;  %v6374_v44 = vld [vmem:[#allocation5 + $0x1d] sm:$0xff] }
 0x685   : > { %7983 = vmatpush3.msra.mxu1 %v6620_v19 }
 0x686   : > { %7984 = vmatprep.subr.mxu1 %v6619_v9 }
 0x687   : > { %7985 = vmatpush3.msra.mxu1 %v6619_v9 }
 0x688   : > { %7986 = vmatprep.subr.mxu1 %v6618_v63 }
 0x689   : > { %7987 = vmatpush3.msra.mxu1 %v6618_v63 }
 0x68a   : > { %7988 = vmatprep.subr.mxu1 %v6617_v13 }
 0x68b   : > { %v8890_v47 = vpop.permute.xlu1 %8889  ;;  %7989 = vmatpush3.msra.mxu1 %v6617_v13 }
 0x68c   : > { %v8892_v37 = vunpack.i.h.bf16 %v8890_v47  ;;  %v8891_v11 = vunpack.i.l.bf16 %v8890_v47  ;;  %7990 = vmatprep.subr.mxu1 %v6616_v55 }
 0x68d   : > { %7991 = vmatpush3.msra.mxu1 %v6616_v55 }
 0x68e   : > { %v6529_v25 = vsel %vm4168_vm11, %v6358_v16, %v8891_v11  ;;  %v6521_v12 = vsel %vm4168_vm11, %v6342_v28, %v8892_v37  ;;  %7992 = vmatprep.subr.mxu1 %v6615_v31  ;;  %v6614_v11 = vld [vmem:[%s12726_s7 + $0x208] sm:$0xff]  ;;  %v6613_v16 = vld [vmem:[%s12726_s7 + $0x200] sm:$0xff] }
 0x68f   : > { %v7542_v18 = vpop.f32.mrf.mxu1  ;;  %6721 = vmatprep.mubr.f32.mxu1 %v6529_v25  ;;  %7993 = vmatpush3.msra.mxu1 %v6615_v31 }
 0x690   : > { %6722 = vmatmul.mubr.f32.gmra.mxu1 %v6521_v12  ;;  %7994 = vmatprep.subr.mxu1 %v6614_v11  ;;  %v7981_v12 = vpop.f32.mrf.mxu0 }
 0x691   : > { %v7543_v50 = vpop.f32.mrf.mxu1  ;;  %7995 = vmatpush3.msra.mxu1 %v6614_v11 }
 0x692   : > { %v7544_v3 = vadd.f32 %v7543_v50, %v7542_v18  ;;  %7996 = vmatprep.subr.mxu1 %v6613_v16 }
 0x693   : > { %7997 = vmatpush3.msra.mxu1 %v6613_v16 }
 0x694   : > { %v6173_v45 = vadd.f32 %v7544_v3, %v12221_v56  ;;  %8010 = vmatprep.subr.mxu1 %v9070_v0 }
 0x696   : > { %v6308_v23 = vadd.f32 %v6307_v7, %v6173_v45 }
 0x697   : > { %v8895_v22 = vpop.permute.xlu0 %8894 }
 0x698   : > { %6336 = vst.msk [vmem:[#allocation5 + $0x50] sm:$0xff] %vm4168_vm11, %v6308_v23  ;;  %v8897_v10 = vunpack.i.h.bf16 %v8895_v22  ;;  %v8896_v41 = vunpack.i.l.bf16 %v8895_v22  ;;  %v6317_v23 = vpop.f32.mrf.mxu0 }
 0x69a   : > { %v6530_v52 = vsel %vm4168_vm11, %v6359_v15, %v8896_v41  ;;  %v6522_v27 = vsel %vm4168_vm11, %v6343_v14, %v8897_v10  ;;  %v6387_v15 = vld [vmem:[#allocation5 + $0x46] sm:$0xff] }
 0x69b   : > { %6726 = vmatprep.mubr.f32.mxu1 %v6530_v52 }
 0x69c   : > { %6727 = vmatmul.mubr.f32.gmra.mxu1 %v6522_v27 }
 0x69f   : > { %v6395_v58 = vld [vmem:[#allocation5 + $0x49] sm:$0xff] }
 0x6a0   : > { %v8933_v36 = vpack.i.bf16 %v6385_v35, %v6395_v58  ;;  %v6372_v18 = vld [vmem:[#allocation5 + $0x4c] sm:$0xff] }
 0x6a1   : > { %v6388_v27 = vld [vmem:[#allocation5 + $0x4e] sm:$0xff] }
 0x6a2   : > { %8934 = vrot.lane.b32.xlu0 %v8933_v36, %s9080_s19 }
 0x6a3   : > { %v8900_v60 = vpop.permute.xlu1 %8899 }
 0x6a4   : > { %v8905_v21 = vpop.permute.xlu0 %8904  ;;  %v8902_v39 = vunpack.i.h.bf16 %v8900_v60  ;;  %v8901_v24 = vunpack.i.l.bf16 %v8900_v60  ;;  %v6348_v60 = vld [vmem:[#allocation5 + $0x38] sm:$0xff] }
 0x6a5   : > { %v8907_v53 = vunpack.i.h.bf16 %v8905_v21  ;;  %v8906_v32 = vunpack.i.l.bf16 %v8905_v21  ;;  %v6375_v21 = vld [vmem:[#allocation5 + $0x25] sm:$0xff] }
 0x6a6   : > { %6486 = vrot.lane.b32.xlu0 %v6386_v20, %s9080_s19  ;;  %v6536_v29 = vsel %vm4168_vm11, %v6373_v62, %v8902_v39  ;;  %v12492_v43 = vsel %vm4168_vm11, %v6346_v54, %v8901_v24  ;;  %v6362_v54 = vld [vmem:[#allocation5 + $0x2a] sm:$0xff] }
 0x6a7   : > { %v6531_v42 = vsel %vm4168_vm11, %v6360_v6, %v8906_v32  ;;  %v6523_v2 = vsel %vm4168_vm11, %v6344_v49, %v8907_v53  ;;  %6821 = vmatprep.mubr.f32.mxu0 %v12492_v43  ;;  %v6389_v49 = vld [vmem:[#allocation5 + $0x40] sm:$0xff] }
 0x6a8   : > { %6731 = vmatprep.mubr.f32.mxu1 %v6531_v42  ;;  %6822 = vmatmul.mubr.f32.vlgmr.msra.gmra.mxu0 %v6536_v29  ;;  %v6376_v29 = vld [vmem:[#allocation5 + $0x2d] sm:$0xff] }
 0x6a9   : > { %6732 = vmatmul.mubr.f32.gmra.mxu1 %v6523_v2 }
 0x6af   : > { %v7545_v51 = vpop.f32.mrf.mxu1 }
 0x6b1   : > { %v7546_v34 = vpop.f32.mrf.mxu1 }
 0x6b2   : > { %v7547_v57 = vadd.f32 %v7546_v34, %v7545_v51  ;;  %v6363_v34 = vld [vmem:[#allocation5 + $0x32] sm:$0xff] }
 0x6b4   : > { %v6178_v5 = vadd.f32 %v7547_v57, %v12221_v56 }
 0x6b5   : > { %v8910_v59 = vpop.permute.xlu1 %8909 }
 0x6b6   : > { %v6313_v48 = vadd.f32 %v7978_v46, %v6178_v5  ;;  %v8915_v26 = vpop.permute.xlu0 %8914  ;;  %v8912_v1 = vunpack.i.h.bf16 %v8910_v59  ;;  %v8911_v30 = vunpack.i.l.bf16 %v8910_v59  ;;  %v6377_v59 = vld [vmem:[#allocation5 + $0x35] sm:$0xff] }
 0x6b7   : > { %v8917_v38 = vunpack.i.h.bf16 %v8915_v26  ;;  %v8916_v61 = vunpack.i.l.bf16 %v8915_v26 }
 0x6b8   : > { %6337 = vst.msk [vmem:[#allocation5 + $0x58] sm:$0xff] %vm4168_vm11, %v6313_v48  ;;  %v12506_v33 = vsel %vm4168_vm11, %v6347_v8, %v8911_v30  ;;  %v6537_v37 = vsel %vm4168_vm11, %v6374_v44, %v8912_v1  ;;  %v6390_v48 = vld [vmem:[#allocation5 + $0x48] sm:$0xff]  ;;  %v6378_v8 = vld [vmem:[#allocation5 + $0x3d] sm:$0xff] }
 0x6b9   : > { %v6532_v40 = vsel %vm4168_vm11, %v6361_v4, %v8916_v61  ;;  %v6524_v47 = vsel %vm4168_vm11, %v6345_v17, %v8917_v38  ;;  %6826 = vmatprep.mubr.f32.mxu0 %v12506_v33  ;;  %v6364_v17 = vld [vmem:[#allocation5 + $0x3a] sm:$0xff]  ;;  %v6391_v4 = vld [vmem:[#allocation5 + $0x50] sm:$0xff] }
 0x6ba   : > { %6736 = vmatprep.mubr.f32.mxu1 %v6532_v40  ;;  %6827 = vmatmul.mubr.f32.gmra.mxu0 %v6537_v37  ;;  %v6400_v37 = vld [vmem:[#allocation5 + $0x4a] sm:$0xff] }
 0x6bb   : > { %6737 = vmatmul.mubr.f32.gmra.mxu1 %v6524_v47  ;;  %v6399_v47 = vld [vmem:[#allocation5 + $0x42] sm:$0xff] }
 0x6bd   : > { %v7548_v28 = vpop.f32.mrf.mxu1 }
 0x6bf   : > { %v6396_v25 = vld [vmem:[#allocation5 + $0x51] sm:$0xff]  ;;  %v7549_v46 = vpop.f32.mrf.mxu1 }
 0x6c0   : > { %v8938_v50 = vpack.i.bf16 %v6396_v25, %v6372_v18  ;;  %v7550_v3 = vadd.f32 %v7549_v46, %v7548_v28  ;;  %v6401_v18 = vld [vmem:[#allocation5 + $0x52] sm:$0xff]  ;;  %v6379_v46 = vld [vmem:[#allocation5 + $0x45] sm:$0xff] }
 0x6c1   : > { %v6392_v25 = vld [vmem:[#allocation5 + $0x58] sm:$0xff] }
 0x6c2   : > { %8939 = vrot.lane.b32.xlu1 %v8938_v50, %s9080_s19  ;;  %v6183_v45 = vadd.f32 %v7550_v3, %v12221_v56  ;;  %v7551_v7 = vpop.f32.mrf.mxu1 }
 0x6c4   : > { %v6318_v22 = vadd.f32 %v6317_v23, %v6183_v45  ;;  %v7552_v10 = vpop.f32.mrf.mxu1 }
 0x6c5   : > { %v7553_v41 = vadd.f32 %v7552_v10, %v7551_v7 }
 0x6c6   : > { %6338 = vst.msk [vmem:[#allocation5 + $0x60] sm:$0xff] %vm4168_vm11, %v6318_v22 }
 0x6c7   : > { %v6188_v19 = vadd.f32 %v7553_v41, %v12221_v56  ;;  %v6380_v41 = vld [vmem:[#allocation5 + $0x4d] sm:$0xff] }
 0x6c9   : > { %v6323_v9 = vadd.f32 %v7981_v12, %v6188_v19 }
 0x6cb   : > { %6340 = vst.msk [vmem:[#allocation5 + $0x68] sm:$0x3] %vm6339_vm0, %v6323_v9 }
 0x6cd   : > { %v6397_v14 = vld [vmem:[#allocation5 + $0x59] sm:$0xff] }
 0x6ce   : > { %v8943_v52 = vpack.i.bf16 %v6387_v15, %v6397_v14  ;;  %v6402_v12 = vld [vmem:[#allocation5 + $0x5a] sm:$0xff]  ;;  %v7044_v15 = vld [vmem:[%s12728_s9 + $0xf8] sm:$0xff] }
 0x6cf   : > { %v6393_v10 = vld [vmem:[#allocation5 + $0x60] sm:$0xff]  ;;  %v7028_v14 = vld [vmem:[%s12728_s9 + $0x78] sm:$0xff]  ;;  %7700 = vmatprep.subr.mxu0 %v7044_v15 }
 0x6d0   : > { %8944 = vrot.lane.b32.xlu1 %v8943_v52, %s9080_s19  ;;  %v7043_v52 = vld [vmem:[%s12728_s9 + $0xf0] sm:$0xff]  ;;  %7701 = vmatpush3.msra.mxu0 %v7028_v14 }
 0x6d1   : > { %7702 = vmatprep.subr.mxu0 %v7043_v52 }
 0x6d2   : > { %v6398_v63 = vld [vmem:[#allocation5 + $0x61] sm:$0xff] }
 0x6d3   : > { %v8948_v13 = vpack.i.bf16 %v6388_v27, %v6398_v63  ;;  %v6403_v7 = vld [vmem:[#allocation5 + $0x62] sm:$0xff]  ;;  %v7042_v63 = vld [vmem:[%s12728_s9 + $0xe8] sm:$0xff] }
 0x6d4   : > { %v8920_v35 = vpop.permute.xlu1 %8919  ;;  %v7027_v27 = vld [vmem:[%s12728_s9 + $0x70] sm:$0xff] }
 0x6d5   : > { %v8922_v58 = vunpack.i.h.bf16 %v8920_v35  ;;  %v8921_v36 = vunpack.i.l.bf16 %v8920_v35  ;;  %8949 = vrot.lane.b32.xlu0 %v8948_v13, %s9080_s19  ;;  %v7026_v13 = vld [vmem:[%s12728_s9 + $0x68] sm:$0xff]  ;;  %7703 = vmatpush3.msra.mxu0 %v7027_v27  ;;  %v7041_v35 = vld [vmem:[%s12728_s9 + $0xe0] sm:$0xff] }
 0x6d6   : > { %7704 = vmatprep.subr.mxu0 %v7042_v63 }
 0x6d7   : > { %v6527_v56 = vsel %vm4168_vm11, %v6348_v60, %v8921_v36  ;;  %v6538_v62 = vsel %vm4168_vm11, %v6375_v21, %v8922_v58  ;;  %v7025_v58 = vld [vmem:[%s12728_s9 + $0x60] sm:$0xff]  ;;  %7705 = vmatpush3.msra.mxu0 %v7026_v13  ;;  %v7040_v36 = vld [vmem:[%s12728_s9 + $0xd8] sm:$0xff]  ;;  %v7039_v21 = vld [vmem:[%s12728_s9 + $0xd0] sm:$0xff] }
 0x6d8   : > { %6831 = vmatprep.mubr.f32.mxu0 %v6527_v56  ;;  %7706 = vmatprep.subr.mxu0 %v7041_v35  ;;  %v7024_v60 = vld [vmem:[%s12728_s9 + $0x58] sm:$0xff] }
 0x6d9   : > { %6832 = vmatmul.mubr.f32.gmra.mxu0 %v6538_v62  ;;  %v7038_v62 = vld [vmem:[%s12728_s9 + $0xc8] sm:$0xff] }
 0x6da   : > { %7707 = vmatpush3.msra.mxu0 %v7025_v58 }
 0x6db   : > { %7708 = vmatprep.subr.mxu0 %v7040_v36 }
 0x6dc   : > { %7709 = vmatpush3.msra.mxu0 %v7024_v60 }
 0x6dd   : > { %7710 = vmatprep.subr.mxu0 %v7039_v21 }
 0x6f4   : > { %v8930_v39 = vpop.permute.xlu1 %8929 }
 0x6f5   : > { %v8925_v24 = vpop.permute.xlu0 %8924  ;;  %v8932_v53 = vunpack.i.h.bf16 %v8930_v39  ;;  %v8931_v32 = vunpack.i.l.bf16 %v8930_v39  ;;  %v7022_v39 = vld [vmem:[%s12728_s9 + $0x48] sm:$0xff] }
 0x6f6   : > { %v8927_v20 = vunpack.i.h.bf16 %v8925_v24  ;;  %v8926_v6 = vunpack.i.l.bf16 %v8925_v24  ;;  %v7037_v24 = vld [vmem:[%s12728_s9 + $0xc0] sm:$0xff] }
 0x6f7   : > { %v6539_v51 = vsel %vm4168_vm11, %v6376_v29, %v8931_v32  ;;  %v6534_v57 = vsel %vm4168_vm11, %v6363_v34, %v8932_v53  ;;  %v7021_v53 = vld [vmem:[%s12728_s9 + $0x40] sm:$0xff]  ;;  %v7036_v32 = vld [vmem:[%s12728_s9 + $0xb8] sm:$0xff]  ;;  %v7018_v29 = vld [vmem:[%s12728_s9 + $0x28] sm:$0xff] }
 0x6f8   : > { %v6533_v42 = vsel %vm4168_vm11, %v6362_v54, %v8926_v6  ;;  %v6544_v2 = vsel %vm4168_vm11, %v6389_v49, %v8927_v20  ;;  %v7020_v20 = vld [vmem:[%s12728_s9 + $0x38] sm:$0xff]  ;;  %v7035_v6 = vld [vmem:[%s12728_s9 + $0xb0] sm:$0xff]  ;;  %v7034_v49 = vld [vmem:[%s12728_s9 + $0xa8] sm:$0xff] }
 0x6f9   : > { %6741 = vmatprep.mubr.f32.mxu1 %v6533_v42  ;;  %6836 = vmatprep.mubr.f32.mxu0 %v6544_v2  ;;  %v7033_v42 = vld [vmem:[%s12728_s9 + $0xa0] sm:$0xff] }
 0x6fa   : > { %6742 = vmatmul.mubr.f32.gmra.mxu1 %v12492_v43  ;;  %6837 = vmatmul.mubr.f32.gmra.mxu0 %v6539_v51  ;;  %v7017_v2 = vld [vmem:[%s12728_s9 + $0x20] sm:$0xff]  ;;  %v7032_v51 = vld [vmem:[%s12728_s9 + $0x98] sm:$0xff] }
 0x6fb   : > { %6746 = vmatprep.mubr.f32.mxu1 %v6534_v57  ;;  %v7031_v57 = vld [vmem:[%s12728_s9 + $0x90] sm:$0xff] }
 0x6fe   : > { %6747 = vmatmul.mubr.f32.gmra.mxu1 %v12506_v33 }
 0x714   : > { %v8935_v5 = vpop.permute.xlu0 %8934 }
 0x715   : > { %v8937_v55 = vunpack.i.h.bf16 %v8935_v5  ;;  %v8936_v31 = vunpack.i.l.bf16 %v8935_v5  ;;  %v7015_v5 = vld [vmem:[%s12728_s9 + $0x10] sm:$0xff] }
 0x717   : > { %v6545_v26 = vsel %vm4168_vm11, %v6390_v48, %v8936_v31  ;;  %v6540_v1 = vsel %vm4168_vm11, %v6377_v59, %v8937_v55  ;;  %v7030_v55 = vld [vmem:[%s12728_s9 + $0x88] sm:$0xff] }
 0x718   : > { %6841 = vmatprep.mubr.f32.mxu0 %v6545_v26  ;;  %v6487_v38 = vpop.permute.xlu0 %6486 }
 0x719   : > { %6842 = vmatmul.mubr.f32.gmra.mxu0 %v6540_v1  ;;  %v6541_v33 = vsel %vm4168_vm11, %v6378_v8, %v6487_v38 }
 0x734   : > { %v8940_v30 = vpop.permute.xlu1 %8939 }
 0x735   : > { %v8942_v43 = vunpack.i.h.bf16 %v8940_v30  ;;  %v8941_v61 = vunpack.i.l.bf16 %v8940_v30 }
 0x737   : > { %v6535_v44 = vsel %vm4168_vm11, %v6364_v17, %v8941_v61  ;;  %v6546_v40 = vsel %vm4168_vm11, %v6391_v4, %v8942_v43 }
 0x738   : > { %6751 = vmatprep.mubr.f32.mxu1 %v6535_v44  ;;  %6846 = vmatprep.mubr.f32.mxu0 %v6546_v40 }
 0x739   : > { %6752 = vmatmul.mubr.f32.gmra.mxu1 %v6527_v56  ;;  %6847 = vmatmul.mubr.f32.gmra.mxu0 %v6541_v33  ;;  %v7023_v56 = vld [vmem:[%s12728_s9 + $0x50] sm:$0xff] }
 0x73a   : > { %7998 = vmatprep.mubr.msk.f32.mxu1 %vm4168_vm11, %v6362_v54  ;;  %7711 = vmatpush3.msra.mxu0 %v7023_v56  ;;  %v7019_v54 = vld [vmem:[%s12728_s9 + $0x30] sm:$0xff] }
 0x73b   : > { %7712 = vmatprep.subr.mxu0 %v7038_v62 }
 0x73c   : > { %7713 = vmatpush3.msra.mxu0 %v7022_v39 }
 0x73d   : > { %7999 = vmatmul.mubr.msk.f32.vlgmr.msra.gmra.mxu1 %vm4168_vm11, %v6363_v34  ;;  %7714 = vmatprep.subr.mxu0 %v7037_v24  ;;  %v7016_v34 = vld [vmem:[%s12728_s9 + $0x18] sm:$0xff] }
 0x73e   : > { %8001 = vmatprep.mubr.msk.f32.mxu1 %vm4168_vm11, %v6364_v17  ;;  %7715 = vmatpush3.msra.mxu0 %v7021_v53 }
 0x73f   : > { %7716 = vmatprep.subr.mxu0 %v7036_v32 }
 0x740   : > { %7717 = vmatpush3.msra.mxu0 %v7020_v20 }
 0x741   : > { %8002 = vmatmul.mubr.msk.f32.gmra.mxu1 %vm4168_vm11, %v6399_v47  ;;  %7718 = vmatprep.subr.mxu0 %v7035_v6 }
 0x742   : > { %8004 = vmatprep.mubr.msk.f32.mxu1 %vm4168_vm11, %v6400_v37  ;;  %v8945_v11 = vpop.permute.xlu1 %8944  ;;  %7719 = vmatpush3.msra.mxu0 %v7019_v54 }
 0x743   : > { %v8947_v16 = vunpack.i.h.bf16 %v8945_v11  ;;  %v8946_v28 = vunpack.i.l.bf16 %v8945_v11  ;;  %7720 = vmatprep.subr.mxu0 %v7034_v49 }
 0x744   : > { %7721 = vmatpush3.msra.mxu0 %v7018_v29  ;;  %v7604_v31 = vpop.f32.mrf.mxu1 }
 0x745   : > { %8005 = vmatmul.mubr.msk.f32.gmra.mxu1 %vm4168_vm11, %v6401_v18  ;;  %v6547_v50 = vsel %vm4168_vm11, %v6392_v25, %v8946_v28  ;;  %v6542_v3 = vsel %vm4168_vm11, %v6379_v46, %v8947_v16  ;;  %7722 = vmatprep.subr.mxu0 %v7033_v42 }
 0x746   : > { %8007 = vmatprep.mubr.msk.f32.mxu1 %vm4168_vm11, %v6402_v12  ;;  %6851 = vmatprep.mubr.f32.mxu0 %v6547_v50  ;;  %v7605_v48 = vpop.f32.mrf.mxu1 }
 0x747   : > { %v8950_v45 = vpop.permute.xlu0 %8949  ;;  %6852 = vmatmul.mubr.f32.gmra.mxu0 %v6542_v3  ;;  %v7606_v50 = vadd.f32 %v7605_v48, %v7604_v31  ;;  %v7373_v3 = vld [vmem:[%s12727_s8] ss:$0 sm:$0xff]  ;;  %v7014_v31 = vld [vmem:[%s12728_s9 + $0x8] sm:$0xff] }
 0x748   : > { %v8952_v23 = vunpack.i.h.bf16 %v8950_v45  ;;  %v8951_v22 = vunpack.i.l.bf16 %v8950_v45  ;;  %7723 = vmatpush3.msra.mxu0 %v7017_v2  ;;  %v7029_v48 = vld [vmem:[%s12728_s9 + $0x80] sm:$0xff] }
 0x749   : > { %8008 = vmatmul.mubr.msk.f32.gmra.mxu1 %vm4168_vm11, %v6403_v7  ;;  %7724 = vmatprep.subr.mxu0 %v7032_v51 }
 0x74a   : > { %8018 = vmatprep.mubr.msk.f32.mxu1 %vm9075_vm1, %v9070_v0  ;;  %v6548_v19 = vsel %vm4168_vm11, %v6393_v10, %v8951_v22  ;;  %v6543_v9 = vsel %vm4168_vm11, %v6380_v41, %v8952_v23  ;;  %7725 = vmatpush3.msra.mxu0 %v7016_v34  ;;  %v6719_v41 = vadd.f32 %v7606_v50, %v7373_v3  ;;  %vm7195_vm1 = vcmask 8192  }
 0x74b   : > { %6856 = vmatprep.mubr.f32.mxu0 %v6548_v19  ;;  %7726 = vmatprep.subr.mxu0 %v7031_v57 }
 0x74c   : > { %6857 = vmatmul.mubr.f32.gmra.mxu0 %v6543_v9 }
 0x74d   : > { %7727 = vmatpush3.msra.mxu0 %v7015_v5 }
 0x74e   : > { %7728 = vmatprep.subr.mxu0 %v7030_v55 }
 0x74f   : > { %7729 = vmatpush3.msra.mxu0 %v7014_v31 }
 0x750   : > { %v7607_v59 = vpop.f32.mrf.mxu1  ;;  %7730 = vmatprep.subr.mxu0 %v7029_v48 }
 0x751   : > { %v7013_v59 = vld [vmem:[%s12728_s9] sm:$0xff] }
 0x752   : > { %v7608_v26 = vpop.f32.mrf.mxu1  ;;  %7731 = vmatpush3.msra.mxu0 %v7013_v59 }
 0x75c   : > { %v7610_v1 = vpop.f32.mrf.mxu1 }
 0x75e   : > { %v7611_v38 = vpop.f32.mrf.mxu1 }
 0x75f   : > { %v7612_v22 = vadd.f32 %v7611_v38, %v7610_v1 }
 0x761   : > { %v6729_v27 = vadd.f32 %v7612_v22, %v7373_v3 }
 0x768   : > { %v7660_v30 = vpop.f32.mrf.mxu0 }
 0x769   : > { %v7613_v43 = vpop.f32.mrf.mxu1 }
 0x76a   : > { %v7661_v61 = vpop.f32.mrf.mxu0  ;;  %v7120_v43 = vld [vmem:[%s12730_s11 + $0x18] sm:$0xff] }
 0x76b   : > { %v7614_v4 = vpop.f32.mrf.mxu1  ;;  %v7662_v23 = vadd.f32 %v7661_v61, %v7660_v30  ;;  %v7119_v61 = vld [vmem:[%s12730_s11 + $0x10] sm:$0xff]  ;;  %8011 = vmatpush3.msra.mxu1 %v7120_v43 }
 0x76c   : > { %8012 = vmatprep.subr.mxu1 %v9070_v0 }
 0x76d   : > { %v6824_v52 = vadd.f32 %v7662_v23, %v6719_v41  ;;  %8013 = vmatpush3.msra.mxu1 %v7119_v61 }
 0x76e   : > { %8014 = vmatprep.subr.mxu1 %v9070_v0 }
 0x77a   : > { %v7663_v17 = vpop.f32.mrf.mxu0 }
 0x77b   : > { %v7616_v8 = vpop.f32.mrf.mxu1 }
 0x77c   : > { %v7664_v44 = vpop.f32.mrf.mxu0 }
 0x77d   : > { %v7617_v33 = vpop.f32.mrf.mxu1 }
 0x799   : > { %v7666_v40 = vpop.f32.mrf.mxu0 }
 0x79b   : > { %v7667_v47 = vpop.f32.mrf.mxu0 }
 0x79c   : > { %v7668_v15 = vadd.f32 %v7667_v47, %v7666_v40 }
 0x79e   : > { %v6834_v60 = vadd.f32 %v7668_v15, %v6729_v27  ;;  %v7118_v27 = vld [vmem:[%s12730_s11 + $0x8] sm:$0xff] }
 0x79f   : > { %8015 = vmatpush3.msra.mxu1 %v7118_v27 }
 0x7a0   : > { %8016 = vmatprep.subr.mxu1 %v9070_v0  ;;  %v7121_v0 = vld [vmem:[%s12731_s12] sm:$0x1] }
 0x7ba   : > { %v7619_v37 = vpop.f32.mrf.mxu1  ;;  %v7669_v11 = vpop.f32.mrf.mxu0 }
 0x7bc   : > { %v7620_v16 = vpop.f32.mrf.mxu1  ;;  %v7670_v28 = vpop.f32.mrf.mxu0 }
 0x7bd   : > { %v7621_v14 = vadd.f32 %v7620_v16, %v7619_v37 }
 0x7be   : > { %v7622_v18 = vpop.f32.mrf.mxu1 }
 0x7bf   : > { %v6744_v36 = vadd.f32 %v7621_v14, %v7373_v3 }
 0x7c0   : > { %v7623_v12 = vpop.f32.mrf.mxu1 }
 0x7d9   : > { %v7672_v25 = vpop.f32.mrf.mxu0 }
 0x7db   : > { %v7673_v46 = vpop.f32.mrf.mxu0 }
 0x7f9   : > { %v7625_v45 = vpop.f32.mrf.mxu1  ;;  %v7675_v7 = vpop.f32.mrf.mxu0 }
 0x7fb   : > { %v7626_v10 = vpop.f32.mrf.mxu1  ;;  %v7676_v19 = vpop.f32.mrf.mxu0 }
 0x7fc   : > { %v7677_v13 = vadd.f32 %v7676_v19, %v7675_v7  ;;  %v7627_v54 = vadd.f32 %v7626_v10, %v7625_v45 }
 0x7fd   : > { %v8000_v9 = vpop.f32.mrf.mxu1 }
 0x7fe   : > { %v6849_v62 = vadd.f32 %v7677_v13, %v6744_v36  ;;  %v6754_v2 = vadd.f32 %v7627_v54, %v7373_v3 }
 0x7ff   : > { %v6928_v63 = vpop.f32.mrf.mxu1 }
 0x800   : > { %v6929_v35 = vadd.f32 %v6928_v63, %v6824_v52  ;;  %v7117_v63 = vld [vmem:[%s12730_s11] sm:$0xff] }
 0x801   : > { %v8003_v58 = vpop.f32.mrf.mxu1  ;;  %8017 = vmatpush3.msra.mxu1 %v7117_v63 }
 0x802   : > { %6967 = vst.msk [vmem:[#allocation6] sm:$0xff] %vm4168_vm11, %v6929_v35  ;;  %v7045_v35 = vld [vmem:[%s12729_s10] sm:$0x1] }
 0x803   : > { %v6938_v21 = vpop.f32.mrf.mxu1 }
 0x804   : > { %v6939_v56 = vadd.f32 %v6938_v21, %v6834_v60 }
 0x805   : > { %v8006_v39 = vpop.f32.mrf.mxu1 }
 0x806   : > { %6969 = vst.msk [vmem:[#allocation6 + $0x10] sm:$0xff] %vm4168_vm11, %v6939_v56  ;;  %v6954_v24 = vadd.f32 %v8006_v39, %v6849_v62 }
 0x807   : > { %v6948_v53 = vpop.f32.mrf.mxu1  ;;  %v7678_v32 = vpop.f32.mrf.mxu0 }
 0x808   : > { %6972 = vst.msk [vmem:[#allocation6 + $0x28] sm:$0xff] %vm4168_vm11, %v6954_v24 }
 0x809   : > { %v7679_v20 = vpop.f32.mrf.mxu0  ;;  %v8009_v6 = vpop.f32.mrf.mxu1  ;;  %v6982_v26 = vld [vmem:[#allocation6 + $0x2] sm:$0x1]  ;;  %v6983_v1 = vld [vmem:[#allocation6 + $0x3] sm:$0x1]  ;;  %v6975_v12 = vld [vmem:[#allocation6] sm:$0x1] }
 0x80a   : > { %v6984_v44 = vmax.f32 %v6982_v26, %v6983_v1  ;;  %v6976_v46 = vld [vmem:[#allocation6 + $0x1] sm:$0x1] }
 0x80b   : > { %v6958_v29 = vpop.f32.mrf.mxu1  ;;  %v6977_v23 = vmax.f32 %v6975_v12, %v6976_v46 }
 0x80c   : > { %v7681_v49 = vpop.f32.mrf.mxu0 }
 0x80d   : > { %v6985_v5 = vld [vmem:[#allocation6 + $0x16] sm:$0x1]  ;;  %v6986_v55 = vld [vmem:[#allocation6 + $0x17] sm:$0x1]  ;;  %v6978_v16 = vld [vmem:[#allocation6 + $0x14] sm:$0x1] }
 0x80e   : > { %v7682_v42 = vpop.f32.mrf.mxu0  ;;  %v6987_v17 = vmax.f32 %v6985_v5, %v6986_v55  ;;  %v6979_v28 = vld [vmem:[#allocation6 + $0x15] sm:$0x1] }
 0x80f   : > { %v7683_v51 = vadd.f32 %v7682_v42, %v7681_v49  ;;  %v6996_v30 = vld [vmem:[#allocation6 + $0x2a] sm:$0x1]  ;;  %v6997_v38 = vld [vmem:[#allocation6 + $0x2b] sm:$0x1]  ;;  %v6989_v50 = vld [vmem:[#allocation6 + $0x28] sm:$0x1]  ;;  %v6980_v45 = vmax.f32 %v6978_v16, %v6979_v28 }
 0x810   : > { %v6998_v40 = vmax.f32 %v6996_v30, %v6997_v38  ;;  %v6988_v47 = vmax.f32 %v6984_v44, %v6987_v17  ;;  %v6990_v3 = vld [vmem:[#allocation6 + $0x29] sm:$0x1] }
 0x811   : > { %v6859_v34 = vadd.f32 %v7683_v51, %v6754_v2  ;;  %v6991_v22 = vmax.f32 %v6989_v50, %v6990_v3  ;;  %v6981_v9 = vmax.f32 %v6977_v23, %v6980_v45 }
 0x813   : > { %v6964_v57 = vadd.f32 %v8009_v6, %v6859_v34 }
 0x815   : > { %6974 = vst.msk [vmem:[#allocation6 + $0x38] sm:$0xff] %vm4168_vm11, %v6964_v57 }
 0x81c   : > { %v6999_v4 = vld [vmem:[#allocation6 + $0x3e] sm:$0x1]  ;;  %v7000_v8 = vld [vmem:[#allocation6 + $0x3f] sm:$0x1]  ;;  %v6992_v18 = vld [vmem:[#allocation6 + $0x3c] sm:$0x1] }
 0x81d   : > { %v7001_v33 = vmax.f32 %v6999_v4, %v7000_v8  ;;  %v6993_v25 = vld [vmem:[#allocation6 + $0x3d] sm:$0x1] }
 0x81e   : > { %v6994_v7 = vmax.f32 %v6992_v18, %v6993_v25 }
 0x81f   : > { %v7002_v37 = vmax.f32 %v6998_v40, %v7001_v33 }
 0x820   : > { %v6995_v15 = vmax.f32 %v6991_v22, %v6994_v7 }
 0x821   : > { %v8953_v11 = vpack.i.bf16 %v6988_v47, %v7002_v37 }
 0x823   : > { %8954 = vrot.lane.b32.xlu1 %v8953_v11, %s9080_s19  ;;  %s7198_s19 = scalar_lea.sflag [#allocation8], %s431_s15 }
 0x895   : > { %v8955_v10 = vpop.permute.xlu1 %8954 }
 0x896   : > { %v8957_v41 = vunpack.i.h.bf16 %v8955_v10  ;;  %v8956_v19 = vunpack.i.l.bf16 %v8955_v10 }
 0x898   : > { %v7011_v14 = vsel %vm4168_vm11, %v6981_v9, %v8957_v41  ;;  %v7012_v52 = vsel %vm4168_vm11, %v6995_v15, %v8956_v19 }
 0x899   : > { %7110 = vmatprep.mubr.f32.mxu0 %v7012_v52 }
 0x89a   : > { %7111 = vmatmul.mubr.f32.vlgmr.msra.gmra.mxu0 %v7011_v14 }
 0x95a   : > { %v7732_v13 = vpop.f32.mrf.mxu0 }
 0x95c   : > { %v7733_v58 = vpop.f32.mrf.mxu0 }
 0x95d   : > { %v7734_v36 = vadd.f32 %v7733_v58, %v7732_v13 }
 0x95f   : > { %v7113_v60 = vadd.f32 %v7734_v36, %v7045_v35 }
 0x961   : > { %v7116_v21 = vmax.f32 %v7113_v60, 0.0 }
 0x963   : > { %8019 = vmatmul.mubr.msk.f32.vlgmr.msra.gmra.mxu1 %vm2410_vm9, %v7116_v21 }
 0xa23   : > { %v7191_v56 = vpop.f32.mrf.mxu1 }
 0xa24   : > { %v7192_v62 = vadd.f32 %v7191_v56, %v7121_v0 }
 0xa25   : > { %v8020_v39 = vpop.f32.mrf.mxu1 }
 0xa26   : > { %7196 = vst.msk [vmem:[%s432_s20] sm:$0x1] %vm7195_vm1, %v7192_v62 }
 0xa27   : > { %9021 = shalt.err (!%p9018_p3)
}
 0xa28   : > { %s9022_s27 = scalar_lea.hbm %s12684_s30, 16  ;;  %s9026_s14 = scalar_lea.hbm %s12732_s13, 32 }
 0xa29   : > { %p9023_p4 = scmp.ne.s32.totalorder %s12684_s30, %s9022_s27  ;;  %p9027_p9 = scmp.lt.s32.totalorder %s12684_s30, %s12732_s13 }
 0xa2a   : > { %p9028_p10 = scmp.lt.s32.totalorder %s9026_s14, %s9022_s27 }
 0xa2b   : > { %p9024_p7 = pnand %p9023_p4, %p9191_p5 }
 0xa2c   : > { %p9029_p11 = por %p9028_p10, %p9027_p9 }
 0xa2d   : > { %p9025_p8 = pneg %p9024_p7 }
 0xa2f   : > { %p9030_p12 = pnand %p9029_p11, %p9025_p8 }
 0xa31   : > { %9033 = shalt.err (!%p9030_p12)
}
 0xa32   : > { %8022 = dma.vmem_to_hbm [thread:$0]  (%p9191_p5), %s7211_s0, 16, %s12684_s30, %s7198_s19  }
 0xa33 PF: > { %s12773_s20 = sld [smem:[#allocation10_spill]]  ;;  %p8028_p13 = scmp.ge.s32.totalorder %s9068_s28, 2 }
 0xa35   : > { %p8025_p0 = pnand %p8028_p13, %p9195_p6 }
 0xa37   : > { %p8026_p1 = pneg %p8025_p0 }
 0xa39   : > { %s7222_s24 = sand.u32 1, %s12773_s20  }
 0xa3a   : > { %s7223_s17 = scalar_lea.sflag [#allocation8], %s7222_s24 }
 0xa3b   : > { %9051 = dma.done.wait (%p8026_p1), %s7223_s17, 16  }
 0xa3c   : > { %9053 = vsyncadd (%p8026_p1), %s7223_s17, 4294967280  ;;  %s12775_s28 = sld [smem:[#allocation12_spill]]  ;;  %s12778_s25 = smov %s9060_s26 }
 0xa3d   : > { %s12776_s29 = sld [smem:[#allocation11_spill]] }
 0xa3e   : > { %s12777_s27 = sld [smem:[#allocation13_spill]] }
 0xa42   : > { %p23_p2 = scmp.ge.s32.totalorder %s12775_s28, 4  }
 0xa43   : > { %s12779_s26 = smov %s12776_s29 }
 0xa44   :  { %25 = sbr.rel (!%p23_p2) target bundleno = 6 (0x6), region = 205 }
 0xa49   :  { %7227 = vsyncpa [#allocation8], 1 }
 0xa4a   :  { %7229 = vsyncpa [#allocation8 + $0x1], 1 }

</bundles_post_ra>
